<compile_context>
chip_gen: v7x
topology: tpu7x:2x2x1
jax: 0.10.0
libtpu: 0.0.40
codegen_flags: <defaults>
</compile_context>

<pallas_src>
import jax
import jax.numpy as jnp
from jax.experimental import pallas as pl
from jax.experimental.pallas import tpu as pltpu

HID_DIM = 512
N_HEADS = 8
HEAD_DIM = HID_DIM // N_HEADS          # 64
PF_DIM = 1024
LN_EPS = 1e-5
NEG_INF = -1e9                         # matches masked_fill(mask == 0, -1e9)


# --------------------------------------------------------------------------
# Kernel: full EncoderLayer forward for one batch element per grid step.
# --------------------------------------------------------------------------
def _encoder_layer_kernel(x_ref, kv_ref,
                          wq_ref, bq_ref, wk_ref, bk_ref, wv_ref, bv_ref,
                          wo_ref, bo_ref, w1_ref, b1_ref, w2_ref, b2_ref,
                          g1_ref, be1_ref, g2_ref, be2_ref,
                          o_ref, ctx_scratch):
    x = x_ref[0]                                      # (S, D) f32
    xb = x.astype(jnp.bfloat16)

    # QKV projections: (S, D) @ (D, D) bf16 matmuls, f32 accumulation.
    # 1/sqrt(head_dim) is already folded into wq/bq by the wrapper.
    q = (jnp.dot(xb, wq_ref[...], preferred_element_type=jnp.float32)
         + bq_ref[...]).astype(jnp.bfloat16)
    k = (jnp.dot(xb, wk_ref[...], preferred_element_type=jnp.float32)
         + bk_ref[...]).astype(jnp.bfloat16)
    v = (jnp.dot(xb, wv_ref[...], preferred_element_type=jnp.float32)
         + bv_ref[...]).astype(jnp.bfloat16)

    # Additive key-validity bias, computed ONCE (hoisted out of the head loop).
    mask_bias = jnp.where(kv_ref[0] > 0.0, 0.0, NEG_INF)          # (1, S)

    # Multi-head attention. Heads are static lane-slices of q/k/v; the
    # 8-iteration loop is unrolled at trace time. Each head's context is
    # written into a lane block of the VMEM scratch; fcOut is applied once
    # after the loop as a single K=512 matmul.
    for h in range(N_HEADS):
        lo = h * HEAD_DIM
        hi_ = lo + HEAD_DIM
        qh = q[:, lo:hi_]
        kh = k[:, lo:hi_]
        vh = v[:, lo:hi_]
        s = jax.lax.dot_general(                      # qh @ kh^T -> (S, S)
            qh, kh, dimension_numbers=(((1,), (1,)), ((), ())),
            preferred_element_type=jnp.float32)
        s = s + mask_bias
        s = s - jnp.max(s, axis=-1, keepdims=True)
        p = jnp.exp(s)
        p = p * pl.reciprocal(jnp.sum(p, axis=-1, keepdims=True), approx=True)
        ctx = jnp.dot(p.astype(jnp.bfloat16), vh,
                      preferred_element_type=jnp.float32)          # (S, Dh)
        ctx_scratch[:, lo:hi_] = ctx.astype(jnp.bfloat16)

    attn = jnp.dot(ctx_scratch[...], wo_ref[...],
                   preferred_element_type=jnp.float32) + bo_ref[...]

    def _ln(hh, g, b):
        mu = jnp.mean(hh, axis=-1, keepdims=True)
        var = jnp.mean((hh - mu) ** 2, axis=-1, keepdims=True)
        return (hh - mu) * jax.lax.rsqrt(var + LN_EPS) * g + b

    # dropout == identity at inference.
    h1 = _ln(x + attn, g1_ref[...], be1_ref[...])

    # Positionwise feed-forward.
    ff = jnp.dot(h1.astype(jnp.bfloat16), w1_ref[...],
                 preferred_element_type=jnp.float32) + b1_ref[...]
    ff = jnp.maximum(ff, 0.0)
    ff = jnp.dot(ff.astype(jnp.bfloat16), w2_ref[...],
                 preferred_element_type=jnp.float32) + b2_ref[...]

    o_ref[0] = _ln(h1 + ff, g2_ref[...], be2_ref[...])


# --------------------------------------------------------------------------
# Wrapper
# --------------------------------------------------------------------------
def encoder_layer_forward(src, src_mask, params):
    """src: (B, S, D) f32; src_mask: (B, 1, S) with 1 = valid key, 0 = pad."""
    B, S, D = src.shape
    assert D == HID_DIM

    (wq, bq, wk, bk, wv, bv, wo, bo, w1, b1, w2, b2, g1, be1, g2, be2) = params
    bf = jnp.bfloat16
    scale = 1.0 / (float(HEAD_DIM) ** 0.5)
    # Big weights streamed as bf16 (halves HBM weight traffic); the Q scale
    # is folded into wq/bq; biases and LayerNorm params stay f32.
    kparams = ((wq * scale).astype(bf), bq * scale,
               wk.astype(bf), bk, wv.astype(bf), bv,
               wo.astype(bf), bo, w1.astype(bf), b1, w2.astype(bf), b2,
               g1, be1, g2, be2)

    kv = src_mask.reshape(B, 1, S).astype(jnp.float32)   # tiny key-validity mask

    def batch_spec(shape):
        n = len(shape)
        return pl.BlockSpec((1,) + tuple(shape[1:]),
                            lambda b, _n=n: (b,) + (0,) * (_n - 1))

    def resident_spec(shape):
        n = len(shape)
        return pl.BlockSpec(tuple(shape), lambda b, _n=n: (0,) * _n)

    grid_spec = pltpu.PrefetchScalarGridSpec(
        num_scalar_prefetch=0,
        grid=(B,),                                   # one batch element / step
        in_specs=[batch_spec((B, S, D)), batch_spec((B, 1, S))]
                 + [resident_spec(p.shape) for p in kparams],
        out_specs=batch_spec((B, S, D)),
        scratch_shapes=[pltpu.VMEM((S, D), jnp.bfloat16)],   # per-head ctx slab
    )

    out = pl.pallas_call(
        _encoder_layer_kernel,
        out_shape=jax.ShapeDtypeStruct((B, S, D), jnp.float32),
        grid_spec=grid_spec,
        compiler_params=pltpu.CompilerParams(
            dimension_semantics=("parallel",),       # v7x: split batch over TCs
            vmem_limit_bytes=32 * 1024 * 1024,       # valid on v5e/v6e/v7x
        ),
    )(src, kv, *kparams)
    return out


# --------------------------------------------------------------------------
# Pure-JAX reference (f32, HIGHEST precision) for correctness check
# --------------------------------------------------------------------------
def _reference(src, src_mask, params):
    hi = jax.lax.Precision.HIGHEST
    (wq, bq, wk, bk, wv, bv, wo, bo, w1, b1, w2, b2, g1, be1, g2, be2) = params
    B, S, D = src.shape
    H, Dh = N_HEADS, HEAD_DIM

    def lin(x, w, b):
        return jnp.einsum("bsd,de->bse", x, w, precision=hi) + b

    q = lin(src, wq, bq).reshape(B, S, H, Dh).transpose(0, 2, 1, 3)
    k = lin(src, wk, bk).reshape(B, S, H, Dh).transpose(0, 2, 1, 3)
    v = lin(src, wv, bv).reshape(B, S, H, Dh).transpose(0, 2, 1, 3)
    sc = jnp.einsum("bhqd,bhkd->bhqk", q / (Dh ** 0.5), k, precision=hi)
    keym = src_mask.reshape(B, 1, 1, S)
    sc = jnp.where(keym > 0.0, sc, NEG_INF)
    p = jax.nn.softmax(sc, axis=-1)
    ctx = jnp.einsum("bhqk,bhkd->bhqd", p, v, precision=hi)
    ctx = ctx.transpose(0, 2, 1, 3).reshape(B, S, D)
    attn = jnp.einsum("bsd,de->bse", ctx, wo, precision=hi) + bo

    def ln(h, g, b):
        mu = jnp.mean(h, axis=-1, keepdims=True)
        var = jnp.mean((h - mu) ** 2, axis=-1, keepdims=True)
        return (h - mu) * jax.lax.rsqrt(var + LN_EPS) * g + b

    h1 = ln(src + attn, g1, be1)
    ff = jnp.maximum(jnp.einsum("bsd,df->bsf", h1, w1, precision=hi) + b1, 0.0)
    ff = jnp.einsum("bsf,fd->bsd", ff, w2, precision=hi) + b2
    return ln(h1 + ff, g2, be2)


if __name__ == "__main__":
    B, S = 2, 14
    key = jax.random.PRNGKey(0)
    ks = jax.random.split(key, 20)

    def w_init(k, shape, scale=0.02):
        return scale * jax.random.normal(k, shape, jnp.float32)

    wq = w_init(ks[0], (HID_DIM, HID_DIM)); bq = w_init(ks[1], (1, HID_DIM))
    wk = w_init(ks[2], (HID_DIM, HID_DIM)); bk = w_init(ks[3], (1, HID_DIM))
    wv = w_init(ks[4], (HID_DIM, HID_DIM)); bv = w_init(ks[5], (1, HID_DIM))
    wo = w_init(ks[6], (HID_DIM, HID_DIM)); bo = w_init(ks[7], (1, HID_DIM))
    w1 = w_init(ks[8], (HID_DIM, PF_DIM));  b1 = w_init(ks[9], (1, PF_DIM))
    w2 = w_init(ks[10], (PF_DIM, HID_DIM)); b2 = w_init(ks[11], (1, HID_DIM))
    g1 = 1.0 + w_init(ks[12], (1, HID_DIM), 0.1)
    be1 = w_init(ks[13], (1, HID_DIM), 0.1)
    g2 = 1.0 + w_init(ks[14], (1, HID_DIM), 0.1)
    be2 = w_init(ks[15], (1, HID_DIM), 0.1)
    params = (wq, bq, wk, bk, wv, bv, wo, bo, w1, b1, w2, b2,
              g1, be1, g2, be2)

    src = jax.random.normal(ks[16], (B, S, HID_DIM), jnp.float32)
    # key-validity mask: last two positions of batch element 1 are padding.
    src_mask = jnp.ones((B, 1, S), jnp.float32)
    src_mask = src_mask.at[1, 0, S - 2:].set(0.0)
    src = src * jnp.swapaxes(src_mask, 1, 2)          # zero padded positions

    out = encoder_layer_forward(src, src_mask, params)
    out = jax.block_until_ready(out)
    assert out.shape == (B, S, HID_DIM), out.shape

    ref = jax.block_until_ready(_reference(src, src_mask, params))
    err = float(jnp.max(jnp.abs(out - ref)))
    assert jnp.allclose(out, ref, rtol=5e-2, atol=5e-2), err

    print("KERNEL_OK")
</pallas_src>

<mosaic_0001>
module attributes {stable_mosaic.version = 11 : i64} {
  func.func @_encoder_layer_kernel(%arg0: i32, %arg1: memref<1x14x512xf32, #tpu.memory_space<vmem>>, %arg2: memref<1x1x14xf32, #tpu.memory_space<vmem>>, %arg3: memref<512x512xbf16, #tpu.memory_space<vmem>>, %arg4: memref<1x512xf32, #tpu.memory_space<vmem>>, %arg5: memref<512x512xbf16, #tpu.memory_space<vmem>>, %arg6: memref<1x512xf32, #tpu.memory_space<vmem>>, %arg7: memref<512x512xbf16, #tpu.memory_space<vmem>>, %arg8: memref<1x512xf32, #tpu.memory_space<vmem>>, %arg9: memref<512x512xbf16, #tpu.memory_space<vmem>>, %arg10: memref<1x512xf32, #tpu.memory_space<vmem>>, %arg11: memref<512x1024xbf16, #tpu.memory_space<vmem>>, %arg12: memref<1x1024xf32, #tpu.memory_space<vmem>>, %arg13: memref<1024x512xbf16, #tpu.memory_space<vmem>>, %arg14: memref<1x512xf32, #tpu.memory_space<vmem>>, %arg15: memref<1x512xf32, #tpu.memory_space<vmem>>, %arg16: memref<1x512xf32, #tpu.memory_space<vmem>>, %arg17: memref<1x512xf32, #tpu.memory_space<vmem>>, %arg18: memref<1x512xf32, #tpu.memory_space<vmem>>, %arg19: memref<1x14x512xf32, #tpu.memory_space<vmem>>, %arg20: memref<14x512xbf16, #tpu.memory_space<vmem>>) attributes {dimension_semantics = [#tpu.dimension_semantics<parallel>], iteration_bounds = array<i64: 2>, scalar_prefetch = 0 : i64, scratch_operands = 1 : i64, tpu.core_type = #tpu.core_type<tc>, window_params = [{transform_indices = @transform_0, window_bounds = array<i64: 1, 14, 512>}, {transform_indices = @transform_1, window_bounds = array<i64: 1, 1, 14>}, {pipeline_mode = #tpu.pipeline_mode<synchronous>, transform_indices = @transform_2, window_bounds = array<i64: 512, 512>}, {pipeline_mode = #tpu.pipeline_mode<synchronous>, transform_indices = @transform_3, window_bounds = array<i64: 1, 512>}, {pipeline_mode = #tpu.pipeline_mode<synchronous>, transform_indices = @transform_4, window_bounds = array<i64: 512, 512>}, {pipeline_mode = #tpu.pipeline_mode<synchronous>, transform_indices = @transform_5, window_bounds = array<i64: 1, 512>}, {pipeline_mode = #tpu.pipeline_mode<synchronous>, transform_indices = @transform_6, window_bounds = array<i64: 512, 512>}, {pipeline_mode = #tpu.pipeline_mode<synchronous>, transform_indices = @transform_7, window_bounds = array<i64: 1, 512>}, {pipeline_mode = #tpu.pipeline_mode<synchronous>, transform_indices = @transform_8, window_bounds = array<i64: 512, 512>}, {pipeline_mode = #tpu.pipeline_mode<synchronous>, transform_indices = @transform_9, window_bounds = array<i64: 1, 512>}, {pipeline_mode = #tpu.pipeline_mode<synchronous>, transform_indices = @transform_10, window_bounds = array<i64: 512, 1024>}, {pipeline_mode = #tpu.pipeline_mode<synchronous>, transform_indices = @transform_11, window_bounds = array<i64: 1, 1024>}, {pipeline_mode = #tpu.pipeline_mode<synchronous>, transform_indices = @transform_12, window_bounds = array<i64: 1024, 512>}, {pipeline_mode = #tpu.pipeline_mode<synchronous>, transform_indices = @transform_13, window_bounds = array<i64: 1, 512>}, {pipeline_mode = #tpu.pipeline_mode<synchronous>, transform_indices = @transform_14, window_bounds = array<i64: 1, 512>}, {pipeline_mode = #tpu.pipeline_mode<synchronous>, transform_indices = @transform_15, window_bounds = array<i64: 1, 512>}, {pipeline_mode = #tpu.pipeline_mode<synchronous>, transform_indices = @transform_16, window_bounds = array<i64: 1, 512>}, {pipeline_mode = #tpu.pipeline_mode<synchronous>, transform_indices = @transform_17, window_bounds = array<i64: 1, 512>}, {transform_indices = @transform_18, window_bounds = array<i64: 1, 14, 512>}]} {
    %c0 = arith.constant 0 : index
    %c0_0 = arith.constant 0 : index
    %c0_1 = arith.constant 0 : index
    %0 = vector.load %arg1[%c0, %c0_0, %c0_1] : memref<1x14x512xf32, #tpu.memory_space<vmem>>, vector<1x14x512xf32>
    %1 = vector.shape_cast %0 : vector<1x14x512xf32> to vector<14x512xf32>
    %2 = arith.truncf %1 : vector<14x512xf32> to vector<14x512xbf16>
    %c0_2 = arith.constant 0 : index
    %c0_3 = arith.constant 0 : index
    %3 = vector.load %arg3[%c0_2, %c0_3] : memref<512x512xbf16, #tpu.memory_space<vmem>>, vector<512x512xbf16>
    %cst = arith.constant dense<0.000000e+00> : vector<14x512xf32>
    %4 = tpu.matmul %2, %3, %cst {dimension_numbers = #tpu.dot_dimension_numbers<[1], [0], [0], [1], [0, 0, 1, 1], [], []>} : vector<14x512xbf16>, vector<512x512xbf16>, vector<14x512xf32> -> vector<14x512xf32>
    %c0_4 = arith.constant 0 : index
    %c0_5 = arith.constant 0 : index
    %5 = vector.load %arg4[%c0_4, %c0_5] : memref<1x512xf32, #tpu.memory_space<vmem>>, vector<1x512xf32>
    %6 = vector.broadcast %5 : vector<1x512xf32> to vector<14x512xf32>
    %7 = arith.addf %4, %6 : vector<14x512xf32>
    %8 = arith.truncf %7 : vector<14x512xf32> to vector<14x512xbf16>
    %c0_6 = arith.constant 0 : index
    %c0_7 = arith.constant 0 : index
    %9 = vector.load %arg5[%c0_6, %c0_7] : memref<512x512xbf16, #tpu.memory_space<vmem>>, vector<512x512xbf16>
    %cst_8 = arith.constant dense<0.000000e+00> : vector<14x512xf32>
    %10 = tpu.matmul %2, %9, %cst_8 {dimension_numbers = #tpu.dot_dimension_numbers<[1], [0], [0], [1], [0, 0, 1, 1], [], []>} : vector<14x512xbf16>, vector<512x512xbf16>, vector<14x512xf32> -> vector<14x512xf32>
    %c0_9 = arith.constant 0 : index
    %c0_10 = arith.constant 0 : index
    %11 = vector.load %arg6[%c0_9, %c0_10] : memref<1x512xf32, #tpu.memory_space<vmem>>, vector<1x512xf32>
    %12 = vector.broadcast %11 : vector<1x512xf32> to vector<14x512xf32>
    %13 = arith.addf %10, %12 : vector<14x512xf32>
    %14 = arith.truncf %13 : vector<14x512xf32> to vector<14x512xbf16>
    %c0_11 = arith.constant 0 : index
    %c0_12 = arith.constant 0 : index
    %15 = vector.load %arg7[%c0_11, %c0_12] : memref<512x512xbf16, #tpu.memory_space<vmem>>, vector<512x512xbf16>
    %cst_13 = arith.constant dense<0.000000e+00> : vector<14x512xf32>
    %16 = tpu.matmul %2, %15, %cst_13 {dimension_numbers = #tpu.dot_dimension_numbers<[1], [0], [0], [1], [0, 0, 1, 1], [], []>} : vector<14x512xbf16>, vector<512x512xbf16>, vector<14x512xf32> -> vector<14x512xf32>
    %c0_14 = arith.constant 0 : index
    %c0_15 = arith.constant 0 : index
    %17 = vector.load %arg8[%c0_14, %c0_15] : memref<1x512xf32, #tpu.memory_space<vmem>>, vector<1x512xf32>
    %18 = vector.broadcast %17 : vector<1x512xf32> to vector<14x512xf32>
    %19 = arith.addf %16, %18 : vector<14x512xf32>
    %20 = arith.truncf %19 : vector<14x512xf32> to vector<14x512xbf16>
    %c0_16 = arith.constant 0 : index
    %c0_17 = arith.constant 0 : index
    %c0_18 = arith.constant 0 : index
    %21 = vector.load %arg2[%c0_16, %c0_17, %c0_18] : memref<1x1x14xf32, #tpu.memory_space<vmem>>, vector<1x1x14xf32>
    %22 = vector.shape_cast %21 : vector<1x1x14xf32> to vector<1x14xf32>
    %cst_19 = arith.constant 0.000000e+00 : f32
    %23 = vector.broadcast %cst_19 : f32 to vector<1x14xf32>
    %24 = arith.cmpf ogt, %22, %23 : vector<1x14xf32>
    %cst_20 = arith.constant 0.000000e+00 : f32
    %cst_21 = arith.constant -1.000000e+09 : f32
    %25 = vector.broadcast %cst_20 : f32 to vector<1x14xf32>
    %26 = vector.broadcast %cst_21 : f32 to vector<1x14xf32>
    %27 = arith.select %24, %25, %26 : vector<1x14xi1>, vector<1x14xf32>
    %28 = vector.extract_strided_slice %8 {offsets = [0, 0], sizes = [14, 64], strides = [1, 1]} : vector<14x512xbf16> to vector<14x64xbf16>
    %29 = vector.extract_strided_slice %14 {offsets = [0, 0], sizes = [14, 64], strides = [1, 1]} : vector<14x512xbf16> to vector<14x64xbf16>
    %30 = vector.extract_strided_slice %20 {offsets = [0, 0], sizes = [14, 64], strides = [1, 1]} : vector<14x512xbf16> to vector<14x64xbf16>
    %cst_22 = arith.constant dense<0.000000e+00> : vector<14x14xf32>
    %31 = tpu.matmul %28, %29, %cst_22 {dimension_numbers = #tpu.dot_dimension_numbers<[1], [1], [0], [0], [0, 0, 1, 0], [], []>} : vector<14x64xbf16>, vector<14x64xbf16>, vector<14x14xf32> -> vector<14x14xf32>
    %32 = vector.broadcast %27 : vector<1x14xf32> to vector<14x14xf32>
    %33 = arith.addf %31, %32 : vector<14x14xf32>
    %cst_23 = arith.constant dense<0xFF800000> : vector<14xf32>
    %34 = vector.multi_reduction <maximumf>, %33, %cst_23 [1] : vector<14x14xf32> to vector<14xf32>
    %35 = vector.shape_cast %34 : vector<14xf32> to vector<14x1xf32>
    %36 = vector.broadcast %35 : vector<14x1xf32> to vector<14x14xf32>
    %37 = arith.subf %33, %36 : vector<14x14xf32>
    %38 = math.exp %37 : vector<14x14xf32>
    %cst_24 = arith.constant dense<0.000000e+00> : vector<14xf32>
    %39 = vector.multi_reduction <add>, %38, %cst_24 [1] : vector<14x14xf32> to vector<14xf32>
    %40 = vector.shape_cast %39 : vector<14xf32> to vector<14x1xf32>
    %41 = tpu.reciprocal %40 {approx = true} : vector<14x1xf32> -> vector<14x1xf32>
    %42 = vector.broadcast %41 : vector<14x1xf32> to vector<14x14xf32>
    %43 = arith.mulf %38, %42 : vector<14x14xf32>
    %44 = arith.truncf %43 : vector<14x14xf32> to vector<14x14xbf16>
    %cst_25 = arith.constant dense<0.000000e+00> : vector<14x64xf32>
    %45 = tpu.matmul %44, %30, %cst_25 {dimension_numbers = #tpu.dot_dimension_numbers<[1], [0], [0], [1], [0, 0, 1, 1], [], []>} : vector<14x14xbf16>, vector<14x64xbf16>, vector<14x64xf32> -> vector<14x64xf32>
    %46 = arith.truncf %45 : vector<14x64xf32> to vector<14x64xbf16>
    %c0_26 = arith.constant 0 : index
    %c0_27 = arith.constant 0 : index
    %47 = vector.load %arg20[%c0_26, %c0_27] : memref<14x512xbf16, #tpu.memory_space<vmem>>, vector<14x64xbf16>
    tpu.vector_store %arg20[%c0_26, %c0_27], %46 {strides = array<i32>} : memref<14x512xbf16, #tpu.memory_space<vmem>>, vector<14x64xbf16>,
    %48 = vector.extract_strided_slice %8 {offsets = [0, 64], sizes = [14, 64], strides = [1, 1]} : vector<14x512xbf16> to vector<14x64xbf16>
    %49 = vector.extract_strided_slice %14 {offsets = [0, 64], sizes = [14, 64], strides = [1, 1]} : vector<14x512xbf16> to vector<14x64xbf16>
    %50 = vector.extract_strided_slice %20 {offsets = [0, 64], sizes = [14, 64], strides = [1, 1]} : vector<14x512xbf16> to vector<14x64xbf16>
    %cst_28 = arith.constant dense<0.000000e+00> : vector<14x14xf32>
    %51 = tpu.matmul %48, %49, %cst_28 {dimension_numbers = #tpu.dot_dimension_numbers<[1], [1], [0], [0], [0, 0, 1, 0], [], []>} : vector<14x64xbf16>, vector<14x64xbf16>, vector<14x14xf32> -> vector<14x14xf32>
    %52 = vector.broadcast %27 : vector<1x14xf32> to vector<14x14xf32>
    %53 = arith.addf %51, %52 : vector<14x14xf32>
    %cst_29 = arith.constant dense<0xFF800000> : vector<14xf32>
    %54 = vector.multi_reduction <maximumf>, %53, %cst_29 [1] : vector<14x14xf32> to vector<14xf32>
    %55 = vector.shape_cast %54 : vector<14xf32> to vector<14x1xf32>
    %56 = vector.broadcast %55 : vector<14x1xf32> to vector<14x14xf32>
    %57 = arith.subf %53, %56 : vector<14x14xf32>
    %58 = math.exp %57 : vector<14x14xf32>
    %cst_30 = arith.constant dense<0.000000e+00> : vector<14xf32>
    %59 = vector.multi_reduction <add>, %58, %cst_30 [1] : vector<14x14xf32> to vector<14xf32>
    %60 = vector.shape_cast %59 : vector<14xf32> to vector<14x1xf32>
    %61 = tpu.reciprocal %60 {approx = true} : vector<14x1xf32> -> vector<14x1xf32>
    %62 = vector.broadcast %61 : vector<14x1xf32> to vector<14x14xf32>
    %63 = arith.mulf %58, %62 : vector<14x14xf32>
    %64 = arith.truncf %63 : vector<14x14xf32> to vector<14x14xbf16>
    %cst_31 = arith.constant dense<0.000000e+00> : vector<14x64xf32>
    %65 = tpu.matmul %64, %50, %cst_31 {dimension_numbers = #tpu.dot_dimension_numbers<[1], [0], [0], [1], [0, 0, 1, 1], [], []>} : vector<14x14xbf16>, vector<14x64xbf16>, vector<14x64xf32> -> vector<14x64xf32>
    %66 = arith.truncf %65 : vector<14x64xf32> to vector<14x64xbf16>
    %c0_32 = arith.constant 0 : index
    %c64 = arith.constant 64 : index
    %67 = vector.load %arg20[%c0_32, %c64] : memref<14x512xbf16, #tpu.memory_space<vmem>>, vector<14x64xbf16>
    tpu.vector_store %arg20[%c0_32, %c64], %66 {strides = array<i32>} : memref<14x512xbf16, #tpu.memory_space<vmem>>, vector<14x64xbf16>,
    %68 = vector.extract_strided_slice %8 {offsets = [0, 128], sizes = [14, 64], strides = [1, 1]} : vector<14x512xbf16> to vector<14x64xbf16>
    %69 = vector.extract_strided_slice %14 {offsets = [0, 128], sizes = [14, 64], strides = [1, 1]} : vector<14x512xbf16> to vector<14x64xbf16>
    %70 = vector.extract_strided_slice %20 {offsets = [0, 128], sizes = [14, 64], strides = [1, 1]} : vector<14x512xbf16> to vector<14x64xbf16>
    %cst_33 = arith.constant dense<0.000000e+00> : vector<14x14xf32>
    %71 = tpu.matmul %68, %69, %cst_33 {dimension_numbers = #tpu.dot_dimension_numbers<[1], [1], [0], [0], [0, 0, 1, 0], [], []>} : vector<14x64xbf16>, vector<14x64xbf16>, vector<14x14xf32> -> vector<14x14xf32>
    %72 = vector.broadcast %27 : vector<1x14xf32> to vector<14x14xf32>
    %73 = arith.addf %71, %72 : vector<14x14xf32>
    %cst_34 = arith.constant dense<0xFF800000> : vector<14xf32>
    %74 = vector.multi_reduction <maximumf>, %73, %cst_34 [1] : vector<14x14xf32> to vector<14xf32>
    %75 = vector.shape_cast %74 : vector<14xf32> to vector<14x1xf32>
    %76 = vector.broadcast %75 : vector<14x1xf32> to vector<14x14xf32>
    %77 = arith.subf %73, %76 : vector<14x14xf32>
    %78 = math.exp %77 : vector<14x14xf32>
    %cst_35 = arith.constant dense<0.000000e+00> : vector<14xf32>
    %79 = vector.multi_reduction <add>, %78, %cst_35 [1] : vector<14x14xf32> to vector<14xf32>
    %80 = vector.shape_cast %79 : vector<14xf32> to vector<14x1xf32>
    %81 = tpu.reciprocal %80 {approx = true} : vector<14x1xf32> -> vector<14x1xf32>
    %82 = vector.broadcast %81 : vector<14x1xf32> to vector<14x14xf32>
    %83 = arith.mulf %78, %82 : vector<14x14xf32>
    %84 = arith.truncf %83 : vector<14x14xf32> to vector<14x14xbf16>
    %cst_36 = arith.constant dense<0.000000e+00> : vector<14x64xf32>
    %85 = tpu.matmul %84, %70, %cst_36 {dimension_numbers = #tpu.dot_dimension_numbers<[1], [0], [0], [1], [0, 0, 1, 1], [], []>} : vector<14x14xbf16>, vector<14x64xbf16>, vector<14x64xf32> -> vector<14x64xf32>
    %86 = arith.truncf %85 : vector<14x64xf32> to vector<14x64xbf16>
    %c0_37 = arith.constant 0 : index
    %c128 = arith.constant 128 : index
    %87 = vector.load %arg20[%c0_37, %c128] : memref<14x512xbf16, #tpu.memory_space<vmem>>, vector<14x64xbf16>
    tpu.vector_store %arg20[%c0_37, %c128], %86 {strides = array<i32>} : memref<14x512xbf16, #tpu.memory_space<vmem>>, vector<14x64xbf16>,
    %88 = vector.extract_strided_slice %8 {offsets = [0, 192], sizes = [14, 64], strides = [1, 1]} : vector<14x512xbf16> to vector<14x64xbf16>
    %89 = vector.extract_strided_slice %14 {offsets = [0, 192], sizes = [14, 64], strides = [1, 1]} : vector<14x512xbf16> to vector<14x64xbf16>
    %90 = vector.extract_strided_slice %20 {offsets = [0, 192], sizes = [14, 64], strides = [1, 1]} : vector<14x512xbf16> to vector<14x64xbf16>
    %cst_38 = arith.constant dense<0.000000e+00> : vector<14x14xf32>
    %91 = tpu.matmul %88, %89, %cst_38 {dimension_numbers = #tpu.dot_dimension_numbers<[1], [1], [0], [0], [0, 0, 1, 0], [], []>} : vector<14x64xbf16>, vector<14x64xbf16>, vector<14x14xf32> -> vector<14x14xf32>
    %92 = vector.broadcast %27 : vector<1x14xf32> to vector<14x14xf32>
    %93 = arith.addf %91, %92 : vector<14x14xf32>
    %cst_39 = arith.constant dense<0xFF800000> : vector<14xf32>
    %94 = vector.multi_reduction <maximumf>, %93, %cst_39 [1] : vector<14x14xf32> to vector<14xf32>
    %95 = vector.shape_cast %94 : vector<14xf32> to vector<14x1xf32>
    %96 = vector.broadcast %95 : vector<14x1xf32> to vector<14x14xf32>
    %97 = arith.subf %93, %96 : vector<14x14xf32>
    %98 = math.exp %97 : vector<14x14xf32>
    %cst_40 = arith.constant dense<0.000000e+00> : vector<14xf32>
    %99 = vector.multi_reduction <add>, %98, %cst_40 [1] : vector<14x14xf32> to vector<14xf32>
    %100 = vector.shape_cast %99 : vector<14xf32> to vector<14x1xf32>
    %101 = tpu.reciprocal %100 {approx = true} : vector<14x1xf32> -> vector<14x1xf32>
    %102 = vector.broadcast %101 : vector<14x1xf32> to vector<14x14xf32>
    %103 = arith.mulf %98, %102 : vector<14x14xf32>
    %104 = arith.truncf %103 : vector<14x14xf32> to vector<14x14xbf16>
    %cst_41 = arith.constant dense<0.000000e+00> : vector<14x64xf32>
    %105 = tpu.matmul %104, %90, %cst_41 {dimension_numbers = #tpu.dot_dimension_numbers<[1], [0], [0], [1], [0, 0, 1, 1], [], []>} : vector<14x14xbf16>, vector<14x64xbf16>, vector<14x64xf32> -> vector<14x64xf32>
    %106 = arith.truncf %105 : vector<14x64xf32> to vector<14x64xbf16>
    %c0_42 = arith.constant 0 : index
    %c192 = arith.constant 192 : index
    %107 = vector.load %arg20[%c0_42, %c192] : memref<14x512xbf16, #tpu.memory_space<vmem>>, vector<14x64xbf16>
    tpu.vector_store %arg20[%c0_42, %c192], %106 {strides = array<i32>} : memref<14x512xbf16, #tpu.memory_space<vmem>>, vector<14x64xbf16>,
    %108 = vector.extract_strided_slice %8 {offsets = [0, 256], sizes = [14, 64], strides = [1, 1]} : vector<14x512xbf16> to vector<14x64xbf16>
    %109 = vector.extract_strided_slice %14 {offsets = [0, 256], sizes = [14, 64], strides = [1, 1]} : vector<14x512xbf16> to vector<14x64xbf16>
    %110 = vector.extract_strided_slice %20 {offsets = [0, 256], sizes = [14, 64], strides = [1, 1]} : vector<14x512xbf16> to vector<14x64xbf16>
    %cst_43 = arith.constant dense<0.000000e+00> : vector<14x14xf32>
    %111 = tpu.matmul %108, %109, %cst_43 {dimension_numbers = #tpu.dot_dimension_numbers<[1], [1], [0], [0], [0, 0, 1, 0], [], []>} : vector<14x64xbf16>, vector<14x64xbf16>, vector<14x14xf32> -> vector<14x14xf32>
    %112 = vector.broadcast %27 : vector<1x14xf32> to vector<14x14xf32>
    %113 = arith.addf %111, %112 : vector<14x14xf32>
    %cst_44 = arith.constant dense<0xFF800000> : vector<14xf32>
    %114 = vector.multi_reduction <maximumf>, %113, %cst_44 [1] : vector<14x14xf32> to vector<14xf32>
    %115 = vector.shape_cast %114 : vector<14xf32> to vector<14x1xf32>
    %116 = vector.broadcast %115 : vector<14x1xf32> to vector<14x14xf32>
    %117 = arith.subf %113, %116 : vector<14x14xf32>
    %118 = math.exp %117 : vector<14x14xf32>
    %cst_45 = arith.constant dense<0.000000e+00> : vector<14xf32>
    %119 = vector.multi_reduction <add>, %118, %cst_45 [1] : vector<14x14xf32> to vector<14xf32>
    %120 = vector.shape_cast %119 : vector<14xf32> to vector<14x1xf32>
    %121 = tpu.reciprocal %120 {approx = true} : vector<14x1xf32> -> vector<14x1xf32>
    %122 = vector.broadcast %121 : vector<14x1xf32> to vector<14x14xf32>
    %123 = arith.mulf %118, %122 : vector<14x14xf32>
    %124 = arith.truncf %123 : vector<14x14xf32> to vector<14x14xbf16>
    %cst_46 = arith.constant dense<0.000000e+00> : vector<14x64xf32>
    %125 = tpu.matmul %124, %110, %cst_46 {dimension_numbers = #tpu.dot_dimension_numbers<[1], [0], [0], [1], [0, 0, 1, 1], [], []>} : vector<14x14xbf16>, vector<14x64xbf16>, vector<14x64xf32> -> vector<14x64xf32>
    %126 = arith.truncf %125 : vector<14x64xf32> to vector<14x64xbf16>
    %c0_47 = arith.constant 0 : index
    %c256 = arith.constant 256 : index
    %127 = vector.load %arg20[%c0_47, %c256] : memref<14x512xbf16, #tpu.memory_space<vmem>>, vector<14x64xbf16>
    tpu.vector_store %arg20[%c0_47, %c256], %126 {strides = array<i32>} : memref<14x512xbf16, #tpu.memory_space<vmem>>, vector<14x64xbf16>,
    %128 = vector.extract_strided_slice %8 {offsets = [0, 320], sizes = [14, 64], strides = [1, 1]} : vector<14x512xbf16> to vector<14x64xbf16>
    %129 = vector.extract_strided_slice %14 {offsets = [0, 320], sizes = [14, 64], strides = [1, 1]} : vector<14x512xbf16> to vector<14x64xbf16>
    %130 = vector.extract_strided_slice %20 {offsets = [0, 320], sizes = [14, 64], strides = [1, 1]} : vector<14x512xbf16> to vector<14x64xbf16>
    %cst_48 = arith.constant dense<0.000000e+00> : vector<14x14xf32>
    %131 = tpu.matmul %128, %129, %cst_48 {dimension_numbers = #tpu.dot_dimension_numbers<[1], [1], [0], [0], [0, 0, 1, 0], [], []>} : vector<14x64xbf16>, vector<14x64xbf16>, vector<14x14xf32> -> vector<14x14xf32>
    %132 = vector.broadcast %27 : vector<1x14xf32> to vector<14x14xf32>
    %133 = arith.addf %131, %132 : vector<14x14xf32>
    %cst_49 = arith.constant dense<0xFF800000> : vector<14xf32>
    %134 = vector.multi_reduction <maximumf>, %133, %cst_49 [1] : vector<14x14xf32> to vector<14xf32>
    %135 = vector.shape_cast %134 : vector<14xf32> to vector<14x1xf32>
    %136 = vector.broadcast %135 : vector<14x1xf32> to vector<14x14xf32>
    %137 = arith.subf %133, %136 : vector<14x14xf32>
    %138 = math.exp %137 : vector<14x14xf32>
    %cst_50 = arith.constant dense<0.000000e+00> : vector<14xf32>
    %139 = vector.multi_reduction <add>, %138, %cst_50 [1] : vector<14x14xf32> to vector<14xf32>
    %140 = vector.shape_cast %139 : vector<14xf32> to vector<14x1xf32>
    %141 = tpu.reciprocal %140 {approx = true} : vector<14x1xf32> -> vector<14x1xf32>
    %142 = vector.broadcast %141 : vector<14x1xf32> to vector<14x14xf32>
    %143 = arith.mulf %138, %142 : vector<14x14xf32>
    %144 = arith.truncf %143 : vector<14x14xf32> to vector<14x14xbf16>
    %cst_51 = arith.constant dense<0.000000e+00> : vector<14x64xf32>
    %145 = tpu.matmul %144, %130, %cst_51 {dimension_numbers = #tpu.dot_dimension_numbers<[1], [0], [0], [1], [0, 0, 1, 1], [], []>} : vector<14x14xbf16>, vector<14x64xbf16>, vector<14x64xf32> -> vector<14x64xf32>
    %146 = arith.truncf %145 : vector<14x64xf32> to vector<14x64xbf16>
    %c0_52 = arith.constant 0 : index
    %c320 = arith.constant 320 : index
    %147 = vector.load %arg20[%c0_52, %c320] : memref<14x512xbf16, #tpu.memory_space<vmem>>, vector<14x64xbf16>
    tpu.vector_store %arg20[%c0_52, %c320], %146 {strides = array<i32>} : memref<14x512xbf16, #tpu.memory_space<vmem>>, vector<14x64xbf16>,
    %148 = vector.extract_strided_slice %8 {offsets = [0, 384], sizes = [14, 64], strides = [1, 1]} : vector<14x512xbf16> to vector<14x64xbf16>
    %149 = vector.extract_strided_slice %14 {offsets = [0, 384], sizes = [14, 64], strides = [1, 1]} : vector<14x512xbf16> to vector<14x64xbf16>
    %150 = vector.extract_strided_slice %20 {offsets = [0, 384], sizes = [14, 64], strides = [1, 1]} : vector<14x512xbf16> to vector<14x64xbf16>
    %cst_53 = arith.constant dense<0.000000e+00> : vector<14x14xf32>
    %151 = tpu.matmul %148, %149, %cst_53 {dimension_numbers = #tpu.dot_dimension_numbers<[1], [1], [0], [0], [0, 0, 1, 0], [], []>} : vector<14x64xbf16>, vector<14x64xbf16>, vector<14x14xf32> -> vector<14x14xf32>
    %152 = vector.broadcast %27 : vector<1x14xf32> to vector<14x14xf32>
    %153 = arith.addf %151, %152 : vector<14x14xf32>
    %cst_54 = arith.constant dense<0xFF800000> : vector<14xf32>
    %154 = vector.multi_reduction <maximumf>, %153, %cst_54 [1] : vector<14x14xf32> to vector<14xf32>
    %155 = vector.shape_cast %154 : vector<14xf32> to vector<14x1xf32>
    %156 = vector.broadcast %155 : vector<14x1xf32> to vector<14x14xf32>
    %157 = arith.subf %153, %156 : vector<14x14xf32>
    %158 = math.exp %157 : vector<14x14xf32>
    %cst_55 = arith.constant dense<0.000000e+00> : vector<14xf32>
    %159 = vector.multi_reduction <add>, %158, %cst_55 [1] : vector<14x14xf32> to vector<14xf32>
    %160 = vector.shape_cast %159 : vector<14xf32> to vector<14x1xf32>
    %161 = tpu.reciprocal %160 {approx = true} : vector<14x1xf32> -> vector<14x1xf32>
    %162 = vector.broadcast %161 : vector<14x1xf32> to vector<14x14xf32>
    %163 = arith.mulf %158, %162 : vector<14x14xf32>
    %164 = arith.truncf %163 : vector<14x14xf32> to vector<14x14xbf16>
    %cst_56 = arith.constant dense<0.000000e+00> : vector<14x64xf32>
    %165 = tpu.matmul %164, %150, %cst_56 {dimension_numbers = #tpu.dot_dimension_numbers<[1], [0], [0], [1], [0, 0, 1, 1], [], []>} : vector<14x14xbf16>, vector<14x64xbf16>, vector<14x64xf32> -> vector<14x64xf32>
    %166 = arith.truncf %165 : vector<14x64xf32> to vector<14x64xbf16>
    %c0_57 = arith.constant 0 : index
    %c384 = arith.constant 384 : index
    %167 = vector.load %arg20[%c0_57, %c384] : memref<14x512xbf16, #tpu.memory_space<vmem>>, vector<14x64xbf16>
    tpu.vector_store %arg20[%c0_57, %c384], %166 {strides = array<i32>} : memref<14x512xbf16, #tpu.memory_space<vmem>>, vector<14x64xbf16>,
    %168 = vector.extract_strided_slice %8 {offsets = [0, 448], sizes = [14, 64], strides = [1, 1]} : vector<14x512xbf16> to vector<14x64xbf16>
    %169 = vector.extract_strided_slice %14 {offsets = [0, 448], sizes = [14, 64], strides = [1, 1]} : vector<14x512xbf16> to vector<14x64xbf16>
    %170 = vector.extract_strided_slice %20 {offsets = [0, 448], sizes = [14, 64], strides = [1, 1]} : vector<14x512xbf16> to vector<14x64xbf16>
    %cst_58 = arith.constant dense<0.000000e+00> : vector<14x14xf32>
    %171 = tpu.matmul %168, %169, %cst_58 {dimension_numbers = #tpu.dot_dimension_numbers<[1], [1], [0], [0], [0, 0, 1, 0], [], []>} : vector<14x64xbf16>, vector<14x64xbf16>, vector<14x14xf32> -> vector<14x14xf32>
    %172 = vector.broadcast %27 : vector<1x14xf32> to vector<14x14xf32>
    %173 = arith.addf %171, %172 : vector<14x14xf32>
    %cst_59 = arith.constant dense<0xFF800000> : vector<14xf32>
    %174 = vector.multi_reduction <maximumf>, %173, %cst_59 [1] : vector<14x14xf32> to vector<14xf32>
    %175 = vector.shape_cast %174 : vector<14xf32> to vector<14x1xf32>
    %176 = vector.broadcast %175 : vector<14x1xf32> to vector<14x14xf32>
    %177 = arith.subf %173, %176 : vector<14x14xf32>
    %178 = math.exp %177 : vector<14x14xf32>
    %cst_60 = arith.constant dense<0.000000e+00> : vector<14xf32>
    %179 = vector.multi_reduction <add>, %178, %cst_60 [1] : vector<14x14xf32> to vector<14xf32>
    %180 = vector.shape_cast %179 : vector<14xf32> to vector<14x1xf32>
    %181 = tpu.reciprocal %180 {approx = true} : vector<14x1xf32> -> vector<14x1xf32>
    %182 = vector.broadcast %181 : vector<14x1xf32> to vector<14x14xf32>
    %183 = arith.mulf %178, %182 : vector<14x14xf32>
    %184 = arith.truncf %183 : vector<14x14xf32> to vector<14x14xbf16>
    %cst_61 = arith.constant dense<0.000000e+00> : vector<14x64xf32>
    %185 = tpu.matmul %184, %170, %cst_61 {dimension_numbers = #tpu.dot_dimension_numbers<[1], [0], [0], [1], [0, 0, 1, 1], [], []>} : vector<14x14xbf16>, vector<14x64xbf16>, vector<14x64xf32> -> vector<14x64xf32>
    %186 = arith.truncf %185 : vector<14x64xf32> to vector<14x64xbf16>
    %c0_62 = arith.constant 0 : index
    %c448 = arith.constant 448 : index
    %187 = vector.load %arg20[%c0_62, %c448] : memref<14x512xbf16, #tpu.memory_space<vmem>>, vector<14x64xbf16>
    tpu.vector_store %arg20[%c0_62, %c448], %186 {strides = array<i32>} : memref<14x512xbf16, #tpu.memory_space<vmem>>, vector<14x64xbf16>,
    %c0_63 = arith.constant 0 : index
    %c0_64 = arith.constant 0 : index
    %188 = vector.load %arg20[%c0_63, %c0_64] : memref<14x512xbf16, #tpu.memory_space<vmem>>, vector<14x512xbf16>
    %c0_65 = arith.constant 0 : index
    %c0_66 = arith.constant 0 : index
    %189 = vector.load %arg9[%c0_65, %c0_66] : memref<512x512xbf16, #tpu.memory_space<vmem>>, vector<512x512xbf16>
    %cst_67 = arith.constant dense<0.000000e+00> : vector<14x512xf32>
    %190 = tpu.matmul %188, %189, %cst_67 {dimension_numbers = #tpu.dot_dimension_numbers<[1], [0], [0], [1], [0, 0, 1, 1], [], []>} : vector<14x512xbf16>, vector<512x512xbf16>, vector<14x512xf32> -> vector<14x512xf32>
    %c0_68 = arith.constant 0 : index
    %c0_69 = arith.constant 0 : index
    %191 = vector.load %arg10[%c0_68, %c0_69] : memref<1x512xf32, #tpu.memory_space<vmem>>, vector<1x512xf32>
    %192 = vector.broadcast %191 : vector<1x512xf32> to vector<14x512xf32>
    %193 = arith.addf %190, %192 : vector<14x512xf32>
    %194 = arith.addf %1, %193 : vector<14x512xf32>
    %c0_70 = arith.constant 0 : index
    %c0_71 = arith.constant 0 : index
    %195 = vector.load %arg15[%c0_70, %c0_71] : memref<1x512xf32, #tpu.memory_space<vmem>>, vector<1x512xf32>
    %c0_72 = arith.constant 0 : index
    %c0_73 = arith.constant 0 : index
    %196 = vector.load %arg16[%c0_72, %c0_73] : memref<1x512xf32, #tpu.memory_space<vmem>>, vector<1x512xf32>
    %cst_74 = arith.constant dense<0.000000e+00> : vector<14xf32>
    %197 = vector.multi_reduction <add>, %194, %cst_74 [1] : vector<14x512xf32> to vector<14xf32>
    %198 = vector.shape_cast %197 : vector<14xf32> to vector<14x1xf32>
    %cst_75 = arith.constant 5.120000e+02 : f32
    %199 = vector.broadcast %cst_75 : f32 to vector<14x1xf32>
    %200 = arith.divf %198, %199 : vector<14x1xf32>
    %201 = vector.broadcast %200 : vector<14x1xf32> to vector<14x512xf32>
    %202 = arith.subf %194, %201 : vector<14x512xf32>
    %203 = arith.mulf %202, %202 : vector<14x512xf32>
    %cst_76 = arith.constant dense<0.000000e+00> : vector<14xf32>
    %204 = vector.multi_reduction <add>, %203, %cst_76 [1] : vector<14x512xf32> to vector<14xf32>
    %205 = vector.shape_cast %204 : vector<14xf32> to vector<14x1xf32>
    %cst_77 = arith.constant 5.120000e+02 : f32
    %206 = vector.broadcast %cst_77 : f32 to vector<14x1xf32>
    %207 = arith.divf %205, %206 : vector<14x1xf32>
    %208 = vector.broadcast %200 : vector<14x1xf32> to vector<14x512xf32>
    %209 = arith.subf %194, %208 : vector<14x512xf32>
    %cst_78 = arith.constant 9.99999974E-6 : f32
    %210 = vector.broadcast %cst_78 : f32 to vector<14x1xf32>
    %211 = arith.addf %207, %210 : vector<14x1xf32>
    %212 = math.rsqrt %211 : vector<14x1xf32>
    %213 = vector.broadcast %212 : vector<14x1xf32> to vector<14x512xf32>
    %214 = arith.mulf %209, %213 : vector<14x512xf32>
    %215 = vector.broadcast %195 : vector<1x512xf32> to vector<14x512xf32>
    %216 = arith.mulf %214, %215 : vector<14x512xf32>
    %217 = vector.broadcast %196 : vector<1x512xf32> to vector<14x512xf32>
    %218 = arith.addf %216, %217 : vector<14x512xf32>
    %219 = arith.truncf %218 : vector<14x512xf32> to vector<14x512xbf16>
    %c0_79 = arith.constant 0 : index
    %c0_80 = arith.constant 0 : index
    %220 = vector.load %arg11[%c0_79, %c0_80] : memref<512x1024xbf16, #tpu.memory_space<vmem>>, vector<512x1024xbf16>
    %cst_81 = arith.constant dense<0.000000e+00> : vector<14x1024xf32>
    %221 = tpu.matmul %219, %220, %cst_81 {dimension_numbers = #tpu.dot_dimension_numbers<[1], [0], [0], [1], [0, 0, 1, 1], [], []>} : vector<14x512xbf16>, vector<512x1024xbf16>, vector<14x1024xf32> -> vector<14x1024xf32>
    %c0_82 = arith.constant 0 : index
    %c0_83 = arith.constant 0 : index
    %222 = vector.load %arg12[%c0_82, %c0_83] : memref<1x1024xf32, #tpu.memory_space<vmem>>, vector<1x1024xf32>
    %223 = vector.broadcast %222 : vector<1x1024xf32> to vector<14x1024xf32>
    %224 = arith.addf %221, %223 : vector<14x1024xf32>
    %cst_84 = arith.constant 0.000000e+00 : f32
    %225 = vector.broadcast %cst_84 : f32 to vector<14x1024xf32>
    %226 = arith.maximumf %224, %225 : vector<14x1024xf32>
    %227 = arith.truncf %226 : vector<14x1024xf32> to vector<14x1024xbf16>
    %c0_85 = arith.constant 0 : index
    %c0_86 = arith.constant 0 : index
    %228 = vector.load %arg13[%c0_85, %c0_86] : memref<1024x512xbf16, #tpu.memory_space<vmem>>, vector<1024x512xbf16>
    %cst_87 = arith.constant dense<0.000000e+00> : vector<14x512xf32>
    %229 = tpu.matmul %227, %228, %cst_87 {dimension_numbers = #tpu.dot_dimension_numbers<[1], [0], [0], [1], [0, 0, 1, 1], [], []>} : vector<14x1024xbf16>, vector<1024x512xbf16>, vector<14x512xf32> -> vector<14x512xf32>
    %c0_88 = arith.constant 0 : index
    %c0_89 = arith.constant 0 : index
    %230 = vector.load %arg14[%c0_88, %c0_89] : memref<1x512xf32, #tpu.memory_space<vmem>>, vector<1x512xf32>
    %231 = vector.broadcast %230 : vector<1x512xf32> to vector<14x512xf32>
    %232 = arith.addf %229, %231 : vector<14x512xf32>
    %233 = arith.addf %218, %232 : vector<14x512xf32>
    %c0_90 = arith.constant 0 : index
    %c0_91 = arith.constant 0 : index
    %234 = vector.load %arg17[%c0_90, %c0_91] : memref<1x512xf32, #tpu.memory_space<vmem>>, vector<1x512xf32>
    %c0_92 = arith.constant 0 : index
    %c0_93 = arith.constant 0 : index
    %235 = vector.load %arg18[%c0_92, %c0_93] : memref<1x512xf32, #tpu.memory_space<vmem>>, vector<1x512xf32>
    %cst_94 = arith.constant dense<0.000000e+00> : vector<14xf32>
    %236 = vector.multi_reduction <add>, %233, %cst_94 [1] : vector<14x512xf32> to vector<14xf32>
    %237 = vector.shape_cast %236 : vector<14xf32> to vector<14x1xf32>
    %cst_95 = arith.constant 5.120000e+02 : f32
    %238 = vector.broadcast %cst_95 : f32 to vector<14x1xf32>
    %239 = arith.divf %237, %238 : vector<14x1xf32>
    %240 = vector.broadcast %239 : vector<14x1xf32> to vector<14x512xf32>
    %241 = arith.subf %233, %240 : vector<14x512xf32>
    %242 = arith.mulf %241, %241 : vector<14x512xf32>
    %cst_96 = arith.constant dense<0.000000e+00> : vector<14xf32>
    %243 = vector.multi_reduction <add>, %242, %cst_96 [1] : vector<14x512xf32> to vector<14xf32>
    %244 = vector.shape_cast %243 : vector<14xf32> to vector<14x1xf32>
    %cst_97 = arith.constant 5.120000e+02 : f32
    %245 = vector.broadcast %cst_97 : f32 to vector<14x1xf32>
    %246 = arith.divf %244, %245 : vector<14x1xf32>
    %247 = vector.broadcast %239 : vector<14x1xf32> to vector<14x512xf32>
    %248 = arith.subf %233, %247 : vector<14x512xf32>
    %cst_98 = arith.constant 9.99999974E-6 : f32
    %249 = vector.broadcast %cst_98 : f32 to vector<14x1xf32>
    %250 = arith.addf %246, %249 : vector<14x1xf32>
    %251 = math.rsqrt %250 : vector<14x1xf32>
    %252 = vector.broadcast %251 : vector<14x1xf32> to vector<14x512xf32>
    %253 = arith.mulf %248, %252 : vector<14x512xf32>
    %254 = vector.broadcast %234 : vector<1x512xf32> to vector<14x512xf32>
    %255 = arith.mulf %253, %254 : vector<14x512xf32>
    %256 = vector.broadcast %235 : vector<1x512xf32> to vector<14x512xf32>
    %257 = arith.addf %255, %256 : vector<14x512xf32>
    %c0_99 = arith.constant 0 : index
    %c0_100 = arith.constant 0 : index
    %c0_101 = arith.constant 0 : index
    %258 = vector.load %arg19[%c0_99, %c0_100, %c0_101] : memref<1x14x512xf32, #tpu.memory_space<vmem>>, vector<1x14x512xf32>
    %259 = vector.shape_cast %258 : vector<1x14x512xf32> to vector<14x512xf32>
    %260 = vector.shape_cast %257 : vector<14x512xf32> to vector<1x14x512xf32>
    tpu.vector_store %arg19[%c0_99, %c0_100, %c0_101], %260 {strides = array<i32>} : memref<1x14x512xf32, #tpu.memory_space<vmem>>, vector<1x14x512xf32>,
    return
  }
  func.func @transform_0(%arg0: i32) -> (i32, i32, i32) {
    %c0_i32 = arith.constant 0 : i32
    %c0_i32_0 = arith.constant 0 : i32
    %c0_i32_1 = arith.constant 0 : i32
    return %arg0, %c0_i32, %c0_i32_0 : i32, i32, i32
  }
  func.func @transform_1(%arg0: i32) -> (i32, i32, i32) {
    %c0_i32 = arith.constant 0 : i32
    %c0_i32_0 = arith.constant 0 : i32
    %c0_i32_1 = arith.constant 0 : i32
    return %arg0, %c0_i32, %c0_i32_0 : i32, i32, i32
  }
  func.func @transform_2(%arg0: i32) -> (i32, i32) {
    %c0_i32 = arith.constant 0 : i32
    %c0_i32_0 = arith.constant 0 : i32
    %c0_i32_1 = arith.constant 0 : i32
    return %c0_i32, %c0_i32_0 : i32, i32
  }
  func.func @transform_3(%arg0: i32) -> (i32, i32) {
    %c0_i32 = arith.constant 0 : i32
    %c0_i32_0 = arith.constant 0 : i32
    %c0_i32_1 = arith.constant 0 : i32
    return %c0_i32, %c0_i32_0 : i32, i32
  }
  func.func @transform_4(%arg0: i32) -> (i32, i32) {
    %c0_i32 = arith.constant 0 : i32
    %c0_i32_0 = arith.constant 0 : i32
    %c0_i32_1 = arith.constant 0 : i32
    return %c0_i32, %c0_i32_0 : i32, i32
  }
  func.func @transform_5(%arg0: i32) -> (i32, i32) {
    %c0_i32 = arith.constant 0 : i32
    %c0_i32_0 = arith.constant 0 : i32
    %c0_i32_1 = arith.constant 0 : i32
    return %c0_i32, %c0_i32_0 : i32, i32
  }
  func.func @transform_6(%arg0: i32) -> (i32, i32) {
    %c0_i32 = arith.constant 0 : i32
    %c0_i32_0 = arith.constant 0 : i32
    %c0_i32_1 = arith.constant 0 : i32
    return %c0_i32, %c0_i32_0 : i32, i32
  }
  func.func @transform_7(%arg0: i32) -> (i32, i32) {
    %c0_i32 = arith.constant 0 : i32
    %c0_i32_0 = arith.constant 0 : i32
    %c0_i32_1 = arith.constant 0 : i32
    return %c0_i32, %c0_i32_0 : i32, i32
  }
  func.func @transform_8(%arg0: i32) -> (i32, i32) {
    %c0_i32 = arith.constant 0 : i32
    %c0_i32_0 = arith.constant 0 : i32
    %c0_i32_1 = arith.constant 0 : i32
    return %c0_i32, %c0_i32_0 : i32, i32
  }
  func.func @transform_9(%arg0: i32) -> (i32, i32) {
    %c0_i32 = arith.constant 0 : i32
    %c0_i32_0 = arith.constant 0 : i32
    %c0_i32_1 = arith.constant 0 : i32
    return %c0_i32, %c0_i32_0 : i32, i32
  }
  func.func @transform_10(%arg0: i32) -> (i32, i32) {
    %c0_i32 = arith.constant 0 : i32
    %c0_i32_0 = arith.constant 0 : i32
    %c0_i32_1 = arith.constant 0 : i32
    return %c0_i32, %c0_i32_0 : i32, i32
  }
  func.func @transform_11(%arg0: i32) -> (i32, i32) {
    %c0_i32 = arith.constant 0 : i32
    %c0_i32_0 = arith.constant 0 : i32
    %c0_i32_1 = arith.constant 0 : i32
    return %c0_i32, %c0_i32_0 : i32, i32
  }
  func.func @transform_12(%arg0: i32) -> (i32, i32) {
    %c0_i32 = arith.constant 0 : i32
    %c0_i32_0 = arith.constant 0 : i32
    %c0_i32_1 = arith.constant 0 : i32
    return %c0_i32, %c0_i32_0 : i32, i32
  }
  func.func @transform_13(%arg0: i32) -> (i32, i32) {
    %c0_i32 = arith.constant 0 : i32
    %c0_i32_0 = arith.constant 0 : i32
    %c0_i32_1 = arith.constant 0 : i32
    return %c0_i32, %c0_i32_0 : i32, i32
  }
  func.func @transform_14(%arg0: i32) -> (i32, i32) {
    %c0_i32 = arith.constant 0 : i32
    %c0_i32_0 = arith.constant 0 : i32
    %c0_i32_1 = arith.constant 0 : i32
    return %c0_i32, %c0_i32_0 : i32, i32
  }
  func.func @transform_15(%arg0: i32) -> (i32, i32) {
    %c0_i32 = arith.constant 0 : i32
    %c0_i32_0 = arith.constant 0 : i32
    %c0_i32_1 = arith.constant 0 : i32
    return %c0_i32, %c0_i32_0 : i32, i32
  }
  func.func @transform_16(%arg0: i32) -> (i32, i32) {
    %c0_i32 = arith.constant 0 : i32
    %c0_i32_0 = arith.constant 0 : i32
    %c0_i32_1 = arith.constant 0 : i32
    return %c0_i32, %c0_i32_0 : i32, i32
  }
  func.func @transform_17(%arg0: i32) -> (i32, i32) {
    %c0_i32 = arith.constant 0 : i32
    %c0_i32_0 = arith.constant 0 : i32
    %c0_i32_1 = arith.constant 0 : i32
    return %c0_i32, %c0_i32_0 : i32, i32
  }
  func.func @transform_18(%arg0: i32) -> (i32, i32, i32) {
    %c0_i32 = arith.constant 0 : i32
    %c0_i32_0 = arith.constant 0 : i32
    %c0_i32_1 = arith.constant 0 : i32
    return %arg0, %c0_i32, %c0_i32_0 : i32, i32, i32
  }
}

</mosaic_0001>

<bundles_post_ra>
// kernel: tpu_custom_call.1
= control target key start
LH: loop header
LB: loop body
LE: loop exit
PB: predicated region body
PF: predicated region fallthrough
CT: control target
= control target key end

     0   :  { %s13750_s0 = inlined_call_operand.vmem [shape: f32[2,14,512], index: 0, kind: input, shape index: {}]   ;;  %s13751_s1 = inlined_call_operand.vmem [shape: f32[2,1,14], index: 1, kind: input, shape index: {}]   ;;  %s13752_s2 = inlined_call_operand.hbm [shape: bf16[512,512], index: 2, kind: input, shape index: {}]   ;;  %s13753_s3 = inlined_call_operand.vmem [shape: f32[1,512], index: 3, kind: input, shape index: {}]   ;;  %s13754_s4 = inlined_call_operand.hbm [shape: bf16[512,512], index: 4, kind: input, shape index: {}]   ;;  %s13755_s5 = inlined_call_operand.vmem [shape: f32[1,512], index: 5, kind: input, shape index: {}]   ;;  %s13756_s6 = inlined_call_operand.hbm [shape: bf16[512,512], index: 6, kind: input, shape index: {}]   ;;  %s13757_s7 = inlined_call_operand.vmem [shape: f32[1,512], index: 7, kind: input, shape index: {}]   ;;  %s13758_s8 = inlined_call_operand.hbm [shape: bf16[512,512], index: 8, kind: input, shape index: {}]   ;;  %s13759_s9 = inlined_call_operand.vmem [shape: f32[1,512], index: 9, kind: input, shape index: {}]   ;;  %s13760_s10 = inlined_call_operand.hbm [shape: bf16[512,1024], index: 10, kind: input, shape index: {}]   ;;  %s13761_s11 = inlined_call_operand.vmem [shape: f32[1,1024], index: 11, kind: input, shape index: {}]   ;;  %s13762_s12 = inlined_call_operand.hbm [shape: bf16[1024,512], index: 12, kind: input, shape index: {}]   ;;  %s13763_s13 = inlined_call_operand.vmem [shape: f32[1,512], index: 13, kind: input, shape index: {}]   ;;  %s13764_s14 = inlined_call_operand.vmem [shape: f32[1,512], index: 14, kind: input, shape index: {}]   ;;  %s13765_s15 = inlined_call_operand.vmem [shape: f32[1,512], index: 15, kind: input, shape index: {}]   ;;  %s13766_s16 = inlined_call_operand.vmem [shape: f32[1,512], index: 16, kind: input, shape index: {}]   ;;  %s13767_s17 = inlined_call_operand.vmem [shape: f32[1,512], index: 17, kind: input, shape index: {}]   ;;  %s13768_s18 = inlined_call_operand.vmem [shape: f32[2,14,512], index: 18, kind: output, shape index: {}]  }
   0x1   :  { %13775 = sst [smem:[#allocation18_spill]] %s13750_s0 }
   0x2   :  { %13776 = sst [smem:[#allocation19_spill]] %s13751_s1 }
   0x3   :  { %13777 = sst [smem:[#allocation20_spill]] %s13752_s2 }
   0x4   :  { %13778 = sst [smem:[#allocation21_spill]] %s13763_s13 }
   0x5   :  { %13779 = sst [smem:[#allocation22_spill]] %s13766_s16 }
   0x6   :  { %13780 = sst [smem:[#allocation23_spill]] %s13767_s17 }
   0x7   :  { %13781 = sst [smem:[#allocation24_spill]] %s13768_s18 }
   0x8   :  { %23 = vsyncpa [#allocation4], 0 }
   0x9   :  { %24 = vsyncpa [#allocation6], 0 }
   0xa   :  { %25 = vsyncpa [#allocation9], 0 }
   0xb   :  { %26 = vsyncpa [#allocation12], 0  ;;  %s12875_s27 = smov 0  }
   0xc LB: > { %13782 = sst [smem:[#allocation17_spill]] %s12764_s27  ;;  %s12881_s28 = sadd.s32 4294967295, %s12764_s27   ;;  %s12764_s27 = sphi %s12875_s27, %s32_s27  }
   0xd   : > { %p9904_p0 = scmp.ge.s32.totalorder %s12764_s27, 1  ;;  %p451_p1 = scmp.lt.s32.totalorder %s12764_s27, 3 }
   0xe   : > { %p13771_p2 = scmp.eq.s32.totalorder %s12881_s28, 0  ;;  %s12766_s30 = smov [#allocation5]  }
   0xf   : > { %p12886_p3 = pnand %p9904_p0, %p451_p1  ;;  %s479_s0 = sshll.u32 %s12766_s30, 4  ;;  %s12890_s0 = int_to_ptr.vmem [resolvable:$true] %s479_s0 }
  0x10   : > { %s12767_s19 = smov [#allocation8]   ;;  %s12768_s21 = smov [#allocation3]  }
  0x11   : > { %s13783_s29 = scalar_select %p12886_p3, 1, 0 }
  0x12   : > { %p11283_p4 = pneg %p12886_p3  ;;  %s511_s1 = sshll.u32 %s12767_s19, 4  ;;  %s12894_s1 = int_to_ptr.vmem [resolvable:$true] %s511_s1 }
  0x13   : > { %s463_s22 = sshll.u32 %s12768_s21, 4  ;;  %s12769_s2 = smov [#allocation7]   ;;  %s12902_s22 = int_to_ptr.vmem [resolvable:$true] %s463_s22 }
  0x14   : > { %p12898_p5 = pnand %p13771_p2, %p11283_p4  ;;  %s12904_s23 = sshll.u32 %s12769_s2, 4  ;;  %s496_s23 = int_to_ptr.vmem [resolvable:$true] %s12904_s23 }
  0x15   : > { %s12574_s26 = scalar_lea.hbm %s13754_s4, 16384 }
  0x16   : > { %p12575_p6 = scmp.ne.s32.totalorder %s13754_s4, %s12574_s26  ;;  %p12914_p7 = pneg %p12898_p5 }
  0x17   : > { %p12581_p10 = scmp.lt.u32.totalorder %s12574_s26, %s13754_s4 }
  0x18   : > { %p12577_p8 = pnand %p12914_p7, %p12575_p6 }
  0x1a   : > { %p12578_p9 = pneg %p12577_p8 }
  0x1c   : > { %p12583_p11 = pnand %p12581_p10, %p12578_p9 }
  0x1e   : > { %12586 = shalt.err (!%p12583_p11)
}
  0x1f   : > { %s12587_s24 = scalar_lea.vmem %s12890_s0, 16384  ;;  %p12595_p1 = scmp.lt.s32.totalorder %s12890_s0, %s12890_s0 }
  0x20   : > { %p12588_p12 = scmp.ne.s32.totalorder %s12890_s0, %s12587_s24  ;;  %p12596_p4 = scmp.lt.s32.totalorder %s12587_s24, %s12587_s24 }
  0x22   : > { %p12590_p13 = pnand %p12588_p12, %p12914_p7  ;;  %p12597_p6 = por %p12596_p4, %p12595_p1 }
  0x24   : > { %p12591_p0 = pneg %p12590_p13 }
  0x26   : > { %p12598_p8 = pnand %p12597_p6, %p12591_p0 }
  0x28   : > { %12601 = shalt.err (!%p12598_p8)
}
  0x29   : > { %s13773_s25 = smov 256   ;;  %s13774_s26 = smov 16  }
  0x2a   : > { %11289 = dma.hbm_to_vmem [thread:$0]  (!%p12898_p5), %s13754_s4, 16384, %s12890_s0, [#allocation6], %s13773_s25, %s13773_s25, %s13774_s26  }
  0x2b   : > { %s12602_s24 = scalar_lea.hbm %s13758_s8, 16384 }
  0x2c   : > { %p12603_p9 = scmp.ne.s32.totalorder %s13758_s8, %s12602_s24  ;;  %p12609_p12 = scmp.lt.u32.totalorder %s12602_s24, %s13758_s8 }
  0x2e   : > { %p12605_p10 = pnand %p12603_p9, %p12914_p7 }
  0x30   : > { %p12606_p11 = pneg %p12605_p10 }
  0x32   : > { %p12611_p13 = pnand %p12609_p12, %p12606_p11 }
  0x34   : > { %12614 = shalt.err (!%p12611_p13)
}
  0x35   : > { %s12615_s0 = scalar_lea.vmem %s12894_s1, 16384  ;;  %p12623_p6 = scmp.lt.s32.totalorder %s12894_s1, %s12894_s1 }
  0x36   : > { %p12616_p0 = scmp.ne.s32.totalorder %s12894_s1, %s12615_s0  ;;  %p12624_p8 = scmp.lt.s32.totalorder %s12615_s0, %s12615_s0 }
  0x38   : > { %p12618_p1 = pnand %p12616_p0, %p12914_p7  ;;  %p12625_p9 = por %p12624_p8, %p12623_p6 }
  0x3a   : > { %p12619_p4 = pneg %p12618_p1 }
  0x3c   : > { %p12626_p10 = pnand %p12625_p9, %p12619_p4 }
  0x3e   : > { %12629 = shalt.err (!%p12626_p10)
}
  0x3f   : > { %11295 = dma.hbm_to_vmem [thread:$0]  (!%p12898_p5), %s13758_s8, 16384, %s12894_s1, [#allocation9], %s13773_s25, %s13773_s25, %s13774_s26  }
  0x40   : > { %s13786_s30 = sld [smem:[#allocation20_spill]] }
  0x46   : > { %s12630_s19 = scalar_lea.hbm %s13786_s30, 16384 }
  0x47   : > { %p12631_p11 = scmp.ne.s32.totalorder %s13786_s30, %s12630_s19  ;;  %p12637_p0 = scmp.lt.u32.totalorder %s12630_s19, %s13786_s30 }
  0x49   : > { %p12633_p12 = pnand %p12631_p11, %p12914_p7 }
  0x4b   : > { %p12634_p13 = pneg %p12633_p12 }
  0x4d   : > { %p12639_p1 = pnand %p12637_p0, %p12634_p13 }
  0x4f   : > { %12642 = shalt.err (!%p12639_p1)
}
  0x50   : > { %s12643_s1 = scalar_lea.vmem %s12902_s22, 16384  ;;  %p12651_p9 = scmp.lt.s32.totalorder %s12902_s22, %s12902_s22 }
  0x51   : > { %p12644_p4 = scmp.ne.s32.totalorder %s12902_s22, %s12643_s1  ;;  %p12652_p10 = scmp.lt.s32.totalorder %s12643_s1, %s12643_s1 }
  0x53   : > { %p12646_p6 = pnand %p12644_p4, %p12914_p7  ;;  %p12653_p11 = por %p12652_p10, %p12651_p9 }
  0x55   : > { %p12647_p8 = pneg %p12646_p6 }
  0x57   : > { %p12654_p12 = pnand %p12653_p11, %p12647_p8 }
  0x59   : > { %12657 = shalt.err (!%p12654_p12)
}
  0x5a   : > { %11286 = dma.hbm_to_vmem [thread:$0]  (!%p12898_p5), %s13786_s30, 16384, %s12902_s22, [#allocation4], %s13773_s25, %s13773_s25, %s13774_s26  }
  0x5b   : > { %s12658_s19 = scalar_lea.hbm %s13756_s6, 16384 }
  0x5c   : > { %p12659_p13 = scmp.ne.s32.totalorder %s13756_s6, %s12658_s19  ;;  %p12665_p4 = scmp.lt.u32.totalorder %s12658_s19, %s13756_s6 }
  0x5e   : > { %p12661_p0 = pnand %p12659_p13, %p12914_p7 }
  0x60   : > { %p12662_p1 = pneg %p12661_p0 }
  0x62   : > { %p12667_p6 = pnand %p12665_p4, %p12662_p1 }
  0x64   : > { %12670 = shalt.err (!%p12667_p6)
}
  0x65   : > { %s12671_s1 = scalar_lea.vmem %s496_s23, 16384  ;;  %p12679_p11 = scmp.lt.s32.totalorder %s496_s23, %s496_s23 }
  0x66   : > { %p12672_p8 = scmp.ne.s32.totalorder %s496_s23, %s12671_s1  ;;  %p12680_p12 = scmp.lt.s32.totalorder %s12671_s1, %s12671_s1 }
  0x68   : > { %p12674_p9 = pnand %p12672_p8, %p12914_p7  ;;  %p12681_p2 = por %p12680_p12, %p12679_p11 }
  0x6a   : > { %p12675_p10 = pneg %p12674_p9 }
  0x6c   : > { %p12682_p3 = pnand %p12681_p2, %p12675_p10 }
  0x6e   : > { %12685 = shalt.err (!%p12682_p3)
}
  0x6f   : > { %11292 = dma.hbm_to_vmem [thread:$0]  (!%p12898_p5), %s13756_s6, 16384, %s496_s23, [#allocation6], %s13773_s25, %s13773_s25, %s13774_s26  }
  0x70   : > { %s12772_s16 = smov [#allocation10]   ;;  %s12686_s21 = scalar_lea.hbm %s13760_s10, 32768 }
  0x71   : > { %s527_s17 = sshll.u32 %s12772_s16, 4  ;;  %p12687_p2 = scmp.ne.s32.totalorder %s13760_s10, %s12686_s21  ;;  %s528_s17 = int_to_ptr.vmem [resolvable:$true] %s527_s17 }
  0x72   : > { %p12693_p0 = scmp.lt.u32.totalorder %s12686_s21, %s13760_s10 }
  0x73   : > { %p12689_p3 = pnand %p12687_p2, %p12914_p7 }
  0x75   : > { %p12690_p13 = pneg %p12689_p3 }
  0x77   : > { %p12695_p1 = pnand %p12693_p0, %p12690_p13 }
  0x79   : > { %12698 = shalt.err (!%p12695_p1)
}
  0x7a   : > { %s12699_s23 = scalar_lea.vmem %s528_s17, 32768  ;;  %p12707_p9 = scmp.lt.s32.totalorder %s528_s17, %s528_s17 }
  0x7b   : > { %p12700_p4 = scmp.ne.s32.totalorder %s528_s17, %s12699_s23  ;;  %p12708_p10 = scmp.lt.s32.totalorder %s12699_s23, %s12699_s23 }
  0x7d   : > { %p12702_p6 = pnand %p12700_p4, %p12914_p7  ;;  %p12709_p11 = por %p12708_p10, %p12707_p9 }
  0x7f   : > { %p12703_p8 = pneg %p12702_p6 }
  0x81   : > { %p12710_p12 = pnand %p12709_p11, %p12703_p8 }
  0x83   : > { %12713 = shalt.err (!%p12710_p12)
}
  0x84   : > { %s12773_s22 = smov 512   ;;  %s12774_s13 = smov 32  }
  0x85   : > { %11298 = dma.hbm_to_vmem [thread:$0]  (!%p12898_p5), %s13760_s10, 32768, %s528_s17, [#allocation9], %s12773_s22, %s12773_s22, %s12774_s13  }
  0x86   : > { %s12775_s19 = smov [#allocation11]   ;;  %s12714_s0 = scalar_lea.hbm %s13762_s12, 32768 }
  0x87   : > { %s543_s21 = sshll.u32 %s12775_s19, 4  ;;  %p12715_p2 = scmp.ne.s32.totalorder %s13762_s12, %s12714_s0  ;;  %s544_s21 = int_to_ptr.vmem [resolvable:$true] %s543_s21 }
  0x88   : > { %p12721_p0 = scmp.lt.u32.totalorder %s12714_s0, %s13762_s12 }
  0x89   : > { %p12717_p3 = pnand %p12715_p2, %p12914_p7 }
  0x8b   : > { %p12718_p13 = pneg %p12717_p3 }
  0x8d   : > { %p12723_p1 = pnand %p12721_p0, %p12718_p13 }
  0x8f   : > { %12726 = shalt.err (!%p12723_p1)
}
  0x90   : > { %s12727_s17 = scalar_lea.vmem %s544_s21, 32768  ;;  %p12735_p9 = scmp.lt.s32.totalorder %s544_s21, %s544_s21 }
  0x91   : > { %p12728_p4 = scmp.ne.s32.totalorder %s544_s21, %s12727_s17  ;;  %p12736_p10 = scmp.lt.s32.totalorder %s12727_s17, %s12727_s17 }
  0x93   : > { %p12730_p6 = pnand %p12728_p4, %p12914_p7  ;;  %p12737_p11 = por %p12736_p10, %p12735_p9 }
  0x95   : > { %p12731_p8 = pneg %p12730_p6 }
  0x97   : > { %p12738_p12 = pnand %p12737_p11, %p12731_p8 }
  0x99   : > { %12741 = shalt.err (!%p12738_p12)
}
  0x9a   : > { %s13787_s22 = smov 16   ;;  %s13788_s13 = smov 256  }
  0x9b   : > { %11301 = dma.hbm_to_vmem [thread:$0]  (!%p12898_p5), %s13762_s12, 32768, %s544_s21, [#allocation12], %s13788_s13, %s13788_s13, %s13787_s22  }
  0x9c   : > { %p13789_p2 = scmp.ne.s32.totalorder %s13783_s29, 0 }
  0x9d   : > { %p13790_p7 = scmp.eq.s32.totalorder (!%p13789_p2), %s12881_s28, 0 }
  0x9e   : > { %588 = sbr.rel (%p13789_p2) target bundleno = 3311 (0xcef), region = 92 }
  0xa5   : > { %12747 = dma.done.wait (%p13790_p7), [#allocation4], 16384   ;;  %p13791_p3 = pmov %p13790_p7 }
  0xa7   : > { %12749 = vsyncadd (%p13791_p3), [#allocation4], 4294950912  ;;  %p13792_p13 = pmov %p13791_p3 }
  0xa8   : > { %p13793_p0 = pmov %p13791_p3 }
  0xa9   : > { %12751 = dma.done.wait (%p13792_p13), [#allocation6], 32768  }
  0xaa   : > { %12753 = vsyncadd (%p13793_p0), [#allocation6], 4294934528  ;;  %p13794_p1 = pmov %p13793_p0 }
  0xab   : > { %p13795_p5 = pmov %p13793_p0 }
  0xac   : > { %12755 = dma.done.wait (%p13794_p1), [#allocation9], 49152  }
  0xad   : > { %12757 = vsyncadd (%p13795_p5), [#allocation9], 4294918144  ;;  %p13796_p4 = pmov %p13793_p0 }
  0xae   : > { %p13797_p6 = pmov %p13793_p0 }
  0xaf   : > { %12759 = dma.done.wait (%p13796_p4), [#allocation12], 32768  }
  0xb0   : > { %12761 = vsyncadd (%p13797_p6), [#allocation12], 4294934528  ;;  %v11336_v0 = vld [vmem:[#allocation3 + $0x4] ss:$16 sps:$4 sm:$0xff]   ;;  %v11338_v1 = vld [vmem:[#allocation3 + $0xc] ss:$16 sps:$4 sm:$0xff]  }
  0xb1   : > { %1481 = vmatprep.subr.bf16.mxu0 %v11336_v0  ;;  %v11340_v2 = vld [vmem:[#allocation3] ss:$16 sps:$4 sm:$0xff]   ;;  %v11341_v3 = vld [vmem:[#allocation3 + $0x8] ss:$16 sps:$4 sm:$0xff]   ;;  %1567 = vmatprep.subr.bf16.mxu1 %v11338_v1  ;;  %v11342_v4 = vld [vmem:[#allocation3 + $0x24] ss:$16 sps:$4 sm:$0xff]  }
  0xb2   : > { %1482 = vmatpush1.bf16.msra.mxu0 %v11340_v2  ;;  %1568 = vmatpush1.bf16.msra.mxu1 %v11341_v3  ;;  %v11344_v5 = vld [vmem:[#allocation3 + $0x2c] ss:$16 sps:$4 sm:$0xff]   ;;  %v11346_v6 = vld [vmem:[#allocation3 + $0x20] ss:$16 sps:$4 sm:$0xff]   ;;  %v11347_v7 = vld [vmem:[#allocation3 + $0x28] ss:$16 sps:$4 sm:$0xff]  }
  0xb3   : > { %1483 = vmatprep.subr.bf16.mxu0 %v11342_v4  ;;  %1569 = vmatprep.subr.bf16.mxu1 %v11344_v5  ;;  %v11348_v8 = vld [vmem:[#allocation3 + $0x44] ss:$16 sps:$4 sm:$0xff]   ;;  %v11350_v9 = vld [vmem:[#allocation3 + $0x4c] ss:$16 sps:$4 sm:$0xff]   ;;  %v11352_v10 = vld [vmem:[#allocation3 + $0x40] ss:$16 sps:$4 sm:$0xff]  }
  0xb4   : > { %v11353_v11 = vld [vmem:[#allocation3 + $0x48] ss:$16 sps:$4 sm:$0xff]   ;;  %v11354_v12 = vld [vmem:[#allocation3 + $0x64] ss:$16 sps:$4 sm:$0xff]   ;;  %v11356_v13 = vld [vmem:[#allocation3 + $0x6c] ss:$16 sps:$4 sm:$0xff]  }
  0xb5   : > { %v11358_v14 = vld [vmem:[#allocation3 + $0x60] ss:$16 sps:$4 sm:$0xff]   ;;  %v11359_v15 = vld [vmem:[#allocation3 + $0x68] ss:$16 sps:$4 sm:$0xff]   ;;  %v11360_v16 = vld [vmem:[#allocation3 + $0x84] ss:$16 sps:$4 sm:$0xff]  }
  0xb6   : > { %1484 = vmatpush1.bf16.msra.mxu0 %v11346_v6  ;;  %1570 = vmatpush1.bf16.msra.mxu1 %v11347_v7  ;;  %v11362_v17 = vld [vmem:[#allocation3 + $0x8c] ss:$16 sps:$4 sm:$0xff]   ;;  %v11364_v18 = vld [vmem:[#allocation3 + $0x80] ss:$16 sps:$4 sm:$0xff]   ;;  %v11365_v19 = vld [vmem:[#allocation3 + $0x88] ss:$16 sps:$4 sm:$0xff]  }
  0xb7   : > { %1485 = vmatprep.subr.bf16.mxu0 %v11348_v8  ;;  %1571 = vmatprep.subr.bf16.mxu1 %v11350_v9  ;;  %v11366_v20 = vld [vmem:[#allocation3 + $0xa4] ss:$16 sps:$4 sm:$0xff]   ;;  %v11368_v21 = vld [vmem:[#allocation3 + $0xac] ss:$16 sps:$4 sm:$0xff]   ;;  %v11370_v22 = vld [vmem:[#allocation3 + $0xa0] ss:$16 sps:$4 sm:$0xff]  }
  0xb8   : > { %v11371_v23 = vld [vmem:[#allocation3 + $0xa8] ss:$16 sps:$4 sm:$0xff]   ;;  %v11372_v24 = vld [vmem:[#allocation3 + $0xc4] ss:$16 sps:$4 sm:$0xff]   ;;  %v11374_v25 = vld [vmem:[#allocation3 + $0xcc] ss:$16 sps:$4 sm:$0xff]  }
  0xb9   : > { %v11376_v26 = vld [vmem:[#allocation3 + $0xc0] ss:$16 sps:$4 sm:$0xff]   ;;  %v11377_v27 = vld [vmem:[#allocation3 + $0xc8] ss:$16 sps:$4 sm:$0xff]   ;;  %v11378_v28 = vld [vmem:[#allocation3 + $0xe4] ss:$16 sps:$4 sm:$0xff]  }
  0xba   : > { %1486 = vmatpush1.bf16.msra.mxu0 %v11352_v10  ;;  %1572 = vmatpush1.bf16.msra.mxu1 %v11353_v11  ;;  %v11380_v29 = vld [vmem:[#allocation3 + $0xec] ss:$16 sps:$4 sm:$0xff]   ;;  %v11382_v30 = vld [vmem:[#allocation3 + $0xe0] ss:$16 sps:$4 sm:$0xff]   ;;  %v11383_v31 = vld [vmem:[#allocation3 + $0xe8] ss:$16 sps:$4 sm:$0xff]  }
  0xbb   : > { %1487 = vmatprep.subr.bf16.mxu0 %v11354_v12  ;;  %1573 = vmatprep.subr.bf16.mxu1 %v11356_v13  ;;  %v11384_v32 = vld [vmem:[#allocation3 + $0x104] ss:$16 sps:$4 sm:$0xff]   ;;  %p665_p8 = scmp.lt.s32.totalorder %s12881_s28, 1  ;;  %v11386_v33 = vld [vmem:[#allocation3 + $0x10c] ss:$16 sps:$4 sm:$0xff]   ;;  %s13798_s16 = sld [smem:[#allocation18_spill]] }
  0xbc   : > { %v11388_v34 = vld [vmem:[#allocation3 + $0x100] ss:$16 sps:$4 sm:$0xff]   ;;  %v11389_v35 = vld [vmem:[#allocation3 + $0x108] ss:$16 sps:$4 sm:$0xff]   ;;  %v11390_v36 = vld [vmem:[#allocation3 + $0x124] ss:$16 sps:$4 sm:$0xff]  }
  0xbd   : > { %s13806_s28 = smov (!%p665_p8, %s12881_s28), 1  ;;  %v11392_v37 = vld [vmem:[#allocation3 + $0x12c] ss:$16 sps:$4 sm:$0xff]   ;;  %v11394_v38 = vld [vmem:[#allocation3 + $0x120] ss:$16 sps:$4 sm:$0xff]   ;;  %vm12777_vm0 = vmmov 0  }
  0xbe   : > { %1488 = vmatpush1.bf16.msra.mxu0 %v11358_v14  ;;  %1574 = vmatpush1.bf16.msra.mxu1 %v11359_v15  ;;  %v11395_v39 = vld [vmem:[#allocation3 + $0x128] ss:$16 sps:$4 sm:$0xff]   ;;  %v11396_v40 = vld [vmem:[#allocation3 + $0x144] ss:$16 sps:$4 sm:$0xff]   ;;  %s10985_s27 = sshll.u32 %s13806_s28, 6  ;;  %vm3598_vm1 = vcmask 523264  }
  0xbf   : > { %1489 = vmatprep.subr.bf16.mxu0 %v11360_v16  ;;  %1575 = vmatprep.subr.bf16.mxu1 %v11362_v17  ;;  %v11398_v41 = vld [vmem:[#allocation3 + $0x14c] ss:$16 sps:$4 sm:$0xff]   ;;  %v11400_v42 = vld [vmem:[#allocation3 + $0x140] ss:$16 sps:$4 sm:$0xff]   ;;  %v11401_v43 = vld [vmem:[#allocation3 + $0x148] ss:$16 sps:$4 sm:$0xff]  }
  0xc0   : > { %v11402_v44 = vld [vmem:[#allocation3 + $0x164] ss:$16 sps:$4 sm:$0xff]   ;;  %v11404_v45 = vld [vmem:[#allocation3 + $0x16c] ss:$16 sps:$4 sm:$0xff]   ;;  %v11406_v47 = vld [vmem:[#allocation3 + $0x160] ss:$16 sps:$4 sm:$0xff]  }
  0xc1   : > { %s13079_s18 = scalar_lea.vmem %s13798_s16, %s10985_s27  ;;  %v11407_v49 = vld [vmem:[#allocation3 + $0x168] ss:$16 sps:$4 sm:$0xff]   ;;  %v11408_v50 = vld [vmem:[#allocation3 + $0x184] ss:$16 sps:$4 sm:$0xff]   ;;  %v11410_v52 = vld [vmem:[#allocation3 + $0x18c] ss:$16 sps:$4 sm:$0xff]  }
  0xc2   : > { %1490 = vmatpush1.bf16.msra.mxu0 %v11364_v18  ;;  %1576 = vmatpush1.bf16.msra.mxu1 %v11365_v19  ;;  %v680_v46 = vld [vmem:[%s13079_s18 + $0x8] sm:$0xff]  ;;  %v11412_v53 = vld [vmem:[#allocation3 + $0x180] ss:$16 sps:$4 sm:$0xff]   ;;  %v11414_v55 = vld [vmem:[#allocation3 + $0x1a4] ss:$16 sps:$4 sm:$0xff]   ;;  %s12778_s0 = smov 64  }
  0xc3   : > { %1491 = vmatprep.subr.bf16.mxu0 %v11366_v20  ;;  %1577 = vmatprep.subr.bf16.mxu1 %v11368_v21  ;;  %v684_v48 = vld [vmem:[%s13079_s18 + $0x28] sm:$0x3f]  ;;  %v11418_v57 = vld [vmem:[#allocation3 + $0x1a0] ss:$16 sps:$4 sm:$0xff]   ;;  %v11420_v59 = vld [vmem:[#allocation3 + $0x1c4] ss:$16 sps:$4 sm:$0xff]  }
  0xc4   : > { %v13083_v51 = vpack.c.bf16 %v684_v48, %v680_v46  ;;  %v11413_v54 = vld [vmem:[#allocation3 + $0x188] ss:$16 sps:$4 sm:$0xff]   ;;  %v11416_v56 = vld [vmem:[#allocation3 + $0x1ac] ss:$16 sps:$4 sm:$0xff]   ;;  %v11424_v61 = vld [vmem:[#allocation3 + $0x1c0] ss:$16 sps:$4 sm:$0xff]  }
  0xc5   : > { %v11419_v58 = vld [vmem:[#allocation3 + $0x1a8] ss:$16 sps:$4 sm:$0xff]   ;;  %v11422_v60 = vld [vmem:[#allocation3 + $0x1cc] ss:$16 sps:$4 sm:$0xff]   ;;  %v11426_v63 = vld [vmem:[#allocation3 + $0x1e4] ss:$16 sps:$4 sm:$0xff]  }
  0xc6   : > { %1492 = vmatpush1.bf16.msra.mxu0 %v11370_v22  ;;  %1578 = vmatpush1.bf16.msra.mxu1 %v11371_v23  ;;  %v11425_v62 = vld [vmem:[#allocation3 + $0x1c8] ss:$16 sps:$4 sm:$0xff]   ;;  %v11428_v0 = vld [vmem:[#allocation3 + $0x1ec] ss:$16 sps:$4 sm:$0xff]   ;;  %v11430_v1 = vld [vmem:[#allocation3 + $0x1e0] ss:$16 sps:$4 sm:$0xff]  }
  0xc7   : > { %1493 = vmatprep.subr.bf16.mxu0 %v11372_v24  ;;  %1579 = vmatprep.subr.bf16.mxu1 %v11374_v25  ;;  %v11431_v2 = vld [vmem:[#allocation3 + $0x1e8] ss:$16 sps:$4 sm:$0xff]   ;;  %v679_v3 = vld [vmem:[%s13079_s18] sm:$0xff]  ;;  %v11437_v6 = vld [vmem:[#allocation3 + $0x20c] ss:$16 sps:$4 sm:$0xff]   ;;  %vm3674_vm2 = vcmask 1046528  }
  0xc8   : > { %1513 = vmatprep.mubr.bf16.mxu0 %v13083_v51  ;;  %1599 = vmatprep.mubr.bf16.mxu1 %v13083_v51  ;;  %v683_v4 = vld [vmem:[%s13079_s18 + $0x20] sm:$0x3f]  ;;  %v11435_v9 = vld [vmem:[#allocation3 + $0x208] ss:$16 sps:$4 sm:$0xff]   ;;  %v11443_v11 = vld [vmem:[#allocation3 + $0x22c] ss:$16 sps:$4 sm:$0xff]  }
  0xc9   : > { %v11434_v5 = vld [vmem:[#allocation3 + $0x204] ss:$16 sps:$4 sm:$0xff]   ;;  %v11432_v7 = vld [vmem:[#allocation3 + $0x200] ss:$16 sps:$4 sm:$0xff]   ;;  %v13089_v8 = vpack.c.bf16 %v683_v4, %v679_v3  ;;  %v11441_v13 = vld [vmem:[#allocation3 + $0x228] ss:$16 sps:$4 sm:$0xff]  }
  0xca   : > { %1494 = vmatpush1.bf16.msra.mxu0 %v11376_v26  ;;  %1580 = vmatpush1.bf16.msra.mxu1 %v11377_v27  ;;  %v11440_v10 = vld [vmem:[#allocation3 + $0x224] ss:$16 sps:$4 sm:$0xff]   ;;  %v11438_v12 = vld [vmem:[#allocation3 + $0x220] ss:$16 sps:$4 sm:$0xff]   ;;  %v11449_v15 = vld [vmem:[#allocation3 + $0x24c] ss:$16 sps:$4 sm:$0xff]  }
  0xcb   : > { %1495 = vmatprep.subr.bf16.mxu0 %v11378_v28  ;;  %1581 = vmatprep.subr.bf16.mxu1 %v11380_v29  ;;  %v11446_v14 = vld [vmem:[#allocation3 + $0x244] ss:$16 sps:$4 sm:$0xff]   ;;  %v11444_v16 = vld [vmem:[#allocation3 + $0x240] ss:$16 sps:$4 sm:$0xff]   ;;  %v11447_v17 = vld [vmem:[#allocation3 + $0x248] ss:$16 sps:$4 sm:$0xff]  }
  0xcc   : > { %v11452_v18 = vld [vmem:[#allocation3 + $0x264] ss:$16 sps:$4 sm:$0xff]   ;;  %v11455_v19 = vld [vmem:[#allocation3 + $0x26c] ss:$16 sps:$4 sm:$0xff]   ;;  %v11450_v20 = vld [vmem:[#allocation3 + $0x260] ss:$16 sps:$4 sm:$0xff]  }
  0xcd   : > { %v11453_v21 = vld [vmem:[#allocation3 + $0x268] ss:$16 sps:$4 sm:$0xff]   ;;  %v11458_v22 = vld [vmem:[#allocation3 + $0x284] ss:$16 sps:$4 sm:$0xff]   ;;  %v11461_v23 = vld [vmem:[#allocation3 + $0x28c] ss:$16 sps:$4 sm:$0xff]  }
  0xce   : > { %1496 = vmatpush1.bf16.msra.mxu0 %v11382_v30  ;;  %1582 = vmatpush1.bf16.msra.mxu1 %v11383_v31  ;;  %v11456_v24 = vld [vmem:[#allocation3 + $0x280] ss:$16 sps:$4 sm:$0xff]   ;;  %v11459_v25 = vld [vmem:[#allocation3 + $0x288] ss:$16 sps:$4 sm:$0xff]   ;;  %v11464_v26 = vld [vmem:[#allocation3 + $0x2a4] ss:$16 sps:$4 sm:$0xff]  }
  0xcf   : > { %1497 = vmatprep.subr.bf16.mxu0 %v11384_v32  ;;  %1583 = vmatprep.subr.bf16.mxu1 %v11386_v33  ;;  %v11467_v27 = vld [vmem:[#allocation3 + $0x2ac] ss:$16 sps:$4 sm:$0xff]   ;;  %v11462_v28 = vld [vmem:[#allocation3 + $0x2a0] ss:$16 sps:$4 sm:$0xff]   ;;  %v11465_v29 = vld [vmem:[#allocation3 + $0x2a8] ss:$16 sps:$4 sm:$0xff]  }
  0xd0   : > { %v11470_v30 = vld [vmem:[#allocation3 + $0x2c4] ss:$16 sps:$4 sm:$0xff]   ;;  %v11473_v31 = vld [vmem:[#allocation3 + $0x2cc] ss:$16 sps:$4 sm:$0xff]   ;;  %v11468_v32 = vld [vmem:[#allocation3 + $0x2c0] ss:$16 sps:$4 sm:$0xff]  }
  0xd1   : > { %v682_v33 = vld [vmem:[%s13079_s18 + $0x18] sm:$0xff]  ;;  %v11516_v4 = vld [vmem:[#allocation3 + $0x3c0] ss:$16 sps:$4 sm:$0xff]   ;;  %s13799_s13 = sld [smem:[#allocation19_spill]]  ;;  %vm3646_vm4 = vcmask 113664   ;;  %vm3650_vm5 = vcmask 111616  }
  0xd2   : > { %1498 = vmatpush1.bf16.msra.mxu0 %v11388_v34  ;;  %1584 = vmatpush1.bf16.msra.mxu1 %v11389_v35  ;;  %v686_v34 = vld [vmem:[%s13079_s18 + $0x38] sm:$0x3f]  ;;  %vm3727_vm6 = vcmask 519168   ;;  %vm3729_vm7 = vcmask 518144   ;;  %vm3869_vm8 = vcmask 1043968   ;;  %vm3871_vm9 = vcmask 1042944  }
  0xd3   : > { %1499 = vmatprep.subr.bf16.mxu0 %v11390_v36  ;;  %1585 = vmatprep.subr.bf16.mxu1 %v11392_v37  ;;  %v11471_v35 = vld [vmem:[#allocation3 + $0x2c8] ss:$16 sps:$4 sm:$0xff]   ;;  %v13095_v36 = vpack.c.bf16 %v686_v34, %v682_v33  ;;  %v11476_v37 = vld [vmem:[#allocation3 + $0x2e4] ss:$16 sps:$4 sm:$0xff]   ;;  %v11491_v46 = vld [vmem:[#allocation3 + $0x32c] ss:$16 sps:$4 sm:$0xff]  }
  0xd4   : > { %v11489_v48 = vld [vmem:[#allocation3 + $0x328] ss:$16 sps:$4 sm:$0xff]   ;;  %v11521_v3 = vld [vmem:[#allocation3 + $0x3cc] ss:$16 sps:$4 sm:$0xff]   ;;  %v11560_v34 = vld [vmem:[#allocation5 + $0xa4] ss:$16 sps:$4 sm:$0xff]  }
  0xd5   : > { %v11555_v33 = vld [vmem:[#allocation5 + $0x88] ss:$16 sps:$4 sm:$0xff]   ;;  %vm5675_vm10 = vcmask 1045504   ;;  %s13800_s1 = sld [smem:[#allocation21_spill]]  ;;  %s13801_s22 = sld [smem:[#allocation22_spill]] }
  0xd6   : > { %1500 = vmatpush1.bf16.msra.mxu0 %v11394_v38  ;;  %1586 = vmatpush1.bf16.msra.mxu1 %v11395_v39  ;;  %v11479_v38 = vld [vmem:[#allocation3 + $0x2ec] ss:$16 sps:$4 sm:$0xff]   ;;  %v11474_v39 = vld [vmem:[#allocation3 + $0x2e0] ss:$16 sps:$4 sm:$0xff]   ;;  %s13802_s26 = sld [smem:[#allocation23_spill]]  ;;  %s13803_s16 = sld [smem:[#allocation24_spill]] }
  0xd7   : > { %1501 = vmatprep.subr.bf16.mxu0 %v11396_v40  ;;  %1587 = vmatprep.subr.bf16.mxu1 %v11398_v41  ;;  %v11477_v40 = vld [vmem:[#allocation3 + $0x2e8] ss:$16 sps:$4 sm:$0xff]   ;;  %v11482_v41 = vld [vmem:[#allocation3 + $0x304] ss:$16 sps:$4 sm:$0xff]   ;;  %s672_s25 = scalar_lea.vmem %s13799_s13, %s13806_s28 }
  0xda   : > { %1502 = vmatpush1.bf16.msra.mxu0 %v11400_v42  ;;  %1588 = vmatpush1.bf16.msra.mxu1 %v11401_v43  ;;  %v11485_v42 = vld [vmem:[#allocation3 + $0x30c] ss:$16 sps:$4 sm:$0xff]   ;;  %v11480_v43 = vld [vmem:[#allocation3 + $0x300] ss:$16 sps:$4 sm:$0xff]  }
  0xdb   : > { %1503 = vmatprep.subr.bf16.mxu0 %v11402_v44  ;;  %1589 = vmatprep.subr.bf16.mxu1 %v11404_v45  ;;  %v11483_v44 = vld [vmem:[#allocation3 + $0x308] ss:$16 sps:$4 sm:$0xff]   ;;  %v11488_v45 = vld [vmem:[#allocation3 + $0x324] ss:$16 sps:$4 sm:$0xff]  }
  0xde   : > { %1504 = vmatpush1.bf16.msra.mxu0 %v11406_v47  ;;  %1590 = vmatpush1.bf16.msra.mxu1 %v11407_v49  ;;  %v11486_v47 = vld [vmem:[#allocation3 + $0x320] ss:$16 sps:$4 sm:$0xff]   ;;  %v11494_v49 = vld [vmem:[#allocation3 + $0x344] ss:$16 sps:$4 sm:$0xff]  }
  0xdf   : > { %1505 = vmatprep.subr.bf16.mxu0 %v11408_v50  ;;  %1591 = vmatprep.subr.bf16.mxu1 %v11410_v52  ;;  %v11497_v50 = vld [vmem:[#allocation3 + $0x34c] ss:$16 sps:$4 sm:$0xff]   ;;  %v11492_v52 = vld [vmem:[#allocation3 + $0x340] ss:$16 sps:$4 sm:$0xff]  }
  0xe2   : > { %1506 = vmatpush1.bf16.msra.mxu0 %v11412_v53  ;;  %1592 = vmatpush1.bf16.msra.mxu1 %v11413_v54  ;;  %v11495_v53 = vld [vmem:[#allocation3 + $0x348] ss:$16 sps:$4 sm:$0xff]   ;;  %v11500_v54 = vld [vmem:[#allocation3 + $0x364] ss:$16 sps:$4 sm:$0xff]  }
  0xe3   : > { %1507 = vmatprep.subr.bf16.mxu0 %v11414_v55  ;;  %1593 = vmatprep.subr.bf16.mxu1 %v11416_v56  ;;  %v11503_v55 = vld [vmem:[#allocation3 + $0x36c] ss:$16 sps:$4 sm:$0xff]   ;;  %v11498_v56 = vld [vmem:[#allocation3 + $0x360] ss:$16 sps:$4 sm:$0xff]  }
  0xe6   : > { %1508 = vmatpush1.bf16.msra.mxu0 %v11418_v57  ;;  %1594 = vmatpush1.bf16.msra.mxu1 %v11419_v58  ;;  %v11501_v57 = vld [vmem:[#allocation3 + $0x368] ss:$16 sps:$4 sm:$0xff]   ;;  %v11506_v58 = vld [vmem:[#allocation3 + $0x384] ss:$16 sps:$4 sm:$0xff]  }
  0xe7   : > { %1509 = vmatprep.subr.bf16.mxu0 %v11420_v59  ;;  %1595 = vmatprep.subr.bf16.mxu1 %v11422_v60  ;;  %v11509_v59 = vld [vmem:[#allocation3 + $0x38c] ss:$16 sps:$4 sm:$0xff]   ;;  %v11504_v60 = vld [vmem:[#allocation3 + $0x380] ss:$16 sps:$4 sm:$0xff]  }
  0xea   : > { %1510 = vmatpush1.bf16.msra.mxu0 %v11424_v61  ;;  %1596 = vmatpush1.bf16.msra.mxu1 %v11425_v62  ;;  %v11507_v61 = vld [vmem:[#allocation3 + $0x388] ss:$16 sps:$4 sm:$0xff]   ;;  %v11512_v62 = vld [vmem:[#allocation3 + $0x3a4] ss:$16 sps:$4 sm:$0xff]  }
  0xeb   : > { %1511 = vmatprep.subr.bf16.mxu0 %v11426_v63  ;;  %1597 = vmatprep.subr.bf16.mxu1 %v11428_v0  ;;  %v11515_v63 = vld [vmem:[#allocation3 + $0x3ac] ss:$16 sps:$4 sm:$0xff]   ;;  %v11510_v0 = vld [vmem:[#allocation3 + $0x3a0] ss:$16 sps:$4 sm:$0xff]  }
  0xee   : > { %1512 = vmatpush1.bf16.msra.mxu0 %v11430_v1  ;;  %1598 = vmatpush1.bf16.msra.mxu1 %v11431_v2  ;;  %v11513_v1 = vld [vmem:[#allocation3 + $0x3a8] ss:$16 sps:$4 sm:$0xff]   ;;  %v11518_v2 = vld [vmem:[#allocation3 + $0x3c4] ss:$16 sps:$4 sm:$0xff]  }
  0xef   : > { %1524 = vmatprep.subr.bf16.mxu0 %v11434_v5  ;;  %1610 = vmatprep.subr.bf16.mxu1 %v11437_v6  ;;  %v11519_v5 = vld [vmem:[#allocation3 + $0x3c8] ss:$16 sps:$4 sm:$0xff]   ;;  %v11524_v6 = vld [vmem:[#allocation3 + $0x3e4] ss:$16 sps:$4 sm:$0xff]  }
  0xf1   : > { %1514 = vmatmul.mubr.bf16.vlgmr.msra.gmra.mrb[0].mxu0 %v13089_v8  ;;  %1600 = vmatmul.mubr.bf16.vlgmr.msra.gmra.mrb[0].mxu1 %v13089_v8 }
  0xf2   : > { %1525 = vmatpush1.bf16.msra.mxu0 %v11432_v7  ;;  %1611 = vmatpush1.bf16.msra.mxu1 %v11435_v9  ;;  %v11527_v7 = vld [vmem:[#allocation3 + $0x3ec] ss:$16 sps:$4 sm:$0xff]   ;;  %v11522_v9 = vld [vmem:[#allocation3 + $0x3e0] ss:$16 sps:$4 sm:$0xff]  }
  0xf3   : > { %1526 = vmatprep.subr.bf16.mxu0 %v11440_v10  ;;  %1612 = vmatprep.subr.bf16.mxu1 %v11443_v11  ;;  %v11525_v10 = vld [vmem:[#allocation3 + $0x3e8] ss:$16 sps:$4 sm:$0xff]   ;;  %v681_v11 = vld [vmem:[%s13079_s18 + $0x10] sm:$0xff] }
  0xf4   : > { %1556 = vmatprep.mubr.bf16.mxu0 %v13095_v36  ;;  %1642 = vmatprep.mubr.bf16.mxu1 %v13095_v36 }
  0xf6   : > { %1527 = vmatpush1.bf16.msra.mxu0 %v11438_v12  ;;  %1613 = vmatpush1.bf16.msra.mxu1 %v11441_v13  ;;  %v685_v12 = vld [vmem:[%s13079_s18 + $0x30] sm:$0x3f] }
  0xf7   : > { %1528 = vmatprep.subr.bf16.mxu0 %v11446_v14  ;;  %1614 = vmatprep.subr.bf16.mxu1 %v11449_v15  ;;  %v11530_v13 = vld [vmem:[#allocation5 + $0x4] ss:$16 sps:$4 sm:$0xff]   ;;  %v11533_v14 = vld [vmem:[#allocation5 + $0xc] ss:$16 sps:$4 sm:$0xff]   ;;  %v13101_v15 = vpack.c.bf16 %v685_v12, %v681_v11  ;;  %v11612_v11 = vld [vmem:[#allocation5 + $0x1c0] ss:$16 sps:$4 sm:$0xff]  }
  0xf8   : > { %v11615_v12 = vld [vmem:[#allocation5 + $0x1c8] ss:$16 sps:$4 sm:$0xff]  }
  0xfa   : > { %1529 = vmatpush1.bf16.msra.mxu0 %v11444_v16  ;;  %1615 = vmatpush1.bf16.msra.mxu1 %v11447_v17  ;;  %v11528_v16 = vld [vmem:[#allocation5] ss:$16 sps:$4 sm:$0xff]   ;;  %v11531_v17 = vld [vmem:[#allocation5 + $0x8] ss:$16 sps:$4 sm:$0xff]  }
  0xfb   : > { %1530 = vmatprep.subr.bf16.mxu0 %v11452_v18  ;;  %1616 = vmatprep.subr.bf16.mxu1 %v11455_v19  ;;  %v11536_v18 = vld [vmem:[#allocation5 + $0x24] ss:$16 sps:$4 sm:$0xff]   ;;  %v11539_v19 = vld [vmem:[#allocation5 + $0x2c] ss:$16 sps:$4 sm:$0xff]  }
  0xfe   : > { %1531 = vmatpush1.bf16.msra.mxu0 %v11450_v20  ;;  %1617 = vmatpush1.bf16.msra.mxu1 %v11453_v21  ;;  %v11534_v20 = vld [vmem:[#allocation5 + $0x20] ss:$16 sps:$4 sm:$0xff]   ;;  %v11537_v21 = vld [vmem:[#allocation5 + $0x28] ss:$16 sps:$4 sm:$0xff]  }
  0xff   : > { %1532 = vmatprep.subr.bf16.mxu0 %v11458_v22  ;;  %1618 = vmatprep.subr.bf16.mxu1 %v11461_v23  ;;  %v11542_v22 = vld [vmem:[#allocation5 + $0x44] ss:$16 sps:$4 sm:$0xff]   ;;  %v11545_v23 = vld [vmem:[#allocation5 + $0x4c] ss:$16 sps:$4 sm:$0xff]  }
 0x102   : > { %1533 = vmatpush1.bf16.msra.mxu0 %v11456_v24  ;;  %1619 = vmatpush1.bf16.msra.mxu1 %v11459_v25  ;;  %v11540_v24 = vld [vmem:[#allocation5 + $0x40] ss:$16 sps:$4 sm:$0xff]   ;;  %v11543_v25 = vld [vmem:[#allocation5 + $0x48] ss:$16 sps:$4 sm:$0xff]  }
 0x103   : > { %1534 = vmatprep.subr.bf16.mxu0 %v11464_v26  ;;  %1620 = vmatprep.subr.bf16.mxu1 %v11467_v27  ;;  %v11548_v26 = vld [vmem:[#allocation5 + $0x64] ss:$16 sps:$4 sm:$0xff]   ;;  %v11551_v27 = vld [vmem:[#allocation5 + $0x6c] ss:$16 sps:$4 sm:$0xff]  }
 0x106   : > { %1535 = vmatpush1.bf16.msra.mxu0 %v11462_v28  ;;  %1621 = vmatpush1.bf16.msra.mxu1 %v11465_v29  ;;  %v11546_v28 = vld [vmem:[#allocation5 + $0x60] ss:$16 sps:$4 sm:$0xff]   ;;  %v11549_v29 = vld [vmem:[#allocation5 + $0x68] ss:$16 sps:$4 sm:$0xff]  }
 0x107   : > { %1536 = vmatprep.subr.bf16.mxu0 %v11470_v30  ;;  %1622 = vmatprep.subr.bf16.mxu1 %v11473_v31  ;;  %v11554_v30 = vld [vmem:[#allocation5 + $0x84] ss:$16 sps:$4 sm:$0xff]   ;;  %v11557_v31 = vld [vmem:[#allocation5 + $0x8c] ss:$16 sps:$4 sm:$0xff]  }
 0x10a   : > { %1537 = vmatpush1.bf16.msra.mxu0 %v11468_v32  ;;  %1623 = vmatpush1.bf16.msra.mxu1 %v11471_v35  ;;  %v11552_v32 = vld [vmem:[#allocation5 + $0x80] ss:$16 sps:$4 sm:$0xff]   ;;  %v11563_v35 = vld [vmem:[#allocation5 + $0xac] ss:$16 sps:$4 sm:$0xff]  }
 0x10b   : > { %1538 = vmatprep.subr.bf16.mxu0 %v11476_v37  ;;  %1624 = vmatprep.subr.bf16.mxu1 %v11479_v38  ;;  %v11558_v37 = vld [vmem:[#allocation5 + $0xa0] ss:$16 sps:$4 sm:$0xff]   ;;  %v11561_v38 = vld [vmem:[#allocation5 + $0xa8] ss:$16 sps:$4 sm:$0xff]  }
 0x10e   : > { %1539 = vmatpush1.bf16.msra.mxu0 %v11474_v39  ;;  %1625 = vmatpush1.bf16.msra.mxu1 %v11477_v40  ;;  %v11566_v39 = vld [vmem:[#allocation5 + $0xc4] ss:$16 sps:$4 sm:$0xff]   ;;  %v11569_v40 = vld [vmem:[#allocation5 + $0xcc] ss:$16 sps:$4 sm:$0xff]  }
 0x10f   : > { %1540 = vmatprep.subr.bf16.mxu0 %v11482_v41  ;;  %1626 = vmatprep.subr.bf16.mxu1 %v11485_v42  ;;  %v11564_v41 = vld [vmem:[#allocation5 + $0xc0] ss:$16 sps:$4 sm:$0xff]   ;;  %v11567_v42 = vld [vmem:[#allocation5 + $0xc8] ss:$16 sps:$4 sm:$0xff]  }
 0x112   : > { %1541 = vmatpush1.bf16.msra.mxu0 %v11480_v43  ;;  %1627 = vmatpush1.bf16.msra.mxu1 %v11483_v44  ;;  %v11572_v43 = vld [vmem:[#allocation5 + $0xe4] ss:$16 sps:$4 sm:$0xff]   ;;  %v11575_v44 = vld [vmem:[#allocation5 + $0xec] ss:$16 sps:$4 sm:$0xff]  }
 0x113   : > { %1542 = vmatprep.subr.bf16.mxu0 %v11488_v45  ;;  %1628 = vmatprep.subr.bf16.mxu1 %v11491_v46  ;;  %v11570_v45 = vld [vmem:[#allocation5 + $0xe0] ss:$16 sps:$4 sm:$0xff]   ;;  %v11573_v46 = vld [vmem:[#allocation5 + $0xe8] ss:$16 sps:$4 sm:$0xff]  }
 0x116   : > { %1543 = vmatpush1.bf16.msra.mxu0 %v11486_v47  ;;  %1629 = vmatpush1.bf16.msra.mxu1 %v11489_v48  ;;  %v11578_v47 = vld [vmem:[#allocation5 + $0x104] ss:$16 sps:$4 sm:$0xff]   ;;  %v11581_v48 = vld [vmem:[#allocation5 + $0x10c] ss:$16 sps:$4 sm:$0xff]  }
 0x117   : > { %1544 = vmatprep.subr.bf16.mxu0 %v11494_v49  ;;  %1630 = vmatprep.subr.bf16.mxu1 %v11497_v50  ;;  %v11576_v49 = vld [vmem:[#allocation5 + $0x100] ss:$16 sps:$4 sm:$0xff]   ;;  %v11579_v50 = vld [vmem:[#allocation5 + $0x108] ss:$16 sps:$4 sm:$0xff]  }
 0x11a   : > { %1545 = vmatpush1.bf16.msra.mxu0 %v11492_v52  ;;  %1631 = vmatpush1.bf16.msra.mxu1 %v11495_v53  ;;  %v11584_v52 = vld [vmem:[#allocation5 + $0x124] ss:$16 sps:$4 sm:$0xff]   ;;  %v11587_v53 = vld [vmem:[#allocation5 + $0x12c] ss:$16 sps:$4 sm:$0xff]  }
 0x11b   : > { %1546 = vmatprep.subr.bf16.mxu0 %v11500_v54  ;;  %1632 = vmatprep.subr.bf16.mxu1 %v11503_v55  ;;  %v11582_v54 = vld [vmem:[#allocation5 + $0x120] ss:$16 sps:$4 sm:$0xff]   ;;  %v11585_v55 = vld [vmem:[#allocation5 + $0x128] ss:$16 sps:$4 sm:$0xff]  }
 0x11e   : > { %1547 = vmatpush1.bf16.msra.mxu0 %v11498_v56  ;;  %1633 = vmatpush1.bf16.msra.mxu1 %v11501_v57  ;;  %v11590_v56 = vld [vmem:[#allocation5 + $0x144] ss:$16 sps:$4 sm:$0xff]   ;;  %v11593_v57 = vld [vmem:[#allocation5 + $0x14c] ss:$16 sps:$4 sm:$0xff]  }
 0x11f   : > { %1548 = vmatprep.subr.bf16.mxu0 %v11506_v58  ;;  %1634 = vmatprep.subr.bf16.mxu1 %v11509_v59  ;;  %v11588_v58 = vld [vmem:[#allocation5 + $0x140] ss:$16 sps:$4 sm:$0xff]   ;;  %v11591_v59 = vld [vmem:[#allocation5 + $0x148] ss:$16 sps:$4 sm:$0xff]  }
 0x122   : > { %1549 = vmatpush1.bf16.msra.mxu0 %v11504_v60  ;;  %1635 = vmatpush1.bf16.msra.mxu1 %v11507_v61  ;;  %v11596_v60 = vld [vmem:[#allocation5 + $0x164] ss:$16 sps:$4 sm:$0xff]   ;;  %v11599_v61 = vld [vmem:[#allocation5 + $0x16c] ss:$16 sps:$4 sm:$0xff]  }
 0x123   : > { %1550 = vmatprep.subr.bf16.mxu0 %v11512_v62  ;;  %1636 = vmatprep.subr.bf16.mxu1 %v11515_v63  ;;  %v11594_v62 = vld [vmem:[#allocation5 + $0x160] ss:$16 sps:$4 sm:$0xff]   ;;  %v11597_v63 = vld [vmem:[#allocation5 + $0x168] ss:$16 sps:$4 sm:$0xff]  }
 0x126   : > { %1551 = vmatpush1.bf16.msra.mxu0 %v11510_v0  ;;  %1637 = vmatpush1.bf16.msra.mxu1 %v11513_v1  ;;  %v11602_v0 = vld [vmem:[#allocation5 + $0x184] ss:$16 sps:$4 sm:$0xff]   ;;  %v11605_v1 = vld [vmem:[#allocation5 + $0x18c] ss:$16 sps:$4 sm:$0xff]  }
 0x127   : > { %1552 = vmatprep.subr.bf16.mxu0 %v11518_v2  ;;  %1638 = vmatprep.subr.bf16.mxu1 %v11521_v3  ;;  %v11600_v2 = vld [vmem:[#allocation5 + $0x180] ss:$16 sps:$4 sm:$0xff]   ;;  %v11603_v3 = vld [vmem:[#allocation5 + $0x188] ss:$16 sps:$4 sm:$0xff]  }
 0x12a   : > { %1553 = vmatpush1.bf16.msra.mxu0 %v11516_v4  ;;  %1639 = vmatpush1.bf16.msra.mxu1 %v11519_v5  ;;  %v11608_v4 = vld [vmem:[#allocation5 + $0x1a4] ss:$16 sps:$4 sm:$0xff]   ;;  %v11611_v5 = vld [vmem:[#allocation5 + $0x1ac] ss:$16 sps:$4 sm:$0xff]  }
 0x12b   : > { %1554 = vmatprep.subr.bf16.mxu0 %v11524_v6  ;;  %1640 = vmatprep.subr.bf16.mxu1 %v11527_v7  ;;  %v11606_v6 = vld [vmem:[#allocation5 + $0x1a0] ss:$16 sps:$4 sm:$0xff]   ;;  %v11609_v7 = vld [vmem:[#allocation5 + $0x1a8] ss:$16 sps:$4 sm:$0xff]  }
 0x12e   : > { %1555 = vmatpush1.bf16.msra.mxu0 %v11522_v9  ;;  %1641 = vmatpush1.bf16.msra.mxu1 %v11525_v10  ;;  %v11614_v9 = vld [vmem:[#allocation5 + $0x1c4] ss:$16 sps:$4 sm:$0xff]   ;;  %v11617_v10 = vld [vmem:[#allocation5 + $0x1cc] ss:$16 sps:$4 sm:$0xff]  }
 0x12f   : > { %2447 = vmatprep.subr.bf16.mxu0 %v11530_v13  ;;  %2533 = vmatprep.subr.bf16.mxu1 %v11533_v14  ;;  %v11620_v13 = vld [vmem:[#allocation5 + $0x1e4] ss:$16 sps:$4 sm:$0xff]   ;;  %v11623_v14 = vld [vmem:[#allocation5 + $0x1ec] ss:$16 sps:$4 sm:$0xff]  }
 0x131   : > { %1557 = vmatmul.mubr.bf16.vlgmr.msra.gmra.mrb[0].mxu0 %v13101_v15  ;;  %1643 = vmatmul.mubr.bf16.vlgmr.msra.gmra.mrb[0].mxu1 %v13101_v15 }
 0x132   : > { %2448 = vmatpush1.bf16.msra.mxu0 %v11528_v16  ;;  %2534 = vmatpush1.bf16.msra.mxu1 %v11531_v17  ;;  %v11618_v16 = vld [vmem:[#allocation5 + $0x1e0] ss:$16 sps:$4 sm:$0xff]   ;;  %v11621_v17 = vld [vmem:[#allocation5 + $0x1e8] ss:$16 sps:$4 sm:$0xff]  }
 0x133   : > { %2449 = vmatprep.subr.bf16.mxu0 %v11536_v18  ;;  %2535 = vmatprep.subr.bf16.mxu1 %v11539_v19  ;;  %v11626_v18 = vld [vmem:[#allocation5 + $0x204] ss:$16 sps:$4 sm:$0xff]   ;;  %v11629_v19 = vld [vmem:[#allocation5 + $0x20c] ss:$16 sps:$4 sm:$0xff]  }
 0x134   : > { %2479 = vmatprep.mubr.bf16.mxu0 %v13083_v51  ;;  %2565 = vmatprep.mubr.bf16.mxu1 %v13083_v51 }
 0x136   : > { %2450 = vmatpush1.bf16.msra.mxu0 %v11534_v20  ;;  %2536 = vmatpush1.bf16.msra.mxu1 %v11537_v21  ;;  %v11624_v20 = vld [vmem:[#allocation5 + $0x200] ss:$16 sps:$4 sm:$0xff]   ;;  %v11627_v21 = vld [vmem:[#allocation5 + $0x208] ss:$16 sps:$4 sm:$0xff]  }
 0x137   : > { %2451 = vmatprep.subr.bf16.mxu0 %v11542_v22  ;;  %2537 = vmatprep.subr.bf16.mxu1 %v11545_v23  ;;  %v11632_v22 = vld [vmem:[#allocation5 + $0x224] ss:$16 sps:$4 sm:$0xff]   ;;  %v11635_v23 = vld [vmem:[#allocation5 + $0x22c] ss:$16 sps:$4 sm:$0xff]  }
 0x13a   : > { %2452 = vmatpush1.bf16.msra.mxu0 %v11540_v24  ;;  %2538 = vmatpush1.bf16.msra.mxu1 %v11543_v25  ;;  %v11630_v24 = vld [vmem:[#allocation5 + $0x220] ss:$16 sps:$4 sm:$0xff]   ;;  %v11633_v25 = vld [vmem:[#allocation5 + $0x228] ss:$16 sps:$4 sm:$0xff]  }
 0x13b   : > { %2453 = vmatprep.subr.bf16.mxu0 %v11548_v26  ;;  %2539 = vmatprep.subr.bf16.mxu1 %v11551_v27  ;;  %v11638_v26 = vld [vmem:[#allocation5 + $0x244] ss:$16 sps:$4 sm:$0xff]   ;;  %v11641_v27 = vld [vmem:[#allocation5 + $0x24c] ss:$16 sps:$4 sm:$0xff]  }
 0x13e   : > { %2454 = vmatpush1.bf16.msra.mxu0 %v11546_v28  ;;  %2540 = vmatpush1.bf16.msra.mxu1 %v11549_v29  ;;  %v11636_v28 = vld [vmem:[#allocation5 + $0x240] ss:$16 sps:$4 sm:$0xff]   ;;  %v11639_v29 = vld [vmem:[#allocation5 + $0x248] ss:$16 sps:$4 sm:$0xff]  }
 0x13f   : > { %2455 = vmatprep.subr.bf16.mxu0 %v11554_v30  ;;  %2541 = vmatprep.subr.bf16.mxu1 %v11557_v31  ;;  %v11644_v30 = vld [vmem:[#allocation5 + $0x264] ss:$16 sps:$4 sm:$0xff]   ;;  %v11647_v31 = vld [vmem:[#allocation5 + $0x26c] ss:$16 sps:$4 sm:$0xff]  }
 0x142   : > { %2456 = vmatpush1.bf16.msra.mxu0 %v11552_v32  ;;  %2542 = vmatpush1.bf16.msra.mxu1 %v11555_v33  ;;  %v11642_v32 = vld [vmem:[#allocation5 + $0x260] ss:$16 sps:$4 sm:$0xff]   ;;  %v11645_v33 = vld [vmem:[#allocation5 + $0x268] ss:$16 sps:$4 sm:$0xff]  }
 0x143   : > { %2457 = vmatprep.subr.bf16.mxu0 %v11560_v34  ;;  %2543 = vmatprep.subr.bf16.mxu1 %v11563_v35  ;;  %v11650_v34 = vld [vmem:[#allocation5 + $0x284] ss:$16 sps:$4 sm:$0xff]   ;;  %v11653_v35 = vld [vmem:[#allocation5 + $0x28c] ss:$16 sps:$4 sm:$0xff]  }
 0x146   : > { %2458 = vmatpush1.bf16.msra.mxu0 %v11558_v37  ;;  %2544 = vmatpush1.bf16.msra.mxu1 %v11561_v38  ;;  %v11648_v37 = vld [vmem:[#allocation5 + $0x280] ss:$16 sps:$4 sm:$0xff]   ;;  %v11651_v38 = vld [vmem:[#allocation5 + $0x288] ss:$16 sps:$4 sm:$0xff]  }
 0x147   : > { %2459 = vmatprep.subr.bf16.mxu0 %v11566_v39  ;;  %2545 = vmatprep.subr.bf16.mxu1 %v11569_v40  ;;  %v11656_v39 = vld [vmem:[#allocation5 + $0x2a4] ss:$16 sps:$4 sm:$0xff]   ;;  %v11659_v40 = vld [vmem:[#allocation5 + $0x2ac] ss:$16 sps:$4 sm:$0xff]  }
 0x14a   : > { %2460 = vmatpush1.bf16.msra.mxu0 %v11564_v41  ;;  %2546 = vmatpush1.bf16.msra.mxu1 %v11567_v42  ;;  %v11654_v41 = vld [vmem:[#allocation5 + $0x2a0] ss:$16 sps:$4 sm:$0xff]   ;;  %v11657_v42 = vld [vmem:[#allocation5 + $0x2a8] ss:$16 sps:$4 sm:$0xff]  }
 0x14b   : > { %2461 = vmatprep.subr.bf16.mxu0 %v11572_v43  ;;  %2547 = vmatprep.subr.bf16.mxu1 %v11575_v44  ;;  %v11662_v43 = vld [vmem:[#allocation5 + $0x2c4] ss:$16 sps:$4 sm:$0xff]   ;;  %v11665_v44 = vld [vmem:[#allocation5 + $0x2cc] ss:$16 sps:$4 sm:$0xff]  }
 0x14e   : > { %2462 = vmatpush1.bf16.msra.mxu0 %v11570_v45  ;;  %2548 = vmatpush1.bf16.msra.mxu1 %v11573_v46  ;;  %v11660_v45 = vld [vmem:[#allocation5 + $0x2c0] ss:$16 sps:$4 sm:$0xff]   ;;  %v11663_v46 = vld [vmem:[#allocation5 + $0x2c8] ss:$16 sps:$4 sm:$0xff]  }
 0x14f   : > { %2463 = vmatprep.subr.bf16.mxu0 %v11578_v47  ;;  %2549 = vmatprep.subr.bf16.mxu1 %v11581_v48  ;;  %v11668_v47 = vld [vmem:[#allocation5 + $0x2e4] ss:$16 sps:$4 sm:$0xff]   ;;  %v11671_v48 = vld [vmem:[#allocation5 + $0x2ec] ss:$16 sps:$4 sm:$0xff]  }
 0x152   : > { %2464 = vmatpush1.bf16.msra.mxu0 %v11576_v49  ;;  %2550 = vmatpush1.bf16.msra.mxu1 %v11579_v50  ;;  %v11666_v49 = vld [vmem:[#allocation5 + $0x2e0] ss:$16 sps:$4 sm:$0xff]   ;;  %v11669_v50 = vld [vmem:[#allocation5 + $0x2e8] ss:$16 sps:$4 sm:$0xff]  }
 0x153   : > { %2465 = vmatprep.subr.bf16.mxu0 %v11584_v52  ;;  %2551 = vmatprep.subr.bf16.mxu1 %v11587_v53  ;;  %v11674_v52 = vld [vmem:[#allocation5 + $0x304] ss:$16 sps:$4 sm:$0xff]   ;;  %v11677_v53 = vld [vmem:[#allocation5 + $0x30c] ss:$16 sps:$4 sm:$0xff]  }
 0x156   : > { %2466 = vmatpush1.bf16.msra.mxu0 %v11582_v54  ;;  %2552 = vmatpush1.bf16.msra.mxu1 %v11585_v55  ;;  %v11672_v54 = vld [vmem:[#allocation5 + $0x300] ss:$16 sps:$4 sm:$0xff]   ;;  %v11675_v55 = vld [vmem:[#allocation5 + $0x308] ss:$16 sps:$4 sm:$0xff]  }
 0x157   : > { %2467 = vmatprep.subr.bf16.mxu0 %v11590_v56  ;;  %2553 = vmatprep.subr.bf16.mxu1 %v11593_v57  ;;  %v11680_v56 = vld [vmem:[#allocation5 + $0x324] ss:$16 sps:$4 sm:$0xff]   ;;  %v11683_v57 = vld [vmem:[#allocation5 + $0x32c] ss:$16 sps:$4 sm:$0xff]  }
 0x15a   : > { %2468 = vmatpush1.bf16.msra.mxu0 %v11588_v58  ;;  %2554 = vmatpush1.bf16.msra.mxu1 %v11591_v59  ;;  %v11678_v58 = vld [vmem:[#allocation5 + $0x320] ss:$16 sps:$4 sm:$0xff]   ;;  %v11681_v59 = vld [vmem:[#allocation5 + $0x328] ss:$16 sps:$4 sm:$0xff]  }
 0x15b   : > { %2469 = vmatprep.subr.bf16.mxu0 %v11596_v60  ;;  %2555 = vmatprep.subr.bf16.mxu1 %v11599_v61  ;;  %v11686_v60 = vld [vmem:[#allocation5 + $0x344] ss:$16 sps:$4 sm:$0xff]   ;;  %v11689_v61 = vld [vmem:[#allocation5 + $0x34c] ss:$16 sps:$4 sm:$0xff]  }
 0x15e   : > { %2470 = vmatpush1.bf16.msra.mxu0 %v11594_v62  ;;  %2556 = vmatpush1.bf16.msra.mxu1 %v11597_v63  ;;  %v11684_v62 = vld [vmem:[#allocation5 + $0x340] ss:$16 sps:$4 sm:$0xff]   ;;  %v11687_v63 = vld [vmem:[#allocation5 + $0x348] ss:$16 sps:$4 sm:$0xff]  }
 0x15f   : > { %2471 = vmatprep.subr.bf16.mxu0 %v11602_v0  ;;  %2557 = vmatprep.subr.bf16.mxu1 %v11605_v1  ;;  %v11692_v0 = vld [vmem:[#allocation5 + $0x364] ss:$16 sps:$4 sm:$0xff]   ;;  %v11695_v1 = vld [vmem:[#allocation5 + $0x36c] ss:$16 sps:$4 sm:$0xff]  }
 0x162   : > { %2472 = vmatpush1.bf16.msra.mxu0 %v11600_v2  ;;  %2558 = vmatpush1.bf16.msra.mxu1 %v11603_v3  ;;  %v11690_v2 = vld [vmem:[#allocation5 + $0x360] ss:$16 sps:$4 sm:$0xff]   ;;  %v11693_v3 = vld [vmem:[#allocation5 + $0x368] ss:$16 sps:$4 sm:$0xff]  }
 0x163   : > { %2473 = vmatprep.subr.bf16.mxu0 %v11608_v4  ;;  %2559 = vmatprep.subr.bf16.mxu1 %v11611_v5  ;;  %v11698_v4 = vld [vmem:[#allocation5 + $0x384] ss:$16 sps:$4 sm:$0xff]   ;;  %v11701_v5 = vld [vmem:[#allocation5 + $0x38c] ss:$16 sps:$4 sm:$0xff]  }
 0x166   : > { %2474 = vmatpush1.bf16.msra.mxu0 %v11606_v6  ;;  %2560 = vmatpush1.bf16.msra.mxu1 %v11609_v7  ;;  %v11696_v6 = vld [vmem:[#allocation5 + $0x380] ss:$16 sps:$4 sm:$0xff]   ;;  %v11699_v7 = vld [vmem:[#allocation5 + $0x388] ss:$16 sps:$4 sm:$0xff]  }
 0x167   : > { %2475 = vmatprep.subr.bf16.mxu0 %v11614_v9  ;;  %2561 = vmatprep.subr.bf16.mxu1 %v11617_v10  ;;  %v11704_v9 = vld [vmem:[#allocation5 + $0x3a4] ss:$16 sps:$4 sm:$0xff]   ;;  %v11707_v10 = vld [vmem:[#allocation5 + $0x3ac] ss:$16 sps:$4 sm:$0xff]  }
 0x16a   : > { %2476 = vmatpush1.bf16.msra.mxu0 %v11612_v11  ;;  %2562 = vmatpush1.bf16.msra.mxu1 %v11615_v12  ;;  %v11702_v11 = vld [vmem:[#allocation5 + $0x3a0] ss:$16 sps:$4 sm:$0xff]   ;;  %v11705_v12 = vld [vmem:[#allocation5 + $0x3a8] ss:$16 sps:$4 sm:$0xff]  }
 0x16b   : > { %2477 = vmatprep.subr.bf16.mxu0 %v11620_v13  ;;  %2563 = vmatprep.subr.bf16.mxu1 %v11623_v14  ;;  %v11710_v13 = vld [vmem:[#allocation5 + $0x3c4] ss:$16 sps:$4 sm:$0xff]   ;;  %v11713_v14 = vld [vmem:[#allocation5 + $0x3cc] ss:$16 sps:$4 sm:$0xff]  }
 0x16e   : > { %2478 = vmatpush1.bf16.msra.mxu0 %v11618_v16  ;;  %2564 = vmatpush1.bf16.msra.mxu1 %v11621_v17  ;;  %v11708_v16 = vld [vmem:[#allocation5 + $0x3c0] ss:$16 sps:$4 sm:$0xff]   ;;  %v11711_v17 = vld [vmem:[#allocation5 + $0x3c8] ss:$16 sps:$4 sm:$0xff]  }
 0x16f   : > { %2490 = vmatprep.subr.bf16.mxu0 %v11626_v18  ;;  %2576 = vmatprep.subr.bf16.mxu1 %v11629_v19  ;;  %v11716_v18 = vld [vmem:[#allocation5 + $0x3e4] ss:$16 sps:$4 sm:$0xff]   ;;  %v11719_v19 = vld [vmem:[#allocation5 + $0x3ec] ss:$16 sps:$4 sm:$0xff]  }
 0x171   : > { %2480 = vmatmul.mubr.bf16.vlgmr.msra.gmra.mrb[4].mxu0 %v13089_v8  ;;  %2566 = vmatmul.mubr.bf16.vlgmr.msra.gmra.mrb[4].mxu1 %v13089_v8 }
 0x172   : > { %2491 = vmatpush1.bf16.msra.mxu0 %v11624_v20  ;;  %2577 = vmatpush1.bf16.msra.mxu1 %v11627_v21  ;;  %v11714_v20 = vld [vmem:[#allocation5 + $0x3e0] ss:$16 sps:$4 sm:$0xff]   ;;  %v11717_v21 = vld [vmem:[#allocation5 + $0x3e8] ss:$16 sps:$4 sm:$0xff]  }
 0x173   : > { %2492 = vmatprep.subr.bf16.mxu0 %v11632_v22  ;;  %2578 = vmatprep.subr.bf16.mxu1 %v11635_v23  ;;  %v11722_v22 = vld [vmem:[#allocation7 + $0x4] ss:$16 sps:$4 sm:$0xff]   ;;  %v11720_v23 = vld [vmem:[#allocation7] ss:$16 sps:$4 sm:$0xff]  }
 0x174   : > { %2522 = vmatprep.mubr.bf16.mxu0 %v13095_v36  ;;  %2608 = vmatprep.mubr.bf16.mxu1 %v13095_v36 }
 0x176   : > { %2493 = vmatpush1.bf16.msra.mxu0 %v11630_v24  ;;  %2579 = vmatpush1.bf16.msra.mxu1 %v11633_v25  ;;  %v11725_v24 = vld [vmem:[#allocation7 + $0x24] ss:$16 sps:$4 sm:$0xff]   ;;  %v11723_v25 = vld [vmem:[#allocation7 + $0x20] ss:$16 sps:$4 sm:$0xff]  }
 0x177   : > { %2494 = vmatprep.subr.bf16.mxu0 %v11638_v26  ;;  %2580 = vmatprep.subr.bf16.mxu1 %v11641_v27  ;;  %v11728_v26 = vld [vmem:[#allocation7 + $0x44] ss:$16 sps:$4 sm:$0xff]   ;;  %v11726_v27 = vld [vmem:[#allocation7 + $0x40] ss:$16 sps:$4 sm:$0xff]  }
 0x17a   : > { %2495 = vmatpush1.bf16.msra.mxu0 %v11636_v28  ;;  %2581 = vmatpush1.bf16.msra.mxu1 %v11639_v29  ;;  %v11731_v28 = vld [vmem:[#allocation7 + $0x64] ss:$16 sps:$4 sm:$0xff]   ;;  %v11729_v29 = vld [vmem:[#allocation7 + $0x60] ss:$16 sps:$4 sm:$0xff]  }
 0x17b   : > { %2496 = vmatprep.subr.bf16.mxu0 %v11644_v30  ;;  %2582 = vmatprep.subr.bf16.mxu1 %v11647_v31  ;;  %v11734_v30 = vld [vmem:[#allocation7 + $0x84] ss:$16 sps:$4 sm:$0xff]   ;;  %v11732_v31 = vld [vmem:[#allocation7 + $0x80] ss:$16 sps:$4 sm:$0xff]  }
 0x17e   : > { %2497 = vmatpush1.bf16.msra.mxu0 %v11642_v32  ;;  %2583 = vmatpush1.bf16.msra.mxu1 %v11645_v33  ;;  %v11737_v32 = vld [vmem:[#allocation7 + $0xa4] ss:$16 sps:$4 sm:$0xff]   ;;  %v11735_v33 = vld [vmem:[#allocation7 + $0xa0] ss:$16 sps:$4 sm:$0xff]  }
 0x17f   : > { %2498 = vmatprep.subr.bf16.mxu0 %v11650_v34  ;;  %2584 = vmatprep.subr.bf16.mxu1 %v11653_v35  ;;  %v11740_v34 = vld [vmem:[#allocation7 + $0xc4] ss:$16 sps:$4 sm:$0xff]   ;;  %v11738_v35 = vld [vmem:[#allocation7 + $0xc0] ss:$16 sps:$4 sm:$0xff]  }
 0x182   : > { %2499 = vmatpush1.bf16.msra.mxu0 %v11648_v37  ;;  %2585 = vmatpush1.bf16.msra.mxu1 %v11651_v38  ;;  %v11743_v37 = vld [vmem:[#allocation7 + $0xe4] ss:$16 sps:$4 sm:$0xff]  }
 0x183   : > { %2500 = vmatprep.subr.bf16.mxu0 %v11656_v39  ;;  %2586 = vmatprep.subr.bf16.mxu1 %v11659_v40  ;;  %v11746_v38 = vld [vmem:[#allocation7 + $0x104] ss:$16 sps:$4 sm:$0xff]   ;;  %v11744_v39 = vld [vmem:[#allocation7 + $0x100] ss:$16 sps:$4 sm:$0xff]  }
 0x184   : > { %v11749_v40 = vld [vmem:[#allocation7 + $0x124] ss:$16 sps:$4 sm:$0xff]  }
 0x186   : > { %2501 = vmatpush1.bf16.msra.mxu0 %v11654_v41  ;;  %2587 = vmatpush1.bf16.msra.mxu1 %v11657_v42  ;;  %v11747_v41 = vld [vmem:[#allocation7 + $0x120] ss:$16 sps:$4 sm:$0xff]   ;;  %v11752_v42 = vld [vmem:[#allocation7 + $0x144] ss:$16 sps:$4 sm:$0xff]  }
 0x187   : > { %2502 = vmatprep.subr.bf16.mxu0 %v11662_v43  ;;  %2588 = vmatprep.subr.bf16.mxu1 %v11665_v44  ;;  %v11750_v43 = vld [vmem:[#allocation7 + $0x140] ss:$16 sps:$4 sm:$0xff]   ;;  %v11755_v44 = vld [vmem:[#allocation7 + $0x164] ss:$16 sps:$4 sm:$0xff]  }
 0x18a   : > { %2503 = vmatpush1.bf16.msra.mxu0 %v11660_v45  ;;  %2589 = vmatpush1.bf16.msra.mxu1 %v11663_v46  ;;  %v11753_v45 = vld [vmem:[#allocation7 + $0x160] ss:$16 sps:$4 sm:$0xff]   ;;  %v11758_v46 = vld [vmem:[#allocation7 + $0x184] ss:$16 sps:$4 sm:$0xff]  }
 0x18b   : > { %2504 = vmatprep.subr.bf16.mxu0 %v11668_v47  ;;  %2590 = vmatprep.subr.bf16.mxu1 %v11671_v48  ;;  %v11756_v47 = vld [vmem:[#allocation7 + $0x180] ss:$16 sps:$4 sm:$0xff]   ;;  %v11761_v48 = vld [vmem:[#allocation7 + $0x1a4] ss:$16 sps:$4 sm:$0xff]  }
 0x18e   : > { %2505 = vmatpush1.bf16.msra.mxu0 %v11666_v49  ;;  %2591 = vmatpush1.bf16.msra.mxu1 %v11669_v50  ;;  %v11759_v49 = vld [vmem:[#allocation7 + $0x1a0] ss:$16 sps:$4 sm:$0xff]   ;;  %v11764_v50 = vld [vmem:[#allocation7 + $0x1c4] ss:$16 sps:$4 sm:$0xff]  }
 0x18f   : > { %2506 = vmatprep.subr.bf16.mxu0 %v11674_v52  ;;  %2592 = vmatprep.subr.bf16.mxu1 %v11677_v53  ;;  %v11762_v52 = vld [vmem:[#allocation7 + $0x1c0] ss:$16 sps:$4 sm:$0xff]   ;;  %v11767_v53 = vld [vmem:[#allocation7 + $0x1e4] ss:$16 sps:$4 sm:$0xff]  }
 0x192   : > { %2507 = vmatpush1.bf16.msra.mxu0 %v11672_v54  ;;  %2593 = vmatpush1.bf16.msra.mxu1 %v11675_v55  ;;  %v11765_v54 = vld [vmem:[#allocation7 + $0x1e0] ss:$16 sps:$4 sm:$0xff]   ;;  %v11770_v55 = vld [vmem:[#allocation7 + $0x204] ss:$16 sps:$4 sm:$0xff]  }
 0x193   : > { %2508 = vmatprep.subr.bf16.mxu0 %v11680_v56  ;;  %2594 = vmatprep.subr.bf16.mxu1 %v11683_v57  ;;  %v11768_v56 = vld [vmem:[#allocation7 + $0x200] ss:$16 sps:$4 sm:$0xff]   ;;  %v11773_v57 = vld [vmem:[#allocation7 + $0x224] ss:$16 sps:$4 sm:$0xff]  }
 0x196   : > { %2509 = vmatpush1.bf16.msra.mxu0 %v11678_v58  ;;  %2595 = vmatpush1.bf16.msra.mxu1 %v11681_v59  ;;  %v11771_v58 = vld [vmem:[#allocation7 + $0x220] ss:$16 sps:$4 sm:$0xff]   ;;  %v11776_v59 = vld [vmem:[#allocation7 + $0x244] ss:$16 sps:$4 sm:$0xff]  }
 0x197   : > { %2510 = vmatprep.subr.bf16.mxu0 %v11686_v60  ;;  %2596 = vmatprep.subr.bf16.mxu1 %v11689_v61  ;;  %v11774_v60 = vld [vmem:[#allocation7 + $0x240] ss:$16 sps:$4 sm:$0xff]   ;;  %v11779_v61 = vld [vmem:[#allocation7 + $0x264] ss:$16 sps:$4 sm:$0xff]  }
 0x19a   : > { %2511 = vmatpush1.bf16.msra.mxu0 %v11684_v62  ;;  %2597 = vmatpush1.bf16.msra.mxu1 %v11687_v63  ;;  %v821_v62 = vlaneseq  ;;  %v11777_v63 = vld [vmem:[#allocation7 + $0x260] ss:$16 sps:$4 sm:$0xff]  }
 0x19b   : > { %2512 = vmatprep.subr.bf16.mxu0 %v11692_v0  ;;  %2598 = vmatprep.subr.bf16.mxu1 %v11695_v1  ;;  %v11782_v0 = vld [vmem:[#allocation7 + $0x284] ss:$16 sps:$4 sm:$0xff]  }
 0x19c   : > { %v13117_v1 = vshrl.u32 %v821_v62, 7  ;;  %v11830_v62 = vld [vmem:[#allocation7 + $0x8c] ss:$16 sps:$4 sm:$0xff]  }
 0x19e   : > { %2513 = vmatpush1.bf16.msra.mxu0 %v11690_v2  ;;  %2599 = vmatpush1.bf16.msra.mxu1 %v11693_v3  ;;  %v11780_v2 = vld [vmem:[#allocation7 + $0x280] ss:$16 sps:$4 sm:$0xff]   ;;  %v13120_v3 = vsub.s32 2, %v13117_v1 }
 0x19f   : > { %2514 = vmatprep.subr.bf16.mxu0 %v11698_v4  ;;  %2600 = vmatprep.subr.bf16.mxu1 %v11701_v5  ;;  %v11785_v4 = vld [vmem:[#allocation7 + $0x2a4] ss:$16 sps:$4 sm:$0xff]   ;;  %v819_v5 = vld [vmem:[%s13753_s3] sm:$0xf] }
 0x1a2   : > { %2515 = vmatpush1.bf16.msra.mxu0 %v11696_v6  ;;  %2601 = vmatpush1.bf16.msra.mxu1 %v11699_v7  ;;  %v13126_v6 = vsub.s32 3, %v13117_v1  ;;  %v13129_v7 = vsub.s32 0, %v13117_v1 }
 0x1a3   : > { %2516 = vmatprep.subr.bf16.mxu0 %v11704_v9  ;;  %2602 = vmatprep.subr.bf16.mxu1 %v11707_v10  ;;  %v13132_v9 = vsub.s32 1, %v13117_v1  ;;  %v11783_v10 = vld [vmem:[#allocation7 + $0x2a0] ss:$16 sps:$4 sm:$0xff]  }
 0x1a6   : > { %2517 = vmatpush1.bf16.msra.mxu0 %v11702_v11  ;;  %2603 = vmatpush1.bf16.msra.mxu1 %v11705_v12  ;;  %v832_v11 = vrot.slane %v819_v5, %v13120_v3  ;;  %v11788_v12 = vld [vmem:[#allocation7 + $0x2c4] ss:$16 sps:$4 sm:$0xff]  }
 0x1a7   : > { %2518 = vmatprep.subr.bf16.mxu0 %v11710_v13  ;;  %2604 = vmatprep.subr.bf16.mxu1 %v11713_v14  ;;  %v836_v13 = vrot.slane %v819_v5, %v13126_v6  ;;  %v824_v14 = vrot.slane %v819_v5, %v13129_v7 }
 0x1aa   : > { %2519 = vmatpush1.bf16.msra.mxu0 %v11708_v16  ;;  %2605 = vmatpush1.bf16.msra.mxu1 %v11711_v17 }
 0x1ab   : > { %2520 = vmatprep.subr.bf16.mxu0 %v11716_v18  ;;  %2606 = vmatprep.subr.bf16.mxu1 %v11719_v19  ;;  %v828_v18 = vrot.slane %v819_v5, %v13132_v9  ;;  %v11786_v19 = vld [vmem:[#allocation7 + $0x2c0] ss:$16 sps:$4 sm:$0xff]  }
 0x1ac   : > { %v11813_v5 = vld [vmem:[#allocation7 + $0x3e0] ss:$16 sps:$4 sm:$0xff]  }
 0x1ae   : > { %2521 = vmatpush1.bf16.msra.mxu0 %v11714_v20  ;;  %2607 = vmatpush1.bf16.msra.mxu1 %v11717_v21 }
 0x1af   : > { %3413 = vmatprep.subr.bf16.mxu0 %v11722_v22 }
 0x1b1   : > { %2523 = vmatmul.mubr.bf16.vlgmr.msra.gmra.mrb[4].mxu0 %v13101_v15  ;;  %2609 = vmatmul.mubr.bf16.vlgmr.msra.gmra.mrb[4].mxu1 %v13101_v15 }
 0x1b2   : > { %3414 = vmatpush1.bf16.msra.mxu0 %v11720_v23  ;;  %3445 = vmatprep.mubr.bf16.mxu0 %v13083_v51  ;;  %v11791_v23 = vld [vmem:[#allocation7 + $0x2e4] ss:$16 sps:$4 sm:$0xff]  }
 0x1b3   : > { %3415 = vmatprep.subr.bf16.mxu0 %v11725_v24  ;;  %3531 = vmatprep.mubr.bf16.mxu1 %v13083_v51  ;;  %v11741_v51 = vld [vmem:[#allocation7 + $0xe0] ss:$16 sps:$4 sm:$0xff]  }
 0x1b6   : > { %3416 = vmatpush1.bf16.msra.mxu0 %v11723_v25 }
 0x1b7   : > { %3417 = vmatprep.subr.bf16.mxu0 %v11728_v26 }
 0x1ba   : > { %3418 = vmatpush1.bf16.msra.mxu0 %v11726_v27 }
 0x1bb   : > { %3419 = vmatprep.subr.bf16.mxu0 %v11731_v28 }
 0x1be   : > { %3420 = vmatpush1.bf16.msra.mxu0 %v11729_v29 }
 0x1bf   : > { %3421 = vmatprep.subr.bf16.mxu0 %v11734_v30 }
 0x1c2   : > { %3422 = vmatpush1.bf16.msra.mxu0 %v11732_v31 }
 0x1c3   : > { %3423 = vmatprep.subr.bf16.mxu0 %v11737_v32 }
 0x1c6   : > { %3424 = vmatpush1.bf16.msra.mxu0 %v11735_v33 }
 0x1c7   : > { %3425 = vmatprep.subr.bf16.mxu0 %v11740_v34 }
 0x1ca   : > { %3426 = vmatpush1.bf16.msra.mxu0 %v11738_v35  ;;  %v11789_v35 = vld [vmem:[#allocation7 + $0x2e0] ss:$16 sps:$4 sm:$0xff]  }
 0x1cb   : > { %3427 = vmatprep.subr.bf16.mxu0 %v11743_v37 }
 0x1ce   : > { %3428 = vmatpush1.bf16.msra.mxu0 %v11741_v51 }
 0x1cf   : > { %3429 = vmatprep.subr.bf16.mxu0 %v11746_v38  ;;  %v11794_v38 = vld [vmem:[#allocation7 + $0x304] ss:$16 sps:$4 sm:$0xff]  }
 0x1d2   : > { %3430 = vmatpush1.bf16.msra.mxu0 %v11744_v39 }
 0x1d3   : > { %3431 = vmatprep.subr.bf16.mxu0 %v11749_v40 }
 0x1d6   : > { %3432 = vmatpush1.bf16.msra.mxu0 %v11747_v41  ;;  %v11792_v41 = vld [vmem:[#allocation7 + $0x300] ss:$16 sps:$4 sm:$0xff]  }
 0x1d7   : > { %3433 = vmatprep.subr.bf16.mxu0 %v11752_v42  ;;  %v11797_v42 = vld [vmem:[#allocation7 + $0x324] ss:$16 sps:$4 sm:$0xff]  }
 0x1da   : > { %3434 = vmatpush1.bf16.msra.mxu0 %v11750_v43  ;;  %v11795_v43 = vld [vmem:[#allocation7 + $0x320] ss:$16 sps:$4 sm:$0xff]  }
 0x1db   : > { %3435 = vmatprep.subr.bf16.mxu0 %v11755_v44  ;;  %v11800_v44 = vld [vmem:[#allocation7 + $0x344] ss:$16 sps:$4 sm:$0xff]  }
 0x1de   : > { %3436 = vmatpush1.bf16.msra.mxu0 %v11753_v45  ;;  %v11798_v45 = vld [vmem:[#allocation7 + $0x340] ss:$16 sps:$4 sm:$0xff]  }
 0x1df   : > { %3437 = vmatprep.subr.bf16.mxu0 %v11758_v46  ;;  %v11803_v46 = vld [vmem:[#allocation7 + $0x364] ss:$16 sps:$4 sm:$0xff]  }
 0x1e2   : > { %3438 = vmatpush1.bf16.msra.mxu0 %v11756_v47  ;;  %v11816_v47 = vld [vmem:[#allocation7 + $0x8] ss:$16 sps:$4 sm:$0xff]  }
 0x1e3   : > { %3439 = vmatprep.subr.bf16.mxu0 %v11761_v48  ;;  %v11818_v48 = vld [vmem:[#allocation7 + $0xc] ss:$16 sps:$4 sm:$0xff]  }
 0x1e4   : > { %3499 = vmatprep.subr.bf16.mxu1 %v11818_v48 }
 0x1e5   : > { %3500 = vmatpush1.bf16.msra.mxu1 %v11816_v47 }
 0x1e6   : > { %3440 = vmatpush1.bf16.msra.mxu0 %v11759_v49  ;;  %v11821_v49 = vld [vmem:[#allocation7 + $0x2c] ss:$16 sps:$4 sm:$0xff]  }
 0x1e7   : > { %3441 = vmatprep.subr.bf16.mxu0 %v11764_v50  ;;  %v11801_v50 = vld [vmem:[#allocation7 + $0x360] ss:$16 sps:$4 sm:$0xff]   ;;  %3501 = vmatprep.subr.bf16.mxu1 %v11821_v49 }
 0x1ea   : > { %3442 = vmatpush1.bf16.msra.mxu0 %v11762_v52  ;;  %v11806_v52 = vld [vmem:[#allocation7 + $0x384] ss:$16 sps:$4 sm:$0xff]  }
 0x1eb   : > { %3443 = vmatprep.subr.bf16.mxu0 %v11767_v53  ;;  %v11819_v53 = vld [vmem:[#allocation7 + $0x28] ss:$16 sps:$4 sm:$0xff]  }
 0x1ec   : > { %3502 = vmatpush1.bf16.msra.mxu1 %v11819_v53  ;;  %v11867_v53 = vld [vmem:[#allocation7 + $0x228] ss:$16 sps:$4 sm:$0xff]  }
 0x1ee   : > { %3444 = vmatpush1.bf16.msra.mxu0 %v11765_v54  ;;  %v11824_v54 = vld [vmem:[#allocation7 + $0x4c] ss:$16 sps:$4 sm:$0xff]  }
 0x1ef   : > { %3456 = vmatprep.subr.bf16.mxu0 %v11770_v55  ;;  %v11804_v55 = vld [vmem:[#allocation7 + $0x380] ss:$16 sps:$4 sm:$0xff]   ;;  %3503 = vmatprep.subr.bf16.mxu1 %v11824_v54  ;;  %v11869_v54 = vld [vmem:[#allocation7 + $0x22c] ss:$16 sps:$4 sm:$0xff]  }
 0x1f1   : > { %3446 = vmatmul.mubr.bf16.vlgmr.msra.gmra.mrb[8].mxu0 %v13089_v8 }
 0x1f2   : > { %3457 = vmatpush1.bf16.msra.mxu0 %v11768_v56  ;;  %3488 = vmatprep.mubr.bf16.mxu0 %v13095_v36  ;;  %v11809_v56 = vld [vmem:[#allocation7 + $0x3a4] ss:$16 sps:$4 sm:$0xff]  }
 0x1f3   : > { %3458 = vmatprep.subr.bf16.mxu0 %v11773_v57  ;;  %v11822_v57 = vld [vmem:[#allocation7 + $0x48] ss:$16 sps:$4 sm:$0xff]  }
 0x1f4   : > { %3504 = vmatpush1.bf16.msra.mxu1 %v11822_v57 }
 0x1f6   : > { %3459 = vmatpush1.bf16.msra.mxu0 %v11771_v58  ;;  %v11827_v58 = vld [vmem:[#allocation7 + $0x6c] ss:$16 sps:$4 sm:$0xff]  }
 0x1f7   : > { %3460 = vmatprep.subr.bf16.mxu0 %v11776_v59  ;;  %v11807_v59 = vld [vmem:[#allocation7 + $0x3a0] ss:$16 sps:$4 sm:$0xff]   ;;  %3505 = vmatprep.subr.bf16.mxu1 %v11827_v58 }
 0x1fa   : > { %3461 = vmatpush1.bf16.msra.mxu0 %v11774_v60  ;;  %v11812_v60 = vld [vmem:[#allocation7 + $0x3c4] ss:$16 sps:$4 sm:$0xff]  }
 0x1fb   : > { %3462 = vmatprep.subr.bf16.mxu0 %v11779_v61  ;;  %v11825_v61 = vld [vmem:[#allocation7 + $0x68] ss:$16 sps:$4 sm:$0xff]  }
 0x1fc   : > { %3506 = vmatpush1.bf16.msra.mxu1 %v11825_v61 }
 0x1fd   : > { %3507 = vmatprep.subr.bf16.mxu1 %v11830_v62 }
 0x1fe   : > { %3463 = vmatpush1.bf16.msra.mxu0 %v11777_v63  ;;  %v11810_v63 = vld [vmem:[#allocation7 + $0x3c0] ss:$16 sps:$4 sm:$0xff]  }
 0x1ff   : > { %3464 = vmatprep.subr.bf16.mxu0 %v11782_v0  ;;  %v11815_v0 = vld [vmem:[#allocation7 + $0x3e4] ss:$16 sps:$4 sm:$0xff]  }
 0x202   : > { %3465 = vmatpush1.bf16.msra.mxu0 %v11780_v2  ;;  %v11828_v2 = vld [vmem:[#allocation7 + $0x88] ss:$16 sps:$4 sm:$0xff]  }
 0x203   : > { %3466 = vmatprep.subr.bf16.mxu0 %v11785_v4  ;;  %v11833_v4 = vld [vmem:[#allocation7 + $0xac] ss:$16 sps:$4 sm:$0xff]   ;;  %3508 = vmatpush1.bf16.msra.mxu1 %v11828_v2  ;;  %v11870_v2 = vld [vmem:[#allocation7 + $0x248] ss:$16 sps:$4 sm:$0xff]  }
 0x204   : > { %v1558_v16 = vpop.f32.mrb[0].mxu0  ;;  %v1644_v17 = vpop.f32.mrb[0].mxu1  ;;  %3509 = vmatprep.subr.bf16.mxu1 %v11833_v4  ;;  %v11872_v4 = vld [vmem:[#allocation7 + $0x24c] ss:$16 sps:$4 sm:$0xff]  }
 0x205   : > { %v11135_v20 = vadd.f32 %v1644_v17, %v832_v11  ;;  %v1560_v21 = vpop.f32.mrb[1].mxu0  ;;  %v1646_v22 = vpop.f32.mrb[1].mxu1  ;;  %v11131_v27 = vadd.f32 %v1558_v16, %v824_v14  ;;  %v11837_v16 = vld [vmem:[#allocation7 + $0xe8] ss:$16 sps:$4 sm:$0xff]   ;;  %v11842_v17 = vld [vmem:[#allocation7 + $0x10c] ss:$16 sps:$4 sm:$0xff]  }
 0x206   : > { %v11136_v24 = vadd.f32 %v1646_v22, %v836_v13  ;;  %v1562_v25 = vpop.f32.mrb[2].mxu0  ;;  %v1648_v26 = vpop.f32.mrb[2].mxu1  ;;  %3467 = vmatpush1.bf16.msra.mxu0 %v11783_v10  ;;  %v11132_v32 = vadd.f32 %v1560_v21, %v828_v18  ;;  %v11831_v10 = vld [vmem:[#allocation7 + $0xa8] ss:$16 sps:$4 sm:$0xff]   ;;  %v11848_v21 = vld [vmem:[#allocation7 + $0x14c] ss:$16 sps:$4 sm:$0xff]  }
 0x207   : > { %v11133_v28 = vadd.f32 %v1562_v25, %v824_v14  ;;  %v11137_v29 = vadd.f32 %v1648_v26, %v832_v11  ;;  %v1564_v30 = vpop.f32.mrb[3].mxu0  ;;  %v1650_v31 = vpop.f32.mrb[3].mxu1  ;;  %3468 = vmatprep.subr.bf16.mxu0 %v11788_v12  ;;  %v11836_v11 = vld [vmem:[#allocation7 + $0xcc] ss:$16 sps:$4 sm:$0xff]   ;;  %v12776_v12 = vmov 0.0   ;;  %3510 = vmatpush1.bf16.msra.mxu1 %v11831_v10 }
 0x208   : > { %v11134_v33 = vadd.f32 %v1564_v30, %v828_v18  ;;  %v11138_v34 = vadd.f32 %v1650_v31, %v836_v13  ;;  %v11834_v13 = vld [vmem:[#allocation7 + $0xc8] ss:$16 sps:$4 sm:$0xff]   ;;  %3511 = vmatprep.subr.bf16.mxu1 %v11836_v11  ;;  %v11839_v14 = vld [vmem:[#allocation7 + $0xec] ss:$16 sps:$4 sm:$0xff]  }
 0x209   : > { %v13138_v37 = vpack.c.bf16 %v11133_v28, %v11131_v27  ;;  %v13140_v51 = vpack.c.bf16 %v11137_v29, %v11135_v20  ;;  %v11840_v18 = vld [vmem:[#allocation7 + $0x108] ss:$16 sps:$4 sm:$0xff]   ;;  %v11854_v25 = vld [vmem:[#allocation7 + $0x18c] ss:$16 sps:$4 sm:$0xff]  }
 0x20a   : > { %v13142_v39 = vpack.c.bf16 %v11134_v33, %v11132_v32  ;;  %v13144_v40 = vpack.c.bf16 %v11138_v34, %v11136_v24  ;;  %3469 = vmatpush1.bf16.msra.mxu0 %v11786_v19  ;;  %v11845_v19 = vld [vmem:[#allocation7 + $0x12c] ss:$16 sps:$4 sm:$0xff]   ;;  %v11843_v20 = vld [vmem:[#allocation7 + $0x128] ss:$16 sps:$4 sm:$0xff]   ;;  %v1785_v33 = vld [vmem:[%s13755_s5] sm:$0xf] }
 0x20b   : > { %3470 = vmatprep.subr.bf16.mxu0 %v11791_v23  ;;  %3512 = vmatpush1.bf16.msra.mxu1 %v11834_v13  ;;  %v11846_v22 = vld [vmem:[#allocation7 + $0x148] ss:$16 sps:$4 sm:$0xff]   ;;  %v11851_v23 = vld [vmem:[#allocation7 + $0x16c] ss:$16 sps:$4 sm:$0xff]   ;;  %v1798_v34 = vrot.slane %v1785_v33, %v13120_v3 }
 0x20c   : > { %3513 = vmatprep.subr.bf16.mxu1 %v11839_v14  ;;  %v11849_v24 = vld [vmem:[#allocation7 + $0x168] ss:$16 sps:$4 sm:$0xff]   ;;  %v11857_v27 = vld [vmem:[#allocation7 + $0x1ac] ss:$16 sps:$4 sm:$0xff]  }
 0x20d   : > { %v11852_v26 = vld [vmem:[#allocation7 + $0x188] ss:$16 sps:$4 sm:$0xff]   ;;  %v11860_v29 = vld [vmem:[#allocation7 + $0x1cc] ss:$16 sps:$4 sm:$0xff]  }
 0x20e   : > { %3471 = vmatpush1.bf16.msra.mxu0 %v11789_v35  ;;  %v11855_v28 = vld [vmem:[#allocation7 + $0x1a8] ss:$16 sps:$4 sm:$0xff]   ;;  %v11863_v32 = vld [vmem:[#allocation7 + $0x1ec] ss:$16 sps:$4 sm:$0xff]  }
 0x20f   : > { %3472 = vmatprep.subr.bf16.mxu0 %v11794_v38  ;;  %3514 = vmatpush1.bf16.msra.mxu1 %v11837_v16  ;;  %v11858_v30 = vld [vmem:[#allocation7 + $0x1c8] ss:$16 sps:$4 sm:$0xff]   ;;  %v11866_v38 = vld [vmem:[#allocation7 + $0x20c] ss:$16 sps:$4 sm:$0xff]  }
 0x210   : > { %3515 = vmatprep.subr.bf16.mxu1 %v11842_v17  ;;  %v11861_v31 = vld [vmem:[#allocation7 + $0x1e8] ss:$16 sps:$4 sm:$0xff]   ;;  %v11875_v10 = vld [vmem:[#allocation7 + $0x26c] ss:$16 sps:$4 sm:$0xff]  }
 0x211   : > { %v11864_v35 = vld [vmem:[#allocation7 + $0x208] ss:$16 sps:$4 sm:$0xff]   ;;  %v11878_v13 = vld [vmem:[#allocation7 + $0x28c] ss:$16 sps:$4 sm:$0xff]  }
 0x212   : > { %3473 = vmatpush1.bf16.msra.mxu0 %v11792_v41  ;;  %v1802_v41 = vrot.slane %v1785_v33, %v13126_v6  ;;  %v11873_v11 = vld [vmem:[#allocation7 + $0x268] ss:$16 sps:$4 sm:$0xff]   ;;  %v11881_v16 = vld [vmem:[#allocation7 + $0x2ac] ss:$16 sps:$4 sm:$0xff]  }
 0x213   : > { %3474 = vmatprep.subr.bf16.mxu0 %v11797_v42  ;;  %3516 = vmatpush1.bf16.msra.mxu1 %v11840_v18  ;;  %v1790_v42 = vrot.slane %v1785_v33, %v13129_v7  ;;  %v11876_v14 = vld [vmem:[#allocation7 + $0x288] ss:$16 sps:$4 sm:$0xff]   ;;  %v11884_v18 = vld [vmem:[#allocation7 + $0x2cc] ss:$16 sps:$4 sm:$0xff]  }
 0x214   : > { %3517 = vmatprep.subr.bf16.mxu1 %v11845_v19  ;;  %v11879_v17 = vld [vmem:[#allocation7 + $0x2a8] ss:$16 sps:$4 sm:$0xff]   ;;  %v11887_v19 = vld [vmem:[#allocation7 + $0x2ec] ss:$16 sps:$4 sm:$0xff]  }
 0x216   : > { %3475 = vmatpush1.bf16.msra.mxu0 %v11795_v43 }
 0x217   : > { %3476 = vmatprep.subr.bf16.mxu0 %v11800_v44  ;;  %3518 = vmatpush1.bf16.msra.mxu1 %v11843_v20  ;;  %v11885_v20 = vld [vmem:[#allocation7 + $0x2e8] ss:$16 sps:$4 sm:$0xff]  }
 0x218   : > { %3519 = vmatprep.subr.bf16.mxu1 %v11848_v21  ;;  %v11890_v21 = vld [vmem:[#allocation7 + $0x30c] ss:$16 sps:$4 sm:$0xff]  }
 0x21a   : > { %3477 = vmatpush1.bf16.msra.mxu0 %v11798_v45  ;;  %v1794_v45 = vrot.slane %v1785_v33, %v13132_v9  ;;  %v11908_v33 = vld [vmem:[#allocation7 + $0x3cc] ss:$16 sps:$4 sm:$0xff]  }
 0x21b   : > { %3478 = vmatprep.subr.bf16.mxu0 %v11803_v46  ;;  %3520 = vmatpush1.bf16.msra.mxu1 %v11846_v22  ;;  %v11888_v22 = vld [vmem:[#allocation7 + $0x308] ss:$16 sps:$4 sm:$0xff]  }
 0x21c   : > { %3521 = vmatprep.subr.bf16.mxu1 %v11851_v23  ;;  %v11893_v23 = vld [vmem:[#allocation7 + $0x32c] ss:$16 sps:$4 sm:$0xff]  }
 0x21e   : > { %3479 = vmatpush1.bf16.msra.mxu0 %v11801_v50 }
 0x21f   : > { %3480 = vmatprep.subr.bf16.mxu0 %v11806_v52  ;;  %3522 = vmatpush1.bf16.msra.mxu1 %v11849_v24  ;;  %v11891_v24 = vld [vmem:[#allocation7 + $0x328] ss:$16 sps:$4 sm:$0xff]  }
 0x220   : > { %3523 = vmatprep.subr.bf16.mxu1 %v11854_v25  ;;  %v11896_v25 = vld [vmem:[#allocation7 + $0x34c] ss:$16 sps:$4 sm:$0xff]  }
 0x222   : > { %3481 = vmatpush1.bf16.msra.mxu0 %v11804_v55 }
 0x223   : > { %3482 = vmatprep.subr.bf16.mxu0 %v11809_v56  ;;  %3524 = vmatpush1.bf16.msra.mxu1 %v11852_v26  ;;  %v11894_v26 = vld [vmem:[#allocation7 + $0x348] ss:$16 sps:$4 sm:$0xff]  }
 0x224   : > { %3525 = vmatprep.subr.bf16.mxu1 %v11857_v27  ;;  %v11899_v27 = vld [vmem:[#allocation7 + $0x36c] ss:$16 sps:$4 sm:$0xff]  }
 0x226   : > { %3483 = vmatpush1.bf16.msra.mxu0 %v11807_v59 }
 0x227   : > { %3484 = vmatprep.subr.bf16.mxu0 %v11812_v60  ;;  %3526 = vmatpush1.bf16.msra.mxu1 %v11855_v28  ;;  %v11897_v28 = vld [vmem:[#allocation7 + $0x368] ss:$16 sps:$4 sm:$0xff]  }
 0x228   : > { %3527 = vmatprep.subr.bf16.mxu1 %v11860_v29  ;;  %v11902_v29 = vld [vmem:[#allocation7 + $0x38c] ss:$16 sps:$4 sm:$0xff]  }
 0x22a   : > { %3485 = vmatpush1.bf16.msra.mxu0 %v11810_v63 }
 0x22b   : > { %3486 = vmatprep.subr.bf16.mxu0 %v11815_v0  ;;  %3528 = vmatpush1.bf16.msra.mxu1 %v11858_v30  ;;  %v11900_v30 = vld [vmem:[#allocation7 + $0x388] ss:$16 sps:$4 sm:$0xff]  }
 0x22c   : > { %3529 = vmatprep.subr.bf16.mxu1 %v11863_v32  ;;  %v11903_v32 = vld [vmem:[#allocation7 + $0x3a8] ss:$16 sps:$4 sm:$0xff]  }
 0x22e   : > { %3487 = vmatpush1.bf16.msra.mxu0 %v11813_v5 }
 0x22f   : > { %11035 = vmatprep.subr.bf16.mxu0 %v12776_v12  ;;  %3530 = vmatpush1.bf16.msra.mxu1 %v11861_v31  ;;  %v11905_v31 = vld [vmem:[#allocation7 + $0x3ac] ss:$16 sps:$4 sm:$0xff]  }
 0x230   : > { %3542 = vmatprep.subr.bf16.mxu1 %v11866_v38  ;;  %v11909_v38 = vld [vmem:[#allocation7 + $0x3e8] ss:$16 sps:$4 sm:$0xff]  }
 0x231   : > { %3489 = vmatmul.mubr.bf16.vlgmr.msra.gmra.mrb[8].mxu0 %v13101_v15 }
 0x232   : > { %11037 = vmatprep.mubr.msk.bf16.mxu0 %vm12777_vm0, %v12776_v12  ;;  %3532 = vmatmul.mubr.bf16.vlgmr.msra.gmra.mrb[8].mxu1 %v13089_v8 }
 0x233   : > { %3543 = vmatpush1.bf16.msra.mxu1 %v11864_v35  ;;  %3574 = vmatprep.mubr.bf16.mxu1 %v13095_v36  ;;  %v11911_v35 = vld [vmem:[#allocation7 + $0x3ec] ss:$16 sps:$4 sm:$0xff]  }
 0x234   : > { %3544 = vmatprep.subr.bf16.mxu1 %v11869_v54 }
 0x237   : > { %3545 = vmatpush1.bf16.msra.mxu1 %v11867_v53 }
 0x238   : > { %3546 = vmatprep.subr.bf16.mxu1 %v11872_v4 }
 0x23b   : > { %3547 = vmatpush1.bf16.msra.mxu1 %v11870_v2 }
 0x23c   : > { %3548 = vmatprep.subr.bf16.mxu1 %v11875_v10 }
 0x23f   : > { %3549 = vmatpush1.bf16.msra.mxu1 %v11873_v11 }
 0x240   : > { %3550 = vmatprep.subr.bf16.mxu1 %v11878_v13 }
 0x243   : > { %3551 = vmatpush1.bf16.msra.mxu1 %v11876_v14 }
 0x244   : > { %3552 = vmatprep.subr.bf16.mxu1 %v11881_v16 }
 0x247   : > { %3553 = vmatpush1.bf16.msra.mxu1 %v11879_v17 }
 0x248   : > { %3554 = vmatprep.subr.bf16.mxu1 %v11884_v18 }
 0x284   : > { %v2524_v43 = vpop.f32.mrb[4].mxu0  ;;  %v2610_v44 = vpop.f32.mrb[4].mxu1 }
 0x285   : > { %v11143_v46 = vadd.f32 %v2610_v44, %v1798_v34  ;;  %v2526_v47 = vpop.f32.mrb[5].mxu0  ;;  %v2612_v48 = vpop.f32.mrb[5].mxu1  ;;  %v11139_v55 = vadd.f32 %v2524_v43, %v1790_v42  ;;  %v13194_v43 = vld [vmem:[%s13757_s7] sm:$0xf] }
 0x286   : > { %v11144_v49 = vadd.f32 %v2612_v48, %v1802_v41  ;;  %v2528_v50 = vpop.f32.mrb[6].mxu0  ;;  %v2614_v52 = vpop.f32.mrb[6].mxu1  ;;  %v11140_v60 = vadd.f32 %v2526_v47, %v1794_v45  ;;  %v2756_v44 = vrot.slane %v13194_v43, %v13129_v7 }
 0x287   : > { %v11141_v56 = vadd.f32 %v2528_v50, %v1790_v42  ;;  %v11145_v57 = vadd.f32 %v2614_v52, %v1798_v34  ;;  %v2530_v58 = vpop.f32.mrb[7].mxu0  ;;  %v2616_v59 = vpop.f32.mrb[7].mxu1  ;;  %v11906_v34 = vld [vmem:[#allocation7 + $0x3c8] ss:$16 sps:$4 sm:$0xff]  }
 0x288   : > { %v11142_v61 = vadd.f32 %v2530_v58, %v1794_v45  ;;  %v11146_v62 = vadd.f32 %v2616_v59, %v1802_v41 }
 0x289   : > { %v13159_v8 = vpack.c.bf16 %v11145_v57, %v11143_v46  ;;  %v2619_v63 = vpack.c.bf16 %v11141_v56, %v11139_v55 }
 0x28a   : > { %v13161_v36 = vpack.c.bf16 %v11146_v62, %v11144_v49  ;;  %v13163_v0 = vpack.c.bf16 %v11142_v61, %v11140_v60 }
 0x28b   : > { %3735 = vrot.lane.b32.xlu0 %v2619_v63, %s12778_s0  ;;  %v3603_v5 = vsel %vm3598_vm1, %v2619_v63, 0  ;;  %v4144_v62 = vsel %vm3598_vm1, %v13159_v8, 0 }
 0x28c   : > { %4004 = vrot.lane.b32.xlu1 %v13163_v0, %s12778_s0  ;;  %11036 = vmatpush3.bf16.xpose.msra.mxu0 %v3603_v5  ;;  %v3877_v49 = vsel %vm3598_vm1, %v13163_v0, 0  ;;  %v4411_v0 = vsel %vm3598_vm1, %v13161_v36, 0  ;;  %v12779_v5 = vmov -1e+09  }
 0x28d   : > { %11047 = vmatprep.subr.bf16.mxu0 %v12776_v12 }
 0x28f   : > { %3732 = vrot.lane.b32.xlu0 %v13138_v37, %s12778_s0 }
 0x290   : > { %4001 = vrot.lane.b32.xlu1 %v13142_v39, %s12778_s0 }
 0x293   : > { %4271 = vrot.lane.b32.xlu0 %v13159_v8, %s12778_s0  ;;  %11038 = vmatmul.mubr.msk.bf16.vlgmr.msra.gmra.mrb[12].mxu0 %vm3598_vm1, %v13138_v37  ;;  %v11882_v37 = vld [vmem:[#allocation7 + $0x2c8] ss:$16 sps:$4 sm:$0xff]  }
 0x294   : > { %4268 = vrot.lane.b32.xlu1 %v13140_v51, %s12778_s0  ;;  %11049 = vmatprep.mubr.msk.bf16.mxu0 %vm12777_vm0, %v12776_v12 }
 0x295   : > { %3555 = vmatpush1.bf16.msra.mxu1 %v11882_v37 }
 0x296   : > { %3556 = vmatprep.subr.bf16.mxu1 %v11887_v19 }
 0x297   : > { %4538 = vrot.lane.b32.xlu0 %v13161_v36, %s12778_s0  ;;  %v3589_v36 = vld [vmem:[%s672_s25] sm:$0x1] }
 0x298   : > { %4535 = vrot.lane.b32.xlu1 %v13144_v40, %s12778_s0  ;;  %vm3590_vm3 = vcmp.gt.f32.partialorder %v3589_v36, 0.0 }
 0x299   : > { %3557 = vmatpush1.bf16.msra.mxu1 %v11885_v20  ;;  %v3591_v10 = vsel %vm3590_vm3, 0.0, %v12779_v5 }
 0x29a   : > { %3558 = vmatprep.subr.bf16.mxu1 %v11890_v21  ;;  %v13249_v11 = vrot.slane %v3591_v10, %v13129_v7 }
 0x29d   : > { %3559 = vmatpush1.bf16.msra.mxu1 %v11888_v22 }
 0x29e   : > { %3560 = vmatprep.subr.bf16.mxu1 %v11893_v23 }
 0x2a1   : > { %3561 = vmatpush1.bf16.msra.mxu1 %v11891_v24 }
 0x2a2   : > { %3562 = vmatprep.subr.bf16.mxu1 %v11896_v25 }
 0x2a5   : > { %3563 = vmatpush1.bf16.msra.mxu1 %v11894_v26 }
 0x2a6   : > { %3564 = vmatprep.subr.bf16.mxu1 %v11899_v27 }
 0x2a9   : > { %3565 = vmatpush1.bf16.msra.mxu1 %v11897_v28 }
 0x2aa   : > { %3566 = vmatprep.subr.bf16.mxu1 %v11902_v29 }
 0x2ad   : > { %3567 = vmatpush1.bf16.msra.mxu1 %v11900_v30 }
 0x2ae   : > { %3568 = vmatprep.subr.bf16.mxu1 %v11905_v31 }
 0x2b1   : > { %3569 = vmatpush1.bf16.msra.mxu1 %v11903_v32 }
 0x2b2   : > { %3570 = vmatprep.subr.bf16.mxu1 %v11908_v33 }
 0x2b5   : > { %3571 = vmatpush1.bf16.msra.mxu1 %v11906_v34 }
 0x2b6   : > { %3572 = vmatprep.subr.bf16.mxu1 %v11911_v35 }
 0x2b9   : > { %3573 = vmatpush1.bf16.msra.mxu1 %v11909_v38 }
 0x2ba   : > { %11041 = vmatprep.subr.bf16.mxu1 %v12776_v12 }
 0x2bc   : > { %3575 = vmatmul.mubr.bf16.vlgmr.msra.gmra.mrb[8].mxu1 %v13101_v15  ;;  %v2760_v15 = vrot.slane %v13194_v43, %v13132_v9 }
 0x2bd   : > { %11043 = vmatprep.mubr.msk.bf16.mxu1 %vm12777_vm0, %v12776_v12 }
 0x2fd   : > { %v3736_v41 = vpop.permute.xlu0 %3735 }
 0x2fe   : > { %v3741_v42 = vsel %vm3598_vm1, %v3736_v41, 0  ;;  %v4005_v58 = vpop.permute.xlu1 %4004 }
 0x2ff   : > { %11048 = vmatpush3.bf16.xpose.msra.mxu0 %v3741_v42  ;;  %v4010_v60 = vsel %vm3598_vm1, %v4005_v58, 0 }
 0x300   : > { %11059 = vmatprep.subr.bf16.mxu0 %v12776_v12 }
 0x301   : > { %v3733_v46 = vpop.permute.xlu0 %3732 }
 0x302   : > { %v4002_v61 = vpop.permute.xlu1 %4001 }
 0x304   : > { %v3490_v45 = vpop.f32.mrb[8].mxu0 }
 0x305   : > { %v11147_v47 = vadd.f32 %v3490_v45, %v2756_v44  ;;  %v3492_v48 = vpop.f32.mrb[9].mxu0  ;;  %v4272_v63 = vpop.permute.xlu0 %4271 }
 0x306   : > { %11050 = vmatmul.mubr.msk.bf16.vlgmr.msra.gmra.mrb[16].mxu0 %vm3598_vm1, %v3733_v46  ;;  %v11148_v50 = vadd.f32 %v3492_v48, %v2760_v15  ;;  %v3494_v52 = vpop.f32.mrb[10].mxu0  ;;  %v4269_v8 = vpop.permute.xlu1 %4268 }
 0x307   : > { %11060 = vmatpush3.bf16.xpose.msra.mxu0 %v3877_v49  ;;  %11061 = vmatprep.mubr.msk.bf16.mxu0 %vm12777_vm0, %v12776_v12  ;;  %v11149_v53 = vadd.f32 %v3494_v52, %v2756_v44  ;;  %v3496_v54 = vpop.f32.mrb[11].mxu0 }
 0x308   : > { %11071 = vmatprep.subr.bf16.mxu0 %v12776_v12  ;;  %v11150_v55 = vadd.f32 %v3496_v54, %v2760_v15 }
 0x309   : > { %v13207_v56 = vpack.c.bf16 %v11149_v53, %v11147_v47 }
 0x30a   : > { %v13209_v57 = vpack.c.bf16 %v11150_v55, %v11148_v50  ;;  %v4536_v4 = vpop.permute.xlu1 %4535 }
 0x30b   : > { %v3676_v59 = vsel %vm3674_vm2, %v13207_v56, 0 }
 0x30c   : > { %11042 = vmatpush3.bf16.msra.mxu1 %v3676_v59 }
 0x30d   : > { %11053 = vmatprep.subr.bf16.mxu1 %v12776_v12 }
 0x30e   : > { %11062 = vmatmul.mubr.msk.bf16.vlgmr.msra.gmra.mrb[20].mxu0 %vm3598_vm1, %v13142_v39  ;;  %v4277_v39 = vsel %vm3598_vm1, %v4272_v63, 0 }
 0x30f   : > { %11072 = vmatpush3.bf16.xpose.msra.mxu0 %v4010_v60  ;;  %11073 = vmatprep.mubr.msk.bf16.mxu0 %vm12777_vm0, %v12776_v12 }
 0x310   : > { %11083 = vmatprep.subr.bf16.mxu0 %v12776_v12 }
 0x316   : > { %11074 = vmatmul.mubr.msk.bf16.vlgmr.msra.gmra.mrb[24].mxu0 %vm3598_vm1, %v4002_v61 }
 0x317   : > { %11084 = vmatpush3.bf16.xpose.msra.mxu0 %v4144_v62  ;;  %11085 = vmatprep.mubr.msk.bf16.mxu0 %vm12777_vm0, %v12776_v12 }
 0x318   : > { %11095 = vmatprep.subr.bf16.mxu0 %v12776_v12 }
 0x31e   : > { %11086 = vmatmul.mubr.msk.bf16.vlgmr.msra.gmra.mrb[28].mxu0 %vm3598_vm1, %v13140_v51  ;;  %v4539_v51 = vpop.permute.xlu0 %4538 }
 0x31f   : > { %11096 = vmatpush3.bf16.xpose.msra.mxu0 %v4277_v39  ;;  %11097 = vmatprep.mubr.msk.bf16.mxu0 %vm12777_vm0, %v12776_v12  ;;  %v4544_v2 = vsel %vm3598_vm1, %v4539_v51, 0 }
 0x320   : > { %11107 = vmatprep.subr.bf16.mxu0 %v12776_v12 }
 0x326   : > { %11098 = vmatmul.mubr.msk.bf16.vlgmr.msra.gmra.mrb[32].mxu0 %vm3598_vm1, %v4269_v8 }
 0x327   : > { %11108 = vmatpush3.bf16.xpose.msra.mxu0 %v4411_v0  ;;  %11109 = vmatprep.mubr.msk.bf16.mxu0 %vm12777_vm0, %v12776_v12 }
 0x328   : > { %11119 = vmatprep.subr.bf16.mxu0 %v12776_v12 }
 0x32e   : > { %11110 = vmatmul.mubr.msk.bf16.vlgmr.msra.gmra.mrb[36].mxu0 %vm3598_vm1, %v13144_v40 }
 0x32f   : > { %11120 = vmatpush3.bf16.xpose.msra.mxu0 %v4544_v2  ;;  %11121 = vmatprep.mubr.msk.bf16.mxu0 %vm12777_vm0, %v12776_v12 }
 0x336   : > { %11122 = vmatmul.mubr.msk.bf16.vlgmr.msra.gmra.mrb[40].mxu0 %vm3598_vm1, %v4536_v4 }
 0x366   : > { %v3639_v13 = vpop.f32.mrb[12].mxu0 }
 0x367   : > { %v3640_v40 = vadd.f32 %v3639_v13, %v13249_v11  ;;  %v11039_v14 = vpop.f32.mrb[13].mxu0 }
 0x368   : > { %v3642_v16 = vpop.f32.mrb[14].mxu0 }
 0x369   : > { %v3643_v17 = vadd.f32 %v3642_v16, %v13249_v11  ;;  %v11040_v18 = vpop.f32.mrb[15].mxu0  ;;  %v3647_v37 = vsel %vm3646_vm4, %v3640_v40, -inf }
 0x36a   : > { %3648 = vmax.xlane.f32.xlu0 %v3647_v37 }
 0x36b   : > { %v3651_v19 = vsel %vm3650_vm5, %v3643_v17, -inf }
 0x36c   : > { %3652 = vmax.xlane.f32.xlu1 %v3651_v19 }
 0x3d9   : > { %v3777_v20 = vpop.f32.mrb[16].mxu0 }
 0x3da   : > { %v13256_v21 = vadd.f32 %v3777_v20, %v13249_v11  ;;  %v11051_v22 = vpop.f32.mrb[17].mxu0 }
 0x3db   : > { %v3780_v23 = vpop.f32.mrb[18].mxu0 }
 0x3dc   : > { %v13259_v24 = vadd.f32 %v3780_v23, %v13249_v11  ;;  %v11052_v25 = vpop.f32.mrb[19].mxu0  ;;  %v3784_v26 = vsel %vm3646_vm4, %v13256_v21, -inf }
 0x3dd   : > { %3785 = vmax.xlane.f32.xlu0 %v3784_v26 }
 0x3de   : > { %v3787_v27 = vsel %vm3650_vm5, %v13259_v24, -inf }
 0x3e1   : > { %3788 = vmax.xlane.f32.xlu0 %v3787_v27  ;;  %v3913_v28 = vpop.f32.mrb[20].mxu0 }
 0x3e2   : > { %v13266_v29 = vadd.f32 %v3913_v28, %v13249_v11  ;;  %v11063_v30 = vpop.f32.mrb[21].mxu0 }
 0x3e3   : > { %v3916_v31 = vpop.f32.mrb[22].mxu0 }
 0x3e4   : > { %v13269_v32 = vadd.f32 %v3916_v31, %v13249_v11  ;;  %v11064_v33 = vpop.f32.mrb[23].mxu0  ;;  %v3920_v34 = vsel %vm3646_vm4, %v13266_v29, -inf }
 0x3e5   : > { %3921 = vmax.xlane.f32.xlu1 %v3920_v34 }
 0x3e6   : > { %v3923_v35 = vsel %vm3650_vm5, %v13269_v32, -inf }
 0x3e7   : > { %3924 = vmax.xlane.f32.xlu0 %v3923_v35 }
 0x3e9   : > { %v4046_v38 = vpop.f32.mrb[24].mxu0 }
 0x3ea   : > { %v13276_v41 = vadd.f32 %v4046_v38, %v13249_v11  ;;  %v11075_v42 = vpop.f32.mrb[25].mxu0  ;;  %v2764_v38 = vrot.slane %v13194_v43, %v13120_v3 }
 0x3eb   : > { %v4049_v44 = vpop.f32.mrb[26].mxu0  ;;  %v3576_v42 = vpop.f32.mrb[8].mxu1 }
 0x3ec   : > { %v13279_v15 = vadd.f32 %v4049_v44, %v13249_v11  ;;  %v11076_v45 = vpop.f32.mrb[27].mxu0  ;;  %v4053_v46 = vsel %vm3646_vm4, %v13276_v41, -inf  ;;  %v2768_v44 = vrot.slane %v13194_v43, %v13126_v6 }
 0x3ed   : > { %4054 = vmax.xlane.f32.xlu1 %v4053_v46  ;;  %v3578_v45 = vpop.f32.mrb[9].mxu1  ;;  %v11151_v46 = vadd.f32 %v3576_v42, %v2764_v38 }
 0x3ee   : > { %v4056_v47 = vsel %vm3650_vm5, %v13279_v15, -inf }
 0x3ef   : > { %4057 = vmax.xlane.f32.xlu0 %v4056_v47  ;;  %v3580_v47 = vpop.f32.mrb[10].mxu1 }
 0x3f1   : > { %v4180_v48 = vpop.f32.mrb[28].mxu0 }
 0x3f2   : > { %v13286_v49 = vadd.f32 %v4180_v48, %v13249_v11  ;;  %v11087_v50 = vpop.f32.mrb[29].mxu0  ;;  %v11153_v48 = vadd.f32 %v3580_v47, %v2764_v38 }
 0x3f3   : > { %v4183_v52 = vpop.f32.mrb[30].mxu0  ;;  %v3582_v50 = vpop.f32.mrb[11].mxu1 }
 0x3f4   : > { %v13289_v53 = vadd.f32 %v4183_v52, %v13249_v11  ;;  %v11088_v54 = vpop.f32.mrb[31].mxu0  ;;  %v4187_v55 = vsel %vm3646_vm4, %v13286_v49, -inf  ;;  %v11154_v52 = vadd.f32 %v3582_v50, %v2768_v44 }
 0x3f5   : > { %4188 = vmax.xlane.f32.xlu1 %v4187_v55  ;;  %v13337_v54 = vpack.c.bf16 %v11153_v48, %v11151_v46 }
 0x3f6   : > { %v4190_v58 = vsel %vm3650_vm5, %v13289_v53, -inf }
 0x3f7   : > { %v3649_v59 = vpop.xlane.xlu0 %3648  ;;  %4191 = vmax.xlane.f32.xlu0 %v4190_v58 }
 0x3f8   : > { %v3654_v60 = vsub.f32 %v3640_v40, %v3649_v59 }
 0x3f9   : > { %v3653_v61 = vpop.xlane.xlu1 %3652  ;;  %v4313_v62 = vpop.f32.mrb[32].mxu0 }
 0x3fa   : > { %v3656_v63 = vmul.f32 1.442695, %v3654_v60  ;;  %v3655_v39 = vsub.f32 %v3643_v17, %v3653_v61  ;;  %v13296_v8 = vadd.f32 %v4313_v62, %v13249_v11  ;;  %v11099_v0 = vpop.f32.mrb[33].mxu0 }
 0x3fb   : > { %v4316_v51 = vpop.f32.mrb[34].mxu0 }
 0x3fc   : > { %12494 = vpow2.f32 %v3656_v63  ;;  %v3658_v2 = vmul.f32 1.442695, %v3655_v39  ;;  %v13299_v4 = vadd.f32 %v4316_v51, %v13249_v11  ;;  %v11100_v36 = vpop.f32.mrb[35].mxu0  ;;  %v4320_v5 = vsel %vm3646_vm4, %v13296_v8, -inf }
 0x3fd   : > { %4321 = vmax.xlane.f32.xlu1 %v4320_v5 }
 0x3fe   : > { %12496 = vpow2.f32 %v3658_v2  ;;  %v4323_v10 = vsel %vm3650_vm5, %v13299_v4, -inf }
 0x3ff   : > { %4324 = vmax.xlane.f32.xlu0 %v4323_v10 }
 0x401   : > { %v4447_v13 = vpop.f32.mrb[36].mxu0 }
 0x402   : > { %v13306_v40 = vadd.f32 %v4447_v13, %v13249_v11  ;;  %v11111_v14 = vpop.f32.mrb[37].mxu0 }
 0x403   : > { %v4450_v16 = vpop.f32.mrb[38].mxu0 }
 0x404   : > { %v13309_v17 = vadd.f32 %v4450_v16, %v13249_v11  ;;  %v11112_v18 = vpop.f32.mrb[39].mxu0  ;;  %v4454_v37 = vsel %vm3646_vm4, %v13306_v40, -inf }
 0x405   : > { %4455 = vmax.xlane.f32.xlu1 %v4454_v37 }
 0x406   : > { %v13313_v19 = vpop.eup %12494  ;;  %v4457_v20 = vsel %vm3650_vm5, %v13309_v17, -inf }
 0x407   : > { %4458 = vmax.xlane.f32.xlu0 %v4457_v20  ;;  %v3660_v22 = vsel %vm3646_vm4, %v13313_v19, 0.0 }
 0x408   : > { %v13319_v23 = vpop.eup %12496 }
 0x409   : > { %3661 = vadd.xlane.f32.xlu1 %v3660_v22  ;;  %v4580_v25 = vpop.f32.mrb[40].mxu0  ;;  %v3663_v26 = vsel %vm3650_vm5, %v13319_v23, 0.0 }
 0x40a   : > { %v13324_v27 = vadd.f32 %v4580_v25, %v13249_v11  ;;  %v11123_v28 = vpop.f32.mrb[41].mxu0 }
 0x40b   : > { %3664 = vadd.xlane.f32.xlu0 %v3663_v26  ;;  %v4583_v30 = vpop.f32.mrb[42].mxu0 }
 0x40c   : > { %v13327_v31 = vadd.f32 %v4583_v30, %v13249_v11  ;;  %v11124_v33 = vpop.f32.mrb[43].mxu0  ;;  %v4587_v34 = vsel %vm3646_vm4, %v13324_v27, -inf  ;;  %v11152_v11 = vadd.f32 %v3578_v45, %v2768_v44 }
 0x40d   : > { %4588 = vmax.xlane.f32.xlu1 %v4587_v34 }
 0x40e   : > { %v4590_v35 = vsel %vm3650_vm5, %v13327_v31, -inf  ;;  %v13339_v55 = vpack.c.bf16 %v11154_v52, %v11152_v11 }
 0x40f   : > { %4591 = vmax.xlane.f32.xlu0 %v4590_v35 }
 0x46a   : > { %v3786_v58 = vpop.xlane.xlu0 %3785 }
 0x46b   : > { %v3790_v59 = vsub.f32 %v13256_v21, %v3786_v58 }
 0x46d   : > { %v3792_v60 = vmul.f32 1.442695, %v3790_v59 }
 0x46e   : > { %v3789_v61 = vpop.xlane.xlu0 %3788 }
 0x46f   : > { %12498 = vpow2.f32 %v3792_v60  ;;  %v3791_v62 = vsub.f32 %v13259_v24, %v3789_v61 }
 0x471   : > { %v3794_v43 = vmul.f32 1.442695, %v3791_v62 }
 0x472   : > { %v3922_v63 = vpop.xlane.xlu1 %3921 }
 0x473   : > { %12500 = vpow2.f32 %v3794_v43  ;;  %v3926_v39 = vsub.f32 %v13266_v29, %v3922_v63 }
 0x474   : > { %v3925_v0 = vpop.xlane.xlu0 %3924 }
 0x475   : > { %v3928_v51 = vmul.f32 1.442695, %v3926_v39  ;;  %v3927_v2 = vsub.f32 %v13269_v32, %v3925_v0 }
 0x477   : > { %12502 = vpow2.f32 %v3928_v51  ;;  %v3930_v36 = vmul.f32 1.442695, %v3927_v2 }
 0x479   : > { %v13345_v5 = vpop.eup %12498  ;;  %12504 = vpow2.f32 %v3930_v36 }
 0x47a   : > { %v4055_v21 = vpop.xlane.xlu1 %4054  ;;  %v3796_v10 = vsel %vm3646_vm4, %v13345_v5, 0.0 }
 0x47b   : > { %v4059_v24 = vsub.f32 %v13276_v41, %v4055_v21  ;;  %3797 = vadd.xlane.f32.xlu1 %v3796_v10 }
 0x47c   : > { %v4058_v13 = vpop.xlane.xlu0 %4057 }
 0x47d   : > { %v13350_v14 = vpop.eup %12500  ;;  %v4061_v29 = vmul.f32 1.442695, %v4059_v24  ;;  %v4060_v16 = vsub.f32 %v13279_v15, %v4058_v13 }
 0x47e   : > { %v3799_v32 = vsel %vm3650_vm5, %v13350_v14, 0.0 }
 0x47f   : > { %12506 = vpow2.f32 %v4061_v29  ;;  %v4063_v18 = vmul.f32 1.442695, %v4060_v16  ;;  %3800 = vadd.xlane.f32.xlu0 %v3799_v32 }
 0x481   : > { %v13355_v37 = vpop.eup %12502  ;;  %12508 = vpow2.f32 %v4063_v18 }
 0x482   : > { %v3932_v20 = vsel %vm3646_vm4, %v13355_v37, 0.0  ;;  %v4189_v25 = vpop.xlane.xlu1 %4188 }
 0x483   : > { %v13359_v41 = vpop.eup %12504  ;;  %3933 = vadd.xlane.f32.xlu1 %v3932_v20  ;;  %v4193_v52 = vsub.f32 %v13286_v49, %v4189_v25 }
 0x484   : > { %v3935_v22 = vsel %vm3650_vm5, %v13359_v41, 0.0  ;;  %v4192_v30 = vpop.xlane.xlu0 %4191 }
 0x485   : > { %3936 = vadd.xlane.f32.xlu0 %v3935_v22  ;;  %v4194_v58 = vsub.f32 %v13289_v53, %v4192_v30 }
 0x487   : > { %v4197_v60 = vmul.f32 1.442695, %v4194_v58 }
 0x489   : > { %v13363_v15 = vpop.eup %12506 }
 0x48a   : > { %v4065_v26 = vsel %vm3646_vm4, %v13363_v15, 0.0  ;;  %v4322_v34 = vpop.xlane.xlu1 %4321 }
 0x48b   : > { %v13367_v28 = vpop.eup %12508  ;;  %4066 = vadd.xlane.f32.xlu1 %v4065_v26  ;;  %v4326_v59 = vsub.f32 %v13296_v8, %v4322_v34 }
 0x48c   : > { %v4068_v33 = vsel %vm3650_vm5, %v13367_v28, 0.0  ;;  %v4325_v35 = vpop.xlane.xlu0 %4324 }
 0x48d   : > { %4069 = vadd.xlane.f32.xlu0 %v4068_v33  ;;  %v4327_v61 = vsub.f32 %v13299_v4, %v4325_v35 }
 0x48f   : > { %v4330_v43 = vmul.f32 1.442695, %v4327_v61 }
 0x492   : > { %v4456_v38 = vpop.xlane.xlu1 %4455 }
 0x494   : > { %v4459_v42 = vpop.xlane.xlu0 %4458 }
 0x495   : > { %v4461_v49 = vsub.f32 %v13309_v17, %v4459_v42 }
 0x496   : > { %v3662_v44 = vpop.xlane.xlu1 %3661 }
 0x497   : > { %12510 = vrcp.f32 %v3662_v44  ;;  %v4464_v0 = vmul.f32 1.442695, %v4461_v49 }
 0x498   : > { %v3665_v45 = vpop.xlane.xlu0 %3664 }
 0x499   : > { %12512 = vrcp.f32 %v3665_v45 }
 0x49a   : > { %v4589_v62 = vpop.xlane.xlu1 %4588 }
 0x49b   : > { %v4593_v53 = vsub.f32 %v13324_v27, %v4589_v62 }
 0x49c   : > { %3808 = vrot.lane.b32.xlu1 %v13207_v56, %s12778_s0  ;;  %v4195_v56 = vmul.f32 1.442695, %v4193_v52  ;;  %v4592_v63 = vpop.xlane.xlu0 %4591 }
 0x49d   : > { %v4594_v8 = vsub.f32 %v13327_v31, %v4592_v63  ;;  %v4595_v4 = vmul.f32 1.442695, %v4593_v53 }
 0x49e   : > { %12514 = vpow2.f32 %v4195_v56 }
 0x49f   : > { %12516 = vpow2.f32 %v4197_v60 }
 0x4a1   : > { %v12511_v46 = vpop.eup %12510 }
 0x4a2   : > { %v3668_v47 = vmul.f32 %v12511_v46, %v13313_v19  ;;  %v4328_v19 = vmul.f32 1.442695, %v4326_v59 }
 0x4a3   : > { %4077 = vrot.lane.b32.xlu0 %v13209_v57, %s12778_s0  ;;  %v12513_v11 = vpop.eup %12512 }
 0x4a4   : > { %v3669_v48 = vmul.f32 %v12513_v11, %v13319_v23  ;;  %v4460_v23 = vsub.f32 %v13306_v40, %v4456_v38  ;;  %12518 = vpow2.f32 %v4328_v19  ;;  %v4597_v40 = vmul.f32 1.442695, %v4594_v8 }
 0x4a5   : > { %12520 = vpow2.f32 %v4330_v43 }
 0x4a6   : > { %v3670_v50 = vpack.c.bf16 %v3669_v48, %v3668_v47  ;;  %v4462_v39 = vmul.f32 1.442695, %v4460_v23 }
 0x4a8   : > { %11044 = vmatmul.mubr.msk.bf16.vlgmr.msra.gmra.mrb[12].mxu1 %vm3646_vm4, %v3670_v50  ;;  %12522 = vpow2.f32 %v4462_v39  ;;  %v13388_v51 = vpop.eup %12514  ;;  %v3947_v50 = vsel %vm3674_vm2, %v13209_v57, 0 }
 0x4a9   : > { %11055 = vmatprep.mubr.msk.bf16.mxu1 %vm12777_vm0, %v12776_v12  ;;  %12524 = vpow2.f32 %v4464_v0  ;;  %v13390_v2 = vpop.eup %12516  ;;  %v4199_v17 = vsel %vm3646_vm4, %v13388_v51, 0.0 }
 0x4aa   : > { %12526 = vpow2.f32 %v4595_v4  ;;  %v4202_v27 = vsel %vm3650_vm5, %v13390_v2, 0.0 }
 0x4ab   : > { %12528 = vpow2.f32 %v4597_v40 }
 0x4ae   : > { %v13394_v36 = vpop.eup %12518 }
 0x4af   : > { %v13398_v31 = vpop.eup %12520  ;;  %v4332_v21 = vsel %vm3646_vm4, %v13394_v36, 0.0 }
 0x4b0   : > { %v4335_v24 = vsel %vm3650_vm5, %v13398_v31, 0.0 }
 0x4b2   : > { %v13402_v10 = vpop.eup %12522 }
 0x4b3   : > { %v13406_v13 = vpop.eup %12524  ;;  %v4466_v29 = vsel %vm3646_vm4, %v13402_v10, 0.0 }
 0x4b4   : > { %v13410_v16 = vpop.eup %12526  ;;  %v4469_v32 = vsel %vm3650_vm5, %v13406_v13, 0.0 }
 0x4b5   : > { %v13414_v18 = vpop.eup %12528  ;;  %v4599_v20 = vsel %vm3646_vm4, %v13410_v16, 0.0 }
 0x4b6   : > { %v4602_v22 = vsel %vm3650_vm5, %v13414_v18, 0.0 }
 0x4c0   : > { %4200 = vadd.xlane.f32.xlu1 %v4199_v17 }
 0x4c2   : > { %4203 = vadd.xlane.f32.xlu0 %v4202_v27 }
 0x4c4   : > { %4333 = vadd.xlane.f32.xlu1 %v4332_v21 }
 0x4c6   : > { %4336 = vadd.xlane.f32.xlu0 %v4335_v24 }
 0x4c8   : > { %4467 = vadd.xlane.f32.xlu1 %v4466_v29 }
 0x4ca   : > { %4470 = vadd.xlane.f32.xlu0 %v4469_v32  ;;  %v4481_v32 = vsel %vm3674_vm2, %v13339_v55, 0 }
 0x4cc   : > { %4600 = vadd.xlane.f32.xlu1 %v4599_v20 }
 0x4ce   : > { %4603 = vadd.xlane.f32.xlu0 %v4602_v22 }
 0x4dd   : > { %4344 = vrot.lane.b32.xlu1 %v13337_v54, %s12778_s0 }
 0x4e4   : > { %4611 = vrot.lane.b32.xlu0 %v13339_v55, %s12778_s0 }
 0x508   : > { %v3798_v26 = vpop.xlane.xlu1 %3797 }
 0x50c   : > { %v3801_v25 = vpop.xlane.xlu0 %3800 }
 0x50d   : > { %12530 = vrcp.f32 %v3801_v25 }
 0x50e   : > { %12532 = vrcp.f32 %v3798_v26 }
 0x510   : > { %v3934_v33 = vpop.xlane.xlu1 %3933 }
 0x512   : > { %v3937_v30 = vpop.xlane.xlu0 %3936 }
 0x513   : > { %12534 = vrcp.f32 %v3937_v30 }
 0x514   : > { %12536 = vrcp.f32 %v3934_v33 }
 0x517   : > { %v12531_v34 = vpop.eup %12530 }
 0x518   : > { %v4067_v35 = vpop.xlane.xlu1 %4066  ;;  %v12533_v38 = vpop.eup %12532  ;;  %v3805_v42 = vmul.f32 %v12531_v34, %v13350_v14 }
 0x519   : > { %v3804_v46 = vmul.f32 %v12533_v38, %v13345_v5 }
 0x51a   : > { %v4070_v44 = vpop.xlane.xlu0 %4069 }
 0x51b   : > { %12538 = vrcp.f32 %v4070_v44  ;;  %v3806_v47 = vpack.c.bf16 %v3805_v42, %v3804_v46  ;;  %v11917_v46 = vld [vmem:[#allocation8 + $0xc] ss:$16 sps:$4 sm:$0xff]  }
 0x51c   : > { %v3809_v45 = vpop.permute.xlu1 %3808  ;;  %12540 = vrcp.f32 %v4067_v35 }
 0x51d   : > { %v3814_v11 = vsel %vm3674_vm2, %v3809_v45, 0  ;;  %v12535_v48 = vpop.eup %12534 }
 0x51e   : > { %11054 = vmatpush3.bf16.msra.mxu1 %v3814_v11  ;;  %v12537_v52 = vpop.eup %12536  ;;  %v3941_v5 = vmul.f32 %v12535_v48, %v13359_v41  ;;  %v4078_v58 = vpop.permute.xlu0 %4077  ;;  %v11915_v11 = vld [vmem:[#allocation8 + $0x8] ss:$16 sps:$4 sm:$0xff]   ;;  %v11918_v48 = vld [vmem:[#allocation8 + $0x20] ss:$16 sps:$4 sm:$0xff]  }
 0x51f   : > { %11065 = vmatprep.subr.bf16.mxu1 %v12776_v12  ;;  %v3940_v14 = vmul.f32 %v12537_v52, %v13355_v37  ;;  %v4083_v60 = vsel %vm3674_vm2, %v4078_v58, 0  ;;  %v4214_v37 = vsel %vm3674_vm2, %v13337_v54, 0  ;;  %v11924_v52 = vld [vmem:[#allocation8 + $0x40] ss:$16 sps:$4 sm:$0xff]   ;;  %v11929_v58 = vld [vmem:[#allocation8 + $0x4c] ss:$16 sps:$4 sm:$0xff]  }
 0x521   : > { %11056 = vmatmul.mubr.msk.bf16.vlgmr.msra.gmra.mrb[16].mxu1 %vm3646_vm4, %v3806_v47  ;;  %v3942_v56 = vpack.c.bf16 %v3941_v5, %v3940_v14  ;;  %v11923_v47 = vld [vmem:[#allocation8 + $0x2c] ss:$16 sps:$4 sm:$0xff]   ;;  %v11926_v5 = vld [vmem:[#allocation8 + $0x44] ss:$16 sps:$4 sm:$0xff]   ;;  %v11927_v14 = vld [vmem:[#allocation8 + $0x48] ss:$16 sps:$4 sm:$0xff]  }
 0x522   : > { %11066 = vmatpush3.bf16.msra.mxu1 %v3947_v50  ;;  %11067 = vmatprep.mubr.msk.bf16.mxu1 %vm12777_vm0, %v12776_v12  ;;  %v11921_v50 = vld [vmem:[#allocation8 + $0x28] ss:$16 sps:$4 sm:$0xff]  }
 0x523   : > { %11077 = vmatprep.subr.bf16.mxu1 %v12776_v12 }
 0x525   : > { %v12539_v59 = vpop.eup %12538 }
 0x526   : > { %v12541_v61 = vpop.eup %12540  ;;  %v4074_v57 = vmul.f32 %v12539_v59, %v13367_v28  ;;  %v11930_v59 = vld [vmem:[#allocation8 + $0x60] ss:$16 sps:$4 sm:$0xff]  }
 0x527   : > { %v4073_v41 = vmul.f32 %v12541_v61, %v13363_v15  ;;  %v11933_v61 = vld [vmem:[#allocation8 + $0x68] ss:$16 sps:$4 sm:$0xff]  }
 0x529   : > { %11068 = vmatmul.mubr.msk.bf16.vlgmr.msra.gmra.mrb[20].mxu1 %vm3646_vm4, %v3942_v56  ;;  %v4075_v19 = vpack.c.bf16 %v4074_v57, %v4073_v41  ;;  %v11932_v56 = vld [vmem:[#allocation8 + $0x64] ss:$16 sps:$4 sm:$0xff]   ;;  %v11941_v41 = vld [vmem:[#allocation8 + $0x8c] ss:$16 sps:$4 sm:$0xff]  }
 0x52a   : > { %11078 = vmatpush3.bf16.msra.mxu1 %v4083_v60  ;;  %11079 = vmatprep.mubr.msk.bf16.mxu1 %vm12777_vm0, %v12776_v12  ;;  %v11935_v60 = vld [vmem:[#allocation8 + $0x6c] ss:$16 sps:$4 sm:$0xff]   ;;  %v11938_v57 = vld [vmem:[#allocation8 + $0x84] ss:$16 sps:$4 sm:$0xff]  }
 0x52b   : > { %11089 = vmatprep.subr.bf16.mxu1 %v12776_v12 }
 0x531   : > { %11080 = vmatmul.mubr.msk.bf16.vlgmr.msra.gmra.mrb[24].mxu1 %vm3646_vm4, %v4075_v19  ;;  %v11936_v19 = vld [vmem:[#allocation8 + $0x80] ss:$16 sps:$4 sm:$0xff]  }
 0x532   : > { %11090 = vmatpush3.bf16.msra.mxu1 %v4214_v37  ;;  %11091 = vmatprep.mubr.msk.bf16.mxu1 %vm12777_vm0, %v12776_v12  ;;  %v11939_v37 = vld [vmem:[#allocation8 + $0x88] ss:$16 sps:$4 sm:$0xff]  }
 0x533   : > { %11101 = vmatprep.subr.bf16.mxu1 %v12776_v12 }
 0x54d   : > { %v4201_v23 = vpop.xlane.xlu1 %4200 }
 0x54e   : > { %12542 = vrcp.f32 %v4201_v23  ;;  %v11944_v23 = vld [vmem:[#allocation8 + $0xa4] ss:$16 sps:$4 sm:$0xff]  }
 0x54f   : > { %v4204_v62 = vpop.xlane.xlu0 %4203 }
 0x550   : > { %12544 = vrcp.f32 %v4204_v62  ;;  %v11947_v62 = vld [vmem:[#allocation8 + $0xac] ss:$16 sps:$4 sm:$0xff]  }
 0x551   : > { %v4334_v28 = vpop.xlane.xlu1 %4333 }
 0x553   : > { %v4337_v43 = vpop.xlane.xlu0 %4336 }
 0x554   : > { %12546 = vrcp.f32 %v4337_v43  ;;  %v11945_v43 = vld [vmem:[#allocation8 + $0xa8] ss:$16 sps:$4 sm:$0xff]  }
 0x555   : > { %v4468_v15 = vpop.xlane.xlu1 %4467  ;;  %12548 = vrcp.f32 %v4334_v28  ;;  %v11942_v28 = vld [vmem:[#allocation8 + $0xa0] ss:$16 sps:$4 sm:$0xff]  }
 0x557   : > { %v4471_v63 = vpop.xlane.xlu0 %4470 }
 0x558   : > { %v12543_v49 = vpop.eup %12542  ;;  %12550 = vrcp.f32 %v4471_v63  ;;  %v11948_v63 = vld [vmem:[#allocation8 + $0xc0] ss:$16 sps:$4 sm:$0xff]  }
 0x559   : > { %v4601_v39 = vpop.xlane.xlu1 %4600  ;;  %v4207_v54 = vmul.f32 %v12543_v49, %v13388_v51  ;;  %12552 = vrcp.f32 %v4468_v15  ;;  %v11950_v15 = vld [vmem:[#allocation8 + $0xc4] ss:$16 sps:$4 sm:$0xff]   ;;  %v11953_v49 = vld [vmem:[#allocation8 + $0xcc] ss:$16 sps:$4 sm:$0xff]  }
 0x55a   : > { %v12545_v53 = vpop.eup %12544 }
 0x55b   : > { %v4208_v0 = vmul.f32 %v12545_v53, %v13390_v2  ;;  %v4604_v24 = vpop.xlane.xlu0 %4603  ;;  %v11956_v53 = vld [vmem:[#allocation8 + $0xe4] ss:$16 sps:$4 sm:$0xff]  }
 0x55c   : > { %12554 = vrcp.f32 %v4604_v24  ;;  %v11971_v24 = vld [vmem:[#allocation8 + $0x12c] ss:$16 sps:$4 sm:$0xff]  }
 0x55d   : > { %v4345_v8 = vpop.permute.xlu1 %4344  ;;  %v4209_v4 = vpack.c.bf16 %v4208_v0, %v4207_v54  ;;  %12556 = vrcp.f32 %v4601_v39  ;;  %v11951_v39 = vld [vmem:[#allocation8 + $0xc8] ss:$16 sps:$4 sm:$0xff]   ;;  %v11959_v54 = vld [vmem:[#allocation8 + $0xec] ss:$16 sps:$4 sm:$0xff]   ;;  %v11954_v0 = vld [vmem:[#allocation8 + $0xe0] ss:$16 sps:$4 sm:$0xff]  }
 0x55e   : > { %v12547_v40 = vpop.eup %12546  ;;  %v4350_v17 = vsel %vm3674_vm2, %v4345_v8, 0  ;;  %v11957_v8 = vld [vmem:[#allocation8 + $0xe8] ss:$16 sps:$4 sm:$0xff]  }
 0x55f   : > { %11092 = vmatmul.mubr.msk.bf16.vlgmr.msra.gmra.mrb[28].mxu1 %vm3646_vm4, %v4209_v4  ;;  %v12549_v27 = vpop.eup %12548  ;;  %v4341_v21 = vmul.f32 %v12547_v40, %v13398_v31  ;;  %v4612_v22 = vpop.permute.xlu0 %4611  ;;  %v11962_v4 = vld [vmem:[#allocation8 + $0x104] ss:$16 sps:$4 sm:$0xff]   ;;  %v11965_v40 = vld [vmem:[#allocation8 + $0x10c] ss:$16 sps:$4 sm:$0xff]  }
 0x560   : > { %11102 = vmatpush3.bf16.msra.mxu1 %v4350_v17  ;;  %11103 = vmatprep.mubr.msk.bf16.mxu1 %vm12777_vm0, %v12776_v12  ;;  %v4340_v51 = vmul.f32 %v12549_v27, %v13394_v36  ;;  %v4617_v30 = vsel %vm3674_vm2, %v4612_v22, 0  ;;  %v11960_v17 = vld [vmem:[#allocation8 + $0x100] ss:$16 sps:$4 sm:$0xff]   ;;  %v11963_v27 = vld [vmem:[#allocation8 + $0x108] ss:$16 sps:$4 sm:$0xff]  }
 0x561   : > { %11113 = vmatprep.subr.bf16.mxu1 %v12776_v12  ;;  %v11983_v22 = vld [vmem:[#allocation8 + $0x16c] ss:$16 sps:$4 sm:$0xff]  }
 0x562   : > { %v4342_v2 = vpack.c.bf16 %v4341_v21, %v4340_v51  ;;  %v12551_v29 = vpop.eup %12550  ;;  %v11968_v21 = vld [vmem:[#allocation8 + $0x124] ss:$16 sps:$4 sm:$0xff]   ;;  %v11966_v51 = vld [vmem:[#allocation8 + $0x120] ss:$16 sps:$4 sm:$0xff]  }
 0x563   : > { %v12553_v20 = vpop.eup %12552  ;;  %v4475_v31 = vmul.f32 %v12551_v29, %v13406_v13  ;;  %v11974_v29 = vld [vmem:[#allocation8 + $0x144] ss:$16 sps:$4 sm:$0xff]  }
 0x564   : > { %v4474_v36 = vmul.f32 %v12553_v20, %v13402_v10  ;;  %v11972_v20 = vld [vmem:[#allocation8 + $0x140] ss:$16 sps:$4 sm:$0xff]  }
 0x566   : > { %v4476_v25 = vpack.c.bf16 %v4475_v31, %v4474_v36  ;;  %v12555_v26 = vpop.eup %12554  ;;  %v11975_v31 = vld [vmem:[#allocation8 + $0x148] ss:$16 sps:$4 sm:$0xff]   ;;  %v11980_v36 = vld [vmem:[#allocation8 + $0x164] ss:$16 sps:$4 sm:$0xff]  }
 0x567   : > { %11104 = vmatmul.mubr.msk.bf16.vlgmr.msra.gmra.mrb[32].mxu1 %vm3646_vm4, %v4342_v2  ;;  %v12557_v33 = vpop.eup %12556  ;;  %v4608_v55 = vmul.f32 %v12555_v26, %v13414_v18  ;;  %v11912_v18 = vld [vmem:[#allocation8] ss:$16 sps:$4 sm:$0xff]   ;;  %v11969_v2 = vld [vmem:[#allocation8 + $0x128] ss:$16 sps:$4 sm:$0xff]  }
 0x568   : > { %11114 = vmatpush3.bf16.msra.mxu1 %v4481_v32  ;;  %11115 = vmatprep.mubr.msk.bf16.mxu1 %vm12777_vm0, %v12776_v12  ;;  %v4607_v13 = vmul.f32 %v12557_v33, %v13410_v16  ;;  %v11920_v16 = vld [vmem:[#allocation8 + $0x24] ss:$16 sps:$4 sm:$0xff]   ;;  %v11977_v32 = vld [vmem:[#allocation8 + $0x14c] ss:$16 sps:$4 sm:$0xff]   ;;  %v11981_v26 = vld [vmem:[#allocation8 + $0x168] ss:$16 sps:$4 sm:$0xff]  }
 0x569   : > { %11125 = vmatprep.subr.bf16.mxu1 %v12776_v12  ;;  %v11989_v33 = vld [vmem:[#allocation8 + $0x18c] ss:$16 sps:$4 sm:$0xff]  }
 0x56a   : > { %v4609_v34 = vpack.c.bf16 %v4608_v55, %v4607_v13  ;;  %v11984_v13 = vld [vmem:[#allocation8 + $0x180] ss:$16 sps:$4 sm:$0xff]  }
 0x56f   : > { %11116 = vmatmul.mubr.msk.bf16.vlgmr.msra.gmra.mrb[36].mxu1 %vm3646_vm4, %v4476_v25  ;;  %v11978_v25 = vld [vmem:[#allocation8 + $0x160] ss:$16 sps:$4 sm:$0xff]  }
 0x570   : > { %11126 = vmatpush3.bf16.msra.mxu1 %v4617_v30  ;;  %11127 = vmatprep.mubr.msk.bf16.mxu1 %vm12777_vm0, %v12776_v12  ;;  %v11914_v12 = vld [vmem:[#allocation8 + $0x4] ss:$16 sps:$4 sm:$0xff]  }
 0x571   : > { %5488 = vmatprep.subr.bf16.mxu0 %v11914_v12  ;;  %5574 = vmatprep.subr.bf16.mxu1 %v11917_v46  ;;  %v11986_v30 = vld [vmem:[#allocation8 + $0x184] ss:$16 sps:$4 sm:$0xff]   ;;  %v11995_v12 = vld [vmem:[#allocation8 + $0x1ac] ss:$16 sps:$4 sm:$0xff]   ;;  %v11990_v46 = vld [vmem:[#allocation8 + $0x1a0] ss:$16 sps:$4 sm:$0xff]  }
 0x572   : > { %5489 = vmatpush1.bf16.msra.mxu0 %v11912_v18  ;;  %v11993_v18 = vld [vmem:[#allocation8 + $0x1a8] ss:$16 sps:$4 sm:$0xff]  }
 0x573   : > { %5490 = vmatprep.subr.bf16.mxu0 %v11920_v16  ;;  %v11996_v16 = vld [vmem:[#allocation8 + $0x1c0] ss:$16 sps:$4 sm:$0xff]  }
 0x576   : > { %5491 = vmatpush1.bf16.msra.mxu0 %v11918_v48 }
 0x577   : > { %11128 = vmatmul.mubr.msk.bf16.vlgmr.msra.gmra.mrb[40].mxu1 %vm3646_vm4, %v4609_v34  ;;  %5492 = vmatprep.subr.bf16.mxu0 %v11926_v5  ;;  %v12001_v5 = vld [vmem:[#allocation8 + $0x1cc] ss:$16 sps:$4 sm:$0xff]  }
 0x578   : > { %5575 = vmatpush1.bf16.msra.mxu1 %v11915_v11 }
 0x579   : > { %5576 = vmatprep.subr.bf16.mxu1 %v11923_v47  ;;  %v11998_v47 = vld [vmem:[#allocation8 + $0x1c4] ss:$16 sps:$4 sm:$0xff]  }
 0x57a   : > { %5493 = vmatpush1.bf16.msra.mxu0 %v11924_v52  ;;  %v11999_v52 = vld [vmem:[#allocation8 + $0x1c8] ss:$16 sps:$4 sm:$0xff]  }
 0x57b   : > { %v3712_v10 = vpop.f32.mrb[12].mxu1  ;;  %5494 = vmatprep.subr.bf16.mxu0 %v11932_v56 }
 0x57c   : > { %v10987_v35 = vpack.c.bf16 %v3712_v10, %v3712_v10  ;;  %v11045_v38 = vpop.f32.mrb[13].mxu1  ;;  %5577 = vmatpush1.bf16.msra.mxu1 %v11921_v50 }
 0x57d   : > { %v3715_v42 = vpop.f32.mrb[14].mxu1  ;;  %5578 = vmatprep.subr.bf16.mxu1 %v11929_v58  ;;  %v12004_v58 = vld [vmem:[#allocation8 + $0x1e4] ss:$16 sps:$4 sm:$0xff]  }
 0x57e   : > { %3728 = vst.msk [vmem:[#allocation2] sm:$0xf] %vm3727_vm6, %v10987_v35  ;;  %v10988_v44 = vpack.c.bf16 %v3715_v42, %v3715_v42  ;;  %v11046_v45 = vpop.f32.mrb[15].mxu1  ;;  %5495 = vmatpush1.bf16.msra.mxu0 %v11930_v59  ;;  %v11987_v35 = vld [vmem:[#allocation8 + $0x188] ss:$16 sps:$4 sm:$0xff]  }
 0x57f   : > { %5496 = vmatprep.subr.bf16.mxu0 %v11938_v57  ;;  %v11992_v45 = vld [vmem:[#allocation8 + $0x1a4] ss:$16 sps:$4 sm:$0xff]   ;;  %v12005_v57 = vld [vmem:[#allocation8 + $0x1e8] ss:$16 sps:$4 sm:$0xff]  }
 0x580   : > { %3730 = vst.msk [vmem:[#allocation2 + $0x10] sm:$0x7] %vm3729_vm7, %v10988_v44  ;;  %5579 = vmatpush1.bf16.msra.mxu1 %v11927_v14 }
 0x581   : > { %5580 = vmatprep.subr.bf16.mxu1 %v11935_v60  ;;  %v12007_v60 = vld [vmem:[#allocation8 + $0x1ec] ss:$16 sps:$4 sm:$0xff]  }
 0x582   : > { %5497 = vmatpush1.bf16.msra.mxu0 %v11936_v19 }
 0x583   : > { %5498 = vmatprep.subr.bf16.mxu0 %v11944_v23 }
 0x584   : > { %5581 = vmatpush1.bf16.msra.mxu1 %v11933_v61  ;;  %v12002_v61 = vld [vmem:[#allocation8 + $0x1e0] ss:$16 sps:$4 sm:$0xff]  }
 0x585   : > { %5582 = vmatprep.subr.bf16.mxu1 %v11941_v41 }
 0x586   : > { %5499 = vmatpush1.bf16.msra.mxu0 %v11942_v28 }
 0x587   : > { %5500 = vmatprep.subr.bf16.mxu0 %v11950_v15  ;;  %v12016_v15 = vld [vmem:[#allocation8 + $0x20c] ss:$16 sps:$4 sm:$0xff]  }
 0x588   : > { %5583 = vmatpush1.bf16.msra.mxu1 %v11939_v37 }
 0x589   : > { %5584 = vmatprep.subr.bf16.mxu1 %v11947_v62 }
 0x58a   : > { %5501 = vmatpush1.bf16.msra.mxu0 %v11948_v63 }
 0x58b   : > { %5502 = vmatprep.subr.bf16.mxu0 %v11956_v53 }
 0x58c   : > { %5585 = vmatpush1.bf16.msra.mxu1 %v11945_v43  ;;  %v12013_v43 = vld [vmem:[#allocation8 + $0x204] ss:$16 sps:$4 sm:$0xff]  }
 0x58d   : > { %5586 = vmatprep.subr.bf16.mxu1 %v11953_v49 }
 0x58e   : > { %5503 = vmatpush1.bf16.msra.mxu0 %v11954_v0 }
 0x58f   : > { %5504 = vmatprep.subr.bf16.mxu0 %v11962_v4 }
 0x590   : > { %5587 = vmatpush1.bf16.msra.mxu1 %v11951_v39 }
 0x591   : > { %5588 = vmatprep.subr.bf16.mxu1 %v11959_v54 }
 0x592   : > { %5505 = vmatpush1.bf16.msra.mxu0 %v11960_v17 }
 0x593   : > { %5506 = vmatprep.subr.bf16.mxu0 %v11968_v21 }
 0x594   : > { %5589 = vmatpush1.bf16.msra.mxu1 %v11957_v8 }
 0x595   : > { %5590 = vmatprep.subr.bf16.mxu1 %v11965_v40 }
 0x596   : > { %5507 = vmatpush1.bf16.msra.mxu0 %v11966_v51 }
 0x597   : > { %5508 = vmatprep.subr.bf16.mxu0 %v11974_v29 }
 0x598   : > { %5591 = vmatpush1.bf16.msra.mxu1 %v11963_v27 }
 0x599   : > { %5592 = vmatprep.subr.bf16.mxu1 %v11971_v24 }
 0x59a   : > { %5509 = vmatpush1.bf16.msra.mxu0 %v11972_v20 }
 0x59b   : > { %5510 = vmatprep.subr.bf16.mxu0 %v11980_v36 }
 0x59c   : > { %5593 = vmatpush1.bf16.msra.mxu1 %v11969_v2 }
 0x59d   : > { %5594 = vmatprep.subr.bf16.mxu1 %v11977_v32 }
 0x59e   : > { %5511 = vmatpush1.bf16.msra.mxu0 %v11978_v25 }
 0x59f   : > { %5512 = vmatprep.subr.bf16.mxu0 %v11986_v30 }
 0x5a0   : > { %5595 = vmatpush1.bf16.msra.mxu1 %v11975_v31 }
 0x5a1   : > { %5596 = vmatprep.subr.bf16.mxu1 %v11983_v22 }
 0x5a2   : > { %5513 = vmatpush1.bf16.msra.mxu0 %v11984_v13 }
 0x5a3   : > { %5514 = vmatprep.subr.bf16.mxu0 %v11992_v45  ;;  %v12022_v45 = vld [vmem:[#allocation8 + $0x22c] ss:$16 sps:$4 sm:$0xff]  }
 0x5a4   : > { %5597 = vmatpush1.bf16.msra.mxu1 %v11981_v26 }
 0x5a5   : > { %5598 = vmatprep.subr.bf16.mxu1 %v11989_v33 }
 0x5a6   : > { %5515 = vmatpush1.bf16.msra.mxu0 %v11990_v46  ;;  %v12020_v46 = vld [vmem:[#allocation8 + $0x228] ss:$16 sps:$4 sm:$0xff]  }
 0x5a7   : > { %5516 = vmatprep.subr.bf16.mxu0 %v11998_v47  ;;  %v12026_v47 = vld [vmem:[#allocation8 + $0x248] ss:$16 sps:$4 sm:$0xff]  }
 0x5a8   : > { %5599 = vmatpush1.bf16.msra.mxu1 %v11987_v35 }
 0x5a9   : > { %5600 = vmatprep.subr.bf16.mxu1 %v11995_v12  ;;  %v12017_v12 = vld [vmem:[#allocation8 + $0x220] ss:$16 sps:$4 sm:$0xff]  }
 0x5aa   : > { %5517 = vmatpush1.bf16.msra.mxu0 %v11996_v16  ;;  %v12023_v16 = vld [vmem:[#allocation8 + $0x240] ss:$16 sps:$4 sm:$0xff]  }
 0x5ab   : > { %5518 = vmatprep.subr.bf16.mxu0 %v12004_v58  ;;  %v12040_v58 = vld [vmem:[#allocation8 + $0x28c] ss:$16 sps:$4 sm:$0xff]  }
 0x5ac   : > { %5601 = vmatpush1.bf16.msra.mxu1 %v11993_v18  ;;  %v12025_v18 = vld [vmem:[#allocation8 + $0x244] ss:$16 sps:$4 sm:$0xff]  }
 0x5ad   : > { %5602 = vmatprep.subr.bf16.mxu1 %v12001_v5  ;;  %v12032_v5 = vld [vmem:[#allocation8 + $0x268] ss:$16 sps:$4 sm:$0xff]  }
 0x5ae   : > { %5519 = vmatpush1.bf16.msra.mxu0 %v12002_v61  ;;  %v12046_v61 = vld [vmem:[#allocation8 + $0x2ac] ss:$16 sps:$4 sm:$0xff]  }
 0x5af   : > { %5531 = vmatprep.subr.bf16.mxu0 %v12013_v43  ;;  %v12058_v43 = vld [vmem:[#allocation8 + $0x2ec] ss:$16 sps:$4 sm:$0xff]  }
 0x5b0   : > { %5603 = vmatpush1.bf16.msra.mxu1 %v11999_v52  ;;  %v12029_v52 = vld [vmem:[#allocation8 + $0x260] ss:$16 sps:$4 sm:$0xff]  }
 0x5b1   : > { %5604 = vmatprep.subr.bf16.mxu1 %v12007_v60  ;;  %v12043_v60 = vld [vmem:[#allocation8 + $0x2a4] ss:$16 sps:$4 sm:$0xff]  }
 0x5b4   : > { %5605 = vmatpush1.bf16.msra.mxu1 %v12005_v57  ;;  %v12041_v57 = vld [vmem:[#allocation8 + $0x2a0] ss:$16 sps:$4 sm:$0xff]  }
 0x5b5   : > { %5617 = vmatprep.subr.bf16.mxu1 %v12016_v15  ;;  %v12053_v15 = vld [vmem:[#allocation8 + $0x2e0] ss:$16 sps:$4 sm:$0xff]  }
 0x5f4   : > { %v3850_v55 = vpop.f32.mrb[16].mxu1 }
 0x5f5   : > { %v10989_v34 = vpack.c.bf16 %v3850_v55, %v3850_v55  ;;  %v11057_v10 = vpop.f32.mrb[17].mxu1 }
 0x5f6   : > { %v3853_v38 = vpop.f32.mrb[18].mxu1  ;;  %v12011_v10 = vld [vmem:[#allocation8 + $0x200] ss:$16 sps:$4 sm:$0xff]  }
 0x5f7   : > { %3863 = vrot.lane.b32.xlu1 %v10989_v34, %s12778_s0  ;;  %v11058_v42 = vpop.f32.mrb[19].mxu1  ;;  %v10990_v44 = vpack.c.bf16 %v3853_v38, %v3853_v38 }
 0x5f8   : > { %v12014_v42 = vld [vmem:[#allocation8 + $0x208] ss:$16 sps:$4 sm:$0xff]  }
 0x5fb   : > { %3865 = vrot.lane.b32.xlu1 %v10990_v44, %s12778_s0  ;;  %v12019_v44 = vld [vmem:[#allocation8 + $0x224] ss:$16 sps:$4 sm:$0xff]  }
 0x5fc   : > { %v3983_v11 = vpop.f32.mrb[20].mxu1 }
 0x5fd   : > { %v10991_v48 = vpack.c.bf16 %v3983_v11, %v3983_v11  ;;  %v11069_v50 = vpop.f32.mrb[21].mxu1  ;;  %v12028_v11 = vld [vmem:[#allocation8 + $0x24c] ss:$16 sps:$4 sm:$0xff]  }
 0x5fe   : > { %v3986_v14 = vpop.f32.mrb[22].mxu1  ;;  %v12034_v50 = vld [vmem:[#allocation8 + $0x26c] ss:$16 sps:$4 sm:$0xff]  }
 0x5ff   : > { %3998 = vst.msk [vmem:[#allocation2 + $0x4] sm:$0xf] %vm3727_vm6, %v10991_v48  ;;  %v10992_v56 = vpack.c.bf16 %v3986_v14, %v3986_v14  ;;  %v11070_v59 = vpop.f32.mrb[23].mxu1  ;;  %v12031_v48 = vld [vmem:[#allocation8 + $0x264] ss:$16 sps:$4 sm:$0xff]  }
 0x600   : > { %v12037_v14 = vld [vmem:[#allocation8 + $0x284] ss:$16 sps:$4 sm:$0xff]   ;;  %v12038_v59 = vld [vmem:[#allocation8 + $0x288] ss:$16 sps:$4 sm:$0xff]  }
 0x601   : > { %3999 = vst.msk [vmem:[#allocation2 + $0x14] sm:$0x7] %vm3729_vm7, %v10992_v56  ;;  %v12035_v56 = vld [vmem:[#allocation8 + $0x280] ss:$16 sps:$4 sm:$0xff]  }
 0x604   : > { %v4119_v41 = vpop.f32.mrb[24].mxu1 }
 0x605   : > { %v10993_v19 = vpack.c.bf16 %v4119_v41, %v4119_v41  ;;  %v11081_v37 = vpop.f32.mrb[25].mxu1  ;;  %v12044_v41 = vld [vmem:[#allocation8 + $0x2a8] ss:$16 sps:$4 sm:$0xff]  }
 0x606   : > { %v4122_v23 = vpop.f32.mrb[26].mxu1  ;;  %v12052_v37 = vld [vmem:[#allocation8 + $0x2cc] ss:$16 sps:$4 sm:$0xff]  }
 0x607   : > { %v10994_v62 = vpack.c.bf16 %v4122_v23, %v4122_v23  ;;  %4132 = vrot.lane.b32.xlu0 %v10993_v19, %s12778_s0  ;;  %v11082_v28 = vpop.f32.mrb[27].mxu1  ;;  %v12049_v19 = vld [vmem:[#allocation8 + $0x2c4] ss:$16 sps:$4 sm:$0xff]   ;;  %v12047_v23 = vld [vmem:[#allocation8 + $0x2c0] ss:$16 sps:$4 sm:$0xff]  }
 0x608   : > { %v12055_v28 = vld [vmem:[#allocation8 + $0x2e4] ss:$16 sps:$4 sm:$0xff]  }
 0x609   : > { %4134 = vrot.lane.b32.xlu1 %v10994_v62, %s12778_s0  ;;  %v12050_v62 = vld [vmem:[#allocation8 + $0x2c8] ss:$16 sps:$4 sm:$0xff]  }
 0x632   : > { %v4250_v49 = vpop.f32.mrb[28].mxu1 }
 0x633   : > { %v10995_v63 = vpack.c.bf16 %v4250_v49, %v4250_v49  ;;  %v11093_v39 = vpop.f32.mrb[29].mxu1  ;;  %v12056_v49 = vld [vmem:[#allocation8 + $0x2e8] ss:$16 sps:$4 sm:$0xff]  }
 0x634   : > { %v4253_v53 = vpop.f32.mrb[30].mxu1  ;;  %v12064_v39 = vld [vmem:[#allocation8 + $0x30c] ss:$16 sps:$4 sm:$0xff]  }
 0x635   : > { %4265 = vst.msk [vmem:[#allocation2 + $0x8] sm:$0xf] %vm3727_vm6, %v10995_v63  ;;  %v10996_v54 = vpack.c.bf16 %v4253_v53, %v4253_v53  ;;  %v11094_v0 = vpop.f32.mrb[31].mxu1  ;;  %v12061_v63 = vld [vmem:[#allocation8 + $0x304] ss:$16 sps:$4 sm:$0xff]  }
 0x636   : > { %v12059_v53 = vld [vmem:[#allocation8 + $0x300] ss:$16 sps:$4 sm:$0xff]   ;;  %v12067_v0 = vld [vmem:[#allocation8 + $0x324] ss:$16 sps:$4 sm:$0xff]  }
 0x637   : > { %4266 = vst.msk [vmem:[#allocation2 + $0x18] sm:$0x7] %vm3729_vm7, %v10996_v54  ;;  %v12062_v54 = vld [vmem:[#allocation8 + $0x308] ss:$16 sps:$4 sm:$0xff]  }
 0x63a   : > { %v4386_v8 = vpop.f32.mrb[32].mxu1 }
 0x63b   : > { %v10997_v4 = vpack.c.bf16 %v4386_v8, %v4386_v8  ;;  %v11105_v40 = vpop.f32.mrb[33].mxu1  ;;  %v12070_v8 = vld [vmem:[#allocation8 + $0x32c] ss:$16 sps:$4 sm:$0xff]  }
 0x63c   : > { %v4389_v17 = vpop.f32.mrb[34].mxu1  ;;  %v12068_v40 = vld [vmem:[#allocation8 + $0x328] ss:$16 sps:$4 sm:$0xff]  }
 0x63d   : > { %v10998_v27 = vpack.c.bf16 %v4389_v17, %v4389_v17  ;;  %4399 = vrot.lane.b32.xlu0 %v10997_v4, %s12778_s0  ;;  %v11106_v21 = vpop.f32.mrb[35].mxu1  ;;  %v12065_v4 = vld [vmem:[#allocation8 + $0x320] ss:$16 sps:$4 sm:$0xff]   ;;  %v12073_v17 = vld [vmem:[#allocation8 + $0x344] ss:$16 sps:$4 sm:$0xff]  }
 0x63e   : > { %v12071_v21 = vld [vmem:[#allocation8 + $0x340] ss:$16 sps:$4 sm:$0xff]  }
 0x63f   : > { %4401 = vrot.lane.b32.xlu1 %v10998_v27, %s12778_s0  ;;  %v12076_v27 = vld [vmem:[#allocation8 + $0x34c] ss:$16 sps:$4 sm:$0xff]  }
 0x642   : > { %v4517_v24 = vpop.f32.mrb[36].mxu1 }
 0x643   : > { %v10999_v51 = vpack.c.bf16 %v4517_v24, %v4517_v24  ;;  %v11117_v2 = vpop.f32.mrb[37].mxu1  ;;  %v12074_v24 = vld [vmem:[#allocation8 + $0x348] ss:$16 sps:$4 sm:$0xff]  }
 0x644   : > { %v4520_v29 = vpop.f32.mrb[38].mxu1  ;;  %v12082_v2 = vld [vmem:[#allocation8 + $0x36c] ss:$16 sps:$4 sm:$0xff]  }
 0x645   : > { %4532 = vst.msk [vmem:[#allocation2 + $0xc] sm:$0xf] %vm3727_vm6, %v10999_v51  ;;  %v11000_v32 = vpack.c.bf16 %v4520_v29, %v4520_v29  ;;  %v11118_v20 = vpop.f32.mrb[39].mxu1  ;;  %v12079_v51 = vld [vmem:[#allocation8 + $0x364] ss:$16 sps:$4 sm:$0xff]  }
 0x646   : > { %v12080_v20 = vld [vmem:[#allocation8 + $0x368] ss:$16 sps:$4 sm:$0xff]  }
 0x647   : > { %4533 = vst.msk [vmem:[#allocation2 + $0x1c] sm:$0x7] %vm3729_vm7, %v11000_v32  ;;  %v12077_v32 = vld [vmem:[#allocation8 + $0x360] ss:$16 sps:$4 sm:$0xff]  }
 0x64a   : > { %v4653_v31 = vpop.f32.mrb[40].mxu1 }
 0x64b   : > { %v11001_v36 = vpack.c.bf16 %v4653_v31, %v4653_v31  ;;  %v11129_v22 = vpop.f32.mrb[41].mxu1 }
 0x64c   : > { %v4656_v25 = vpop.f32.mrb[42].mxu1  ;;  %v12088_v22 = vld [vmem:[#allocation8 + $0x38c] ss:$16 sps:$4 sm:$0xff]  }
 0x64d   : > { %v11002_v26 = vpack.c.bf16 %v4656_v25, %v4656_v25  ;;  %4666 = vrot.lane.b32.xlu0 %v11001_v36, %s12778_s0  ;;  %v11130_v30 = vpop.f32.mrb[43].mxu1  ;;  %v12085_v36 = vld [vmem:[#allocation8 + $0x384] ss:$16 sps:$4 sm:$0xff]   ;;  %v12083_v25 = vld [vmem:[#allocation8 + $0x380] ss:$16 sps:$4 sm:$0xff]  }
 0x64e   : > { %v12091_v30 = vld [vmem:[#allocation8 + $0x3a4] ss:$16 sps:$4 sm:$0xff]  }
 0x64f   : > { %4668 = vrot.lane.b32.xlu1 %v11002_v26, %s12778_s0  ;;  %v12086_v26 = vld [vmem:[#allocation8 + $0x388] ss:$16 sps:$4 sm:$0xff]  }
 0x669   : > { %v3864_v33 = vpop.permute.xlu1 %3863 }
 0x66a   : > { %3870 = vst.msk [vmem:[#allocation2] sm:$0xf] %vm3869_vm8, %v3864_v33  ;;  %v12094_v33 = vld [vmem:[#allocation8 + $0x3ac] ss:$16 sps:$4 sm:$0xff]  }
 0x66d   : > { %v3866_v55 = vpop.permute.xlu1 %3865 }
 0x66e   : > { %3872 = vst.msk [vmem:[#allocation2 + $0x10] sm:$0x7] %vm3871_vm9, %v3866_v55  ;;  %v12089_v55 = vld [vmem:[#allocation8 + $0x3a0] ss:$16 sps:$4 sm:$0xff]  }
 0x675   : > { %v12008_v35 = vld [vmem:[#allocation2] ss:$16 sps:$4 sm:$0x7f]  }
 0x679   : > { %v4133_v13 = vpop.permute.xlu0 %4132 }
 0x67a   : > { %4138 = vst.msk [vmem:[#allocation2 + $0x4] sm:$0xf] %vm3869_vm8, %v4133_v13  ;;  %v12092_v13 = vld [vmem:[#allocation8 + $0x3a8] ss:$16 sps:$4 sm:$0xff]  }
 0x67b   : > { %v4135_v34 = vpop.permute.xlu1 %4134 }
 0x67c   : > { %4139 = vst.msk [vmem:[#allocation2 + $0x14] sm:$0x7] %vm3871_vm9, %v4135_v34  ;;  %v12097_v34 = vld [vmem:[#allocation8 + $0x3c4] ss:$16 sps:$4 sm:$0xff]  }
 0x683   : > { %v12010_v38 = vld [vmem:[#allocation2 + $0x4] ss:$16 sps:$4 sm:$0x7f]  }
 0x684   : > { %5520 = vmatprep.mubr.bf16.mxu0 %v12010_v38  ;;  %5606 = vmatprep.mubr.bf16.mxu1 %v12010_v38  ;;  %v12098_v38 = vld [vmem:[#allocation8 + $0x3c8] ss:$16 sps:$4 sm:$0xff]  }
 0x685   : > { %5521 = vmatmul.mubr.bf16.vlgmr.msra.gmra.mrb[44].mxu0 %v12008_v35  ;;  %5607 = vmatmul.mubr.bf16.vlgmr.msra.gmra.mrb[44].mxu1 %v12008_v35  ;;  %v12095_v35 = vld [vmem:[#allocation8 + $0x3c0] ss:$16 sps:$4 sm:$0xff]  }
 0x686   : > { %5532 = vmatpush1.bf16.msra.mxu0 %v12011_v10  ;;  %5618 = vmatpush1.bf16.msra.mxu1 %v12014_v42  ;;  %v12100_v10 = vld [vmem:[#allocation8 + $0x3cc] ss:$16 sps:$4 sm:$0xff]   ;;  %v12103_v42 = vld [vmem:[#allocation8 + $0x3e4] ss:$16 sps:$4 sm:$0xff]  }
 0x687   : > { %5533 = vmatprep.subr.bf16.mxu0 %v12019_v44  ;;  %5619 = vmatprep.subr.bf16.mxu1 %v12022_v45  ;;  %v12106_v44 = vld [vmem:[#allocation8 + $0x3ec] ss:$16 sps:$4 sm:$0xff]  }
 0x68a   : > { %5534 = vmatpush1.bf16.msra.mxu0 %v12017_v12  ;;  %5620 = vmatpush1.bf16.msra.mxu1 %v12020_v46  ;;  %v12101_v12 = vld [vmem:[#allocation8 + $0x3e0] ss:$16 sps:$4 sm:$0xff]   ;;  %v12104_v46 = vld [vmem:[#allocation8 + $0x3e8] ss:$16 sps:$4 sm:$0xff]  }
 0x68b   : > { %5535 = vmatprep.subr.bf16.mxu0 %v12025_v18  ;;  %5621 = vmatprep.subr.bf16.mxu1 %v12028_v11 }
 0x68e   : > { %5536 = vmatpush1.bf16.msra.mxu0 %v12023_v16  ;;  %5622 = vmatpush1.bf16.msra.mxu1 %v12026_v47  ;;  %v4806_v47 = vld [vmem:[%s13759_s9] sm:$0xf] }
 0x68f   : > { %5537 = vmatprep.subr.bf16.mxu0 %v12031_v48  ;;  %5623 = vmatprep.subr.bf16.mxu1 %v12034_v50  ;;  %v4811_v48 = vrot.slane %v4806_v47, %v13129_v7  ;;  %v4819_v50 = vrot.slane %v4806_v47, %v13120_v3 }
 0x692   : > { %5538 = vmatpush1.bf16.msra.mxu0 %v12029_v52  ;;  %5624 = vmatpush1.bf16.msra.mxu1 %v12032_v5  ;;  %v4815_v52 = vrot.slane %v4806_v47, %v13132_v9 }
 0x693   : > { %5539 = vmatprep.subr.bf16.mxu0 %v12037_v14  ;;  %5625 = vmatprep.subr.bf16.mxu1 %v12040_v58  ;;  %v4823_v58 = vrot.slane %v4806_v47, %v13126_v6  ;;  %v5807_v47 = vld [vmem:[#allocation10 + $0x68] sm:$0xff] }
 0x696   : > { %5540 = vmatpush1.bf16.msra.mxu0 %v12035_v56  ;;  %5626 = vmatpush1.bf16.msra.mxu1 %v12038_v59 }
 0x697   : > { %5541 = vmatprep.subr.bf16.mxu0 %v12043_v60  ;;  %5627 = vmatprep.subr.bf16.mxu1 %v12046_v61 }
 0x69a   : > { %5542 = vmatpush1.bf16.msra.mxu0 %v12041_v57  ;;  %5628 = vmatpush1.bf16.msra.mxu1 %v12044_v41 }
 0x69b   : > { %5543 = vmatprep.subr.bf16.mxu0 %v12049_v19  ;;  %5629 = vmatprep.subr.bf16.mxu1 %v12052_v37  ;;  %v12566_v37 = vld [vmem:[%s13079_s18] sm:$0xff] }
 0x69e   : > { %5544 = vmatpush1.bf16.msra.mxu0 %v12047_v23  ;;  %5630 = vmatpush1.bf16.msra.mxu1 %v12050_v62 }
 0x69f   : > { %5545 = vmatprep.subr.bf16.mxu0 %v12055_v28  ;;  %5631 = vmatprep.subr.bf16.mxu1 %v12058_v43 }
 0x6a2   : > { %5546 = vmatpush1.bf16.msra.mxu0 %v12053_v15  ;;  %5632 = vmatpush1.bf16.msra.mxu1 %v12056_v49  ;;  %v12567_v49 = vld [vmem:[%s13079_s18 + $0x8] sm:$0xff] }
 0x6a3   : > { %5547 = vmatprep.subr.bf16.mxu0 %v12061_v63  ;;  %5633 = vmatprep.subr.bf16.mxu1 %v12064_v39 }
 0x6a6   : > { %5548 = vmatpush1.bf16.msra.mxu0 %v12059_v53  ;;  %5634 = vmatpush1.bf16.msra.mxu1 %v12062_v54 }
 0x6a7   : > { %5549 = vmatprep.subr.bf16.mxu0 %v12067_v0  ;;  %5635 = vmatprep.subr.bf16.mxu1 %v12070_v8  ;;  %v12568_v0 = vld [vmem:[%s13079_s18 + $0x20] sm:$0x3f] }
 0x6aa   : > { %5550 = vmatpush1.bf16.msra.mxu0 %v12065_v4  ;;  %5636 = vmatpush1.bf16.msra.mxu1 %v12068_v40  ;;  %v12569_v4 = vld [vmem:[%s13079_s18 + $0x10] sm:$0xff] }
 0x6ab   : > { %5551 = vmatprep.subr.bf16.mxu0 %v12073_v17  ;;  %5637 = vmatprep.subr.bf16.mxu1 %v12076_v27  ;;  %v12570_v27 = vld [vmem:[%s13079_s18 + $0x30] sm:$0x3f] }
 0x6ae   : > { %5552 = vmatpush1.bf16.msra.mxu0 %v12071_v21  ;;  %5638 = vmatpush1.bf16.msra.mxu1 %v12074_v24  ;;  %v12571_v24 = vld [vmem:[%s13079_s18 + $0x28] sm:$0x3f] }
 0x6af   : > { %v4400_v29 = vpop.permute.xlu0 %4399  ;;  %5553 = vmatprep.subr.bf16.mxu0 %v12079_v51  ;;  %5639 = vmatprep.subr.bf16.mxu1 %v12082_v2 }
 0x6b0   : > { %4405 = vst.msk [vmem:[#allocation2 + $0x8] sm:$0xf] %vm3869_vm8, %v4400_v29  ;;  %v12572_v29 = vld [vmem:[%s13079_s18 + $0x18] sm:$0xff] }
 0x6b1   : > { %v4402_v31 = vpop.permute.xlu1 %4401 }
 0x6b2   : > { %4406 = vst.msk [vmem:[#allocation2 + $0x18] sm:$0x7] %vm3871_vm9, %v4402_v31  ;;  %5554 = vmatpush1.bf16.msra.mxu0 %v12077_v32  ;;  %5640 = vmatpush1.bf16.msra.mxu1 %v12080_v20  ;;  %v12573_v31 = vld [vmem:[%s13079_s18 + $0x38] sm:$0x3f]  ;;  %s677_s18 = scalar_lea.vmem %s13803_s16, %s10985_s27 }
 0x6b3   : > { %5555 = vmatprep.subr.bf16.mxu0 %v12085_v36  ;;  %5641 = vmatprep.subr.bf16.mxu1 %v12088_v22 }
 0x6b6   : > { %5556 = vmatpush1.bf16.msra.mxu0 %v12083_v25  ;;  %5642 = vmatpush1.bf16.msra.mxu1 %v12086_v26 }
 0x6b7   : > { %5557 = vmatprep.subr.bf16.mxu0 %v12091_v30  ;;  %5643 = vmatprep.subr.bf16.mxu1 %v12094_v33 }
 0x6b9   : > { %v12107_v11 = vld [vmem:[#allocation2 + $0x8] ss:$16 sps:$4 sm:$0x7f]  }
 0x6ba   : > { %5558 = vmatpush1.bf16.msra.mxu0 %v12089_v55  ;;  %5644 = vmatpush1.bf16.msra.mxu1 %v12092_v13 }
 0x6bb   : > { %5559 = vmatprep.subr.bf16.mxu0 %v12097_v34  ;;  %5645 = vmatprep.subr.bf16.mxu1 %v12100_v10  ;;  %v5794_v34 = vld [vmem:[#allocation10] sm:$0xff] }
 0x6bc   : > { %v5798_v10 = vld [vmem:[#allocation10 + $0x20] sm:$0xff] }
 0x6be   : > { %5560 = vmatpush1.bf16.msra.mxu0 %v12095_v35  ;;  %5646 = vmatpush1.bf16.msra.mxu1 %v12098_v38  ;;  %v5795_v35 = vld [vmem:[#allocation10 + $0x8] sm:$0xff]  ;;  %v10471_v38 = vcombine.low %v5794_v34, %v5798_v10 }
 0x6bf   : > { %v4667_v45 = vpop.permute.xlu0 %4666  ;;  %5561 = vmatprep.subr.bf16.mxu0 %v12103_v42  ;;  %5647 = vmatprep.subr.bf16.mxu1 %v12106_v44  ;;  %v10472_v42 = vcombine.high %v5794_v34, %v5798_v10  ;;  %v5799_v44 = vld [vmem:[#allocation10 + $0x28] sm:$0xff] }
 0x6c0   : > { %4672 = vst.msk [vmem:[#allocation2 + $0xc] sm:$0xf] %vm3869_vm8, %v4667_v45  ;;  %v5802_v45 = vld [vmem:[#allocation10 + $0x40] sm:$0xff] }
 0x6c1   : > { %v4669_v18 = vpop.permute.xlu1 %4668 }
 0x6c2   : > { %4673 = vst.msk [vmem:[#allocation2 + $0x1c] sm:$0x7] %vm3871_vm9, %v4669_v18  ;;  %5562 = vmatpush1.bf16.msra.mxu0 %v12101_v12  ;;  %5648 = vmatpush1.bf16.msra.mxu1 %v12104_v46  ;;  %v5806_v12 = vld [vmem:[#allocation10 + $0x60] sm:$0xff]  ;;  %v10473_v46 = vcombine.low %v5795_v35, %v5799_v44  ;;  %v10474_v18 = vcombine.high %v5795_v35, %v5799_v44  ;;  %v5851_v44 = vld [vmem:[#allocation10 + $0x1c8] sm:$0xff] }
 0x6c3   : > { %7372 = vmatprep.subr.bf16.mxu0 %v10472_v42  ;;  %v5854_v42 = vld [vmem:[#allocation10 + $0x1e0] sm:$0xff] }
 0x6c4   : > { %7458 = vmatprep.subr.bf16.mxu1 %v10474_v18 }
 0x6c9   : > { %v12109_v16 = vld [vmem:[#allocation2 + $0xc] ss:$16 sps:$4 sm:$0x7f]  }
 0x6ca   : > { %5563 = vmatprep.mubr.bf16.mxu0 %v12109_v16  ;;  %5649 = vmatprep.mubr.bf16.mxu1 %v12109_v16  ;;  %v5803_v16 = vld [vmem:[#allocation10 + $0x48] sm:$0xff] }
 0x6cb   : > { %5564 = vmatmul.mubr.bf16.vlgmr.msra.gmra.mrb[44].mxu0 %v12107_v11  ;;  %5650 = vmatmul.mubr.bf16.vlgmr.msra.gmra.mrb[44].mxu1 %v12107_v11  ;;  %v10480_v11 = vcombine.high %v5802_v45, %v5806_v12 }
 0x6cc   : > { %7373 = vmatpush1.bf16.msra.mxu0 %v10471_v38  ;;  %7459 = vmatpush1.bf16.msra.mxu1 %v10473_v46  ;;  %v5850_v38 = vld [vmem:[#allocation10 + $0x1c0] sm:$0xff] }
 0x6cd   : > { %7374 = vmatprep.subr.bf16.mxu0 %v10480_v11  ;;  %v10528_v18 = vcombine.high %v5850_v38, %v5854_v42 }
 0x79e   : > { %v5565_v5 = vpop.f32.mrb[44].mxu0  ;;  %v5651_v14 = vpop.f32.mrb[44].mxu1 }
 0x79f   : > { %v11155_v56 = vadd.f32 %v5565_v5, %v4811_v48  ;;  %v5567_v59 = vpop.f32.mrb[45].mxu0  ;;  %v5653_v60 = vpop.f32.mrb[45].mxu1  ;;  %v11159_v61 = vadd.f32 %v5651_v14, %v4819_v50  ;;  %v5811_v5 = vld [vmem:[#allocation10 + $0x88] sm:$0xff] }
 0x7a0   : > { %v11156_v57 = vadd.f32 %v5567_v59, %v4815_v52  ;;  %v5569_v41 = vpop.f32.mrb[46].mxu0  ;;  %v5655_v19 = vpop.f32.mrb[46].mxu1  ;;  %v11160_v39 = vadd.f32 %v5653_v60, %v4823_v58  ;;  %v5815_v14 = vld [vmem:[#allocation10 + $0xa8] sm:$0xff] }
 0x7a1   : > { %v13505_v23 = vadd.f32 %v12566_v37, %v11155_v56  ;;  %v11157_v62 = vadd.f32 %v5569_v41, %v4811_v48  ;;  %v11161_v28 = vadd.f32 %v5655_v19, %v4819_v50  ;;  %v5571_v43 = vpop.f32.mrb[47].mxu0  ;;  %v5657_v15 = vpop.f32.mrb[47].mxu1  ;;  %v13514_v40 = vadd.f32 %v12569_v4, %v11159_v61  ;;  %v5810_v48 = vld [vmem:[#allocation10 + $0x80] sm:$0xff]  ;;  %v5819_v41 = vld [vmem:[#allocation10 + $0xc8] sm:$0xff] }
 0x7a2   : > { %v13508_v63 = vadd.f32 %v12567_v49, %v11156_v57  ;;  %v11158_v53 = vadd.f32 %v5571_v43, %v4815_v52  ;;  %v11162_v54 = vadd.f32 %v5657_v15, %v4823_v58  ;;  %v13527_v32 = vadd.f32 %v12572_v29, %v11160_v39  ;;  %v5814_v52 = vld [vmem:[#allocation10 + $0xa0] sm:$0xff]  ;;  %v5823_v19 = vld [vmem:[#allocation10 + $0xe8] sm:$0xff] }
 0x7a3   : > { %v13511_v8 = vadd.f32 %v12568_v0, %v11157_v62  ;;  %v13519_v21 = vadd.f32 %v12570_v27, %v11161_v28  ;;  %v10482_v50 = vcombine.high %v5803_v16, %v5807_v47  ;;  %v10479_v58 = vcombine.low %v5802_v45, %v5806_v12  ;;  %v5818_v61 = vld [vmem:[#allocation10 + $0xc0] sm:$0xff]  ;;  %v5827_v39 = vld [vmem:[#allocation10 + $0x108] sm:$0xff] }
 0x7a4   : > { %v5670_v17 = vadd.f32 %v13508_v63, %v13505_v23  ;;  %v13522_v51 = vadd.f32 %v12571_v24, %v11158_v53  ;;  %v13532_v36 = vadd.f32 %v12573_v31, %v11162_v54  ;;  %v10481_v56 = vcombine.low %v5803_v16, %v5807_v47  ;;  %v5822_v57 = vld [vmem:[#allocation10 + $0xe0] sm:$0xff]  ;;  %v5831_v53 = vld [vmem:[#allocation10 + $0x128] sm:$0xff] }
 0x7a5   : > { %v5676_v2 = vsel %vm5675_vm10, %v13511_v8, 0.0  ;;  %v5679_v30 = vsel %vm5675_vm10, %v13519_v21, 0.0  ;;  %v10488_v59 = vcombine.high %v5810_v48, %v5814_v52  ;;  %7460 = vmatprep.subr.bf16.mxu1 %v10482_v50  ;;  %v10490_v60 = vcombine.high %v5811_v5, %v5815_v14  ;;  %7375 = vmatpush1.bf16.msra.mxu0 %v10479_v58  ;;  %v5826_v15 = vld [vmem:[#allocation10 + $0x100] sm:$0xff]  ;;  %v5839_v29 = vld [vmem:[#allocation10 + $0x168] sm:$0xff] }
 0x7a6   : > { %v5677_v20 = vsel %vm5675_vm10, %v13522_v51, 0.0  ;;  %v5671_v22 = vadd.f32 %v5670_v17, %v13514_v40  ;;  %v5681_v55 = vsel %vm5675_vm10, %v13532_v36, 0.0  ;;  %v10487_v37 = vcombine.low %v5810_v48, %v5814_v52  ;;  %7461 = vmatpush1.bf16.msra.mxu1 %v10481_v56  ;;  %v5830_v49 = vld [vmem:[#allocation10 + $0x120] sm:$0xff]  ;;  %v5855_v45 = vld [vmem:[#allocation10 + $0x1e8] sm:$0xff] }
 0x7a7   : > { %v5678_v25 = vadd.f32 %v5677_v20, %v5676_v2  ;;  %7376 = vmatprep.subr.bf16.mxu0 %v10488_v59  ;;  %v10489_v62 = vcombine.low %v5811_v5, %v5815_v14  ;;  %v10496_v28 = vcombine.high %v5818_v61, %v5822_v57  ;;  %7462 = vmatprep.subr.bf16.mxu1 %v10490_v60  ;;  %v5834_v27 = vld [vmem:[#allocation10 + $0x140] sm:$0xff]  ;;  %v5835_v2 = vld [vmem:[#allocation10 + $0x148] sm:$0xff] }
 0x7a8   : > { %v5672_v26 = vadd.f32 %v5671_v22, %v13527_v32  ;;  %v10498_v43 = vcombine.high %v5819_v41, %v5823_v19  ;;  %v10495_v54 = vcombine.low %v5818_v61, %v5822_v57  ;;  %v10497_v0 = vcombine.low %v5819_v41, %v5823_v19  ;;  %v5838_v24 = vld [vmem:[#allocation10 + $0x160] sm:$0xff]  ;;  %v5859_v48 = vld [vmem:[#allocation10 + $0x208] sm:$0xff] }
 0x7a9   : > { %v5680_v33 = vadd.f32 %v5679_v30, %v5678_v25  ;;  %7377 = vmatpush1.bf16.msra.mxu0 %v10487_v37  ;;  %v10504_v4 = vcombine.high %v5826_v15, %v5830_v49  ;;  %v10506_v17 = vcombine.high %v5827_v39, %v5831_v53  ;;  %v10503_v20 = vcombine.low %v5826_v15, %v5830_v49  ;;  %v5846_v30 = vld [vmem:[#allocation10 + $0x1a0] sm:$0xff]  ;;  %v5863_v50 = vld [vmem:[#allocation10 + $0x228] sm:$0xff] }
 0x7aa   : > { %5673 = vadd.xlane.f32.xlu1 %v5672_v26  ;;  %7463 = vmatpush1.bf16.msra.mxu1 %v10489_v62  ;;  %v10505_v31 = vcombine.low %v5827_v39, %v5831_v53  ;;  %v10512_v22 = vcombine.high %v5834_v27, %v5838_v24  ;;  %v10514_v25 = vcombine.high %v5835_v2, %v5839_v29  ;;  %v5842_v26 = vld [vmem:[#allocation10 + $0x180] sm:$0xff]  ;;  %v5867_v60 = vld [vmem:[#allocation10 + $0x248] sm:$0xff] }
 0x7ab   : > { %v5682_v13 = vadd.f32 %v5681_v55, %v5680_v33  ;;  %7378 = vmatprep.subr.bf16.mxu0 %v10496_v28  ;;  %7464 = vmatprep.subr.bf16.mxu1 %v10498_v43  ;;  %v5843_v33 = vld [vmem:[#allocation10 + $0x188] sm:$0xff]  ;;  %v10513_v34 = vcombine.low %v5835_v2, %v5839_v29  ;;  %v10520_v10 = vcombine.high %v5842_v26, %v5846_v30  ;;  %v5858_v16 = vld [vmem:[#allocation10 + $0x200] sm:$0xff] }
 0x7ac   : > { %v5847_v55 = vld [vmem:[#allocation10 + $0x1a8] sm:$0xff]  ;;  %v10519_v12 = vcombine.low %v5842_v26, %v5846_v30  ;;  %v10530_v11 = vcombine.high %v5851_v44, %v5855_v45  ;;  %v5862_v47 = vld [vmem:[#allocation10 + $0x220] sm:$0xff]  ;;  %v10527_v52 = vcombine.low %v5850_v38, %v5854_v42  ;;  %v10529_v5 = vcombine.low %v5851_v44, %v5855_v45 }
 0x7ad   : > { %5683 = vadd.xlane.f32.xlu0 %v5682_v13  ;;  %7379 = vmatpush1.bf16.msra.mxu0 %v10495_v54  ;;  %v10511_v13 = vcombine.low %v5834_v27, %v5838_v24  ;;  %v10522_v35 = vcombine.high %v5843_v33, %v5847_v55  ;;  %v10521_v46 = vcombine.low %v5843_v33, %v5847_v55  ;;  %v5866_v56 = vld [vmem:[#allocation10 + $0x240] sm:$0xff]  ;;  %v5871_v61 = vld [vmem:[#allocation10 + $0x268] sm:$0xff] }
 0x7ae   : > { %7465 = vmatpush1.bf16.msra.mxu1 %v10497_v0  ;;  %7380 = vmatprep.subr.bf16.mxu0 %v10504_v4  ;;  %v10536_v14 = vcombine.high %v5858_v16, %v5862_v47  ;;  %v10538_v58 = vcombine.high %v5859_v48, %v5863_v50  ;;  %v5870_v59 = vld [vmem:[#allocation10 + $0x260] sm:$0xff]  ;;  %v10535_v57 = vcombine.low %v5858_v16, %v5862_v47  ;;  %v5879_v42 = vld [vmem:[#allocation10 + $0x2a8] sm:$0xff] }
 0x7af   : > { %7466 = vmatprep.subr.bf16.mxu1 %v10506_v17  ;;  %v10537_v41 = vcombine.low %v5859_v48, %v5863_v50  ;;  %v10544_v19 = vcombine.high %v5866_v56, %v5870_v59  ;;  %v10546_v37 = vcombine.high %v5867_v60, %v5871_v61  ;;  %v10543_v62 = vcombine.low %v5866_v56, %v5870_v59  ;;  %v5887_v47 = vld [vmem:[#allocation10 + $0x2e8] sm:$0xff] }
 0x7b0   : > { %v10545_v28 = vcombine.low %v5867_v60, %v5871_v61  ;;  %v5895_v60 = vld [vmem:[#allocation10 + $0x328] sm:$0xff]  ;;  %v5898_v61 = vld [vmem:[#allocation10 + $0x340] sm:$0xff] }
 0x7b1   : > { %7381 = vmatpush1.bf16.msra.mxu0 %v10503_v20 }
 0x7b2   : > { %7467 = vmatpush1.bf16.msra.mxu1 %v10505_v31  ;;  %7382 = vmatprep.subr.bf16.mxu0 %v10512_v22 }
 0x7b3   : > { %7468 = vmatprep.subr.bf16.mxu1 %v10514_v25 }
 0x7b5   : > { %7383 = vmatpush1.bf16.msra.mxu0 %v10511_v13 }
 0x7b6   : > { %7469 = vmatpush1.bf16.msra.mxu1 %v10513_v34  ;;  %7384 = vmatprep.subr.bf16.mxu0 %v10520_v10  ;;  %v5874_v34 = vld [vmem:[#allocation10 + $0x280] sm:$0xff] }
 0x7b7   : > { %7470 = vmatprep.subr.bf16.mxu1 %v10522_v35  ;;  %v5878_v10 = vld [vmem:[#allocation10 + $0x2a0] sm:$0xff]  ;;  %v5875_v35 = vld [vmem:[#allocation10 + $0x288] sm:$0xff] }
 0x7b8   : > { %v10552_v38 = vcombine.high %v5874_v34, %v5878_v10  ;;  %v10551_v44 = vcombine.low %v5874_v34, %v5878_v10  ;;  %v10553_v45 = vcombine.low %v5875_v35, %v5879_v42  ;;  %v13592_v10 = vld [vmem:[#allocation10 + $0x428] sm:$0xff] }
 0x7b9   : > { %7385 = vmatpush1.bf16.msra.mxu0 %v10519_v12  ;;  %v10554_v12 = vcombine.high %v5875_v35, %v5879_v42 }
 0x7ba   : > { %7471 = vmatpush1.bf16.msra.mxu1 %v10521_v46  ;;  %7386 = vmatprep.subr.bf16.mxu0 %v10528_v18  ;;  %v5882_v46 = vld [vmem:[#allocation10 + $0x2c0] sm:$0xff] }
 0x7bb   : > { %7472 = vmatprep.subr.bf16.mxu1 %v10530_v11  ;;  %v5886_v18 = vld [vmem:[#allocation10 + $0x2e0] sm:$0xff]  ;;  %v5883_v11 = vld [vmem:[#allocation10 + $0x2c8] sm:$0xff] }
 0x7bc   : > { %v10560_v16 = vcombine.high %v5882_v46, %v5886_v18  ;;  %v10559_v48 = vcombine.low %v5882_v46, %v5886_v18  ;;  %v10561_v50 = vcombine.low %v5883_v11, %v5887_v47 }
 0x7bd   : > { %7387 = vmatpush1.bf16.msra.mxu0 %v10527_v52  ;;  %v10562_v52 = vcombine.high %v5883_v11, %v5887_v47  ;;  %v5669_v47 = vld [vmem:[%s13765_s15] sm:$0xf] }
 0x7be   : > { %7473 = vmatpush1.bf16.msra.mxu1 %v10529_v5  ;;  %7388 = vmatprep.subr.bf16.mxu0 %v10536_v14  ;;  %v5890_v5 = vld [vmem:[#allocation10 + $0x300] sm:$0xff] }
 0x7bf   : > { %7474 = vmatprep.subr.bf16.mxu1 %v10538_v58  ;;  %v5894_v14 = vld [vmem:[#allocation10 + $0x320] sm:$0xff]  ;;  %v5891_v58 = vld [vmem:[#allocation10 + $0x308] sm:$0xff] }
 0x7c0   : > { %v10567_v56 = vcombine.low %v5890_v5, %v5894_v14  ;;  %v10568_v59 = vcombine.high %v5890_v5, %v5894_v14 }
 0x7c1   : > { %7389 = vmatpush1.bf16.msra.mxu0 %v10535_v57  ;;  %v5902_v57 = vld [vmem:[#allocation10 + $0x360] sm:$0xff] }
 0x7c2   : > { %7475 = vmatpush1.bf16.msra.mxu1 %v10537_v41  ;;  %7390 = vmatprep.subr.bf16.mxu0 %v10544_v19  ;;  %v10569_v41 = vcombine.low %v5891_v58, %v5895_v60  ;;  %v10570_v19 = vcombine.high %v5891_v58, %v5895_v60 }
 0x7c3   : > { %7476 = vmatprep.subr.bf16.mxu1 %v10546_v37  ;;  %v10576_v37 = vcombine.high %v5898_v61, %v5902_v57 }
 0x7c5   : > { %7391 = vmatpush1.bf16.msra.mxu0 %v10543_v62  ;;  %v5899_v62 = vld [vmem:[#allocation10 + $0x348] sm:$0xff] }
 0x7c6   : > { %7477 = vmatpush1.bf16.msra.mxu1 %v10545_v28  ;;  %7392 = vmatprep.subr.bf16.mxu0 %v10552_v38  ;;  %v5903_v28 = vld [vmem:[#allocation10 + $0x368] sm:$0xff] }
 0x7c7   : > { %7478 = vmatprep.subr.bf16.mxu1 %v10554_v12 }
 0x7c9   : > { %7393 = vmatpush1.bf16.msra.mxu0 %v10551_v44 }
 0x7ca   : > { %7479 = vmatpush1.bf16.msra.mxu1 %v10553_v45  ;;  %7394 = vmatprep.subr.bf16.mxu0 %v10560_v16  ;;  %v5668_v16 = vld [vmem:[%s13764_s14] sm:$0xf] }
 0x7cb   : > { %7480 = vmatprep.subr.bf16.mxu1 %v10562_v52  ;;  %v5740_v52 = vrot.slane %v5668_v16, %v13132_v9  ;;  %v5736_v58 = vrot.slane %v5668_v16, %v13129_v7 }
 0x7cd   : > { %7395 = vmatpush1.bf16.msra.mxu0 %v10559_v48  ;;  %v5744_v48 = vrot.slane %v5668_v16, %v13120_v3 }
 0x7ce   : > { %7481 = vmatpush1.bf16.msra.mxu1 %v10561_v50  ;;  %7396 = vmatprep.subr.bf16.mxu0 %v10568_v59  ;;  %v5773_v59 = vrot.slane %v5669_v47, %v13120_v3 }
 0x7cf   : > { %7482 = vmatprep.subr.bf16.mxu1 %v10570_v19 }
 0x7d1   : > { %7397 = vmatpush1.bf16.msra.mxu0 %v10567_v56 }
 0x7d2   : > { %7483 = vmatpush1.bf16.msra.mxu1 %v10569_v41  ;;  %7398 = vmatprep.subr.bf16.mxu0 %v10576_v37  ;;  %v5765_v41 = vrot.slane %v5669_v47, %v13129_v7  ;;  %v5748_v37 = vrot.slane %v5668_v16, %v13126_v6  ;;  %v5946_v16 = vld [vmem:[#allocation10 + $0x4c0] sm:$0xff] }
 0x837   : > { %v5674_v43 = vpop.xlane.xlu1 %5673 }
 0x838   : > { %v5686_v15 = vmul.f32 0.001953125, %v5674_v43  ;;  %v5906_v43 = vld [vmem:[#allocation10 + $0x380] sm:$0xff] }
 0x83a   : > { %v13541_v49 = vsub.f32 %v13505_v23, %v5686_v15  ;;  %v13544_v39 = vsub.f32 %v13508_v63, %v5686_v15  ;;  %v5684_v53 = vpop.xlane.xlu0 %5683  ;;  %v13547_v54 = vsub.f32 %v13514_v40, %v5686_v15  ;;  %v13550_v4 = vsub.f32 %v13527_v32, %v5686_v15 }
 0x83b   : > { %v5687_v0 = vmul.f32 0.001953125, %v5684_v53  ;;  %v10578_v15 = vcombine.high %v5899_v62, %v5903_v28  ;;  %v5910_v53 = vld [vmem:[#allocation10 + $0x3a0] sm:$0xff] }
 0x83c   : > { %v5696_v17 = vmul.f32 %v13541_v49, %v13541_v49  ;;  %v5697_v27 = vmul.f32 %v13544_v39, %v13544_v39  ;;  %v5698_v32 = vmul.f32 %v13547_v54, %v13547_v54 }
 0x83d   : > { %v13557_v23 = vsub.f32 %v13511_v8, %v5687_v0  ;;  %v13560_v63 = vsub.f32 %v13522_v51, %v5687_v0  ;;  %v13563_v24 = vsub.f32 %v13519_v21, %v5687_v0  ;;  %v13566_v40 = vsub.f32 %v13532_v36, %v5687_v0  ;;  %v5907_v0 = vld [vmem:[#allocation10 + $0x388] sm:$0xff]  ;;  %7484 = vmatprep.subr.bf16.mxu1 %v10578_v15 }
 0x83e   : > { %v5704_v2 = vadd.f32 %v5697_v27, %v5696_v17  ;;  %v5699_v21 = vmul.f32 %v13550_v4, %v13550_v4  ;;  %v5911_v17 = vld [vmem:[#allocation10 + $0x3a8] sm:$0xff]  ;;  %v10575_v27 = vcombine.low %v5898_v61, %v5902_v57  ;;  %v5769_v57 = vrot.slane %v5669_v47, %v13132_v9 }
 0x83f   : > { %v5700_v29 = vmul.f32 %v13557_v23, %v13557_v23  ;;  %v5701_v8 = vmul.f32 %v13560_v63, %v13560_v63  ;;  %v5702_v51 = vmul.f32 %v13563_v24, %v13563_v24  ;;  %v5703_v36 = vmul.f32 %v13566_v40, %v13566_v40 }
 0x840   : > { %v5705_v20 = vadd.f32 %v5704_v2, %v5698_v32  ;;  %v10577_v32 = vcombine.low %v5899_v62, %v5903_v28  ;;  %v10584_v2 = vcombine.high %v5906_v43, %v5910_v53  ;;  %7399 = vmatpush1.bf16.msra.mxu0 %v10575_v27 }
 0x841   : > { %v5709_v31 = vsel %vm5675_vm10, %v5700_v29, 0.0  ;;  %v5710_v22 = vsel %vm5675_vm10, %v5701_v8, 0.0  ;;  %v5712_v30 = vsel %vm5675_vm10, %v5702_v51, 0.0  ;;  %v5714_v55 = vsel %vm5675_vm10, %v5703_v36, 0.0  ;;  %v5914_v8 = vld [vmem:[#allocation10 + $0x3c0] sm:$0xff] }
 0x842   : > { %v5706_v25 = vadd.f32 %v5705_v20, %v5699_v21  ;;  %v5711_v26 = vadd.f32 %v5710_v22, %v5709_v31  ;;  %v10586_v29 = vcombine.high %v5907_v0, %v5911_v17  ;;  %v5918_v51 = vld [vmem:[#allocation10 + $0x3e0] sm:$0xff]  ;;  %v5915_v21 = vld [vmem:[#allocation10 + $0x3c8] sm:$0xff]  ;;  %v10583_v36 = vcombine.low %v5906_v43, %v5910_v53  ;;  %7485 = vmatpush1.bf16.msra.mxu1 %v10577_v32 }
 0x843   : > { %v5919_v20 = vld [vmem:[#allocation10 + $0x3e8] sm:$0xff]  ;;  %7400 = vmatprep.subr.bf16.mxu0 %v10584_v2  ;;  %v10585_v31 = vcombine.low %v5907_v0, %v5911_v17  ;;  %v10592_v22 = vcombine.high %v5914_v8, %v5918_v51 }
 0x844   : > { %5707 = vadd.xlane.f32.xlu0 %v5706_v25  ;;  %v5713_v33 = vadd.f32 %v5712_v30, %v5711_v26  ;;  %7486 = vmatprep.subr.bf16.mxu1 %v10586_v29  ;;  %v10594_v25 = vcombine.high %v5915_v21, %v5919_v20  ;;  %v10591_v26 = vcombine.low %v5914_v8, %v5918_v51  ;;  %v5931_v51 = vld [vmem:[#allocation10 + $0x448] sm:$0xff] }
 0x845   : > { %7401 = vmatpush1.bf16.msra.mxu0 %v10583_v36  ;;  %v10593_v30 = vcombine.low %v5915_v21, %v5919_v20  ;;  %v5935_v21 = vld [vmem:[#allocation10 + $0x468] sm:$0xff] }
 0x846   : > { %v5715_v13 = vadd.f32 %v5714_v55, %v5713_v33  ;;  %7487 = vmatpush1.bf16.msra.mxu1 %v10585_v31  ;;  %7402 = vmatprep.subr.bf16.mxu0 %v10592_v22  ;;  %v13584_v33 = vld [vmem:[#allocation10 + $0x400] sm:$0xff] }
 0x847   : > { %7488 = vmatprep.subr.bf16.mxu1 %v10594_v25  ;;  %v13586_v55 = vld [vmem:[#allocation10 + $0x420] sm:$0xff] }
 0x848   : > { %5716 = vadd.xlane.f32.xlu0 %v5715_v13  ;;  %v13588_v13 = vld [vmem:[#allocation10 + $0x408] sm:$0xff]  ;;  %v10600_v34 = vcombine.high %v13584_v33, %v13586_v55  ;;  %v10599_v35 = vcombine.low %v13584_v33, %v13586_v55  ;;  %v5938_v25 = vld [vmem:[#allocation10 + $0x480] sm:$0xff] }
 0x849   : > { %7403 = vmatpush1.bf16.msra.mxu0 %v10591_v26  ;;  %v10601_v38 = vcombine.low %v13588_v13, %v13592_v10  ;;  %v10602_v42 = vcombine.high %v13588_v13, %v13592_v10 }
 0x84a   : > { %7489 = vmatpush1.bf16.msra.mxu1 %v10593_v30  ;;  %7415 = vmatprep.subr.bf16.mxu0 %v10600_v34  ;;  %v10610_v30 = vcombine.high %v5931_v51, %v5935_v21  ;;  %v5942_v34 = vld [vmem:[#allocation10 + $0x4a0] sm:$0xff] }
 0x84b   : > { %7501 = vmatprep.subr.bf16.mxu1 %v10602_v42  ;;  %v5939_v42 = vld [vmem:[#allocation10 + $0x488] sm:$0xff]  ;;  %v10615_v33 = vcombine.low %v5938_v25, %v5942_v34 }
 0x8d1   : > { %v5708_v44 = vpop.xlane.xlu0 %5707 }
 0x8d2   : > { %v5718_v45 = vmul.f32 0.001953125, %v5708_v44  ;;  %v5943_v44 = vld [vmem:[#allocation10 + $0x4a8] sm:$0xff] }
 0x8d3   : > { %v10617_v55 = vcombine.low %v5939_v42, %v5943_v44 }
 0x8d4   : > { %v5720_v12 = vadd.f32 1e-05, %v5718_v45 }
 0x8d5   : > { %v5717_v46 = vpop.xlane.xlu0 %5716 }
 0x8d6   : > { %12558 = vrsqrt.f32 %v5720_v12  ;;  %v5719_v18 = vmul.f32 0.001953125, %v5717_v46  ;;  %v10609_v46 = vcombine.low %v5931_v51, %v5935_v21 }
 0x8d8   : > { %v5721_v11 = vadd.f32 1e-05, %v5719_v18  ;;  %v10616_v18 = vcombine.high %v5938_v25, %v5942_v34  ;;  %v5990_v34 = vld [vmem:[#allocation10 + $0x620] sm:$0xff] }
 0x8da   : > { %12560 = vrsqrt.f32 %v5721_v11  ;;  %v10618_v11 = vcombine.high %v5939_v42, %v5943_v44  ;;  %v5987_v42 = vld [vmem:[#allocation10 + $0x608] sm:$0xff] }
 0x8db   : > { %v5991_v44 = vld [vmem:[#allocation10 + $0x628] sm:$0xff] }
 0x8e0   : > { %v12559_v50 = vpop.eup %12558 }
 0x8e1   : > { %v5725_v5 = vmul.f32 %v12559_v50, %v13544_v39  ;;  %v5724_v14 = vmul.f32 %v12559_v50, %v13541_v49  ;;  %v5726_v56 = vmul.f32 %v12559_v50, %v13547_v54  ;;  %v5727_v19 = vmul.f32 %v12559_v50, %v13550_v4  ;;  %v5951_v50 = vld [vmem:[#allocation10 + $0x4e8] sm:$0xff] }
 0x8e2   : > { %v5777_v4 = vrot.slane %v5669_v47, %v13126_v6  ;;  %v5950_v47 = vld [vmem:[#allocation10 + $0x4e0] sm:$0xff] }
 0x8e3   : > { %v5755_v60 = vmul.f32 %v5744_v48, %v5726_v56  ;;  %v5754_v62 = vmul.f32 %v5740_v52, %v5725_v5  ;;  %v5753_v28 = vmul.f32 %v5736_v58, %v5724_v14  ;;  %v5756_v17 = vmul.f32 %v5748_v37, %v5727_v19  ;;  %v5959_v5 = vld [vmem:[#allocation10 + $0x528] sm:$0xff] }
 0x8e4   : > { %v12561_v61 = vpop.eup %12560  ;;  %v10624_v13 = vcombine.high %v5946_v16, %v5950_v47  ;;  %v10623_v14 = vcombine.low %v5946_v16, %v5950_v47  ;;  %v5994_v16 = vld [vmem:[#allocation10 + $0x640] sm:$0xff] }
 0x8e5   : > { %v5729_v39 = vmul.f32 %v12561_v61, %v13560_v63  ;;  %v5728_v49 = vmul.f32 %v12561_v61, %v13557_v23  ;;  %v5731_v54 = vmul.f32 %v12561_v61, %v13566_v40  ;;  %v5730_v43 = vmul.f32 %v12561_v61, %v13563_v24  ;;  %v5930_v40 = vld [vmem:[#allocation10 + $0x440] sm:$0xff] }
 0x8e6   : > { %v13621_v15 = vadd.f32 %v5773_v59, %v5755_v60  ;;  %v13624_v2 = vadd.f32 %v5769_v57, %v5754_v62  ;;  %v13628_v29 = vadd.f32 %v5765_v41, %v5753_v28  ;;  %v5934_v24 = vld [vmem:[#allocation10 + $0x460] sm:$0xff]  ;;  %v13644_v22 = vadd.f32 %v5777_v4, %v5756_v17 }
 0x8e7   : > { %v5758_v53 = vmul.f32 %v5740_v52, %v5729_v39  ;;  %v5757_v0 = vmul.f32 %v5736_v58, %v5728_v49  ;;  %v5760_v27 = vmul.f32 %v5748_v37, %v5731_v54  ;;  %v5759_v32 = vmul.f32 %v5744_v48, %v5730_v43  ;;  %v5947_v48 = vld [vmem:[#allocation10 + $0x4c8] sm:$0xff]  ;;  %v5962_v60 = vld [vmem:[#allocation10 + $0x540] sm:$0xff] }
 0x8e8   : > { %v10608_v26 = vcombine.high %v5930_v40, %v5934_v24  ;;  %v10607_v12 = vcombine.low %v5930_v40, %v5934_v24  ;;  %v10626_v10 = vcombine.high %v5947_v48, %v5951_v50  ;;  %v5955_v52 = vld [vmem:[#allocation10 + $0x508] sm:$0xff]  ;;  %v10625_v58 = vcombine.low %v5947_v48, %v5951_v50  ;;  %v5966_v61 = vld [vmem:[#allocation10 + $0x560] sm:$0xff] }
 0x8e9   : > { %v13626_v63 = vadd.f32 %v5769_v57, %v5758_v53  ;;  %v13630_v23 = vadd.f32 %v5765_v41, %v5757_v0  ;;  %v13632_v8 = vadd.f32 %v5777_v4, %v5760_v27  ;;  %v13634_v20 = vadd.f32 %v5773_v59, %v5759_v32  ;;  %v5963_v57 = vld [vmem:[#allocation10 + $0x548] sm:$0xff]  ;;  %v5970_v49 = vld [vmem:[#allocation10 + $0x580] sm:$0xff] }
 0x8ea   : > { %v10634_v59 = vcombine.high %v5955_v52, %v5959_v5  ;;  %v5967_v41 = vld [vmem:[#allocation10 + $0x568] sm:$0xff]  ;;  %v10633_v37 = vcombine.low %v5955_v52, %v5959_v5  ;;  %v10640_v39 = vcombine.high %v5962_v60, %v5966_v61  ;;  %v5974_v28 = vld [vmem:[#allocation10 + $0x5a0] sm:$0xff]  ;;  %v10639_v53 = vcombine.low %v5962_v60, %v5966_v61 }
 0x8eb   : > { %v13638_v36 = vpack.c.bf16 %v13626_v63, %v13624_v2  ;;  %v13642_v31 = vpack.c.bf16 %v13630_v23, %v13628_v29  ;;  %v13652_v45 = vpack.c.bf16 %v13632_v8, %v13644_v22  ;;  %v10642_v62 = vcombine.high %v5963_v57, %v5967_v41  ;;  %v5971_v54 = vld [vmem:[#allocation10 + $0x588] sm:$0xff]  ;;  %v5978_v4 = vld [vmem:[#allocation10 + $0x5c0] sm:$0xff] }
 0x8ec   : > { %v5975_v43 = vld [vmem:[#allocation10 + $0x5a8] sm:$0xff]  ;;  %v10641_v0 = vcombine.low %v5963_v57, %v5967_v41  ;;  %v10648_v17 = vcombine.high %v5970_v49, %v5974_v28  ;;  %v5982_v32 = vld [vmem:[#allocation10 + $0x5e0] sm:$0xff]  ;;  %v10647_v51 = vcombine.low %v5970_v49, %v5974_v28 }
 0x8ed   : > { %7404 = vmatprep.mubr.bf16.mxu0 %v13638_v36  ;;  %7490 = vmatprep.mubr.bf16.mxu1 %v13638_v36  ;;  %v10650_v27 = vcombine.high %v5971_v54, %v5975_v43  ;;  %v5979_v40 = vld [vmem:[#allocation10 + $0x5c8] sm:$0xff]  ;;  %v10649_v21 = vcombine.low %v5971_v54, %v5975_v43  ;;  %v10656_v25 = vcombine.high %v5978_v4, %v5982_v32  ;;  %v5998_v47 = vld [vmem:[#allocation10 + $0x660] sm:$0xff] }
 0x8ee   : > { %7405 = vmatmul.mubr.bf16.vlgmr.msra.gmra.mrb[48].mxu0 %v13642_v31  ;;  %7491 = vmatmul.mubr.bf16.vlgmr.msra.gmra.mrb[48].mxu1 %v13642_v31  ;;  %v5983_v24 = vld [vmem:[#allocation10 + $0x5e8] sm:$0xff]  ;;  %v6010_v60 = vld [vmem:[#allocation10 + $0x6c0] sm:$0xff] }
 0x8ef   : > { %7416 = vmatpush1.bf16.msra.mxu0 %v10599_v35  ;;  %7502 = vmatpush1.bf16.msra.mxu1 %v10601_v38  ;;  %v5954_v35 = vld [vmem:[#allocation10 + $0x500] sm:$0xff]  ;;  %v5995_v48 = vld [vmem:[#allocation10 + $0x648] sm:$0xff] }
 0x8f0   : > { %7447 = vmatprep.mubr.bf16.mxu0 %v13652_v45  ;;  %7533 = vmatprep.mubr.bf16.mxu1 %v13652_v45  ;;  %v5958_v38 = vld [vmem:[#allocation10 + $0x520] sm:$0xff]  ;;  %v5999_v50 = vld [vmem:[#allocation10 + $0x668] sm:$0xff] }
 0x8f1   : > { %7417 = vmatprep.subr.bf16.mxu0 %v10608_v26  ;;  %7503 = vmatprep.subr.bf16.mxu1 %v10610_v30  ;;  %v10632_v56 = vcombine.high %v5954_v35, %v5958_v38  ;;  %v10631_v19 = vcombine.low %v5954_v35, %v5958_v38  ;;  %v10658_v26 = vcombine.high %v5979_v40, %v5983_v24  ;;  %v5986_v30 = vld [vmem:[#allocation10 + $0x600] sm:$0xff]  ;;  %v6003_v52 = vld [vmem:[#allocation10 + $0x688] sm:$0xff] }
 0x8f2   : > { %v6002_v35 = vld [vmem:[#allocation10 + $0x680] sm:$0xff]  ;;  %v6007_v5 = vld [vmem:[#allocation10 + $0x6a8] sm:$0xff] }
 0x8f3   : > { %7418 = vmatpush1.bf16.msra.mxu0 %v10607_v12  ;;  %7504 = vmatpush1.bf16.msra.mxu1 %v10609_v46  ;;  %v10655_v12 = vcombine.low %v5978_v4, %v5982_v32  ;;  %v10657_v46 = vcombine.low %v5979_v40, %v5983_v24  ;;  %v6006_v38 = vld [vmem:[#allocation10 + $0x6a0] sm:$0xff]  ;;  %v6011_v57 = vld [vmem:[#allocation10 + $0x6c8] sm:$0xff] }
 0x8f4   : > { %7419 = vmatprep.subr.bf16.mxu0 %v10616_v18  ;;  %7505 = vmatprep.subr.bf16.mxu1 %v10618_v11  ;;  %v10664_v18 = vcombine.high %v5986_v30, %v5990_v34  ;;  %v10666_v11 = vcombine.high %v5987_v42, %v5991_v44  ;;  %v6014_v61 = vld [vmem:[#allocation10 + $0x6e0] sm:$0xff]  ;;  %v6015_v41 = vld [vmem:[#allocation10 + $0x6e8] sm:$0xff] }
 0x8f5   : > { %v6018_v49 = vld [vmem:[#allocation10 + $0x700] sm:$0xff]  ;;  %v6019_v54 = vld [vmem:[#allocation10 + $0x708] sm:$0xff] }
 0x8f6   : > { %v6022_v28 = vld [vmem:[#allocation10 + $0x720] sm:$0xff]  ;;  %v6023_v43 = vld [vmem:[#allocation10 + $0x728] sm:$0xff] }
 0x8f7   : > { %7420 = vmatpush1.bf16.msra.mxu0 %v10615_v33  ;;  %7506 = vmatpush1.bf16.msra.mxu1 %v10617_v55  ;;  %v10663_v33 = vcombine.low %v5986_v30, %v5990_v34  ;;  %v10665_v55 = vcombine.low %v5987_v42, %v5991_v44  ;;  %v6026_v4 = vld [vmem:[#allocation10 + $0x740] sm:$0xff]  ;;  %v6027_v40 = vld [vmem:[#allocation10 + $0x748] sm:$0xff] }
 0x8f8   : > { %7421 = vmatprep.subr.bf16.mxu0 %v10624_v13  ;;  %7507 = vmatprep.subr.bf16.mxu1 %v10626_v10  ;;  %v10672_v13 = vcombine.high %v5994_v16, %v5998_v47  ;;  %v10674_v10 = vcombine.high %v5995_v48, %v5999_v50  ;;  %v6030_v32 = vld [vmem:[#allocation10 + $0x760] sm:$0xff]  ;;  %v6031_v24 = vld [vmem:[#allocation10 + $0x768] sm:$0xff] }
 0x8f9   : > { %v6034_v30 = vld [vmem:[#allocation10 + $0x780] sm:$0xff]  ;;  %v6035_v42 = vld [vmem:[#allocation10 + $0x788] sm:$0xff] }
 0x8fa   : > { %v6038_v34 = vld [vmem:[#allocation10 + $0x7a0] sm:$0xff]  ;;  %v6039_v44 = vld [vmem:[#allocation10 + $0x7a8] sm:$0xff] }
 0x8fb   : > { %7422 = vmatpush1.bf16.msra.mxu0 %v10623_v14  ;;  %7508 = vmatpush1.bf16.msra.mxu1 %v10625_v58  ;;  %v10671_v14 = vcombine.low %v5994_v16, %v5998_v47  ;;  %v10673_v58 = vcombine.low %v5995_v48, %v5999_v50  ;;  %v6042_v16 = vld [vmem:[#allocation10 + $0x7c0] sm:$0xff]  ;;  %v6043_v48 = vld [vmem:[#allocation10 + $0x7c8] sm:$0xff] }
 0x8fc   : > { %7423 = vmatprep.subr.bf16.mxu0 %v10632_v56  ;;  %7509 = vmatprep.subr.bf16.mxu1 %v10634_v59  ;;  %v10680_v56 = vcombine.high %v6002_v35, %v6006_v38  ;;  %v10682_v59 = vcombine.high %v6003_v52, %v6007_v5  ;;  %v6046_v47 = vld [vmem:[#allocation10 + $0x7e0] sm:$0xff]  ;;  %v6047_v50 = vld [vmem:[#allocation10 + $0x7e8] sm:$0xff] }
 0x8ff   : > { %7424 = vmatpush1.bf16.msra.mxu0 %v10631_v19  ;;  %7510 = vmatpush1.bf16.msra.mxu1 %v10633_v37  ;;  %v10679_v19 = vcombine.low %v6002_v35, %v6006_v38  ;;  %v10681_v37 = vcombine.low %v6003_v52, %v6007_v5  ;;  %v5796_v35 = vld [vmem:[#allocation10 + $0x10] sm:$0xff]  ;;  %v5797_v52 = vld [vmem:[#allocation10 + $0x18] sm:$0xff] }
 0x900   : > { %7425 = vmatprep.subr.bf16.mxu0 %v10640_v39  ;;  %7511 = vmatprep.subr.bf16.mxu1 %v10642_v62  ;;  %v10688_v39 = vcombine.high %v6010_v60, %v6014_v61  ;;  %v10690_v62 = vcombine.high %v6011_v57, %v6015_v41  ;;  %v5800_v38 = vld [vmem:[#allocation10 + $0x30] sm:$0xff]  ;;  %v5801_v5 = vld [vmem:[#allocation10 + $0x38] sm:$0xff] }
 0x903   : > { %7426 = vmatpush1.bf16.msra.mxu0 %v10639_v53  ;;  %7512 = vmatpush1.bf16.msra.mxu1 %v10641_v0  ;;  %v10687_v53 = vcombine.low %v6010_v60, %v6014_v61  ;;  %v10689_v0 = vcombine.low %v6011_v57, %v6015_v41  ;;  %v5804_v60 = vld [vmem:[#allocation10 + $0x50] sm:$0xff]  ;;  %v5805_v57 = vld [vmem:[#allocation10 + $0x58] sm:$0xff] }
 0x904   : > { %7427 = vmatprep.subr.bf16.mxu0 %v10648_v17  ;;  %7513 = vmatprep.subr.bf16.mxu1 %v10650_v27  ;;  %v10696_v17 = vcombine.high %v6018_v49, %v6022_v28  ;;  %v10698_v27 = vcombine.high %v6019_v54, %v6023_v43  ;;  %v5808_v61 = vld [vmem:[#allocation10 + $0x70] sm:$0xff]  ;;  %v5809_v41 = vld [vmem:[#allocation10 + $0x78] sm:$0xff] }
 0x907   : > { %7428 = vmatpush1.bf16.msra.mxu0 %v10647_v51  ;;  %7514 = vmatpush1.bf16.msra.mxu1 %v10649_v21  ;;  %v10695_v51 = vcombine.low %v6018_v49, %v6022_v28  ;;  %v10697_v21 = vcombine.low %v6019_v54, %v6023_v43  ;;  %v10486_v49 = vcombine.high %v5805_v57, %v5809_v41  ;;  %v5812_v28 = vld [vmem:[#allocation10 + $0x90] sm:$0xff]  ;;  %v5813_v43 = vld [vmem:[#allocation10 + $0x98] sm:$0xff] }
 0x908   : > { %7429 = vmatprep.subr.bf16.mxu0 %v10656_v25  ;;  %7515 = vmatprep.subr.bf16.mxu1 %v10658_v26  ;;  %v10704_v25 = vcombine.high %v6026_v4, %v6030_v32  ;;  %v10706_v26 = vcombine.high %v6027_v40, %v6031_v24  ;;  %v5816_v54 = vld [vmem:[#allocation10 + $0xb0] sm:$0xff] }
 0x90b   : > { %7430 = vmatpush1.bf16.msra.mxu0 %v10655_v12  ;;  %7516 = vmatpush1.bf16.msra.mxu1 %v10657_v46  ;;  %v10703_v12 = vcombine.low %v6026_v4, %v6030_v32  ;;  %v10705_v46 = vcombine.low %v6027_v40, %v6031_v24  ;;  %v5820_v32 = vld [vmem:[#allocation10 + $0xd0] sm:$0xff]  ;;  %v5821_v24 = vld [vmem:[#allocation10 + $0xd8] sm:$0xff] }
 0x90c   : > { %7431 = vmatprep.subr.bf16.mxu0 %v10664_v18  ;;  %7517 = vmatprep.subr.bf16.mxu1 %v10666_v11  ;;  %v10712_v18 = vcombine.high %v6034_v30, %v6038_v34  ;;  %v10714_v11 = vcombine.high %v6035_v42, %v6039_v44  ;;  %v5824_v40 = vld [vmem:[#allocation10 + $0xf0] sm:$0xff] }
 0x90f   : > { %7432 = vmatpush1.bf16.msra.mxu0 %v10663_v33  ;;  %7518 = vmatpush1.bf16.msra.mxu1 %v10665_v55  ;;  %v10711_v33 = vcombine.low %v6034_v30, %v6038_v34  ;;  %v10713_v55 = vcombine.low %v6035_v42, %v6039_v44  ;;  %v5828_v34 = vld [vmem:[#allocation10 + $0x110] sm:$0xff]  ;;  %v5833_v44 = vld [vmem:[#allocation10 + $0x138] sm:$0xff] }
 0x910   : > { %7433 = vmatprep.subr.bf16.mxu0 %v10672_v13  ;;  %7519 = vmatprep.subr.bf16.mxu1 %v10674_v10  ;;  %v10720_v13 = vcombine.high %v6042_v16, %v6046_v47  ;;  %v10722_v10 = vcombine.high %v6043_v48, %v6047_v50  ;;  %v5832_v42 = vld [vmem:[#allocation10 + $0x130] sm:$0xff] }
 0x913   : > { %7434 = vmatpush1.bf16.msra.mxu0 %v10671_v14  ;;  %7520 = vmatpush1.bf16.msra.mxu1 %v10673_v58  ;;  %v10719_v14 = vcombine.low %v6042_v16, %v6046_v47  ;;  %v10721_v58 = vcombine.low %v6043_v48, %v6047_v50  ;;  %v5836_v16 = vld [vmem:[#allocation10 + $0x150] sm:$0xff]  ;;  %v5837_v48 = vld [vmem:[#allocation10 + $0x158] sm:$0xff] }
 0x914   : > { %7435 = vmatprep.subr.bf16.mxu0 %v10680_v56  ;;  %7521 = vmatprep.subr.bf16.mxu1 %v10682_v59  ;;  %v10476_v56 = vcombine.high %v5796_v35, %v5800_v38  ;;  %v10478_v59 = vcombine.high %v5797_v52, %v5801_v5  ;;  %v5840_v47 = vld [vmem:[#allocation10 + $0x170] sm:$0xff]  ;;  %v5841_v50 = vld [vmem:[#allocation10 + $0x178] sm:$0xff] }
 0x917   : > { %7436 = vmatpush1.bf16.msra.mxu0 %v10679_v19  ;;  %7522 = vmatpush1.bf16.msra.mxu1 %v10681_v37  ;;  %v10475_v19 = vcombine.low %v5796_v35, %v5800_v38  ;;  %v13664_v37 = vpack.c.bf16 %v13634_v20, %v13621_v15  ;;  %v5844_v35 = vld [vmem:[#allocation10 + $0x190] sm:$0xff] }
 0x918   : > { %7437 = vmatprep.subr.bf16.mxu0 %v10688_v39  ;;  %7523 = vmatprep.subr.bf16.mxu1 %v10690_v62  ;;  %v10477_v39 = vcombine.low %v5797_v52, %v5801_v5  ;;  %v10484_v62 = vcombine.high %v5804_v60, %v5808_v61  ;;  %v5848_v38 = vld [vmem:[#allocation10 + $0x1b0] sm:$0xff]  ;;  %v5845_v52 = vld [vmem:[#allocation10 + $0x198] sm:$0xff] }
 0x919   : > { %v5849_v5 = vld [vmem:[#allocation10 + $0x1b8] sm:$0xff] }
 0x91b   : > { %7438 = vmatpush1.bf16.msra.mxu0 %v10687_v53  ;;  %7524 = vmatpush1.bf16.msra.mxu1 %v10689_v0  ;;  %v5817_v53 = vld [vmem:[#allocation10 + $0xb8] sm:$0xff]  ;;  %v10483_v0 = vcombine.low %v5804_v60, %v5808_v61  ;;  %v5852_v60 = vld [vmem:[#allocation10 + $0x1d0] sm:$0xff] }
 0x91c   : > { %7439 = vmatprep.subr.bf16.mxu0 %v10696_v17  ;;  %7525 = vmatprep.subr.bf16.mxu1 %v10698_v27  ;;  %v10485_v17 = vcombine.low %v5805_v57, %v5809_v41  ;;  %v10492_v27 = vcombine.high %v5812_v28, %v5816_v54  ;;  %v10494_v4 = vcombine.high %v5813_v43, %v5817_v53  ;;  %v5856_v61 = vld [vmem:[#allocation10 + $0x1f0] sm:$0xff]  ;;  %v5853_v57 = vld [vmem:[#allocation10 + $0x1d8] sm:$0xff] }
 0x91d   : > { %v5857_v41 = vld [vmem:[#allocation10 + $0x1f8] sm:$0xff] }
 0x91f   : > { %7440 = vmatpush1.bf16.msra.mxu0 %v10695_v51  ;;  %7526 = vmatpush1.bf16.msra.mxu1 %v10697_v21  ;;  %v5825_v51 = vld [vmem:[#allocation10 + $0xf8] sm:$0xff]  ;;  %v10491_v21 = vcombine.low %v5812_v28, %v5816_v54  ;;  %v5860_v28 = vld [vmem:[#allocation10 + $0x210] sm:$0xff] }
 0x920   : > { %7441 = vmatprep.subr.bf16.mxu0 %v10704_v25  ;;  %7527 = vmatprep.subr.bf16.mxu1 %v10706_v26  ;;  %v10493_v25 = vcombine.low %v5813_v43, %v5817_v53  ;;  %v10500_v26 = vcombine.high %v5820_v32, %v5824_v40  ;;  %v10502_v30 = vcombine.high %v5821_v24, %v5825_v51  ;;  %v5864_v54 = vld [vmem:[#allocation10 + $0x230] sm:$0xff]  ;;  %v5861_v43 = vld [vmem:[#allocation10 + $0x218] sm:$0xff] }
 0x921   : > { %v5865_v53 = vld [vmem:[#allocation10 + $0x238] sm:$0xff] }
 0x923   : > { %7442 = vmatpush1.bf16.msra.mxu0 %v10703_v12  ;;  %7528 = vmatpush1.bf16.msra.mxu1 %v10705_v46  ;;  %v10499_v12 = vcombine.low %v5820_v32, %v5824_v40  ;;  %v10501_v46 = vcombine.low %v5821_v24, %v5825_v51  ;;  %v5868_v32 = vld [vmem:[#allocation10 + $0x250] sm:$0xff]  ;;  %v5869_v24 = vld [vmem:[#allocation10 + $0x258] sm:$0xff] }
 0x924   : > { %7443 = vmatprep.subr.bf16.mxu0 %v10712_v18  ;;  %7529 = vmatprep.subr.bf16.mxu1 %v10714_v11  ;;  %v10508_v18 = vcombine.high %v5828_v34, %v5832_v42  ;;  %v5872_v40 = vld [vmem:[#allocation10 + $0x270] sm:$0xff]  ;;  %v5873_v51 = vld [vmem:[#allocation10 + $0x278] sm:$0xff] }
 0x927   : > { %7444 = vmatpush1.bf16.msra.mxu0 %v10711_v33  ;;  %7530 = vmatpush1.bf16.msra.mxu1 %v10713_v55  ;;  %v10507_v33 = vcombine.low %v5828_v34, %v5832_v42  ;;  %v5876_v34 = vld [vmem:[#allocation10 + $0x290] sm:$0xff] }
 0x928   : > { %7445 = vmatprep.subr.bf16.mxu0 %v10720_v13  ;;  %7531 = vmatprep.subr.bf16.mxu1 %v10722_v10  ;;  %v10516_v13 = vcombine.high %v5836_v16, %v5840_v47  ;;  %v10518_v10 = vcombine.high %v5837_v48, %v5841_v50  ;;  %v5880_v42 = vld [vmem:[#allocation10 + $0x2b0] sm:$0xff] }
 0x92b   : > { %7446 = vmatpush1.bf16.msra.mxu0 %v10719_v14  ;;  %7532 = vmatpush1.bf16.msra.mxu1 %v10721_v58  ;;  %v10515_v14 = vcombine.low %v5836_v16, %v5840_v47  ;;  %v10517_v58 = vcombine.low %v5837_v48, %v5841_v50  ;;  %v5884_v16 = vld [vmem:[#allocation10 + $0x2d0] sm:$0xff]  ;;  %v5885_v48 = vld [vmem:[#allocation10 + $0x2d8] sm:$0xff] }
 0x92c   : > { %7544 = vmatprep.subr.bf16.mxu0 %v10476_v56  ;;  %7630 = vmatprep.subr.bf16.mxu1 %v10478_v59  ;;  %v10524_v56 = vcombine.high %v5844_v35, %v5848_v38  ;;  %v10526_v59 = vcombine.high %v5845_v52, %v5849_v5  ;;  %v5888_v47 = vld [vmem:[#allocation10 + $0x2f0] sm:$0xff]  ;;  %v5889_v50 = vld [vmem:[#allocation10 + $0x2f8] sm:$0xff] }
 0x92e   : > { %7448 = vmatmul.mubr.bf16.vlgmr.msra.gmra.mrb[48].mxu0 %v13664_v37  ;;  %7534 = vmatmul.mubr.bf16.vlgmr.msra.gmra.mrb[48].mxu1 %v13664_v37 }
 0x92f   : > { %7545 = vmatpush1.bf16.msra.mxu0 %v10475_v19  ;;  %7576 = vmatprep.mubr.bf16.mxu0 %v13638_v36  ;;  %v10523_v19 = vcombine.low %v5844_v35, %v5848_v38  ;;  %v5892_v35 = vld [vmem:[#allocation10 + $0x310] sm:$0xff] }
 0x930   : > { %7631 = vmatpush1.bf16.msra.mxu1 %v10477_v39  ;;  %7662 = vmatprep.mubr.bf16.mxu1 %v13638_v36  ;;  %v5829_v36 = vld [vmem:[#allocation10 + $0x118] sm:$0xff]  ;;  %v10525_v39 = vcombine.low %v5845_v52, %v5849_v5  ;;  %v5896_v38 = vld [vmem:[#allocation10 + $0x330] sm:$0xff] }
 0x931   : > { %7546 = vmatprep.subr.bf16.mxu0 %v10484_v62  ;;  %7632 = vmatprep.subr.bf16.mxu1 %v10486_v49  ;;  %v10510_v11 = vcombine.high %v5829_v36, %v5833_v44  ;;  %v10509_v55 = vcombine.low %v5829_v36, %v5833_v44  ;;  %v10532_v62 = vcombine.high %v5852_v60, %v5856_v61  ;;  %v5877_v36 = vld [vmem:[#allocation10 + $0x298] sm:$0xff] }
 0x932   : > { %v10534_v49 = vcombine.high %v5853_v57, %v5857_v41  ;;  %v5881_v44 = vld [vmem:[#allocation10 + $0x2b8] sm:$0xff] }
 0x933   : > { %7547 = vmatpush1.bf16.msra.mxu0 %v10483_v0  ;;  %v10531_v0 = vcombine.low %v5852_v60, %v5856_v61  ;;  %v5893_v52 = vld [vmem:[#allocation10 + $0x318] sm:$0xff]  ;;  %v5900_v60 = vld [vmem:[#allocation10 + $0x350] sm:$0xff] }
 0x934   : > { %7633 = vmatpush1.bf16.msra.mxu1 %v10485_v17  ;;  %7548 = vmatprep.subr.bf16.mxu0 %v10492_v27  ;;  %v10533_v17 = vcombine.low %v5853_v57, %v5857_v41  ;;  %v10540_v27 = vcombine.high %v5860_v28, %v5864_v54  ;;  %v5897_v5 = vld [vmem:[#allocation10 + $0x338] sm:$0xff]  ;;  %v5904_v61 = vld [vmem:[#allocation10 + $0x370] sm:$0xff] }
 0x935   : > { %7634 = vmatprep.subr.bf16.mxu1 %v10494_v4  ;;  %v10542_v4 = vcombine.high %v5861_v43, %v5865_v53  ;;  %v5901_v57 = vld [vmem:[#allocation10 + $0x358] sm:$0xff] }
 0x936   : > { %v5905_v41 = vld [vmem:[#allocation10 + $0x378] sm:$0xff] }
 0x937   : > { %7549 = vmatpush1.bf16.msra.mxu0 %v10491_v21  ;;  %v10539_v21 = vcombine.low %v5860_v28, %v5864_v54  ;;  %v5908_v28 = vld [vmem:[#allocation10 + $0x390] sm:$0xff] }
 0x938   : > { %7635 = vmatpush1.bf16.msra.mxu1 %v10493_v25  ;;  %7550 = vmatprep.subr.bf16.mxu0 %v10500_v26  ;;  %v10541_v25 = vcombine.low %v5861_v43, %v5865_v53  ;;  %v10548_v26 = vcombine.high %v5868_v32, %v5872_v40  ;;  %v5912_v54 = vld [vmem:[#allocation10 + $0x3b0] sm:$0xff]  ;;  %v5909_v43 = vld [vmem:[#allocation10 + $0x398] sm:$0xff] }
 0x939   : > { %7636 = vmatprep.subr.bf16.mxu1 %v10502_v30  ;;  %v10550_v30 = vcombine.high %v5869_v24, %v5873_v51  ;;  %v5913_v53 = vld [vmem:[#allocation10 + $0x3b8] sm:$0xff] }
 0x93b   : > { %7551 = vmatpush1.bf16.msra.mxu0 %v10499_v12  ;;  %v10547_v12 = vcombine.low %v5868_v32, %v5872_v40  ;;  %v5916_v32 = vld [vmem:[#allocation10 + $0x3d0] sm:$0xff] }
 0x93c   : > { %7637 = vmatpush1.bf16.msra.mxu1 %v10501_v46  ;;  %7552 = vmatprep.subr.bf16.mxu0 %v10508_v18  ;;  %v10549_v46 = vcombine.low %v5869_v24, %v5873_v51  ;;  %v10556_v18 = vcombine.high %v5876_v34, %v5880_v42  ;;  %v5920_v40 = vld [vmem:[#allocation10 + $0x3f0] sm:$0xff]  ;;  %v5917_v24 = vld [vmem:[#allocation10 + $0x3d8] sm:$0xff] }
 0x93d   : > { %7638 = vmatprep.subr.bf16.mxu1 %v10510_v11  ;;  %v10558_v11 = vcombine.high %v5877_v36, %v5881_v44  ;;  %v5921_v51 = vld [vmem:[#allocation10 + $0x3f8] sm:$0xff] }
 0x93f   : > { %7553 = vmatpush1.bf16.msra.mxu0 %v10507_v33  ;;  %v10555_v33 = vcombine.low %v5876_v34, %v5880_v42  ;;  %v5924_v34 = vld [vmem:[#allocation10 + $0x410] sm:$0xff] }
 0x940   : > { %7639 = vmatpush1.bf16.msra.mxu1 %v10509_v55  ;;  %7554 = vmatprep.subr.bf16.mxu0 %v10516_v13  ;;  %v10557_v55 = vcombine.low %v5877_v36, %v5881_v44  ;;  %v10564_v13 = vcombine.high %v5884_v16, %v5888_v47  ;;  %v5928_v42 = vld [vmem:[#allocation10 + $0x430] sm:$0xff]  ;;  %v5925_v36 = vld [vmem:[#allocation10 + $0x418] sm:$0xff] }
 0x941   : > { %7640 = vmatprep.subr.bf16.mxu1 %v10518_v10  ;;  %v10566_v10 = vcombine.high %v5885_v48, %v5889_v50  ;;  %v5929_v44 = vld [vmem:[#allocation10 + $0x438] sm:$0xff] }
 0x943   : > { %7555 = vmatpush1.bf16.msra.mxu0 %v10515_v14  ;;  %v10563_v14 = vcombine.low %v5884_v16, %v5888_v47  ;;  %v5932_v16 = vld [vmem:[#allocation10 + $0x450] sm:$0xff] }
 0x944   : > { %7641 = vmatpush1.bf16.msra.mxu1 %v10517_v58  ;;  %7556 = vmatprep.subr.bf16.mxu0 %v10524_v56  ;;  %v10565_v58 = vcombine.low %v5885_v48, %v5889_v50  ;;  %v10572_v56 = vcombine.high %v5892_v35, %v5896_v38  ;;  %v5936_v47 = vld [vmem:[#allocation10 + $0x470] sm:$0xff]  ;;  %v10603_v48 = vcombine.low %v5924_v34, %v5928_v42  ;;  %v5933_v50 = vld [vmem:[#allocation10 + $0x458] sm:$0xff] }
 0x945   : > { %7642 = vmatprep.subr.bf16.mxu1 %v10526_v59  ;;  %v10574_v59 = vcombine.high %v5893_v52, %v5897_v5 }
 0x947   : > { %7557 = vmatpush1.bf16.msra.mxu0 %v10523_v19  ;;  %v10571_v19 = vcombine.low %v5892_v35, %v5896_v38  ;;  %v5944_v35 = vld [vmem:[#allocation10 + $0x4b0] sm:$0xff] }
 0x948   : > { %7643 = vmatpush1.bf16.msra.mxu1 %v10525_v39  ;;  %7558 = vmatprep.subr.bf16.mxu0 %v10532_v62  ;;  %v10573_v39 = vcombine.low %v5893_v52, %v5897_v5  ;;  %v10580_v62 = vcombine.high %v5900_v60, %v5904_v61  ;;  %v5941_v52 = vld [vmem:[#allocation10 + $0x498] sm:$0xff] }
 0x949   : > { %7644 = vmatprep.subr.bf16.mxu1 %v10534_v49  ;;  %v10582_v49 = vcombine.high %v5901_v57, %v5905_v41  ;;  %v5945_v5 = vld [vmem:[#allocation10 + $0x4b8] sm:$0xff] }
 0x94b   : > { %7559 = vmatpush1.bf16.msra.mxu0 %v10531_v0  ;;  %v10579_v0 = vcombine.low %v5900_v60, %v5904_v61  ;;  %v5948_v60 = vld [vmem:[#allocation10 + $0x4d0] sm:$0xff] }
 0x94c   : > { %7645 = vmatpush1.bf16.msra.mxu1 %v10533_v17  ;;  %7560 = vmatprep.subr.bf16.mxu0 %v10540_v27  ;;  %v10581_v17 = vcombine.low %v5901_v57, %v5905_v41  ;;  %v10588_v27 = vcombine.high %v5908_v28, %v5912_v54  ;;  %v5952_v61 = vld [vmem:[#allocation10 + $0x4f0] sm:$0xff]  ;;  %v5949_v57 = vld [vmem:[#allocation10 + $0x4d8] sm:$0xff] }
 0x94d   : > { %7646 = vmatprep.subr.bf16.mxu1 %v10542_v4  ;;  %v10590_v4 = vcombine.high %v5909_v43, %v5913_v53  ;;  %v5953_v41 = vld [vmem:[#allocation10 + $0x4f8] sm:$0xff] }
 0x94f   : > { %7561 = vmatpush1.bf16.msra.mxu0 %v10539_v21  ;;  %v10587_v21 = vcombine.low %v5908_v28, %v5912_v54  ;;  %v5960_v28 = vld [vmem:[#allocation10 + $0x530] sm:$0xff]  ;;  %v5957_v54 = vld [vmem:[#allocation10 + $0x518] sm:$0xff] }
 0x950   : > { %7647 = vmatpush1.bf16.msra.mxu1 %v10541_v25  ;;  %7562 = vmatprep.subr.bf16.mxu0 %v10548_v26  ;;  %v10589_v25 = vcombine.low %v5909_v43, %v5913_v53  ;;  %v10596_v26 = vcombine.high %v5916_v32, %v5920_v40  ;;  %v5961_v43 = vld [vmem:[#allocation10 + $0x538] sm:$0xff]  ;;  %v10629_v53 = vcombine.low %v5949_v57, %v5953_v41 }
 0x951   : > { %7648 = vmatprep.subr.bf16.mxu1 %v10550_v30  ;;  %v10598_v30 = vcombine.high %v5917_v24, %v5921_v51 }
 0x953   : > { %7563 = vmatpush1.bf16.msra.mxu0 %v10547_v12  ;;  %v10595_v12 = vcombine.low %v5916_v32, %v5920_v40  ;;  %v5965_v32 = vld [vmem:[#allocation10 + $0x558] sm:$0xff] }
 0x954   : > { %7649 = vmatpush1.bf16.msra.mxu1 %v10549_v46  ;;  %7564 = vmatprep.subr.bf16.mxu0 %v10556_v18  ;;  %v10597_v46 = vcombine.low %v5917_v24, %v5921_v51  ;;  %v10604_v18 = vcombine.high %v5924_v34, %v5928_v42  ;;  %v5969_v40 = vld [vmem:[#allocation10 + $0x578] sm:$0xff]  ;;  %v10637_v51 = vcombine.low %v5957_v54, %v5961_v43 }
 0x955   : > { %7650 = vmatprep.subr.bf16.mxu1 %v10558_v11  ;;  %v10606_v11 = vcombine.high %v5925_v36, %v5929_v44  ;;  %v5973_v34 = vld [vmem:[#allocation10 + $0x598] sm:$0xff] }
 0x956   : > { %v5977_v42 = vld [vmem:[#allocation10 + $0x5b8] sm:$0xff] }
 0x957   : > { %7565 = vmatpush1.bf16.msra.mxu0 %v10555_v33  ;;  %v5937_v33 = vld [vmem:[#allocation10 + $0x478] sm:$0xff] }
 0x958   : > { %7651 = vmatpush1.bf16.msra.mxu1 %v10557_v55  ;;  %7566 = vmatprep.subr.bf16.mxu0 %v10564_v13  ;;  %v10605_v55 = vcombine.low %v5925_v36, %v5929_v44  ;;  %v10612_v13 = vcombine.high %v5932_v16, %v5936_v47  ;;  %v10614_v38 = vcombine.high %v5933_v50, %v5937_v33 }
 0x959   : > { %7652 = vmatprep.subr.bf16.mxu1 %v10566_v10  ;;  %v5940_v10 = vld [vmem:[#allocation10 + $0x490] sm:$0xff]  ;;  %v10645_v44 = vcombine.low %v5965_v32, %v5969_v40 }
 0x95b   : > { %7567 = vmatpush1.bf16.msra.mxu0 %v10563_v14  ;;  %v10611_v14 = vcombine.low %v5932_v16, %v5936_v47  ;;  %v5981_v16 = vld [vmem:[#allocation10 + $0x5d8] sm:$0xff] }
 0x95c   : > { %7653 = vmatpush1.bf16.msra.mxu1 %v10565_v58  ;;  %7568 = vmatprep.subr.bf16.mxu0 %v10572_v56  ;;  %v10613_v58 = vcombine.low %v5933_v50, %v5937_v33  ;;  %v10620_v56 = vcombine.high %v5940_v10, %v5944_v35  ;;  %v5985_v47 = vld [vmem:[#allocation10 + $0x5f8] sm:$0xff]  ;;  %v10653_v50 = vcombine.low %v5973_v34, %v5977_v42 }
 0x95d   : > { %7654 = vmatprep.subr.bf16.mxu1 %v10574_v59  ;;  %v10622_v59 = vcombine.high %v5941_v52, %v5945_v5 }
 0x95f   : > { %7569 = vmatpush1.bf16.msra.mxu0 %v10571_v19  ;;  %v10619_v19 = vcombine.low %v5940_v10, %v5944_v35  ;;  %v5992_v10 = vld [vmem:[#allocation10 + $0x630] sm:$0xff]  ;;  %v5989_v35 = vld [vmem:[#allocation10 + $0x618] sm:$0xff] }
 0x960   : > { %7655 = vmatpush1.bf16.msra.mxu1 %v10573_v39  ;;  %7570 = vmatprep.subr.bf16.mxu0 %v10580_v62  ;;  %v10628_v39 = vcombine.high %v5948_v60, %v5952_v61  ;;  %v10630_v62 = vcombine.high %v5949_v57, %v5953_v41 }
 0x961   : > { %7656 = vmatprep.subr.bf16.mxu1 %v10582_v49  ;;  %v5956_v49 = vld [vmem:[#allocation10 + $0x510] sm:$0xff] }
 0x962   : > { %v10635_v24 = vcombine.low %v5956_v49, %v5960_v28 }
 0x963   : > { %7571 = vmatpush1.bf16.msra.mxu0 %v10579_v0  ;;  %v10636_v0 = vcombine.high %v5956_v49, %v5960_v28  ;;  %v6005_v49 = vld [vmem:[#allocation10 + $0x698] sm:$0xff] }
 0x964   : > { %7657 = vmatpush1.bf16.msra.mxu1 %v10581_v17  ;;  %7572 = vmatprep.subr.bf16.mxu0 %v10588_v27  ;;  %v10638_v17 = vcombine.high %v5957_v54, %v5961_v43  ;;  %v5964_v27 = vld [vmem:[#allocation10 + $0x550] sm:$0xff]  ;;  %v6009_v28 = vld [vmem:[#allocation10 + $0x6b8] sm:$0xff] }
 0x965   : > { %7658 = vmatprep.subr.bf16.mxu1 %v10590_v4  ;;  %v5968_v4 = vld [vmem:[#allocation10 + $0x570] sm:$0xff] }
 0x966   : > { %v10643_v36 = vcombine.low %v5964_v27, %v5968_v4 }
 0x967   : > { %7573 = vmatpush1.bf16.msra.mxu0 %v10587_v21  ;;  %v10644_v21 = vcombine.high %v5964_v27, %v5968_v4  ;;  %v6013_v27 = vld [vmem:[#allocation10 + $0x6d8] sm:$0xff] }
 0x968   : > { %7659 = vmatpush1.bf16.msra.mxu1 %v10589_v25  ;;  %7574 = vmatprep.subr.bf16.mxu0 %v10596_v26  ;;  %v10646_v25 = vcombine.high %v5965_v32, %v5969_v40  ;;  %v5972_v26 = vld [vmem:[#allocation10 + $0x590] sm:$0xff]  ;;  %v6017_v4 = vld [vmem:[#allocation10 + $0x6f8] sm:$0xff]  ;;  %v10685_v40 = vcombine.low %v6005_v49, %v6009_v28 }
 0x969   : > { %7660 = vmatprep.subr.bf16.mxu1 %v10598_v30  ;;  %v5976_v30 = vld [vmem:[#allocation10 + $0x5b0] sm:$0xff] }
 0x96b   : > { %7575 = vmatpush1.bf16.msra.mxu0 %v10595_v12  ;;  %v10652_v12 = vcombine.high %v5972_v26, %v5976_v30 }
 0x96c   : > { %7661 = vmatpush1.bf16.msra.mxu1 %v10597_v46  ;;  %7587 = vmatprep.subr.bf16.mxu0 %v10604_v18  ;;  %v10654_v46 = vcombine.high %v5973_v34, %v5977_v42  ;;  %v5980_v18 = vld [vmem:[#allocation10 + $0x5d0] sm:$0xff]  ;;  %v10693_v42 = vcombine.low %v6013_v27, %v6017_v4 }
 0x96d   : > { %7673 = vmatprep.subr.bf16.mxu1 %v10606_v11  ;;  %v5984_v11 = vld [vmem:[#allocation10 + $0x5f0] sm:$0xff] }
 0x96e   : > { %7577 = vmatmul.mubr.bf16.vlgmr.msra.gmra.mrb[52].mxu0 %v13642_v31  ;;  %v10660_v33 = vcombine.high %v5980_v18, %v5984_v11 }
 0x96f   : > { %7663 = vmatmul.mubr.bf16.vlgmr.msra.gmra.mrb[52].mxu1 %v13642_v31  ;;  %7588 = vmatpush1.bf16.msra.mxu0 %v10603_v48  ;;  %v10621_v31 = vcombine.low %v5941_v52, %v5945_v5  ;;  %v10651_v48 = vcombine.low %v5972_v26, %v5976_v30  ;;  %v10659_v52 = vcombine.low %v5980_v18, %v5984_v11  ;;  %v6021_v26 = vld [vmem:[#allocation10 + $0x718] sm:$0xff] }
 0x970   : > { %7619 = vmatprep.mubr.bf16.mxu0 %v13652_v45  ;;  %7674 = vmatpush1.bf16.msra.mxu1 %v10605_v55  ;;  %v10662_v55 = vcombine.high %v5981_v16, %v5985_v47  ;;  %v10661_v5 = vcombine.low %v5981_v16, %v5985_v47  ;;  %v6025_v30 = vld [vmem:[#allocation10 + $0x738] sm:$0xff] }
 0x971   : > { %7705 = vmatprep.mubr.bf16.mxu1 %v13652_v45  ;;  %7589 = vmatprep.subr.bf16.mxu0 %v10612_v13  ;;  %v10627_v45 = vcombine.low %v5948_v60, %v5952_v61  ;;  %v5988_v13 = vld [vmem:[#allocation10 + $0x610] sm:$0xff]  ;;  %v5997_v60 = vld [vmem:[#allocation10 + $0x658] sm:$0xff]  ;;  %v10701_v47 = vcombine.low %v6021_v26, %v6025_v30 }
 0x972   : > { %7675 = vmatprep.subr.bf16.mxu1 %v10614_v38  ;;  %v5993_v38 = vld [vmem:[#allocation10 + $0x638] sm:$0xff]  ;;  %v10667_v57 = vcombine.low %v5988_v13, %v5992_v10 }
 0x973   : > { %7590 = vmatpush1.bf16.msra.mxu0 %v10611_v14  ;;  %v10668_v14 = vcombine.high %v5988_v13, %v5992_v10  ;;  %v6001_v61 = vld [vmem:[#allocation10 + $0x678] sm:$0xff]  ;;  %v10669_v41 = vcombine.low %v5989_v35, %v5993_v38 }
 0x974   : > { %7676 = vmatpush1.bf16.msra.mxu1 %v10613_v58  ;;  %7591 = vmatprep.subr.bf16.mxu0 %v10620_v56  ;;  %v10670_v58 = vcombine.high %v5989_v35, %v5993_v38  ;;  %v5996_v56 = vld [vmem:[#allocation10 + $0x650] sm:$0xff]  ;;  %v10677_v43 = vcombine.low %v5997_v60, %v6001_v61  ;;  %v6029_v18 = vld [vmem:[#allocation10 + $0x758] sm:$0xff] }
 0x975   : > { %7677 = vmatprep.subr.bf16.mxu1 %v10622_v59  ;;  %v6000_v59 = vld [vmem:[#allocation10 + $0x670] sm:$0xff]  ;;  %v6033_v11 = vld [vmem:[#allocation10 + $0x778] sm:$0xff] }
 0x976   : > { %v10675_v54 = vcombine.low %v5996_v56, %v6000_v59  ;;  %v6037_v13 = vld [vmem:[#allocation10 + $0x798] sm:$0xff]  ;;  %v10709_v38 = vcombine.low %v6029_v18, %v6033_v11 }
 0x977   : > { %7592 = vmatpush1.bf16.msra.mxu0 %v10619_v19  ;;  %v10676_v19 = vcombine.high %v5996_v56, %v6000_v59  ;;  %v6041_v10 = vld [vmem:[#allocation10 + $0x7b8] sm:$0xff] }
 0x978   : > { %7678 = vmatpush1.bf16.msra.mxu1 %v10621_v31  ;;  %7593 = vmatprep.subr.bf16.mxu0 %v10628_v39  ;;  %v10678_v31 = vcombine.high %v5997_v60, %v6001_v61  ;;  %v6004_v39 = vld [vmem:[#allocation10 + $0x690] sm:$0xff]  ;;  %v6045_v56 = vld [vmem:[#allocation10 + $0x7d8] sm:$0xff]  ;;  %v10717_v61 = vcombine.low %v6037_v13, %v6041_v10 }
 0x979   : > { %7679 = vmatprep.subr.bf16.mxu1 %v10630_v62  ;;  %v6008_v62 = vld [vmem:[#allocation10 + $0x6b0] sm:$0xff]  ;;  %v6049_v59 = vld [vmem:[#allocation10 + $0x7f8] sm:$0xff] }
 0x97a   : > { %v10683_v32 = vcombine.low %v6004_v39, %v6008_v62 }
 0x97b   : > { %7594 = vmatpush1.bf16.msra.mxu0 %v10627_v45  ;;  %v10684_v45 = vcombine.high %v6004_v39, %v6008_v62  ;;  %v12112_v39 = vld [vmem:[#allocation11 + $0x4] ss:$16 sps:$4 sm:$0xff]   ;;  %v12115_v62 = vld [vmem:[#allocation11 + $0xc] ss:$16 sps:$4 sm:$0xff]  }
 0x97c   : > { %7680 = vmatpush1.bf16.msra.mxu1 %v10629_v53  ;;  %7595 = vmatprep.subr.bf16.mxu0 %v10636_v0  ;;  %v10686_v53 = vcombine.high %v6005_v49, %v6009_v28  ;;  %v6012_v0 = vld [vmem:[#allocation10 + $0x6d0] sm:$0xff]  ;;  %v12113_v28 = vld [vmem:[#allocation11 + $0x8] ss:$16 sps:$4 sm:$0xff]  }
 0x97d   : > { %7681 = vmatprep.subr.bf16.mxu1 %v10638_v17  ;;  %v6016_v17 = vld [vmem:[#allocation10 + $0x6f0] sm:$0xff] }
 0x97e   : > { %v10691_v34 = vcombine.low %v6012_v0, %v6016_v17  ;;  %v12110_v49 = vld [vmem:[#allocation11] ss:$16 sps:$4 sm:$0xff]  }
 0x97f   : > { %7596 = vmatpush1.bf16.msra.mxu0 %v10635_v24  ;;  %v10692_v24 = vcombine.high %v6012_v0, %v6016_v17  ;;  %v12124_v0 = vld [vmem:[#allocation11 + $0x44] ss:$16 sps:$4 sm:$0xff]   ;;  %v12127_v17 = vld [vmem:[#allocation11 + $0x4c] ss:$16 sps:$4 sm:$0xff]  }
 0x980   : > { %7682 = vmatpush1.bf16.msra.mxu1 %v10637_v51  ;;  %7597 = vmatprep.subr.bf16.mxu0 %v10644_v21  ;;  %v10694_v51 = vcombine.high %v6013_v27, %v6017_v4  ;;  %v6020_v21 = vld [vmem:[#allocation10 + $0x710] sm:$0xff]  ;;  %v12125_v4 = vld [vmem:[#allocation11 + $0x48] ss:$16 sps:$4 sm:$0xff]  }
 0x981   : > { %7683 = vmatprep.subr.bf16.mxu1 %v10646_v25  ;;  %v6024_v25 = vld [vmem:[#allocation10 + $0x730] sm:$0xff] }
 0x982   : > { %v10699_v16 = vcombine.low %v6020_v21, %v6024_v25  ;;  %v12122_v27 = vld [vmem:[#allocation11 + $0x40] ss:$16 sps:$4 sm:$0xff]  }
 0x983   : > { %7598 = vmatpush1.bf16.msra.mxu0 %v10643_v36  ;;  %v10700_v36 = vcombine.high %v6020_v21, %v6024_v25  ;;  %v12139_v21 = vld [vmem:[#allocation11 + $0x8c] ss:$16 sps:$4 sm:$0xff]   ;;  %v12134_v25 = vld [vmem:[#allocation11 + $0x80] ss:$16 sps:$4 sm:$0xff]  }
 0x984   : > { %7684 = vmatpush1.bf16.msra.mxu1 %v10645_v44  ;;  %7599 = vmatprep.subr.bf16.mxu0 %v10652_v12  ;;  %v10702_v44 = vcombine.high %v6021_v26, %v6025_v30  ;;  %v6028_v12 = vld [vmem:[#allocation10 + $0x750] sm:$0xff]  ;;  %v12137_v26 = vld [vmem:[#allocation11 + $0x88] ss:$16 sps:$4 sm:$0xff]  }
 0x985   : > { %7685 = vmatprep.subr.bf16.mxu1 %v10654_v46  ;;  %v6032_v46 = vld [vmem:[#allocation10 + $0x770] sm:$0xff] }
 0x986   : > { %v10707_v35 = vcombine.low %v6028_v12, %v6032_v46  ;;  %v12142_v30 = vld [vmem:[#allocation11 + $0xa4] ss:$16 sps:$4 sm:$0xff]  }
 0x987   : > { %7600 = vmatpush1.bf16.msra.mxu0 %v10651_v48  ;;  %v10708_v48 = vcombine.high %v6028_v12, %v6032_v46  ;;  %v12151_v12 = vld [vmem:[#allocation11 + $0xcc] ss:$16 sps:$4 sm:$0xff]   ;;  %v12146_v46 = vld [vmem:[#allocation11 + $0xc0] ss:$16 sps:$4 sm:$0xff]  }
 0x988   : > { %7686 = vmatpush1.bf16.msra.mxu1 %v10653_v50  ;;  %7601 = vmatprep.subr.bf16.mxu0 %v10660_v33  ;;  %v10710_v50 = vcombine.high %v6029_v18, %v6033_v11  ;;  %v6036_v33 = vld [vmem:[#allocation10 + $0x790] sm:$0xff]  ;;  %v12149_v18 = vld [vmem:[#allocation11 + $0xc8] ss:$16 sps:$4 sm:$0xff]  }
 0x989   : > { %7687 = vmatprep.subr.bf16.mxu1 %v10662_v55  ;;  %v6040_v55 = vld [vmem:[#allocation10 + $0x7b0] sm:$0xff] }
 0x98a   : > { %v10715_v60 = vcombine.low %v6036_v33, %v6040_v55  ;;  %v12154_v11 = vld [vmem:[#allocation11 + $0xe4] ss:$16 sps:$4 sm:$0xff]  }
 0x98b   : > { %7602 = vmatpush1.bf16.msra.mxu0 %v10659_v52  ;;  %v10716_v52 = vcombine.high %v6036_v33, %v6040_v55  ;;  %v12163_v33 = vld [vmem:[#allocation11 + $0x10c] ss:$16 sps:$4 sm:$0xff]   ;;  %v12158_v55 = vld [vmem:[#allocation11 + $0x100] ss:$16 sps:$4 sm:$0xff]  }
 0x98c   : > { %7688 = vmatpush1.bf16.msra.mxu1 %v10661_v5  ;;  %7603 = vmatprep.subr.bf16.mxu0 %v10668_v14  ;;  %v10718_v5 = vcombine.high %v6037_v13, %v6041_v10  ;;  %v6044_v14 = vld [vmem:[#allocation10 + $0x7d0] sm:$0xff]  ;;  %v12161_v13 = vld [vmem:[#allocation11 + $0x108] ss:$16 sps:$4 sm:$0xff]  }
 0x98d   : > { %7689 = vmatprep.subr.bf16.mxu1 %v10670_v58  ;;  %v6048_v58 = vld [vmem:[#allocation10 + $0x7f0] sm:$0xff] }
 0x98e   : > { %v12166_v10 = vld [vmem:[#allocation11 + $0x124] ss:$16 sps:$4 sm:$0xff]  }
 0x98f   : > { %7604 = vmatpush1.bf16.msra.mxu0 %v10667_v57  ;;  %v10724_v57 = vcombine.high %v6044_v14, %v6048_v58 }
 0x990   : > { %7690 = vmatpush1.bf16.msra.mxu1 %v10669_v41  ;;  %7605 = vmatprep.subr.bf16.mxu0 %v10676_v19  ;;  %v10726_v41 = vcombine.high %v6045_v56, %v6049_v59  ;;  %v10723_v19 = vcombine.low %v6044_v14, %v6048_v58  ;;  %v12175_v14 = vld [vmem:[#allocation11 + $0x14c] ss:$16 sps:$4 sm:$0xff]   ;;  %v12170_v58 = vld [vmem:[#allocation11 + $0x140] ss:$16 sps:$4 sm:$0xff]  }
 0x991   : > { %7691 = vmatprep.subr.bf16.mxu1 %v10678_v31  ;;  %v10725_v31 = vcombine.low %v6045_v56, %v6049_v59  ;;  %v12173_v56 = vld [vmem:[#allocation11 + $0x148] ss:$16 sps:$4 sm:$0xff]   ;;  %v12178_v59 = vld [vmem:[#allocation11 + $0x164] ss:$16 sps:$4 sm:$0xff]  }
 0x993   : > { %7606 = vmatpush1.bf16.msra.mxu0 %v10675_v54  ;;  %v12118_v54 = vld [vmem:[#allocation11 + $0x24] ss:$16 sps:$4 sm:$0xff]  }
 0x994   : > { %7692 = vmatpush1.bf16.msra.mxu1 %v10677_v43  ;;  %7607 = vmatprep.subr.bf16.mxu0 %v10684_v45  ;;  %v12121_v43 = vld [vmem:[#allocation11 + $0x2c] ss:$16 sps:$4 sm:$0xff]   ;;  %v12116_v45 = vld [vmem:[#allocation11 + $0x20] ss:$16 sps:$4 sm:$0xff]  }
 0x995   : > { %7693 = vmatprep.subr.bf16.mxu1 %v10686_v53  ;;  %v12119_v53 = vld [vmem:[#allocation11 + $0x28] ss:$16 sps:$4 sm:$0xff]  }
 0x997   : > { %7608 = vmatpush1.bf16.msra.mxu0 %v10683_v32  ;;  %v12130_v32 = vld [vmem:[#allocation11 + $0x64] ss:$16 sps:$4 sm:$0xff]  }
 0x998   : > { %7694 = vmatpush1.bf16.msra.mxu1 %v10685_v40  ;;  %7609 = vmatprep.subr.bf16.mxu0 %v10692_v24  ;;  %v12133_v40 = vld [vmem:[#allocation11 + $0x6c] ss:$16 sps:$4 sm:$0xff]   ;;  %v12128_v24 = vld [vmem:[#allocation11 + $0x60] ss:$16 sps:$4 sm:$0xff]  }
 0x999   : > { %7695 = vmatprep.subr.bf16.mxu1 %v10694_v51  ;;  %v12136_v51 = vld [vmem:[#allocation11 + $0x84] ss:$16 sps:$4 sm:$0xff]  }
 0x99b   : > { %7610 = vmatpush1.bf16.msra.mxu0 %v10691_v34  ;;  %v12145_v34 = vld [vmem:[#allocation11 + $0xac] ss:$16 sps:$4 sm:$0xff]  }
 0x99c   : > { %7696 = vmatpush1.bf16.msra.mxu1 %v10693_v42  ;;  %7611 = vmatprep.subr.bf16.mxu0 %v10700_v36  ;;  %v12140_v42 = vld [vmem:[#allocation11 + $0xa0] ss:$16 sps:$4 sm:$0xff]   ;;  %v12143_v36 = vld [vmem:[#allocation11 + $0xa8] ss:$16 sps:$4 sm:$0xff]  }
 0x99d   : > { %7697 = vmatprep.subr.bf16.mxu1 %v10702_v44  ;;  %v12148_v44 = vld [vmem:[#allocation11 + $0xc4] ss:$16 sps:$4 sm:$0xff]  }
 0x99f   : > { %7612 = vmatpush1.bf16.msra.mxu0 %v10699_v16  ;;  %v12157_v16 = vld [vmem:[#allocation11 + $0xec] ss:$16 sps:$4 sm:$0xff]  }
 0x9a0   : > { %7698 = vmatpush1.bf16.msra.mxu1 %v10701_v47  ;;  %7613 = vmatprep.subr.bf16.mxu0 %v10708_v48  ;;  %v12152_v47 = vld [vmem:[#allocation11 + $0xe0] ss:$16 sps:$4 sm:$0xff]   ;;  %v12155_v48 = vld [vmem:[#allocation11 + $0xe8] ss:$16 sps:$4 sm:$0xff]  }
 0x9a1   : > { %7699 = vmatprep.subr.bf16.mxu1 %v10710_v50  ;;  %v12160_v50 = vld [vmem:[#allocation11 + $0x104] ss:$16 sps:$4 sm:$0xff]  }
 0x9a3   : > { %7614 = vmatpush1.bf16.msra.mxu0 %v10707_v35  ;;  %v12169_v35 = vld [vmem:[#allocation11 + $0x12c] ss:$16 sps:$4 sm:$0xff]  }
 0x9a4   : > { %7700 = vmatpush1.bf16.msra.mxu1 %v10709_v38  ;;  %7615 = vmatprep.subr.bf16.mxu0 %v10716_v52  ;;  %v12164_v38 = vld [vmem:[#allocation11 + $0x120] ss:$16 sps:$4 sm:$0xff]   ;;  %v12167_v52 = vld [vmem:[#allocation11 + $0x128] ss:$16 sps:$4 sm:$0xff]  }
 0x9a5   : > { %7701 = vmatprep.subr.bf16.mxu1 %v10718_v5  ;;  %v12172_v5 = vld [vmem:[#allocation11 + $0x144] ss:$16 sps:$4 sm:$0xff]  }
 0x9a7   : > { %7616 = vmatpush1.bf16.msra.mxu0 %v10715_v60  ;;  %v12181_v60 = vld [vmem:[#allocation11 + $0x16c] ss:$16 sps:$4 sm:$0xff]  }
 0x9a8   : > { %7702 = vmatpush1.bf16.msra.mxu1 %v10717_v61  ;;  %7617 = vmatprep.subr.bf16.mxu0 %v10724_v57  ;;  %v12176_v61 = vld [vmem:[#allocation11 + $0x160] ss:$16 sps:$4 sm:$0xff]   ;;  %v12179_v57 = vld [vmem:[#allocation11 + $0x168] ss:$16 sps:$4 sm:$0xff]  }
 0x9a9   : > { %7703 = vmatprep.subr.bf16.mxu1 %v10726_v41  ;;  %v12184_v41 = vld [vmem:[#allocation11 + $0x184] ss:$16 sps:$4 sm:$0xff]  }
 0x9ab   : > { %7618 = vmatpush1.bf16.msra.mxu0 %v10723_v19  ;;  %v12187_v19 = vld [vmem:[#allocation11 + $0x18c] ss:$16 sps:$4 sm:$0xff]  }
 0x9ac   : > { %7704 = vmatpush1.bf16.msra.mxu1 %v10725_v31  ;;  %9298 = vmatprep.subr.bf16.mxu0 %v12112_v39  ;;  %v12182_v31 = vld [vmem:[#allocation11 + $0x180] ss:$16 sps:$4 sm:$0xff]   ;;  %v12185_v39 = vld [vmem:[#allocation11 + $0x188] ss:$16 sps:$4 sm:$0xff]  }
 0x9ad   : > { %9470 = vmatprep.subr.bf16.mxu1 %v12115_v62  ;;  %v12190_v62 = vld [vmem:[#allocation11 + $0x1a4] ss:$16 sps:$4 sm:$0xff]  }
 0x9ae   : > { %7620 = vmatmul.mubr.bf16.vlgmr.msra.gmra.mrb[52].mxu0 %v13664_v37 }
 0x9af   : > { %7706 = vmatmul.mubr.bf16.vlgmr.msra.gmra.mrb[52].mxu1 %v13664_v37  ;;  %9299 = vmatpush1.bf16.msra.mxu0 %v12110_v49  ;;  %v12131_v37 = vld [vmem:[#allocation11 + $0x68] ss:$16 sps:$4 sm:$0xff]   ;;  %v12193_v49 = vld [vmem:[#allocation11 + $0x1ac] ss:$16 sps:$4 sm:$0xff]  }
 0x9b0   : > { %9471 = vmatpush1.bf16.msra.mxu1 %v12113_v28  ;;  %9300 = vmatprep.subr.bf16.mxu0 %v12118_v54  ;;  %v12188_v28 = vld [vmem:[#allocation11 + $0x1a0] ss:$16 sps:$4 sm:$0xff]   ;;  %v12191_v54 = vld [vmem:[#allocation11 + $0x1a8] ss:$16 sps:$4 sm:$0xff]  }
 0x9b1   : > { %9472 = vmatprep.subr.bf16.mxu1 %v12121_v43  ;;  %v12196_v43 = vld [vmem:[#allocation11 + $0x1c4] ss:$16 sps:$4 sm:$0xff]  }
 0x9b3   : > { %9301 = vmatpush1.bf16.msra.mxu0 %v12116_v45  ;;  %v12199_v45 = vld [vmem:[#allocation11 + $0x1cc] ss:$16 sps:$4 sm:$0xff]  }
 0x9b4   : > { %9473 = vmatpush1.bf16.msra.mxu1 %v12119_v53  ;;  %9302 = vmatprep.subr.bf16.mxu0 %v12124_v0  ;;  %v12194_v53 = vld [vmem:[#allocation11 + $0x1c0] ss:$16 sps:$4 sm:$0xff]   ;;  %v12197_v0 = vld [vmem:[#allocation11 + $0x1c8] ss:$16 sps:$4 sm:$0xff]  }
 0x9b5   : > { %9474 = vmatprep.subr.bf16.mxu1 %v12127_v17  ;;  %v12202_v17 = vld [vmem:[#allocation11 + $0x1e4] ss:$16 sps:$4 sm:$0xff]  }
 0x9b7   : > { %9303 = vmatpush1.bf16.msra.mxu0 %v12122_v27  ;;  %v12205_v27 = vld [vmem:[#allocation11 + $0x1ec] ss:$16 sps:$4 sm:$0xff]  }
 0x9b8   : > { %9475 = vmatpush1.bf16.msra.mxu1 %v12125_v4  ;;  %9304 = vmatprep.subr.bf16.mxu0 %v12130_v32  ;;  %v12200_v4 = vld [vmem:[#allocation11 + $0x1e0] ss:$16 sps:$4 sm:$0xff]   ;;  %v12203_v32 = vld [vmem:[#allocation11 + $0x1e8] ss:$16 sps:$4 sm:$0xff]  }
 0x9b9   : > { %9476 = vmatprep.subr.bf16.mxu1 %v12133_v40  ;;  %v12208_v40 = vld [vmem:[#allocation11 + $0x204] ss:$16 sps:$4 sm:$0xff]  }
 0x9bb   : > { %9305 = vmatpush1.bf16.msra.mxu0 %v12128_v24  ;;  %v12211_v24 = vld [vmem:[#allocation11 + $0x20c] ss:$16 sps:$4 sm:$0xff]  }
 0x9bc   : > { %9477 = vmatpush1.bf16.msra.mxu1 %v12131_v37  ;;  %9306 = vmatprep.subr.bf16.mxu0 %v12136_v51  ;;  %v13679_v37 = vld [vmem:[%s13761_s11] sm:$0xff] }
 0x9bd   : > { %9478 = vmatprep.subr.bf16.mxu1 %v12139_v21  ;;  %v6055_v51 = vrot.slane %v13679_v37, %v13129_v7  ;;  %v6063_v21 = vrot.slane %v13679_v37, %v13120_v3 }
 0x9bf   : > { %9307 = vmatpush1.bf16.msra.mxu0 %v12134_v25  ;;  %v6059_v25 = vrot.slane %v13679_v37, %v13132_v9 }
 0x9c0   : > { %9479 = vmatpush1.bf16.msra.mxu1 %v12137_v26  ;;  %9308 = vmatprep.subr.bf16.mxu0 %v12142_v30  ;;  %v6067_v26 = vrot.slane %v13679_v37, %v13126_v6 }
 0x9c1   : > { %9480 = vmatprep.subr.bf16.mxu1 %v12145_v34 }
 0x9c3   : > { %9309 = vmatpush1.bf16.msra.mxu0 %v12140_v42 }
 0x9c4   : > { %9481 = vmatpush1.bf16.msra.mxu1 %v12143_v36  ;;  %9310 = vmatprep.subr.bf16.mxu0 %v12148_v44 }
 0x9c5   : > { %9482 = vmatprep.subr.bf16.mxu1 %v12151_v12 }
 0x9c7   : > { %9311 = vmatpush1.bf16.msra.mxu0 %v12146_v46 }
 0x9c8   : > { %9483 = vmatpush1.bf16.msra.mxu1 %v12149_v18  ;;  %9312 = vmatprep.subr.bf16.mxu0 %v12154_v11 }
 0x9c9   : > { %9484 = vmatprep.subr.bf16.mxu1 %v12157_v16 }
 0x9cb   : > { %9313 = vmatpush1.bf16.msra.mxu0 %v12152_v47 }
 0x9cc   : > { %9485 = vmatpush1.bf16.msra.mxu1 %v12155_v48  ;;  %9314 = vmatprep.subr.bf16.mxu0 %v12160_v50 }
 0x9cd   : > { %9486 = vmatprep.subr.bf16.mxu1 %v12163_v33 }
 0x9cf   : > { %9315 = vmatpush1.bf16.msra.mxu0 %v12158_v55 }
 0x9d0   : > { %9487 = vmatpush1.bf16.msra.mxu1 %v12161_v13  ;;  %9316 = vmatprep.subr.bf16.mxu0 %v12166_v10 }
 0x9d1   : > { %9488 = vmatprep.subr.bf16.mxu1 %v12169_v35 }
 0x9d3   : > { %9317 = vmatpush1.bf16.msra.mxu0 %v12164_v38 }
 0x9d4   : > { %9489 = vmatpush1.bf16.msra.mxu1 %v12167_v52  ;;  %9318 = vmatprep.subr.bf16.mxu0 %v12172_v5 }
 0x9d5   : > { %9490 = vmatprep.subr.bf16.mxu1 %v12175_v14 }
 0x9d7   : > { %9319 = vmatpush1.bf16.msra.mxu0 %v12170_v58 }
 0x9d8   : > { %9491 = vmatpush1.bf16.msra.mxu1 %v12173_v56  ;;  %9320 = vmatprep.subr.bf16.mxu0 %v12178_v59 }
 0x9d9   : > { %9492 = vmatprep.subr.bf16.mxu1 %v12181_v60 }
 0x9db   : > { %9321 = vmatpush1.bf16.msra.mxu0 %v12176_v61 }
 0x9dc   : > { %9493 = vmatpush1.bf16.msra.mxu1 %v12179_v57  ;;  %9322 = vmatprep.subr.bf16.mxu0 %v12184_v41  ;;  %v12206_v41 = vld [vmem:[#allocation11 + $0x200] ss:$16 sps:$4 sm:$0xff]  }
 0x9dd   : > { %9494 = vmatprep.subr.bf16.mxu1 %v12187_v19  ;;  %v12209_v19 = vld [vmem:[#allocation11 + $0x208] ss:$16 sps:$4 sm:$0xff]  }
 0x9df   : > { %9323 = vmatpush1.bf16.msra.mxu0 %v12182_v31  ;;  %v12214_v31 = vld [vmem:[#allocation11 + $0x224] ss:$16 sps:$4 sm:$0xff]  }
 0x9e0   : > { %9495 = vmatpush1.bf16.msra.mxu1 %v12185_v39  ;;  %9324 = vmatprep.subr.bf16.mxu0 %v12190_v62  ;;  %v12217_v39 = vld [vmem:[#allocation11 + $0x22c] ss:$16 sps:$4 sm:$0xff]   ;;  %v12212_v62 = vld [vmem:[#allocation11 + $0x220] ss:$16 sps:$4 sm:$0xff]  }
 0x9e1   : > { %9496 = vmatprep.subr.bf16.mxu1 %v12193_v49  ;;  %v12215_v49 = vld [vmem:[#allocation11 + $0x228] ss:$16 sps:$4 sm:$0xff]  }
 0x9e3   : > { %9325 = vmatpush1.bf16.msra.mxu0 %v12188_v28  ;;  %v12220_v28 = vld [vmem:[#allocation11 + $0x244] ss:$16 sps:$4 sm:$0xff]  }
 0x9e4   : > { %9497 = vmatpush1.bf16.msra.mxu1 %v12191_v54  ;;  %9326 = vmatprep.subr.bf16.mxu0 %v12196_v43  ;;  %v12223_v54 = vld [vmem:[#allocation11 + $0x24c] ss:$16 sps:$4 sm:$0xff]   ;;  %v12218_v43 = vld [vmem:[#allocation11 + $0x240] ss:$16 sps:$4 sm:$0xff]  }
 0x9e5   : > { %9498 = vmatprep.subr.bf16.mxu1 %v12199_v45  ;;  %v12221_v45 = vld [vmem:[#allocation11 + $0x248] ss:$16 sps:$4 sm:$0xff]  }
 0x9e7   : > { %9327 = vmatpush1.bf16.msra.mxu0 %v12194_v53  ;;  %v12226_v53 = vld [vmem:[#allocation11 + $0x264] ss:$16 sps:$4 sm:$0xff]  }
 0x9e8   : > { %9499 = vmatpush1.bf16.msra.mxu1 %v12197_v0  ;;  %9328 = vmatprep.subr.bf16.mxu0 %v12202_v17  ;;  %v12229_v0 = vld [vmem:[#allocation11 + $0x26c] ss:$16 sps:$4 sm:$0xff]   ;;  %v12224_v17 = vld [vmem:[#allocation11 + $0x260] ss:$16 sps:$4 sm:$0xff]  }
 0x9e9   : > { %9500 = vmatprep.subr.bf16.mxu1 %v12205_v27  ;;  %v12227_v27 = vld [vmem:[#allocation11 + $0x268] ss:$16 sps:$4 sm:$0xff]  }
 0x9eb   : > { %9329 = vmatpush1.bf16.msra.mxu0 %v12200_v4  ;;  %v12232_v4 = vld [vmem:[#allocation11 + $0x284] ss:$16 sps:$4 sm:$0xff]  }
 0x9ec   : > { %9501 = vmatpush1.bf16.msra.mxu1 %v12203_v32  ;;  %9341 = vmatprep.subr.bf16.mxu0 %v12208_v40  ;;  %v12235_v32 = vld [vmem:[#allocation11 + $0x28c] ss:$16 sps:$4 sm:$0xff]   ;;  %v12230_v40 = vld [vmem:[#allocation11 + $0x280] ss:$16 sps:$4 sm:$0xff]  }
 0x9ed   : > { %9513 = vmatprep.subr.bf16.mxu1 %v12211_v24  ;;  %v12233_v24 = vld [vmem:[#allocation11 + $0x288] ss:$16 sps:$4 sm:$0xff]  }
 0xa01   : > { %v7449_v30 = vpop.f32.mrb[48].mxu0  ;;  %v7535_v34 = vpop.f32.mrb[48].mxu1 }
 0xa02   : > { %v11163_v42 = vadd.f32 %v7449_v30, %v6055_v51  ;;  %v11167_v36 = vadd.f32 %v7535_v34, %v6063_v21  ;;  %v7451_v44 = vpop.f32.mrb[49].mxu0  ;;  %v7537_v12 = vpop.f32.mrb[49].mxu1  ;;  %v12244_v30 = vld [vmem:[#allocation11 + $0x2c4] ss:$16 sps:$4 sm:$0xff]   ;;  %v12247_v34 = vld [vmem:[#allocation11 + $0x2cc] ss:$16 sps:$4 sm:$0xff]  }
 0xa03   : > { %v11164_v46 = vadd.f32 %v7451_v44, %v6059_v25  ;;  %v11168_v18 = vadd.f32 %v7537_v12, %v6067_v26  ;;  %v7453_v11 = vpop.f32.mrb[50].mxu0  ;;  %v7539_v16 = vpop.f32.mrb[50].mxu1  ;;  %v12250_v44 = vld [vmem:[#allocation11 + $0x2e4] ss:$16 sps:$4 sm:$0xff]   ;;  %v12253_v12 = vld [vmem:[#allocation11 + $0x2ec] ss:$16 sps:$4 sm:$0xff]  }
 0xa04   : > { %v11165_v47 = vadd.f32 %v7453_v11, %v6055_v51  ;;  %v11169_v48 = vadd.f32 %v7539_v16, %v6063_v21  ;;  %v7455_v50 = vpop.f32.mrb[51].mxu0  ;;  %v7541_v33 = vpop.f32.mrb[51].mxu1  ;;  %v7716_v10 = vmax.f32 %v11163_v42, 0.0  ;;  %v7718_v35 = vmax.f32 %v11167_v36, 0.0  ;;  %v12238_v51 = vld [vmem:[#allocation11 + $0x2a4] ss:$16 sps:$4 sm:$0xff]  }
 0xa05   : > { %v11166_v55 = vadd.f32 %v7455_v50, %v6059_v25  ;;  %v11170_v13 = vadd.f32 %v7541_v33, %v6067_v26  ;;  %v7717_v5 = vmax.f32 %v11164_v46, 0.0  ;;  %v7719_v14 = vmax.f32 %v11168_v18, 0.0  ;;  %v12241_v21 = vld [vmem:[#allocation11 + $0x2ac] ss:$16 sps:$4 sm:$0xff]   ;;  %v12236_v25 = vld [vmem:[#allocation11 + $0x2a0] ss:$16 sps:$4 sm:$0xff]  }
 0xa06   : > { %v7724_v38 = vmax.f32 %v11165_v47, 0.0  ;;  %v7726_v52 = vmax.f32 %v11169_v48, 0.0  ;;  %v12239_v26 = vld [vmem:[#allocation11 + $0x2a8] ss:$16 sps:$4 sm:$0xff]   ;;  %v12242_v42 = vld [vmem:[#allocation11 + $0x2c0] ss:$16 sps:$4 sm:$0xff]  }
 0xa07   : > { %v7725_v58 = vmax.f32 %v11166_v55, 0.0  ;;  %v7727_v56 = vmax.f32 %v11170_v13, 0.0  ;;  %v12245_v36 = vld [vmem:[#allocation11 + $0x2c8] ss:$16 sps:$4 sm:$0xff]   ;;  %v12248_v46 = vld [vmem:[#allocation11 + $0x2e0] ss:$16 sps:$4 sm:$0xff]  }
 0xa08   : > { %v7732_v59 = vpack.c.bf16 %v7724_v38, %v7716_v10  ;;  %v13689_v60 = vpack.c.bf16 %v7726_v52, %v7718_v35  ;;  %v12251_v18 = vld [vmem:[#allocation11 + $0x2e8] ss:$16 sps:$4 sm:$0xff]   ;;  %v12256_v11 = vld [vmem:[#allocation11 + $0x304] ss:$16 sps:$4 sm:$0xff]   ;;  %v12259_v16 = vld [vmem:[#allocation11 + $0x30c] ss:$16 sps:$4 sm:$0xff]  }
 0xa09   : > { %v7733_v61 = vpack.c.bf16 %v7725_v58, %v7717_v5  ;;  %v7735_v57 = vpack.c.bf16 %v7727_v56, %v7719_v14  ;;  %v12254_v47 = vld [vmem:[#allocation11 + $0x300] ss:$16 sps:$4 sm:$0xff]   ;;  %v12257_v48 = vld [vmem:[#allocation11 + $0x308] ss:$16 sps:$4 sm:$0xff]   ;;  %v12262_v50 = vld [vmem:[#allocation11 + $0x324] ss:$16 sps:$4 sm:$0xff]  }
 0xa0a   : > { %v12265_v33 = vld [vmem:[#allocation11 + $0x32c] ss:$16 sps:$4 sm:$0xff]   ;;  %v12260_v55 = vld [vmem:[#allocation11 + $0x320] ss:$16 sps:$4 sm:$0xff]   ;;  %v12263_v13 = vld [vmem:[#allocation11 + $0x328] ss:$16 sps:$4 sm:$0xff]  }
 0xa0b   : > { %9330 = vmatprep.mubr.bf16.mxu0 %v7733_v61  ;;  %9502 = vmatprep.mubr.bf16.mxu1 %v7733_v61  ;;  %v12268_v10 = vld [vmem:[#allocation11 + $0x344] ss:$16 sps:$4 sm:$0xff]   ;;  %v12271_v35 = vld [vmem:[#allocation11 + $0x34c] ss:$16 sps:$4 sm:$0xff]   ;;  %v12266_v38 = vld [vmem:[#allocation11 + $0x340] ss:$16 sps:$4 sm:$0xff]  }
 0xa0c   : > { %9331 = vmatmul.mubr.bf16.vlgmr.msra.gmra.mrb[56].mxu0 %v7732_v59  ;;  %9503 = vmatmul.mubr.bf16.vlgmr.msra.gmra.mrb[56].mxu1 %v7732_v59  ;;  %v12269_v52 = vld [vmem:[#allocation11 + $0x348] ss:$16 sps:$4 sm:$0xff]   ;;  %v12274_v5 = vld [vmem:[#allocation11 + $0x364] ss:$16 sps:$4 sm:$0xff]   ;;  %v12277_v14 = vld [vmem:[#allocation11 + $0x36c] ss:$16 sps:$4 sm:$0xff]  }
 0xa0d   : > { %9342 = vmatpush1.bf16.msra.mxu0 %v12206_v41  ;;  %9514 = vmatpush1.bf16.msra.mxu1 %v12209_v19  ;;  %v12272_v58 = vld [vmem:[#allocation11 + $0x360] ss:$16 sps:$4 sm:$0xff]   ;;  %v12275_v56 = vld [vmem:[#allocation11 + $0x368] ss:$16 sps:$4 sm:$0xff]   ;;  %v12280_v59 = vld [vmem:[#allocation11 + $0x384] ss:$16 sps:$4 sm:$0xff]  }
 0xa0e   : > { %9373 = vmatprep.mubr.bf16.mxu0 %v7735_v57  ;;  %9545 = vmatprep.mubr.bf16.mxu1 %v7735_v57  ;;  %v12283_v61 = vld [vmem:[#allocation11 + $0x38c] ss:$16 sps:$4 sm:$0xff]   ;;  %v12278_v57 = vld [vmem:[#allocation11 + $0x380] ss:$16 sps:$4 sm:$0xff]   ;;  %v12281_v41 = vld [vmem:[#allocation11 + $0x388] ss:$16 sps:$4 sm:$0xff]  }
 0xa0f   : > { %9343 = vmatprep.subr.bf16.mxu0 %v12214_v31  ;;  %9515 = vmatprep.subr.bf16.mxu1 %v12217_v39  ;;  %v12286_v19 = vld [vmem:[#allocation11 + $0x3a4] ss:$16 sps:$4 sm:$0xff]   ;;  %v12289_v31 = vld [vmem:[#allocation11 + $0x3ac] ss:$16 sps:$4 sm:$0xff]   ;;  %v12284_v39 = vld [vmem:[#allocation11 + $0x3a0] ss:$16 sps:$4 sm:$0xff]  }
 0xa11   : > { %9344 = vmatpush1.bf16.msra.mxu0 %v12212_v62  ;;  %9516 = vmatpush1.bf16.msra.mxu1 %v12215_v49  ;;  %v12287_v62 = vld [vmem:[#allocation11 + $0x3a8] ss:$16 sps:$4 sm:$0xff]   ;;  %v12292_v49 = vld [vmem:[#allocation11 + $0x3c4] ss:$16 sps:$4 sm:$0xff]  }
 0xa12   : > { %9345 = vmatprep.subr.bf16.mxu0 %v12220_v28  ;;  %9517 = vmatprep.subr.bf16.mxu1 %v12223_v54  ;;  %v12295_v28 = vld [vmem:[#allocation11 + $0x3cc] ss:$16 sps:$4 sm:$0xff]   ;;  %v12290_v54 = vld [vmem:[#allocation11 + $0x3c0] ss:$16 sps:$4 sm:$0xff]  }
 0xa15   : > { %9346 = vmatpush1.bf16.msra.mxu0 %v12218_v43  ;;  %9518 = vmatpush1.bf16.msra.mxu1 %v12221_v45  ;;  %v12293_v43 = vld [vmem:[#allocation11 + $0x3c8] ss:$16 sps:$4 sm:$0xff]   ;;  %v12298_v45 = vld [vmem:[#allocation11 + $0x3e4] ss:$16 sps:$4 sm:$0xff]  }
 0xa16   : > { %9347 = vmatprep.subr.bf16.mxu0 %v12226_v53  ;;  %9519 = vmatprep.subr.bf16.mxu1 %v12229_v0  ;;  %v12301_v53 = vld [vmem:[#allocation11 + $0x3ec] ss:$16 sps:$4 sm:$0xff]   ;;  %v12296_v0 = vld [vmem:[#allocation11 + $0x3e0] ss:$16 sps:$4 sm:$0xff]  }
 0xa19   : > { %9348 = vmatpush1.bf16.msra.mxu0 %v12224_v17  ;;  %9520 = vmatpush1.bf16.msra.mxu1 %v12227_v27  ;;  %v12299_v17 = vld [vmem:[#allocation11 + $0x3e8] ss:$16 sps:$4 sm:$0xff]   ;;  %v12304_v27 = vld [vmem:[#allocation11 + $0x404] ss:$16 sps:$4 sm:$0xff]  }
 0xa1a   : > { %9349 = vmatprep.subr.bf16.mxu0 %v12232_v4  ;;  %9521 = vmatprep.subr.bf16.mxu1 %v12235_v32  ;;  %v12307_v4 = vld [vmem:[#allocation11 + $0x40c] ss:$16 sps:$4 sm:$0xff]   ;;  %v12302_v32 = vld [vmem:[#allocation11 + $0x400] ss:$16 sps:$4 sm:$0xff]  }
 0xa1d   : > { %9350 = vmatpush1.bf16.msra.mxu0 %v12230_v40  ;;  %9522 = vmatpush1.bf16.msra.mxu1 %v12233_v24  ;;  %v12305_v40 = vld [vmem:[#allocation11 + $0x408] ss:$16 sps:$4 sm:$0xff]   ;;  %v12310_v24 = vld [vmem:[#allocation11 + $0x424] ss:$16 sps:$4 sm:$0xff]  }
 0xa1e   : > { %9351 = vmatprep.subr.bf16.mxu0 %v12238_v51  ;;  %9523 = vmatprep.subr.bf16.mxu1 %v12241_v21  ;;  %v12313_v51 = vld [vmem:[#allocation11 + $0x42c] ss:$16 sps:$4 sm:$0xff]   ;;  %v12308_v21 = vld [vmem:[#allocation11 + $0x420] ss:$16 sps:$4 sm:$0xff]  }
 0xa21   : > { %9352 = vmatpush1.bf16.msra.mxu0 %v12236_v25  ;;  %9524 = vmatpush1.bf16.msra.mxu1 %v12239_v26  ;;  %v12311_v25 = vld [vmem:[#allocation11 + $0x428] ss:$16 sps:$4 sm:$0xff]   ;;  %v12316_v26 = vld [vmem:[#allocation11 + $0x444] ss:$16 sps:$4 sm:$0xff]  }
 0xa22   : > { %9353 = vmatprep.subr.bf16.mxu0 %v12244_v30  ;;  %9525 = vmatprep.subr.bf16.mxu1 %v12247_v34  ;;  %v12319_v30 = vld [vmem:[#allocation11 + $0x44c] ss:$16 sps:$4 sm:$0xff]   ;;  %v12314_v34 = vld [vmem:[#allocation11 + $0x440] ss:$16 sps:$4 sm:$0xff]  }
 0xa25   : > { %9354 = vmatpush1.bf16.msra.mxu0 %v12242_v42  ;;  %9526 = vmatpush1.bf16.msra.mxu1 %v12245_v36  ;;  %v12317_v42 = vld [vmem:[#allocation11 + $0x448] ss:$16 sps:$4 sm:$0xff]   ;;  %v12322_v36 = vld [vmem:[#allocation11 + $0x464] ss:$16 sps:$4 sm:$0xff]  }
 0xa26   : > { %9355 = vmatprep.subr.bf16.mxu0 %v12250_v44  ;;  %9527 = vmatprep.subr.bf16.mxu1 %v12253_v12  ;;  %v12325_v44 = vld [vmem:[#allocation11 + $0x46c] ss:$16 sps:$4 sm:$0xff]   ;;  %v12320_v12 = vld [vmem:[#allocation11 + $0x460] ss:$16 sps:$4 sm:$0xff]  }
 0xa29   : > { %9356 = vmatpush1.bf16.msra.mxu0 %v12248_v46  ;;  %9528 = vmatpush1.bf16.msra.mxu1 %v12251_v18  ;;  %v12328_v46 = vld [vmem:[#allocation11 + $0x484] ss:$16 sps:$4 sm:$0xff]   ;;  %v12331_v18 = vld [vmem:[#allocation11 + $0x48c] ss:$16 sps:$4 sm:$0xff]  }
 0xa2a   : > { %9357 = vmatprep.subr.bf16.mxu0 %v12256_v11  ;;  %9529 = vmatprep.subr.bf16.mxu1 %v12259_v16  ;;  %v12326_v11 = vld [vmem:[#allocation11 + $0x480] ss:$16 sps:$4 sm:$0xff]   ;;  %v12329_v16 = vld [vmem:[#allocation11 + $0x488] ss:$16 sps:$4 sm:$0xff]  }
 0xa2d   : > { %9358 = vmatpush1.bf16.msra.mxu0 %v12254_v47  ;;  %9530 = vmatpush1.bf16.msra.mxu1 %v12257_v48  ;;  %v12334_v47 = vld [vmem:[#allocation11 + $0x4a4] ss:$16 sps:$4 sm:$0xff]   ;;  %v12337_v48 = vld [vmem:[#allocation11 + $0x4ac] ss:$16 sps:$4 sm:$0xff]  }
 0xa2e   : > { %9359 = vmatprep.subr.bf16.mxu0 %v12262_v50  ;;  %9531 = vmatprep.subr.bf16.mxu1 %v12265_v33  ;;  %v12332_v50 = vld [vmem:[#allocation11 + $0x4a0] ss:$16 sps:$4 sm:$0xff]   ;;  %v12335_v33 = vld [vmem:[#allocation11 + $0x4a8] ss:$16 sps:$4 sm:$0xff]  }
 0xa31   : > { %9360 = vmatpush1.bf16.msra.mxu0 %v12260_v55  ;;  %9532 = vmatpush1.bf16.msra.mxu1 %v12263_v13  ;;  %v12340_v55 = vld [vmem:[#allocation11 + $0x4c4] ss:$16 sps:$4 sm:$0xff]   ;;  %v12343_v13 = vld [vmem:[#allocation11 + $0x4cc] ss:$16 sps:$4 sm:$0xff]  }
 0xa32   : > { %9361 = vmatprep.subr.bf16.mxu0 %v12268_v10  ;;  %9533 = vmatprep.subr.bf16.mxu1 %v12271_v35  ;;  %v12338_v10 = vld [vmem:[#allocation11 + $0x4c0] ss:$16 sps:$4 sm:$0xff]   ;;  %v12341_v35 = vld [vmem:[#allocation11 + $0x4c8] ss:$16 sps:$4 sm:$0xff]  }
 0xa35   : > { %9362 = vmatpush1.bf16.msra.mxu0 %v12266_v38  ;;  %9534 = vmatpush1.bf16.msra.mxu1 %v12269_v52  ;;  %v12346_v38 = vld [vmem:[#allocation11 + $0x4e4] ss:$16 sps:$4 sm:$0xff]   ;;  %v12349_v52 = vld [vmem:[#allocation11 + $0x4ec] ss:$16 sps:$4 sm:$0xff]  }
 0xa36   : > { %9363 = vmatprep.subr.bf16.mxu0 %v12274_v5  ;;  %9535 = vmatprep.subr.bf16.mxu1 %v12277_v14  ;;  %v12344_v5 = vld [vmem:[#allocation11 + $0x4e0] ss:$16 sps:$4 sm:$0xff]   ;;  %v12347_v14 = vld [vmem:[#allocation11 + $0x4e8] ss:$16 sps:$4 sm:$0xff]  }
 0xa39   : > { %9364 = vmatpush1.bf16.msra.mxu0 %v12272_v58  ;;  %9536 = vmatpush1.bf16.msra.mxu1 %v12275_v56  ;;  %v12352_v58 = vld [vmem:[#allocation11 + $0x504] ss:$16 sps:$4 sm:$0xff]   ;;  %v12355_v56 = vld [vmem:[#allocation11 + $0x50c] ss:$16 sps:$4 sm:$0xff]  }
 0xa3a   : > { %9365 = vmatprep.subr.bf16.mxu0 %v12280_v59  ;;  %9537 = vmatprep.subr.bf16.mxu1 %v12283_v61  ;;  %v12350_v59 = vld [vmem:[#allocation11 + $0x500] ss:$16 sps:$4 sm:$0xff]   ;;  %v12353_v61 = vld [vmem:[#allocation11 + $0x508] ss:$16 sps:$4 sm:$0xff]  }
 0xa3d   : > { %9366 = vmatpush1.bf16.msra.mxu0 %v12278_v57  ;;  %9538 = vmatpush1.bf16.msra.mxu1 %v12281_v41  ;;  %v12358_v57 = vld [vmem:[#allocation11 + $0x524] ss:$16 sps:$4 sm:$0xff]   ;;  %v12361_v41 = vld [vmem:[#allocation11 + $0x52c] ss:$16 sps:$4 sm:$0xff]  }
 0xa3e   : > { %9367 = vmatprep.subr.bf16.mxu0 %v12286_v19  ;;  %9539 = vmatprep.subr.bf16.mxu1 %v12289_v31  ;;  %v12356_v19 = vld [vmem:[#allocation11 + $0x520] ss:$16 sps:$4 sm:$0xff]   ;;  %v12359_v31 = vld [vmem:[#allocation11 + $0x528] ss:$16 sps:$4 sm:$0xff]  }
 0xa41   : > { %9368 = vmatpush1.bf16.msra.mxu0 %v12284_v39  ;;  %9540 = vmatpush1.bf16.msra.mxu1 %v12287_v62  ;;  %v12364_v39 = vld [vmem:[#allocation11 + $0x544] ss:$16 sps:$4 sm:$0xff]   ;;  %v12367_v62 = vld [vmem:[#allocation11 + $0x54c] ss:$16 sps:$4 sm:$0xff]  }
 0xa42   : > { %9369 = vmatprep.subr.bf16.mxu0 %v12292_v49  ;;  %9541 = vmatprep.subr.bf16.mxu1 %v12295_v28  ;;  %v12362_v49 = vld [vmem:[#allocation11 + $0x540] ss:$16 sps:$4 sm:$0xff]   ;;  %v12365_v28 = vld [vmem:[#allocation11 + $0x548] ss:$16 sps:$4 sm:$0xff]  }
 0xa45   : > { %9370 = vmatpush1.bf16.msra.mxu0 %v12290_v54  ;;  %9542 = vmatpush1.bf16.msra.mxu1 %v12293_v43  ;;  %v12370_v54 = vld [vmem:[#allocation11 + $0x564] ss:$16 sps:$4 sm:$0xff]   ;;  %v12373_v43 = vld [vmem:[#allocation11 + $0x56c] ss:$16 sps:$4 sm:$0xff]  }
 0xa46   : > { %9371 = vmatprep.subr.bf16.mxu0 %v12298_v45  ;;  %9543 = vmatprep.subr.bf16.mxu1 %v12301_v53  ;;  %v12368_v45 = vld [vmem:[#allocation11 + $0x560] ss:$16 sps:$4 sm:$0xff]   ;;  %v12371_v53 = vld [vmem:[#allocation11 + $0x568] ss:$16 sps:$4 sm:$0xff]  }
 0xa49   : > { %9372 = vmatpush1.bf16.msra.mxu0 %v12296_v0  ;;  %9544 = vmatpush1.bf16.msra.mxu1 %v12299_v17  ;;  %v12376_v0 = vld [vmem:[#allocation11 + $0x584] ss:$16 sps:$4 sm:$0xff]   ;;  %v12379_v17 = vld [vmem:[#allocation11 + $0x58c] ss:$16 sps:$4 sm:$0xff]  }
 0xa4a   : > { %9384 = vmatprep.subr.bf16.mxu0 %v12304_v27  ;;  %9556 = vmatprep.subr.bf16.mxu1 %v12307_v4  ;;  %v12374_v27 = vld [vmem:[#allocation11 + $0x580] ss:$16 sps:$4 sm:$0xff]   ;;  %v12377_v4 = vld [vmem:[#allocation11 + $0x588] ss:$16 sps:$4 sm:$0xff]  }
 0xa4c   : > { %9374 = vmatmul.mubr.bf16.vlgmr.msra.gmra.mrb[56].mxu0 %v13689_v60  ;;  %9546 = vmatmul.mubr.bf16.vlgmr.msra.gmra.mrb[56].mxu1 %v13689_v60  ;;  %v12323_v60 = vld [vmem:[#allocation11 + $0x468] ss:$16 sps:$4 sm:$0xff]  }
 0xa4d   : > { %9385 = vmatpush1.bf16.msra.mxu0 %v12302_v32  ;;  %9557 = vmatpush1.bf16.msra.mxu1 %v12305_v40  ;;  %v12382_v32 = vld [vmem:[#allocation11 + $0x5a4] ss:$16 sps:$4 sm:$0xff]   ;;  %v12385_v40 = vld [vmem:[#allocation11 + $0x5ac] ss:$16 sps:$4 sm:$0xff]  }
 0xa4e   : > { %9386 = vmatprep.subr.bf16.mxu0 %v12310_v24  ;;  %9558 = vmatprep.subr.bf16.mxu1 %v12313_v51  ;;  %v6070_v24 = vsub.s32 4, %v13117_v1  ;;  %v6078_v51 = vsub.s32 6, %v13117_v1 }
 0xa51   : > { %9387 = vmatpush1.bf16.msra.mxu0 %v12308_v21  ;;  %9559 = vmatpush1.bf16.msra.mxu1 %v12311_v25  ;;  %v6074_v21 = vsub.s32 5, %v13117_v1  ;;  %v6082_v25 = vsub.s32 7, %v13117_v1  ;;  %v12386_v1 = vld [vmem:[#allocation11 + $0x5c0] ss:$16 sps:$4 sm:$0xff]  }
 0xa52   : > { %9388 = vmatprep.subr.bf16.mxu0 %v12316_v26  ;;  %9560 = vmatprep.subr.bf16.mxu1 %v12319_v30  ;;  %v12380_v26 = vld [vmem:[#allocation11 + $0x5a0] ss:$16 sps:$4 sm:$0xff]   ;;  %v12383_v30 = vld [vmem:[#allocation11 + $0x5a8] ss:$16 sps:$4 sm:$0xff]  }
 0xa55   : > { %9389 = vmatpush1.bf16.msra.mxu0 %v12314_v34  ;;  %9561 = vmatpush1.bf16.msra.mxu1 %v12317_v42  ;;  %v6071_v34 = vrot.slane %v13679_v37, %v6070_v24  ;;  %v12388_v42 = vld [vmem:[#allocation11 + $0x5c4] ss:$16 sps:$4 sm:$0xff]   ;;  %v12404_v24 = vld [vmem:[#allocation11 + $0x620] ss:$16 sps:$4 sm:$0xff]  }
 0xa56   : > { %9390 = vmatprep.subr.bf16.mxu0 %v12322_v36  ;;  %9562 = vmatprep.subr.bf16.mxu1 %v12325_v44  ;;  %v12391_v36 = vld [vmem:[#allocation11 + $0x5cc] ss:$16 sps:$4 sm:$0xff]   ;;  %v6079_v44 = vrot.slane %v13679_v37, %v6078_v51  ;;  %v12407_v51 = vld [vmem:[#allocation11 + $0x628] ss:$16 sps:$4 sm:$0xff]  }
 0xa59   : > { %9391 = vmatpush1.bf16.msra.mxu0 %v12320_v12  ;;  %9563 = vmatpush1.bf16.msra.mxu1 %v12323_v60  ;;  %v6075_v12 = vrot.slane %v13679_v37, %v6074_v21  ;;  %v6083_v60 = vrot.slane %v13679_v37, %v6082_v25  ;;  %v12412_v21 = vld [vmem:[#allocation11 + $0x644] ss:$16 sps:$4 sm:$0xff]   ;;  %v12415_v25 = vld [vmem:[#allocation11 + $0x64c] ss:$16 sps:$4 sm:$0xff]  }
 0xa5a   : > { %9392 = vmatprep.subr.bf16.mxu0 %v12328_v46  ;;  %9564 = vmatprep.subr.bf16.mxu1 %v12331_v18  ;;  %v12389_v18 = vld [vmem:[#allocation11 + $0x5c8] ss:$16 sps:$4 sm:$0xff]  }
 0xa5d   : > { %9393 = vmatpush1.bf16.msra.mxu0 %v12326_v11  ;;  %9565 = vmatpush1.bf16.msra.mxu1 %v12329_v16 }
 0xa5e   : > { %9394 = vmatprep.subr.bf16.mxu0 %v12334_v47  ;;  %9566 = vmatprep.subr.bf16.mxu1 %v12337_v48  ;;  %v12394_v48 = vld [vmem:[#allocation11 + $0x5e4] ss:$16 sps:$4 sm:$0xff]  }
 0xa61   : > { %9395 = vmatpush1.bf16.msra.mxu0 %v12332_v50  ;;  %9567 = vmatpush1.bf16.msra.mxu1 %v12335_v33  ;;  %v12397_v50 = vld [vmem:[#allocation11 + $0x5ec] ss:$16 sps:$4 sm:$0xff]  }
 0xa62   : > { %9396 = vmatprep.subr.bf16.mxu0 %v12340_v55  ;;  %9568 = vmatprep.subr.bf16.mxu1 %v12343_v13 }
 0xa65   : > { %9397 = vmatpush1.bf16.msra.mxu0 %v12338_v10  ;;  %9569 = vmatpush1.bf16.msra.mxu1 %v12341_v35 }
 0xa66   : > { %9398 = vmatprep.subr.bf16.mxu0 %v12346_v38  ;;  %9570 = vmatprep.subr.bf16.mxu1 %v12349_v52 }
 0xa69   : > { %9399 = vmatpush1.bf16.msra.mxu0 %v12344_v5  ;;  %9571 = vmatpush1.bf16.msra.mxu1 %v12347_v14 }
 0xa6a   : > { %9400 = vmatprep.subr.bf16.mxu0 %v12352_v58  ;;  %9572 = vmatprep.subr.bf16.mxu1 %v12355_v56  ;;  %v12392_v56 = vld [vmem:[#allocation11 + $0x5e0] ss:$16 sps:$4 sm:$0xff]  }
 0xa6d   : > { %9401 = vmatpush1.bf16.msra.mxu0 %v12350_v59  ;;  %9573 = vmatpush1.bf16.msra.mxu1 %v12353_v61  ;;  %v12395_v59 = vld [vmem:[#allocation11 + $0x5e8] ss:$16 sps:$4 sm:$0xff]  }
 0xa6e   : > { %9402 = vmatprep.subr.bf16.mxu0 %v12358_v57  ;;  %9574 = vmatprep.subr.bf16.mxu1 %v12361_v41 }
 0xa71   : > { %9403 = vmatpush1.bf16.msra.mxu0 %v12356_v19  ;;  %9575 = vmatpush1.bf16.msra.mxu1 %v12359_v31  ;;  %v12400_v19 = vld [vmem:[#allocation11 + $0x604] ss:$16 sps:$4 sm:$0xff]   ;;  %v12403_v31 = vld [vmem:[#allocation11 + $0x60c] ss:$16 sps:$4 sm:$0xff]  }
 0xa72   : > { %9404 = vmatprep.subr.bf16.mxu0 %v12364_v39  ;;  %9576 = vmatprep.subr.bf16.mxu1 %v12367_v62 }
 0xa75   : > { %9405 = vmatpush1.bf16.msra.mxu0 %v12362_v49  ;;  %9577 = vmatpush1.bf16.msra.mxu1 %v12365_v28 }
 0xa76   : > { %9406 = vmatprep.subr.bf16.mxu0 %v12370_v54  ;;  %9578 = vmatprep.subr.bf16.mxu1 %v12373_v43 }
 0xa79   : > { %9407 = vmatpush1.bf16.msra.mxu0 %v12368_v45  ;;  %9579 = vmatpush1.bf16.msra.mxu1 %v12371_v53 }
 0xa7a   : > { %9408 = vmatprep.subr.bf16.mxu0 %v12376_v0  ;;  %9580 = vmatprep.subr.bf16.mxu1 %v12379_v17  ;;  %v12398_v17 = vld [vmem:[#allocation11 + $0x600] ss:$16 sps:$4 sm:$0xff]  }
 0xa7d   : > { %9409 = vmatpush1.bf16.msra.mxu0 %v12374_v27  ;;  %9581 = vmatpush1.bf16.msra.mxu1 %v12377_v4  ;;  %v12401_v27 = vld [vmem:[#allocation11 + $0x608] ss:$16 sps:$4 sm:$0xff]  }
 0xa7e   : > { %9410 = vmatprep.subr.bf16.mxu0 %v12382_v32  ;;  %9582 = vmatprep.subr.bf16.mxu1 %v12385_v40  ;;  %v12406_v32 = vld [vmem:[#allocation11 + $0x624] ss:$16 sps:$4 sm:$0xff]   ;;  %v12409_v40 = vld [vmem:[#allocation11 + $0x62c] ss:$16 sps:$4 sm:$0xff]  }
 0xa81   : > { %9411 = vmatpush1.bf16.msra.mxu0 %v12380_v26  ;;  %9583 = vmatpush1.bf16.msra.mxu1 %v12383_v30  ;;  %v7621_v46 = vpop.f32.mrb[52].mxu0  ;;  %v12410_v26 = vld [vmem:[#allocation11 + $0x640] ss:$16 sps:$4 sm:$0xff]   ;;  %v12413_v30 = vld [vmem:[#allocation11 + $0x648] ss:$16 sps:$4 sm:$0xff]  }
 0xa82   : > { %v11171_v11 = vadd.f32 %v7621_v46, %v6071_v34  ;;  %v7707_v16 = vpop.f32.mrb[52].mxu1  ;;  %v7623_v47 = vpop.f32.mrb[53].mxu0  ;;  %9412 = vmatprep.subr.bf16.mxu0 %v12388_v42  ;;  %9584 = vmatprep.subr.bf16.mxu1 %v12391_v36  ;;  %v12421_v42 = vld [vmem:[#allocation11 + $0x66c] ss:$16 sps:$4 sm:$0xff]   ;;  %v12416_v36 = vld [vmem:[#allocation11 + $0x660] ss:$16 sps:$4 sm:$0xff]  }
 0xa83   : > { %v11175_v33 = vadd.f32 %v7707_v16, %v6079_v44  ;;  %v11172_v55 = vadd.f32 %v7623_v47, %v6075_v12  ;;  %v7709_v13 = vpop.f32.mrb[53].mxu1  ;;  %v7625_v10 = vpop.f32.mrb[54].mxu0  ;;  %v12422_v46 = vld [vmem:[#allocation11 + $0x680] ss:$16 sps:$4 sm:$0xff]   ;;  %v12431_v47 = vld [vmem:[#allocation11 + $0x6a8] ss:$16 sps:$4 sm:$0xff]  }
 0xa84   : > { %v11176_v35 = vadd.f32 %v7709_v13, %v6083_v60  ;;  %v11173_v38 = vadd.f32 %v7625_v10, %v6071_v34  ;;  %v7711_v52 = vpop.f32.mrb[54].mxu1  ;;  %v7627_v37 = vpop.f32.mrb[55].mxu0  ;;  %v7720_v61 = vmax.f32 %v11171_v11, 0.0  ;;  %v12418_v34 = vld [vmem:[#allocation11 + $0x664] ss:$16 sps:$4 sm:$0xff]  }
 0xa85   : > { %v11177_v5 = vadd.f32 %v7711_v52, %v6079_v44  ;;  %v11174_v14 = vadd.f32 %v7627_v37, %v6075_v12  ;;  %v7713_v58 = vpop.f32.mrb[55].mxu1  ;;  %9413 = vmatpush1.bf16.msra.mxu0 %v12386_v1  ;;  %9585 = vmatpush1.bf16.msra.mxu1 %v12389_v18  ;;  %v7722_v39 = vmax.f32 %v11175_v33, 0.0  ;;  %v7721_v62 = vmax.f32 %v11172_v55, 0.0  ;;  %v12419_v44 = vld [vmem:[#allocation11 + $0x668] ss:$16 sps:$4 sm:$0xff]  }
 0xa86   : > { %v7728_v57 = vmax.f32 %v11173_v38, 0.0  ;;  %v11178_v41 = vadd.f32 %v7713_v58, %v6083_v60  ;;  %9414 = vmatprep.subr.bf16.mxu0 %v12394_v48  ;;  %9586 = vmatprep.subr.bf16.mxu1 %v12397_v50  ;;  %v7723_v54 = vmax.f32 %v11176_v35, 0.0  ;;  %v12424_v12 = vld [vmem:[#allocation11 + $0x684] ss:$16 sps:$4 sm:$0xff]   ;;  %v12427_v60 = vld [vmem:[#allocation11 + $0x68c] ss:$16 sps:$4 sm:$0xff]  }
 0xa87   : > { %v7730_v49 = vmax.f32 %v11177_v5, 0.0  ;;  %v7729_v28 = vmax.f32 %v11174_v14, 0.0  ;;  %v12425_v1 = vld [vmem:[#allocation11 + $0x688] ss:$16 sps:$4 sm:$0xff]   ;;  %v12430_v18 = vld [vmem:[#allocation11 + $0x6a4] ss:$16 sps:$4 sm:$0xff]  }
 0xa88   : > { %v7736_v43 = vpack.c.bf16 %v7728_v57, %v7720_v61  ;;  %v7731_v45 = vmax.f32 %v11178_v41, 0.0  ;;  %v12433_v11 = vld [vmem:[#allocation11 + $0x6ac] ss:$16 sps:$4 sm:$0xff]   ;;  %v12428_v16 = vld [vmem:[#allocation11 + $0x6a0] ss:$16 sps:$4 sm:$0xff]  }
 0xa89   : > { %v13701_v53 = vpack.c.bf16 %v7730_v49, %v7722_v39  ;;  %v7737_v0 = vpack.c.bf16 %v7729_v28, %v7721_v62  ;;  %9415 = vmatpush1.bf16.msra.mxu0 %v12392_v56  ;;  %9587 = vmatpush1.bf16.msra.mxu1 %v12395_v59  ;;  %v12436_v48 = vld [vmem:[#allocation11 + $0x6c4] ss:$16 sps:$4 sm:$0xff]   ;;  %v12439_v50 = vld [vmem:[#allocation11 + $0x6cc] ss:$16 sps:$4 sm:$0xff]   ;;  %v12434_v33 = vld [vmem:[#allocation11 + $0x6c0] ss:$16 sps:$4 sm:$0xff]  }
 0xa8a   : > { %v7739_v4 = vpack.c.bf16 %v7731_v45, %v7723_v54  ;;  %9427 = vmatprep.subr.bf16.mxu0 %v12400_v19  ;;  %9599 = vmatprep.subr.bf16.mxu1 %v12403_v31  ;;  %v12437_v55 = vld [vmem:[#allocation11 + $0x6c8] ss:$16 sps:$4 sm:$0xff]   ;;  %v12442_v13 = vld [vmem:[#allocation11 + $0x6e4] ss:$16 sps:$4 sm:$0xff]   ;;  %v12445_v10 = vld [vmem:[#allocation11 + $0x6ec] ss:$16 sps:$4 sm:$0xff]  }
 0xa8b   : > { %9416 = vmatprep.mubr.bf16.mxu0 %v7737_v0  ;;  %9588 = vmatprep.mubr.bf16.mxu1 %v7737_v0  ;;  %v12440_v35 = vld [vmem:[#allocation11 + $0x6e0] ss:$16 sps:$4 sm:$0xff]   ;;  %v12443_v38 = vld [vmem:[#allocation11 + $0x6e8] ss:$16 sps:$4 sm:$0xff]   ;;  %v12448_v52 = vld [vmem:[#allocation11 + $0x704] ss:$16 sps:$4 sm:$0xff]  }
 0xa8c   : > { %9417 = vmatmul.mubr.bf16.vlgmr.msra.gmra.mrb[56].mxu0 %v7736_v43  ;;  %9589 = vmatmul.mubr.bf16.vlgmr.msra.gmra.mrb[56].mxu1 %v7736_v43  ;;  %v12451_v37 = vld [vmem:[#allocation11 + $0x70c] ss:$16 sps:$4 sm:$0xff]   ;;  %v12446_v5 = vld [vmem:[#allocation11 + $0x700] ss:$16 sps:$4 sm:$0xff]   ;;  %v12449_v14 = vld [vmem:[#allocation11 + $0x708] ss:$16 sps:$4 sm:$0xff]  }
 0xa8d   : > { %9428 = vmatpush1.bf16.msra.mxu0 %v12398_v17  ;;  %9600 = vmatpush1.bf16.msra.mxu1 %v12401_v27  ;;  %v12454_v58 = vld [vmem:[#allocation11 + $0x724] ss:$16 sps:$4 sm:$0xff]   ;;  %v12457_v56 = vld [vmem:[#allocation11 + $0x72c] ss:$16 sps:$4 sm:$0xff]   ;;  %v12452_v59 = vld [vmem:[#allocation11 + $0x720] ss:$16 sps:$4 sm:$0xff]  }
 0xa8e   : > { %9459 = vmatprep.mubr.bf16.mxu0 %v7739_v4  ;;  %9631 = vmatprep.mubr.bf16.mxu1 %v7739_v4  ;;  %v12455_v61 = vld [vmem:[#allocation11 + $0x728] ss:$16 sps:$4 sm:$0xff]   ;;  %v12460_v57 = vld [vmem:[#allocation11 + $0x744] ss:$16 sps:$4 sm:$0xff]   ;;  %v12463_v41 = vld [vmem:[#allocation11 + $0x74c] ss:$16 sps:$4 sm:$0xff]  }
 0xa8f   : > { %9429 = vmatprep.subr.bf16.mxu0 %v12406_v32  ;;  %9601 = vmatprep.subr.bf16.mxu1 %v12409_v40  ;;  %v12458_v19 = vld [vmem:[#allocation11 + $0x740] ss:$16 sps:$4 sm:$0xff]   ;;  %v12461_v31 = vld [vmem:[#allocation11 + $0x748] ss:$16 sps:$4 sm:$0xff]   ;;  %v12466_v39 = vld [vmem:[#allocation11 + $0x764] ss:$16 sps:$4 sm:$0xff]  }
 0xa90   : > { %v12469_v62 = vld [vmem:[#allocation11 + $0x76c] ss:$16 sps:$4 sm:$0xff]   ;;  %v12464_v49 = vld [vmem:[#allocation11 + $0x760] ss:$16 sps:$4 sm:$0xff]   ;;  %v12467_v28 = vld [vmem:[#allocation11 + $0x768] ss:$16 sps:$4 sm:$0xff]  }
 0xa91   : > { %9430 = vmatpush1.bf16.msra.mxu0 %v12404_v24  ;;  %9602 = vmatpush1.bf16.msra.mxu1 %v12407_v51  ;;  %v12472_v54 = vld [vmem:[#allocation11 + $0x784] ss:$16 sps:$4 sm:$0xff]   ;;  %v12475_v43 = vld [vmem:[#allocation11 + $0x78c] ss:$16 sps:$4 sm:$0xff]   ;;  %v12470_v45 = vld [vmem:[#allocation11 + $0x780] ss:$16 sps:$4 sm:$0xff]  }
 0xa92   : > { %9431 = vmatprep.subr.bf16.mxu0 %v12412_v21  ;;  %9603 = vmatprep.subr.bf16.mxu1 %v12415_v25  ;;  %v12473_v0 = vld [vmem:[#allocation11 + $0x788] ss:$16 sps:$4 sm:$0xff]   ;;  %v12478_v17 = vld [vmem:[#allocation11 + $0x7a4] ss:$16 sps:$4 sm:$0xff]   ;;  %v12481_v27 = vld [vmem:[#allocation11 + $0x7ac] ss:$16 sps:$4 sm:$0xff]  }
 0xa93   : > { %v12476_v4 = vld [vmem:[#allocation11 + $0x7a0] ss:$16 sps:$4 sm:$0xff]   ;;  %v12479_v32 = vld [vmem:[#allocation11 + $0x7a8] ss:$16 sps:$4 sm:$0xff]   ;;  %v12484_v40 = vld [vmem:[#allocation11 + $0x7c4] ss:$16 sps:$4 sm:$0xff]  }
 0xa94   : > { %v12487_v24 = vld [vmem:[#allocation11 + $0x7cc] ss:$16 sps:$4 sm:$0xff]   ;;  %v12482_v51 = vld [vmem:[#allocation11 + $0x7c0] ss:$16 sps:$4 sm:$0xff]   ;;  %v12485_v21 = vld [vmem:[#allocation11 + $0x7c8] ss:$16 sps:$4 sm:$0xff]  }
 0xa95   : > { %9432 = vmatpush1.bf16.msra.mxu0 %v12410_v26  ;;  %9604 = vmatpush1.bf16.msra.mxu1 %v12413_v30  ;;  %v12490_v25 = vld [vmem:[#allocation11 + $0x7e4] ss:$16 sps:$4 sm:$0xff]   ;;  %v12493_v26 = vld [vmem:[#allocation11 + $0x7ec] ss:$16 sps:$4 sm:$0xff]   ;;  %v12488_v30 = vld [vmem:[#allocation11 + $0x7e0] ss:$16 sps:$4 sm:$0xff]  }
 0xa96   : > { %9433 = vmatprep.subr.bf16.mxu0 %v12418_v34  ;;  %9605 = vmatprep.subr.bf16.mxu1 %v12421_v42  ;;  %v12491_v34 = vld [vmem:[#allocation11 + $0x7e8] ss:$16 sps:$4 sm:$0xff]   ;;  %v7996_v42 = vld [vmem:[%s13800_s1] sm:$0xf] }
 0xa99   : > { %9434 = vmatpush1.bf16.msra.mxu0 %v12416_v36  ;;  %9606 = vmatpush1.bf16.msra.mxu1 %v12419_v44  ;;  %v8001_v36 = vrot.slane %v7996_v42, %v13129_v7  ;;  %v8009_v44 = vrot.slane %v7996_v42, %v13120_v3 }
 0xa9a   : > { %9435 = vmatprep.subr.bf16.mxu0 %v12424_v12  ;;  %9607 = vmatprep.subr.bf16.mxu1 %v12427_v60  ;;  %v8005_v12 = vrot.slane %v7996_v42, %v13132_v9 }
 0xa9d   : > { %9436 = vmatpush1.bf16.msra.mxu0 %v12422_v46  ;;  %9608 = vmatpush1.bf16.msra.mxu1 %v12425_v1  ;;  %v8013_v1 = vrot.slane %v7996_v42, %v13126_v6 }
 0xa9e   : > { %9437 = vmatprep.subr.bf16.mxu0 %v12430_v18  ;;  %9609 = vmatprep.subr.bf16.mxu1 %v12433_v11 }
 0xaa1   : > { %9438 = vmatpush1.bf16.msra.mxu0 %v12428_v16  ;;  %9610 = vmatpush1.bf16.msra.mxu1 %v12431_v47 }
 0xaa2   : > { %9439 = vmatprep.subr.bf16.mxu0 %v12436_v48  ;;  %9611 = vmatprep.subr.bf16.mxu1 %v12439_v50 }
 0xaa5   : > { %9440 = vmatpush1.bf16.msra.mxu0 %v12434_v33  ;;  %9612 = vmatpush1.bf16.msra.mxu1 %v12437_v55 }
 0xaa6   : > { %9441 = vmatprep.subr.bf16.mxu0 %v12442_v13  ;;  %9613 = vmatprep.subr.bf16.mxu1 %v12445_v10 }
 0xaa9   : > { %9442 = vmatpush1.bf16.msra.mxu0 %v12440_v35  ;;  %9614 = vmatpush1.bf16.msra.mxu1 %v12443_v38 }
 0xaaa   : > { %9443 = vmatprep.subr.bf16.mxu0 %v12448_v52  ;;  %9615 = vmatprep.subr.bf16.mxu1 %v12451_v37 }
 0xaad   : > { %9444 = vmatpush1.bf16.msra.mxu0 %v12446_v5  ;;  %9616 = vmatpush1.bf16.msra.mxu1 %v12449_v14 }
 0xaae   : > { %9445 = vmatprep.subr.bf16.mxu0 %v12454_v58  ;;  %9617 = vmatprep.subr.bf16.mxu1 %v12457_v56 }
 0xab1   : > { %9446 = vmatpush1.bf16.msra.mxu0 %v12452_v59  ;;  %9618 = vmatpush1.bf16.msra.mxu1 %v12455_v61 }
 0xab2   : > { %9447 = vmatprep.subr.bf16.mxu0 %v12460_v57  ;;  %9619 = vmatprep.subr.bf16.mxu1 %v12463_v41 }
 0xab5   : > { %9448 = vmatpush1.bf16.msra.mxu0 %v12458_v19  ;;  %9620 = vmatpush1.bf16.msra.mxu1 %v12461_v31 }
 0xab6   : > { %9449 = vmatprep.subr.bf16.mxu0 %v12466_v39  ;;  %9621 = vmatprep.subr.bf16.mxu1 %v12469_v62 }
 0xab9   : > { %9450 = vmatpush1.bf16.msra.mxu0 %v12464_v49  ;;  %9622 = vmatpush1.bf16.msra.mxu1 %v12467_v28 }
 0xaba   : > { %9451 = vmatprep.subr.bf16.mxu0 %v12472_v54  ;;  %9623 = vmatprep.subr.bf16.mxu1 %v12475_v43 }
 0xabd   : > { %9452 = vmatpush1.bf16.msra.mxu0 %v12470_v45  ;;  %9624 = vmatpush1.bf16.msra.mxu1 %v12473_v0 }
 0xabe   : > { %9453 = vmatprep.subr.bf16.mxu0 %v12478_v17  ;;  %9625 = vmatprep.subr.bf16.mxu1 %v12481_v27 }
 0xac1   : > { %9454 = vmatpush1.bf16.msra.mxu0 %v12476_v4  ;;  %9626 = vmatpush1.bf16.msra.mxu1 %v12479_v32 }
 0xac2   : > { %9455 = vmatprep.subr.bf16.mxu0 %v12484_v40  ;;  %9627 = vmatprep.subr.bf16.mxu1 %v12487_v24 }
 0xac5   : > { %9456 = vmatpush1.bf16.msra.mxu0 %v12482_v51  ;;  %9628 = vmatpush1.bf16.msra.mxu1 %v12485_v21 }
 0xac6   : > { %9457 = vmatprep.subr.bf16.mxu0 %v12490_v25  ;;  %9629 = vmatprep.subr.bf16.mxu1 %v12493_v26 }
 0xac9   : > { %9458 = vmatpush1.bf16.msra.mxu0 %v12488_v30  ;;  %9630 = vmatpush1.bf16.msra.mxu1 %v12491_v34 }
 0xacc   : > { %9460 = vmatmul.mubr.bf16.vlgmr.msra.gmra.mrb[56].mxu0 %v13701_v53  ;;  %9632 = vmatmul.mubr.bf16.vlgmr.msra.gmra.mrb[56].mxu1 %v13701_v53 }
 0xb9f   : > { %v9461_v60 = vpop.f32.mrb[56].mxu0  ;;  %v9633_v46 = vpop.f32.mrb[56].mxu1 }
 0xba0   : > { %v11179_v18 = vadd.f32 %v9461_v60, %v8001_v36  ;;  %v9463_v11 = vpop.f32.mrb[57].mxu0  ;;  %v9635_v16 = vpop.f32.mrb[57].mxu1  ;;  %v11183_v47 = vadd.f32 %v9633_v46, %v8009_v44 }
 0xba1   : > { %v11180_v48 = vadd.f32 %v9463_v11, %v8005_v12  ;;  %v9465_v53 = vpop.f32.mrb[58].mxu0  ;;  %v9637_v50 = vpop.f32.mrb[58].mxu1  ;;  %v11184_v52 = vadd.f32 %v9635_v16, %v8013_v1 }
 0xba2   : > { %v9642_v33 = vadd.f32 %v11179_v18, %v13628_v29  ;;  %v11181_v55 = vadd.f32 %v9465_v53, %v8001_v36  ;;  %v11185_v13 = vadd.f32 %v9637_v50, %v8009_v44  ;;  %v9467_v10 = vpop.f32.mrb[59].mxu0  ;;  %v9639_v35 = vpop.f32.mrb[59].mxu1  ;;  %v9644_v58 = vadd.f32 %v11183_v47, %v13621_v15 }
 0xba3   : > { %v9643_v38 = vadd.f32 %v11180_v48, %v13624_v2  ;;  %v11182_v37 = vadd.f32 %v9467_v10, %v8005_v12  ;;  %v11186_v5 = vadd.f32 %v9639_v35, %v8013_v1  ;;  %v9645_v57 = vadd.f32 %v11184_v52, %v13644_v22 }
 0xba4   : > { %v9646_v14 = vadd.f32 %v11181_v55, %v13630_v23  ;;  %v9648_v59 = vadd.f32 %v11185_v13, %v13634_v20  ;;  %v9650_v55 = vld [vmem:[%s13801_s22] sm:$0xf] }
 0xba5   : > { %v9652_v56 = vadd.f32 %v9643_v38, %v9642_v33  ;;  %v9647_v61 = vadd.f32 %v11182_v37, %v13626_v63  ;;  %v9649_v2 = vadd.f32 %v11186_v5, %v13632_v8  ;;  %v9651_v13 = vld [vmem:[%s13802_s26] sm:$0xf]  ;;  %v9716_v10 = vrot.slane %v9650_v55, %v13129_v7 }
 0xba6   : > { %v9657_v29 = vsel %vm5675_vm10, %v9646_v14, 0.0  ;;  %v9660_v23 = vsel %vm5675_vm10, %v9648_v59, 0.0  ;;  %v9720_v35 = vrot.slane %v9650_v55, %v13132_v9  ;;  %v9728_v52 = vrot.slane %v9650_v55, %v13126_v6 }
 0xba7   : > { %v9658_v41 = vsel %vm5675_vm10, %v9647_v61, 0.0  ;;  %v9653_v19 = vadd.f32 %v9652_v56, %v9644_v58  ;;  %v9662_v15 = vsel %vm5675_vm10, %v9649_v2, 0.0  ;;  %v9745_v5 = vrot.slane %v9651_v13, %v13129_v7 }
 0xba8   : > { %v9659_v31 = vadd.f32 %v9658_v41, %v9657_v29  ;;  %v9757_v56 = vrot.slane %v9651_v13, %v13126_v6 }
 0xba9   : > { %v9654_v39 = vadd.f32 %v9653_v19, %v9645_v57 }
 0xbaa   : > { %v9661_v62 = vadd.f32 %v9660_v23, %v9659_v31 }
 0xbab   : > { %9655 = vadd.xlane.f32.xlu0 %v9654_v39 }
 0xbac   : > { %v9663_v20 = vadd.f32 %v9662_v15, %v9661_v62 }
 0xbae   : > { %9664 = vadd.xlane.f32.xlu1 %v9663_v20 }
 0xc38   : > { %v9656_v63 = vpop.xlane.xlu0 %9655 }
 0xc39   : > { %v9666_v49 = vmul.f32 0.001953125, %v9656_v63 }
 0xc3b   : > { %v9668_v28 = vsub.f32 %v9642_v33, %v9666_v49  ;;  %v9669_v54 = vsub.f32 %v9643_v38, %v9666_v49  ;;  %v9665_v22 = vpop.xlane.xlu1 %9664  ;;  %v9670_v43 = vsub.f32 %v9644_v58, %v9666_v49  ;;  %v9671_v0 = vsub.f32 %v9645_v57, %v9666_v49 }
 0xc3c   : > { %v9667_v45 = vmul.f32 0.001953125, %v9665_v22  ;;  %v9724_v38 = vrot.slane %v9650_v55, %v13120_v3  ;;  %v9753_v58 = vrot.slane %v9651_v13, %v13120_v3 }
 0xc3d   : > { %v9676_v8 = vmul.f32 %v9668_v28, %v9668_v28  ;;  %v9677_v17 = vmul.f32 %v9669_v54, %v9669_v54  ;;  %v9678_v24 = vmul.f32 %v9670_v43, %v9670_v43  ;;  %v9679_v30 = vmul.f32 %v9671_v0, %v9671_v0 }
 0xc3e   : > { %v9672_v27 = vsub.f32 %v9646_v14, %v9667_v45  ;;  %v9673_v4 = vsub.f32 %v9647_v61, %v9667_v45  ;;  %v9674_v32 = vsub.f32 %v9648_v59, %v9667_v45  ;;  %v9675_v40 = vsub.f32 %v9649_v2, %v9667_v45 }
 0xc3f   : > { %v9684_v51 = vadd.f32 %v9677_v17, %v9676_v8  ;;  %v9749_v14 = vrot.slane %v9651_v13, %v13132_v9 }
 0xc40   : > { %v9680_v21 = vmul.f32 %v9672_v27, %v9672_v27  ;;  %v9681_v25 = vmul.f32 %v9673_v4, %v9673_v4  ;;  %v9682_v26 = vmul.f32 %v9674_v32, %v9674_v32  ;;  %v9683_v42 = vmul.f32 %v9675_v40, %v9675_v40 }
 0xc41   : > { %v9685_v34 = vadd.f32 %v9684_v51, %v9678_v24 }
 0xc42   : > { %v9689_v36 = vsel %vm5675_vm10, %v9680_v21, 0.0  ;;  %v9690_v44 = vsel %vm5675_vm10, %v9681_v25, 0.0  ;;  %v9692_v46 = vsel %vm5675_vm10, %v9682_v26, 0.0  ;;  %v9694_v18 = vsel %vm5675_vm10, %v9683_v42, 0.0 }
 0xc43   : > { %v9686_v12 = vadd.f32 %v9685_v34, %v9679_v30  ;;  %v9691_v60 = vadd.f32 %v9690_v44, %v9689_v36 }
 0xc45   : > { %9687 = vadd.xlane.f32.xlu1 %v9686_v12  ;;  %v9693_v1 = vadd.f32 %v9692_v46, %v9691_v60 }
 0xc47   : > { %v9695_v11 = vadd.f32 %v9694_v18, %v9693_v1 }
 0xc49   : > { %9696 = vadd.xlane.f32.xlu0 %v9695_v11 }
 0xcd2   : > { %v9688_v16 = vpop.xlane.xlu1 %9687 }
 0xcd3   : > { %v9698_v47 = vmul.f32 0.001953125, %v9688_v16 }
 0xcd5   : > { %v9700_v48 = vadd.f32 1e-05, %v9698_v47 }
 0xcd6   : > { %v9697_v53 = vpop.xlane.xlu0 %9696 }
 0xcd7   : > { %12562 = vrsqrt.f32 %v9700_v48  ;;  %v9699_v50 = vmul.f32 0.001953125, %v9697_v53 }
 0xcd9   : > { %v9701_v33 = vadd.f32 1e-05, %v9699_v50 }
 0xcdb   : > { %12564 = vrsqrt.f32 %v9701_v33 }
 0xce1   : > { %v12563_v37 = vpop.eup %12562 }
 0xce2   : > { %v9704_v59 = vmul.f32 %v12563_v37, %v9668_v28  ;;  %v9705_v61 = vmul.f32 %v12563_v37, %v9669_v54  ;;  %v9706_v29 = vmul.f32 %v12563_v37, %v9670_v43  ;;  %v9707_v57 = vmul.f32 %v12563_v37, %v9671_v0 }
 0xce4   : > { %v9733_v41 = vmul.f32 %v9716_v10, %v9704_v59  ;;  %v9734_v2 = vmul.f32 %v9720_v35, %v9705_v61  ;;  %v9735_v19 = vmul.f32 %v9724_v38, %v9706_v29  ;;  %v9736_v31 = vmul.f32 %v9728_v52, %v9707_v57 }
 0xce5   : > { %v12565_v39 = vpop.eup %12564 }
 0xce6   : > { %v9762_v7 = vadd.f32 %v9745_v5, %v9733_v41  ;;  %v9763_v9 = vadd.f32 %v9749_v14, %v9734_v2  ;;  %v9764_v23 = vadd.f32 %v9753_v58, %v9735_v19  ;;  %v9765_v3 = vadd.f32 %v9757_v56, %v9736_v31 }
 0xce7   : > { %v9708_v62 = vmul.f32 %v12565_v39, %v9672_v27  ;;  %v9709_v6 = vmul.f32 %v12565_v39, %v9673_v4  ;;  %v9710_v15 = vmul.f32 %v12565_v39, %v9674_v32  ;;  %v9711_v20 = vmul.f32 %v12565_v39, %v9675_v40 }
 0xce8   : > { %9770 = vst [vmem:[%s677_s18] sm:$0xff] %v9762_v7  ;;  %9771 = vst [vmem:[%s677_s18 + $0x8] sm:$0xff] %v9763_v9 }
 0xce9   : > { %9772 = vst [vmem:[%s677_s18 + $0x10] sm:$0xff] %v9764_v23  ;;  %9773 = vst [vmem:[%s677_s18 + $0x18] sm:$0xff] %v9765_v3  ;;  %v9737_v63 = vmul.f32 %v9716_v10, %v9708_v62  ;;  %v9738_v49 = vmul.f32 %v9720_v35, %v9709_v6  ;;  %v9739_v28 = vmul.f32 %v9724_v38, %v9710_v15 }
 0xcea   : > { %v9740_v54 = vmul.f32 %v9728_v52, %v9711_v20 }
 0xceb   : > { %v9766_v22 = vadd.f32 %v9745_v5, %v9737_v63  ;;  %v9767_v43 = vadd.f32 %v9749_v14, %v9738_v49  ;;  %v9768_v45 = vadd.f32 %v9753_v58, %v9739_v28 }
 0xcec   : > { %v9769_v0 = vadd.f32 %v9757_v56, %v9740_v54 }
 0xced   : > { %9774 = vst [vmem:[%s677_s18 + $0x20] sm:$0x3f] %v9766_v22  ;;  %9775 = vst [vmem:[%s677_s18 + $0x28] sm:$0x3f] %v9767_v43 }
 0xcee   : > { %9776 = vst [vmem:[%s677_s18 + $0x30] sm:$0x3f] %v9768_v45  ;;  %9777 = vst [vmem:[%s677_s18 + $0x38] sm:$0x3f] %v9769_v0 }
 0xcef PF: > { %s13804_s28 = sld [smem:[#allocation17_spill]] }
 0xcf5   : > { %s32_s27 = sadd.s32 1, %s13804_s28  }
 0xcf6   : > { %p29_p9 = scmp.ge.s32.totalorder %s32_s27, 4  }
 0xcf8   :  { %31 = sbr.rel (!%p29_p9) target bundleno = 12 (0xc), region = 150 }
 0xcff   :  { %9799 = vsyncpa [#allocation4], 1 }
 0xd00   :  { %9801 = vsyncpa [#allocation4 + $0x1], 1 }
 0xd01   :  { %9802 = vsyncpa [#allocation6], 1 }
 0xd02   :  { %9803 = vsyncpa [#allocation9], 1 }
 0xd03   :  { %9804 = vsyncpa [#allocation12], 1 }

</bundles_post_ra>
